<compile_context>
chip_gen: v7x
topology: tpu7x:2x2x1
jax: 0.10.0
libtpu: 0.0.40
codegen_flags: <defaults>
</compile_context>

<pallas_src>
import jax
import jax.numpy as jnp
import numpy as np
from jax.experimental import pallas as pl
from jax.experimental.pallas import tpu as pltpu

EPS = 1e-5


# ---------------------------------------------------------------------------
# In-kernel helpers
# ---------------------------------------------------------------------------
def _pad_hw(y):
    """Zero-pad an (H, W, C) tile to (H+2, W+2, C) (SAME padding for 3x3)."""
    H, W, C = y.shape
    zc = jnp.zeros((H, 1, C), y.dtype)
    y = jnp.concatenate([zc, y, zc], axis=1)
    zr = jnp.zeros((1, W + 2, C), y.dtype)
    return jnp.concatenate([zr, y, zr], axis=0)


def _im2col(padded, H, W):
    """(H+2, W+2, C) -> (H*W, 9*C) slab, tap-major columns (t = kh*3 + kw)."""
    C = padded.shape[-1]
    taps = []
    for kh in range(3):
        for kw in range(3):
            taps.append(padded[kh:kh + H, kw:kw + W, :].reshape(H * W, C))
    return jnp.concatenate(taps, axis=-1)


# ---------------------------------------------------------------------------
# Pass 1: per-batch-element partial sums of x (BN_a / BN_b share batch stats)
# ---------------------------------------------------------------------------
def _xstats_kernel(x_ref, stat_ref):
    # x_ref: (1, H*W, Cin)   stat_ref: (1, 2, Cin) = [sum, sum of squares]
    x = x_ref[0].astype(jnp.float32)
    s1 = jnp.sum(x, axis=0, keepdims=True)
    s2 = jnp.sum(x * x, axis=0, keepdims=True)
    stat_ref[0] = jnp.concatenate([s1, s2], axis=0)


# ---------------------------------------------------------------------------
# Pass 2: fused [BN_a -> conv_s] and [BN_b -> ReLU -> conv_1] (+ BN_c partials)
# ---------------------------------------------------------------------------
def make_stage1_kernel(H, W, Cin, Cout):
    def kernel(x_ref, aff_ref, w_ref, b_ref, outs_ref, h_ref, hstat_ref):
        x = x_ref[0].astype(jnp.float32)                     # (H, W, Cin)
        aff = aff_ref[...]                                   # (4, Cin): sa, ta, sb, tb
        ya = x * aff[0] + aff[1]                             # BN_a(x)
        yb = jnp.maximum(x * aff[2] + aff[3], 0.0)           # ReLU(BN_b(x))

        # Both branches share one im2col slab / one matmul via a block-diagonal
        # packed weight: columns [0:Cout) = single_conv, [Cout:2*Cout) = conv_1.
        slab = _im2col(_pad_hw(jnp.concatenate([ya, yb], axis=-1)), H, W)  # (HW, 18*Cin)
        y = jnp.dot(slab.astype(jnp.bfloat16), w_ref[...],
                    preferred_element_type=jnp.float32) + b_ref[...]        # (HW, 2*Cout)

        outs_ref[0] = y[:, :Cout]                            # single_conv output
        hv = y[:, Cout:]                                     # double_conv intermediate
        h_ref[0] = hv

        # Partial sums for BN_c batch stats (reduced over the batch in the wrapper,
        # so the grid axis can stay "parallel" for megacore).
        s1 = jnp.sum(hv, axis=0, keepdims=True)
        s2 = jnp.sum(hv * hv, axis=0, keepdims=True)
        hstat_ref[0] = jnp.concatenate([s1, s2], axis=0)

    return kernel


# ---------------------------------------------------------------------------
# Pass 3: BN_c -> ReLU -> conv_2, plus residual add of the single_conv output
# ---------------------------------------------------------------------------
def make_stage2_kernel(H, W, Cout):
    def kernel(h_ref, res_ref, aff_ref, w_ref, b_ref, out_ref):
        h = h_ref[0].astype(jnp.float32)                     # (H, W, Cout)
        aff = aff_ref[...]                                   # (2, Cout): sc, tc
        y = jnp.maximum(h * aff[0] + aff[1], 0.0)            # ReLU(BN_c(h))
        slab = _im2col(_pad_hw(y), H, W)                     # (HW, 9*Cout)
        acc = jnp.dot(slab.astype(jnp.bfloat16), w_ref[...],
                      preferred_element_type=jnp.float32)    # (HW, Cout)
        out_ref[0] = acc + b_ref[...] + res_ref[0]

    return kernel


# ---------------------------------------------------------------------------
# Wrapper: layout transforms, weight packing, pallas_call plumbing
# ---------------------------------------------------------------------------
def double_conv_forward(x_nchw, params):
    N, Cin, H, W = x_nchw.shape
    Cout = params["w_s"].shape[0]
    HW = H * W
    cnt = float(N * HW)

    x = jnp.transpose(x_nchw, (0, 2, 3, 1))                  # NHWC
    x_flat = x.reshape(N, HW, Cin)

    par = pltpu.CompilerParams(dimension_semantics=("parallel",))

    # ---- pass 1: batch statistics of x --------------------------------------
    xstats = pl.pallas_call(
        _xstats_kernel,
        grid=(N,),
        in_specs=[pl.BlockSpec((1, HW, Cin), lambda n: (n, 0, 0))],
        out_specs=pl.BlockSpec((1, 2, Cin), lambda n: (n, 0, 0)),
        out_shape=jax.ShapeDtypeStruct((N, 2, Cin), jnp.float32),
        compiler_params=par,
    )(x_flat)
    s = jnp.sum(xstats, axis=0)
    mean_x = s[0] / cnt
    var_x = s[1] / cnt - mean_x * mean_x
    inv_x = jax.lax.rsqrt(var_x + EPS)
    scale_a = params["gamma_a"] * inv_x
    shift_a = params["beta_a"] - mean_x * scale_a
    scale_b = params["gamma_b"] * inv_x
    shift_b = params["beta_b"] - mean_x * scale_b
    aff1 = jnp.stack([scale_a, shift_a, scale_b, shift_b], axis=0)   # (4, Cin)

    # ---- weight packing (tap-major HWIO, bf16 for the MXU) -------------------
    def taps(wc):  # (Co, Ci, 3, 3) -> (9, Ci, Co)
        return jnp.transpose(wc, (2, 3, 1, 0)).reshape(9, wc.shape[1], wc.shape[0])

    ws_t, w1_t = taps(params["w_s"]), taps(params["w_1"])
    z = jnp.zeros_like(ws_t)
    w_pack = jnp.concatenate(
        [jnp.concatenate([ws_t, z], axis=2),      # branch-a channels -> cols [0:Cout)
         jnp.concatenate([z, w1_t], axis=2)],     # branch-b channels -> cols [Cout:2Cout)
        axis=1).reshape(9 * 2 * Cin, 2 * Cout).astype(jnp.bfloat16)
    b_pack = jnp.concatenate([params["b_s"], params["b_1"]]).reshape(1, 2 * Cout)
    w2_pack = taps(params["w_2"]).reshape(9 * Cout, Cout).astype(jnp.bfloat16)
    b2_row = params["b_2"].reshape(1, Cout)

    # ---- pass 2: conv_s and conv_1 in one fused matmul per tile --------------
    out_s, h_flat, hstats = pl.pallas_call(
        make_stage1_kernel(H, W, Cin, Cout),
        grid=(N,),
        in_specs=[
            pl.BlockSpec((1, H, W, Cin), lambda n: (n, 0, 0, 0)),
            pl.BlockSpec((4, Cin), lambda n: (0, 0)),
            pl.BlockSpec((9 * 2 * Cin, 2 * Cout), lambda n: (0, 0)),
            pl.BlockSpec((1, 2 * Cout), lambda n: (0, 0)),
        ],
        out_specs=(
            pl.BlockSpec((1, HW, Cout), lambda n: (n, 0, 0)),
            pl.BlockSpec((1, HW, Cout), lambda n: (n, 0, 0)),
            pl.BlockSpec((1, 2, Cout), lambda n: (n, 0, 0)),
        ),
        out_shape=(
            jax.ShapeDtypeStruct((N, HW, Cout), jnp.float32),
            jax.ShapeDtypeStruct((N, HW, Cout), jnp.float32),
            jax.ShapeDtypeStruct((N, 2, Cout), jnp.float32),
        ),
        compiler_params=par,
    )(x, aff1, w_pack, b_pack)

    hs = jnp.sum(hstats, axis=0)
    mean_h = hs[0] / cnt
    var_h = hs[1] / cnt - mean_h * mean_h
    inv_h = jax.lax.rsqrt(var_h + EPS)
    scale_c = params["gamma_c"] * inv_h
    shift_c = params["beta_c"] - mean_h * scale_c
    aff2 = jnp.stack([scale_c, shift_c], axis=0)                     # (2, Cout)

    # ---- pass 3: conv_2 + residual add ---------------------------------------
    out_flat = pl.pallas_call(
        make_stage2_kernel(H, W, Cout),
        grid=(N,),
        in_specs=[
            pl.BlockSpec((1, H, W, Cout), lambda n: (n, 0, 0, 0)),
            pl.BlockSpec((1, HW, Cout), lambda n: (n, 0, 0)),
            pl.BlockSpec((2, Cout), lambda n: (0, 0)),
            pl.BlockSpec((9 * Cout, Cout), lambda n: (0, 0)),
            pl.BlockSpec((1, Cout), lambda n: (0, 0)),
        ],
        out_specs=pl.BlockSpec((1, HW, Cout), lambda n: (n, 0, 0)),
        out_shape=jax.ShapeDtypeStruct((N, HW, Cout), jnp.float32),
        compiler_params=par,
    )(h_flat.reshape(N, H, W, Cout), out_s, aff2, w2_pack, b2_row)

    out = out_flat.reshape(N, H, W, Cout)
    return jnp.transpose(out, (0, 3, 1, 2))                  # back to NCHW


# ---------------------------------------------------------------------------
# Deterministic parameter initialization (synthetic, matches module shapes)
# ---------------------------------------------------------------------------
def _spectral_normalize(w, key):
    # One power iteration (PyTorch spectral_norm default), deterministic u init.
    co = w.shape[0]
    wm = w.reshape(co, -1)
    u = jax.random.normal(key, (co,), jnp.float32)
    u = u / (jnp.linalg.norm(u) + 1e-12)
    v = wm.T @ u
    v = v / (jnp.linalg.norm(v) + 1e-12)
    u = wm @ v
    u = u / (jnp.linalg.norm(u) + 1e-12)
    sigma = u @ (wm @ v)
    return w / sigma


def init_params(key, cin, cout):
    ks = jax.random.split(key, 12)

    def conv_w(k, ci, co):
        return jax.random.normal(k, (co, ci, 3, 3), jnp.float32) / np.sqrt(ci * 9)

    p = dict(
        # single_conv: BN(in) -> SNConv(in->out)
        gamma_a=1.0 + 0.1 * jax.random.normal(ks[0], (cin,)),
        beta_a=0.1 * jax.random.normal(ks[1], (cin,)),
        w_s=_spectral_normalize(conv_w(ks[2], cin, cout), ks[3]),
        b_s=0.1 * jax.random.normal(ks[4], (cout,)),
        # double_conv: BN(in) -> ReLU -> SNConv(in->out) -> BN(out) -> ReLU -> SNConv(out->out)
        gamma_b=1.0 + 0.1 * jax.random.normal(ks[5], (cin,)),
        beta_b=0.1 * jax.random.normal(ks[6], (cin,)),
        w_1=_spectral_normalize(conv_w(ks[7], cin, cout), ks[8]),
        b_1=0.1 * jax.random.normal(ks[9], (cout,)),
        gamma_c=jnp.ones((cout,), jnp.float32),
        beta_c=jnp.zeros((cout,), jnp.float32),
        w_2=_spectral_normalize(conv_w(ks[10], cout, cout), ks[11]),
        b_2=jnp.zeros((cout,), jnp.float32),
    )
    return {k: jnp.asarray(v, jnp.float32) for k, v in p.items()}


# ---------------------------------------------------------------------------
# Pure-JAX reference (for correctness check)
# ---------------------------------------------------------------------------
def reference(x_nchw, p):
    x = jnp.transpose(x_nchw, (0, 2, 3, 1))

    def bn(t, g, b):
        m = jnp.mean(t, axis=(0, 1, 2), keepdims=True)
        v = jnp.mean((t - m) ** 2, axis=(0, 1, 2), keepdims=True)
        return (t - m) * jax.lax.rsqrt(v + EPS) * g + b

    def conv(t, w, b):
        w_hwio = jnp.transpose(w, (2, 3, 1, 0))
        y = jax.lax.conv_general_dilated(
            t, w_hwio, (1, 1), "SAME",
            dimension_numbers=("NHWC", "HWIO", "NHWC"),
            precision=jax.lax.Precision.HIGHEST)
        return y + b

    out_s = conv(bn(x, p["gamma_a"], p["beta_a"]), p["w_s"], p["b_s"])
    h = conv(jax.nn.relu(bn(x, p["gamma_b"], p["beta_b"])), p["w_1"], p["b_1"])
    out_d = conv(jax.nn.relu(bn(h, p["gamma_c"], p["beta_c"])), p["w_2"], p["b_2"])
    return jnp.transpose(out_s + out_d, (0, 3, 1, 2))


if __name__ == "__main__":
    key = jax.random.PRNGKey(0)
    k_x, k_p = jax.random.split(key)

    N, Cin, H, W = 2, 4, 16, 16
    Cout = 8

    x = jax.random.normal(k_x, (N, Cin, H, W), jnp.float32)
    params = init_params(k_p, Cin, Cout)

    out = jax.jit(double_conv_forward)(x, params)
    out = jax.block_until_ready(out)

    ref = reference(x, params)
    np.testing.assert_allclose(np.asarray(out), np.asarray(ref), rtol=2e-2, atol=2e-2)

    print("KERNEL_OK")
</pallas_src>

<mosaic_0001>
module attributes {stable_mosaic.version = 11 : i64} {
  func.func @_xstats_kernel(%arg0: i32, %arg1: memref<1x256x4xf32, #tpu.memory_space<vmem>>, %arg2: memref<1x2x4xf32, #tpu.memory_space<vmem>>) attributes {dimension_semantics = [#tpu.dimension_semantics<parallel>], iteration_bounds = array<i64: 2>, scalar_prefetch = 0 : i64, scratch_operands = 0 : i64, tpu.core_type = #tpu.core_type<tc>, window_params = [{transform_indices = @transform_0, window_bounds = array<i64: 1, 256, 4>}, {transform_indices = @transform_1, window_bounds = array<i64: 1, 2, 4>}]} {
    %c0 = arith.constant 0 : index
    %c0_0 = arith.constant 0 : index
    %c0_1 = arith.constant 0 : index
    %0 = vector.load %arg1[%c0, %c0_0, %c0_1] : memref<1x256x4xf32, #tpu.memory_space<vmem>>, vector<1x256x4xf32>
    %1 = vector.shape_cast %0 : vector<1x256x4xf32> to vector<256x4xf32>
    %cst = arith.constant dense<0.000000e+00> : vector<4xf32>
    %2 = vector.multi_reduction <add>, %1, %cst [0] : vector<256x4xf32> to vector<4xf32>
    %3 = vector.shape_cast %2 : vector<4xf32> to vector<1x4xf32>
    %4 = arith.mulf %1, %1 : vector<256x4xf32>
    %cst_2 = arith.constant dense<0.000000e+00> : vector<4xf32>
    %5 = vector.multi_reduction <add>, %4, %cst_2 [0] : vector<256x4xf32> to vector<4xf32>
    %6 = vector.shape_cast %5 : vector<4xf32> to vector<1x4xf32>
    %7 = tpu.concatenate %3, %6 in 0 : vector<1x4xf32>, vector<1x4xf32> -> vector<2x4xf32>
    %c0_3 = arith.constant 0 : index
    %c0_4 = arith.constant 0 : index
    %c0_5 = arith.constant 0 : index
    %8 = vector.load %arg2[%c0_3, %c0_4, %c0_5] : memref<1x2x4xf32, #tpu.memory_space<vmem>>, vector<1x2x4xf32>
    %9 = vector.shape_cast %8 : vector<1x2x4xf32> to vector<2x4xf32>
    %10 = vector.shape_cast %7 : vector<2x4xf32> to vector<1x2x4xf32>
    tpu.vector_store %arg2[%c0_3, %c0_4, %c0_5], %10 {strides = array<i32>} : memref<1x2x4xf32, #tpu.memory_space<vmem>>, vector<1x2x4xf32>,
    return
  }
  func.func @transform_0(%arg0: i32) -> (i32, i32, i32) {
    %c0_i32 = arith.constant 0 : i32
    %c0_i32_0 = arith.constant 0 : i32
    %c0_i32_1 = arith.constant 0 : i32
    return %arg0, %c0_i32, %c0_i32_0 : i32, i32, i32
  }
  func.func @transform_1(%arg0: i32) -> (i32, i32, i32) {
    %c0_i32 = arith.constant 0 : i32
    %c0_i32_0 = arith.constant 0 : i32
    %c0_i32_1 = arith.constant 0 : i32
    return %arg0, %c0_i32, %c0_i32_0 : i32, i32, i32
  }
}

module attributes {stable_mosaic.version = 11 : i64} {
  func.func @kernel(%arg0: i32, %arg1: memref<1x16x16x4xf32, #tpu.memory_space<vmem>>, %arg2: memref<4x4xf32, #tpu.memory_space<vmem>>, %arg3: memref<72x16xbf16, #tpu.memory_space<vmem>>, %arg4: memref<1x16xf32, #tpu.memory_space<vmem>>, %arg5: memref<1x256x8xf32, #tpu.memory_space<vmem>>, %arg6: memref<1x256x8xf32, #tpu.memory_space<vmem>>, %arg7: memref<1x2x8xf32, #tpu.memory_space<vmem>>) attributes {dimension_semantics = [#tpu.dimension_semantics<parallel>], iteration_bounds = array<i64: 2>, scalar_prefetch = 0 : i64, scratch_operands = 0 : i64, tpu.core_type = #tpu.core_type<tc>, window_params = [{transform_indices = @transform_0, window_bounds = array<i64: 1, 16, 16, 4>}, {pipeline_mode = #tpu.pipeline_mode<synchronous>, transform_indices = @transform_1, window_bounds = array<i64: 4, 4>}, {pipeline_mode = #tpu.pipeline_mode<synchronous>, transform_indices = @transform_2, window_bounds = array<i64: 72, 16>}, {pipeline_mode = #tpu.pipeline_mode<synchronous>, transform_indices = @transform_3, window_bounds = array<i64: 1, 16>}, {transform_indices = @transform_4, window_bounds = array<i64: 1, 256, 8>}, {transform_indices = @transform_5, window_bounds = array<i64: 1, 256, 8>}, {transform_indices = @transform_6, window_bounds = array<i64: 1, 2, 8>}]} {
    %c0 = arith.constant 0 : index
    %c0_0 = arith.constant 0 : index
    %c0_1 = arith.constant 0 : index
    %c0_2 = arith.constant 0 : index
    %0 = vector.load %arg1[%c0, %c0_0, %c0_1, %c0_2] : memref<1x16x16x4xf32, #tpu.memory_space<vmem>>, vector<1x16x16x4xf32>
    %1 = vector.shape_cast %0 : vector<1x16x16x4xf32> to vector<16x16x4xf32>
    %c0_3 = arith.constant 0 : index
    %c0_4 = arith.constant 0 : index
    %2 = vector.load %arg2[%c0_3, %c0_4] : memref<4x4xf32, #tpu.memory_space<vmem>>, vector<4x4xf32>
    %3 = vector.extract_strided_slice %2 {offsets = [0, 0], sizes = [1, 4], strides = [1, 1]} : vector<4x4xf32> to vector<1x4xf32>
    %4 = vector.shape_cast %3 : vector<1x4xf32> to vector<4xf32>
    %5 = vector.shape_cast %4 : vector<4xf32> to vector<1x1x4xf32>
    %6 = vector.broadcast %5 : vector<1x1x4xf32> to vector<16x16x4xf32>
    %7 = arith.mulf %1, %6 : vector<16x16x4xf32>
    %8 = vector.extract_strided_slice %2 {offsets = [1, 0], sizes = [1, 4], strides = [1, 1]} : vector<4x4xf32> to vector<1x4xf32>
    %9 = vector.shape_cast %8 : vector<1x4xf32> to vector<4xf32>
    %10 = vector.shape_cast %9 : vector<4xf32> to vector<1x1x4xf32>
    %11 = vector.broadcast %10 : vector<1x1x4xf32> to vector<16x16x4xf32>
    %12 = arith.addf %7, %11 : vector<16x16x4xf32>
    %13 = vector.extract_strided_slice %2 {offsets = [2, 0], sizes = [1, 4], strides = [1, 1]} : vector<4x4xf32> to vector<1x4xf32>
    %14 = vector.shape_cast %13 : vector<1x4xf32> to vector<4xf32>
    %15 = vector.shape_cast %14 : vector<4xf32> to vector<1x1x4xf32>
    %16 = vector.broadcast %15 : vector<1x1x4xf32> to vector<16x16x4xf32>
    %17 = arith.mulf %1, %16 : vector<16x16x4xf32>
    %18 = vector.extract_strided_slice %2 {offsets = [3, 0], sizes = [1, 4], strides = [1, 1]} : vector<4x4xf32> to vector<1x4xf32>
    %19 = vector.shape_cast %18 : vector<1x4xf32> to vector<4xf32>
    %20 = vector.shape_cast %19 : vector<4xf32> to vector<1x1x4xf32>
    %21 = vector.broadcast %20 : vector<1x1x4xf32> to vector<16x16x4xf32>
    %22 = arith.addf %17, %21 : vector<16x16x4xf32>
    %cst = arith.constant 0.000000e+00 : f32
    %23 = vector.broadcast %cst : f32 to vector<16x16x4xf32>
    %24 = arith.maximumf %22, %23 : vector<16x16x4xf32>
    %25 = tpu.concatenate %12, %24 in 2 : vector<16x16x4xf32>, vector<16x16x4xf32> -> vector<16x16x8xf32>
    %cst_5 = arith.constant 0.000000e+00 : f32
    %26 = vector.broadcast %cst_5 : f32 to vector<16x1x8xf32>
    %27 = tpu.concatenate %26, %25, %26 in 1 : vector<16x1x8xf32>, vector<16x16x8xf32>, vector<16x1x8xf32> -> vector<16x18x8xf32>
    %cst_6 = arith.constant 0.000000e+00 : f32
    %28 = vector.broadcast %cst_6 : f32 to vector<1x18x8xf32>
    %29 = tpu.concatenate %28, %27, %28 in 0 : vector<1x18x8xf32>, vector<16x18x8xf32>, vector<1x18x8xf32> -> vector<18x18x8xf32>
    %30 = vector.extract_strided_slice %29 {offsets = [0, 0, 0], sizes = [16, 16, 8], strides = [1, 1, 1]} : vector<18x18x8xf32> to vector<16x16x8xf32>
    %31 = vector.shape_cast %30 : vector<16x16x8xf32> to vector<256x8xf32>
    %32 = vector.extract_strided_slice %29 {offsets = [0, 1, 0], sizes = [16, 16, 8], strides = [1, 1, 1]} : vector<18x18x8xf32> to vector<16x16x8xf32>
    %33 = vector.shape_cast %32 : vector<16x16x8xf32> to vector<256x8xf32>
    %34 = vector.extract_strided_slice %29 {offsets = [0, 2, 0], sizes = [16, 16, 8], strides = [1, 1, 1]} : vector<18x18x8xf32> to vector<16x16x8xf32>
    %35 = vector.shape_cast %34 : vector<16x16x8xf32> to vector<256x8xf32>
    %36 = vector.extract_strided_slice %29 {offsets = [1, 0, 0], sizes = [16, 16, 8], strides = [1, 1, 1]} : vector<18x18x8xf32> to vector<16x16x8xf32>
    %37 = vector.shape_cast %36 : vector<16x16x8xf32> to vector<256x8xf32>
    %38 = vector.extract_strided_slice %29 {offsets = [1, 1, 0], sizes = [16, 16, 8], strides = [1, 1, 1]} : vector<18x18x8xf32> to vector<16x16x8xf32>
    %39 = vector.shape_cast %38 : vector<16x16x8xf32> to vector<256x8xf32>
    %40 = vector.extract_strided_slice %29 {offsets = [1, 2, 0], sizes = [16, 16, 8], strides = [1, 1, 1]} : vector<18x18x8xf32> to vector<16x16x8xf32>
    %41 = vector.shape_cast %40 : vector<16x16x8xf32> to vector<256x8xf32>
    %42 = vector.extract_strided_slice %29 {offsets = [2, 0, 0], sizes = [16, 16, 8], strides = [1, 1, 1]} : vector<18x18x8xf32> to vector<16x16x8xf32>
    %43 = vector.shape_cast %42 : vector<16x16x8xf32> to vector<256x8xf32>
    %44 = vector.extract_strided_slice %29 {offsets = [2, 1, 0], sizes = [16, 16, 8], strides = [1, 1, 1]} : vector<18x18x8xf32> to vector<16x16x8xf32>
    %45 = vector.shape_cast %44 : vector<16x16x8xf32> to vector<256x8xf32>
    %46 = vector.extract_strided_slice %29 {offsets = [2, 2, 0], sizes = [16, 16, 8], strides = [1, 1, 1]} : vector<18x18x8xf32> to vector<16x16x8xf32>
    %47 = vector.shape_cast %46 : vector<16x16x8xf32> to vector<256x8xf32>
    %48 = tpu.concatenate %31, %33, %35, %37, %39, %41, %43, %45, %47 in 1 : vector<256x8xf32>, vector<256x8xf32>, vector<256x8xf32>, vector<256x8xf32>, vector<256x8xf32>, vector<256x8xf32>, vector<256x8xf32>, vector<256x8xf32>, vector<256x8xf32> -> vector<256x72xf32>
    %49 = arith.truncf %48 : vector<256x72xf32> to vector<256x72xbf16>
    %c0_7 = arith.constant 0 : index
    %c0_8 = arith.constant 0 : index
    %50 = vector.load %arg3[%c0_7, %c0_8] : memref<72x16xbf16, #tpu.memory_space<vmem>>, vector<72x16xbf16>
    %cst_9 = arith.constant dense<0.000000e+00> : vector<256x16xf32>
    %51 = tpu.matmul %49, %50, %cst_9 {dimension_numbers = #tpu.dot_dimension_numbers<[1], [0], [0], [1], [0, 0, 1, 1], [], []>} : vector<256x72xbf16>, vector<72x16xbf16>, vector<256x16xf32> -> vector<256x16xf32>
    %c0_10 = arith.constant 0 : index
    %c0_11 = arith.constant 0 : index
    %52 = vector.load %arg4[%c0_10, %c0_11] : memref<1x16xf32, #tpu.memory_space<vmem>>, vector<1x16xf32>
    %53 = vector.broadcast %52 : vector<1x16xf32> to vector<256x16xf32>
    %54 = arith.addf %51, %53 : vector<256x16xf32>
    %55 = vector.extract_strided_slice %54 {offsets = [0, 0], sizes = [256, 8], strides = [1, 1]} : vector<256x16xf32> to vector<256x8xf32>
    %c0_12 = arith.constant 0 : index
    %c0_13 = arith.constant 0 : index
    %c0_14 = arith.constant 0 : index
    %56 = vector.load %arg5[%c0_12, %c0_13, %c0_14] : memref<1x256x8xf32, #tpu.memory_space<vmem>>, vector<1x256x8xf32>
    %57 = vector.shape_cast %56 : vector<1x256x8xf32> to vector<256x8xf32>
    %58 = vector.shape_cast %55 : vector<256x8xf32> to vector<1x256x8xf32>
    tpu.vector_store %arg5[%c0_12, %c0_13, %c0_14], %58 {strides = array<i32>} : memref<1x256x8xf32, #tpu.memory_space<vmem>>, vector<1x256x8xf32>,
    %59 = vector.extract_strided_slice %54 {offsets = [0, 8], sizes = [256, 8], strides = [1, 1]} : vector<256x16xf32> to vector<256x8xf32>
    %c0_15 = arith.constant 0 : index
    %c0_16 = arith.constant 0 : index
    %c0_17 = arith.constant 0 : index
    %60 = vector.load %arg6[%c0_15, %c0_16, %c0_17] : memref<1x256x8xf32, #tpu.memory_space<vmem>>, vector<1x256x8xf32>
    %61 = vector.shape_cast %60 : vector<1x256x8xf32> to vector<256x8xf32>
    %62 = vector.shape_cast %59 : vector<256x8xf32> to vector<1x256x8xf32>
    tpu.vector_store %arg6[%c0_15, %c0_16, %c0_17], %62 {strides = array<i32>} : memref<1x256x8xf32, #tpu.memory_space<vmem>>, vector<1x256x8xf32>,
    %cst_18 = arith.constant dense<0.000000e+00> : vector<8xf32>
    %63 = vector.multi_reduction <add>, %59, %cst_18 [0] : vector<256x8xf32> to vector<8xf32>
    %64 = vector.shape_cast %63 : vector<8xf32> to vector<1x8xf32>
    %65 = arith.mulf %59, %59 : vector<256x8xf32>
    %cst_19 = arith.constant dense<0.000000e+00> : vector<8xf32>
    %66 = vector.multi_reduction <add>, %65, %cst_19 [0] : vector<256x8xf32> to vector<8xf32>
    %67 = vector.shape_cast %66 : vector<8xf32> to vector<1x8xf32>
    %68 = tpu.concatenate %64, %67 in 0 : vector<1x8xf32>, vector<1x8xf32> -> vector<2x8xf32>
    %c0_20 = arith.constant 0 : index
    %c0_21 = arith.constant 0 : index
    %c0_22 = arith.constant 0 : index
    %69 = vector.load %arg7[%c0_20, %c0_21, %c0_22] : memref<1x2x8xf32, #tpu.memory_space<vmem>>, vector<1x2x8xf32>
    %70 = vector.shape_cast %69 : vector<1x2x8xf32> to vector<2x8xf32>
    %71 = vector.shape_cast %68 : vector<2x8xf32> to vector<1x2x8xf32>
    tpu.vector_store %arg7[%c0_20, %c0_21, %c0_22], %71 {strides = array<i32>} : memref<1x2x8xf32, #tpu.memory_space<vmem>>, vector<1x2x8xf32>,
    return
  }
  func.func @transform_0(%arg0: i32) -> (i32, i32, i32, i32) {
    %c0_i32 = arith.constant 0 : i32
    %c0_i32_0 = arith.constant 0 : i32
    %c0_i32_1 = arith.constant 0 : i32
    %c0_i32_2 = arith.constant 0 : i32
    return %arg0, %c0_i32, %c0_i32_0, %c0_i32_1 : i32, i32, i32, i32
  }
  func.func @transform_1(%arg0: i32) -> (i32, i32) {
    %c0_i32 = arith.constant 0 : i32
    %c0_i32_0 = arith.constant 0 : i32
    %c0_i32_1 = arith.constant 0 : i32
    return %c0_i32, %c0_i32_0 : i32, i32
  }
  func.func @transform_2(%arg0: i32) -> (i32, i32) {
    %c0_i32 = arith.constant 0 : i32
    %c0_i32_0 = arith.constant 0 : i32
    %c0_i32_1 = arith.constant 0 : i32
    return %c0_i32, %c0_i32_0 : i32, i32
  }
  func.func @transform_3(%arg0: i32) -> (i32, i32) {
    %c0_i32 = arith.constant 0 : i32
    %c0_i32_0 = arith.constant 0 : i32
    %c0_i32_1 = arith.constant 0 : i32
    return %c0_i32, %c0_i32_0 : i32, i32
  }
  func.func @transform_4(%arg0: i32) -> (i32, i32, i32) {
    %c0_i32 = arith.constant 0 : i32
    %c0_i32_0 = arith.constant 0 : i32
    %c0_i32_1 = arith.constant 0 : i32
    return %arg0, %c0_i32, %c0_i32_0 : i32, i32, i32
  }
  func.func @transform_5(%arg0: i32) -> (i32, i32, i32) {
    %c0_i32 = arith.constant 0 : i32
    %c0_i32_0 = arith.constant 0 : i32
    %c0_i32_1 = arith.constant 0 : i32
    return %arg0, %c0_i32, %c0_i32_0 : i32, i32, i32
  }
  func.func @transform_6(%arg0: i32) -> (i32, i32, i32) {
    %c0_i32 = arith.constant 0 : i32
    %c0_i32_0 = arith.constant 0 : i32
    %c0_i32_1 = arith.constant 0 : i32
    return %arg0, %c0_i32, %c0_i32_0 : i32, i32, i32
  }
}

module attributes {stable_mosaic.version = 11 : i64} {
  func.func @kernel(%arg0: i32, %arg1: memref<1x16x16x8xf32, #tpu.memory_space<vmem>>, %arg2: memref<1x256x8xf32, #tpu.memory_space<vmem>>, %arg3: memref<2x8xf32, #tpu.memory_space<vmem>>, %arg4: memref<72x8xbf16, #tpu.memory_space<vmem>>, %arg5: memref<1x8xf32, #tpu.memory_space<vmem>>, %arg6: memref<1x256x8xf32, #tpu.memory_space<vmem>>) attributes {dimension_semantics = [#tpu.dimension_semantics<parallel>], iteration_bounds = array<i64: 2>, scalar_prefetch = 0 : i64, scratch_operands = 0 : i64, tpu.core_type = #tpu.core_type<tc>, window_params = [{transform_indices = @transform_0, window_bounds = array<i64: 1, 16, 16, 8>}, {transform_indices = @transform_1, window_bounds = array<i64: 1, 256, 8>}, {pipeline_mode = #tpu.pipeline_mode<synchronous>, transform_indices = @transform_2, window_bounds = array<i64: 2, 8>}, {pipeline_mode = #tpu.pipeline_mode<synchronous>, transform_indices = @transform_3, window_bounds = array<i64: 72, 8>}, {pipeline_mode = #tpu.pipeline_mode<synchronous>, transform_indices = @transform_4, window_bounds = array<i64: 1, 8>}, {transform_indices = @transform_5, window_bounds = array<i64: 1, 256, 8>}]} {
    %c0 = arith.constant 0 : index
    %c0_0 = arith.constant 0 : index
    %c0_1 = arith.constant 0 : index
    %c0_2 = arith.constant 0 : index
    %0 = vector.load %arg1[%c0, %c0_0, %c0_1, %c0_2] : memref<1x16x16x8xf32, #tpu.memory_space<vmem>>, vector<1x16x16x8xf32>
    %1 = vector.shape_cast %0 : vector<1x16x16x8xf32> to vector<16x16x8xf32>
    %c0_3 = arith.constant 0 : index
    %c0_4 = arith.constant 0 : index
    %2 = vector.load %arg3[%c0_3, %c0_4] : memref<2x8xf32, #tpu.memory_space<vmem>>, vector<2x8xf32>
    %3 = vector.extract_strided_slice %2 {offsets = [0, 0], sizes = [1, 8], strides = [1, 1]} : vector<2x8xf32> to vector<1x8xf32>
    %4 = vector.shape_cast %3 : vector<1x8xf32> to vector<8xf32>
    %5 = vector.shape_cast %4 : vector<8xf32> to vector<1x1x8xf32>
    %6 = vector.broadcast %5 : vector<1x1x8xf32> to vector<16x16x8xf32>
    %7 = arith.mulf %1, %6 : vector<16x16x8xf32>
    %8 = vector.extract_strided_slice %2 {offsets = [1, 0], sizes = [1, 8], strides = [1, 1]} : vector<2x8xf32> to vector<1x8xf32>
    %9 = vector.shape_cast %8 : vector<1x8xf32> to vector<8xf32>
    %10 = vector.shape_cast %9 : vector<8xf32> to vector<1x1x8xf32>
    %11 = vector.broadcast %10 : vector<1x1x8xf32> to vector<16x16x8xf32>
    %12 = arith.addf %7, %11 : vector<16x16x8xf32>
    %cst = arith.constant 0.000000e+00 : f32
    %13 = vector.broadcast %cst : f32 to vector<16x16x8xf32>
    %14 = arith.maximumf %12, %13 : vector<16x16x8xf32>
    %cst_5 = arith.constant 0.000000e+00 : f32
    %15 = vector.broadcast %cst_5 : f32 to vector<16x1x8xf32>
    %16 = tpu.concatenate %15, %14, %15 in 1 : vector<16x1x8xf32>, vector<16x16x8xf32>, vector<16x1x8xf32> -> vector<16x18x8xf32>
    %cst_6 = arith.constant 0.000000e+00 : f32
    %17 = vector.broadcast %cst_6 : f32 to vector<1x18x8xf32>
    %18 = tpu.concatenate %17, %16, %17 in 0 : vector<1x18x8xf32>, vector<16x18x8xf32>, vector<1x18x8xf32> -> vector<18x18x8xf32>
    %19 = vector.extract_strided_slice %18 {offsets = [0, 0, 0], sizes = [16, 16, 8], strides = [1, 1, 1]} : vector<18x18x8xf32> to vector<16x16x8xf32>
    %20 = vector.shape_cast %19 : vector<16x16x8xf32> to vector<256x8xf32>
    %21 = vector.extract_strided_slice %18 {offsets = [0, 1, 0], sizes = [16, 16, 8], strides = [1, 1, 1]} : vector<18x18x8xf32> to vector<16x16x8xf32>
    %22 = vector.shape_cast %21 : vector<16x16x8xf32> to vector<256x8xf32>
    %23 = vector.extract_strided_slice %18 {offsets = [0, 2, 0], sizes = [16, 16, 8], strides = [1, 1, 1]} : vector<18x18x8xf32> to vector<16x16x8xf32>
    %24 = vector.shape_cast %23 : vector<16x16x8xf32> to vector<256x8xf32>
    %25 = vector.extract_strided_slice %18 {offsets = [1, 0, 0], sizes = [16, 16, 8], strides = [1, 1, 1]} : vector<18x18x8xf32> to vector<16x16x8xf32>
    %26 = vector.shape_cast %25 : vector<16x16x8xf32> to vector<256x8xf32>
    %27 = vector.extract_strided_slice %18 {offsets = [1, 1, 0], sizes = [16, 16, 8], strides = [1, 1, 1]} : vector<18x18x8xf32> to vector<16x16x8xf32>
    %28 = vector.shape_cast %27 : vector<16x16x8xf32> to vector<256x8xf32>
    %29 = vector.extract_strided_slice %18 {offsets = [1, 2, 0], sizes = [16, 16, 8], strides = [1, 1, 1]} : vector<18x18x8xf32> to vector<16x16x8xf32>
    %30 = vector.shape_cast %29 : vector<16x16x8xf32> to vector<256x8xf32>
    %31 = vector.extract_strided_slice %18 {offsets = [2, 0, 0], sizes = [16, 16, 8], strides = [1, 1, 1]} : vector<18x18x8xf32> to vector<16x16x8xf32>
    %32 = vector.shape_cast %31 : vector<16x16x8xf32> to vector<256x8xf32>
    %33 = vector.extract_strided_slice %18 {offsets = [2, 1, 0], sizes = [16, 16, 8], strides = [1, 1, 1]} : vector<18x18x8xf32> to vector<16x16x8xf32>
    %34 = vector.shape_cast %33 : vector<16x16x8xf32> to vector<256x8xf32>
    %35 = vector.extract_strided_slice %18 {offsets = [2, 2, 0], sizes = [16, 16, 8], strides = [1, 1, 1]} : vector<18x18x8xf32> to vector<16x16x8xf32>
    %36 = vector.shape_cast %35 : vector<16x16x8xf32> to vector<256x8xf32>
    %37 = tpu.concatenate %20, %22, %24, %26, %28, %30, %32, %34, %36 in 1 : vector<256x8xf32>, vector<256x8xf32>, vector<256x8xf32>, vector<256x8xf32>, vector<256x8xf32>, vector<256x8xf32>, vector<256x8xf32>, vector<256x8xf32>, vector<256x8xf32> -> vector<256x72xf32>
    %38 = arith.truncf %37 : vector<256x72xf32> to vector<256x72xbf16>
    %c0_7 = arith.constant 0 : index
    %c0_8 = arith.constant 0 : index
    %39 = vector.load %arg4[%c0_7, %c0_8] : memref<72x8xbf16, #tpu.memory_space<vmem>>, vector<72x8xbf16>
    %cst_9 = arith.constant dense<0.000000e+00> : vector<256x8xf32>
    %40 = tpu.matmul %38, %39, %cst_9 {dimension_numbers = #tpu.dot_dimension_numbers<[1], [0], [0], [1], [0, 0, 1, 1], [], []>} : vector<256x72xbf16>, vector<72x8xbf16>, vector<256x8xf32> -> vector<256x8xf32>
    %c0_10 = arith.constant 0 : index
    %c0_11 = arith.constant 0 : index
    %41 = vector.load %arg5[%c0_10, %c0_11] : memref<1x8xf32, #tpu.memory_space<vmem>>, vector<1x8xf32>
    %42 = vector.broadcast %41 : vector<1x8xf32> to vector<256x8xf32>
    %43 = arith.addf %40, %42 : vector<256x8xf32>
    %c0_12 = arith.constant 0 : index
    %c0_13 = arith.constant 0 : index
    %c0_14 = arith.constant 0 : index
    %44 = vector.load %arg2[%c0_12, %c0_13, %c0_14] : memref<1x256x8xf32, #tpu.memory_space<vmem>>, vector<1x256x8xf32>
    %45 = vector.shape_cast %44 : vector<1x256x8xf32> to vector<256x8xf32>
    %46 = arith.addf %43, %45 : vector<256x8xf32>
    %c0_15 = arith.constant 0 : index
    %c0_16 = arith.constant 0 : index
    %c0_17 = arith.constant 0 : index
    %47 = vector.load %arg6[%c0_15, %c0_16, %c0_17] : memref<1x256x8xf32, #tpu.memory_space<vmem>>, vector<1x256x8xf32>
    %48 = vector.shape_cast %47 : vector<1x256x8xf32> to vector<256x8xf32>
    %49 = vector.shape_cast %46 : vector<256x8xf32> to vector<1x256x8xf32>
    tpu.vector_store %arg6[%c0_15, %c0_16, %c0_17], %49 {strides = array<i32>} : memref<1x256x8xf32, #tpu.memory_space<vmem>>, vector<1x256x8xf32>,
    return
  }
  func.func @transform_0(%arg0: i32) -> (i32, i32, i32, i32) {
    %c0_i32 = arith.constant 0 : i32
    %c0_i32_0 = arith.constant 0 : i32
    %c0_i32_1 = arith.constant 0 : i32
    %c0_i32_2 = arith.constant 0 : i32
    return %arg0, %c0_i32, %c0_i32_0, %c0_i32_1 : i32, i32, i32, i32
  }
  func.func @transform_1(%arg0: i32) -> (i32, i32, i32) {
    %c0_i32 = arith.constant 0 : i32
    %c0_i32_0 = arith.constant 0 : i32
    %c0_i32_1 = arith.constant 0 : i32
    return %arg0, %c0_i32, %c0_i32_0 : i32, i32, i32
  }
  func.func @transform_2(%arg0: i32) -> (i32, i32) {
    %c0_i32 = arith.constant 0 : i32
    %c0_i32_0 = arith.constant 0 : i32
    %c0_i32_1 = arith.constant 0 : i32
    return %c0_i32, %c0_i32_0 : i32, i32
  }
  func.func @transform_3(%arg0: i32) -> (i32, i32) {
    %c0_i32 = arith.constant 0 : i32
    %c0_i32_0 = arith.constant 0 : i32
    %c0_i32_1 = arith.constant 0 : i32
    return %c0_i32, %c0_i32_0 : i32, i32
  }
  func.func @transform_4(%arg0: i32) -> (i32, i32) {
    %c0_i32 = arith.constant 0 : i32
    %c0_i32_0 = arith.constant 0 : i32
    %c0_i32_1 = arith.constant 0 : i32
    return %c0_i32, %c0_i32_0 : i32, i32
  }
  func.func @transform_5(%arg0: i32) -> (i32, i32, i32) {
    %c0_i32 = arith.constant 0 : i32
    %c0_i32_0 = arith.constant 0 : i32
    %c0_i32_1 = arith.constant 0 : i32
    return %arg0, %c0_i32, %c0_i32_0 : i32, i32, i32
  }
}

</mosaic_0001>

<bundles_post_ra>
// kernel: double_conv_forward.3
= control target key start
LH: loop header
LB: loop body
LE: loop exit
PB: predicated region body
PF: predicated region fallthrough
CT: control target
= control target key end

     0   :  { %s412_s6 = smov 0   ;;  %s531_s0 = inlined_call_operand.vmem [shape: f32[2,256,4], index: 0, kind: input, shape index: {}]   ;;  %s532_s1 = inlined_call_operand.vmem [shape: f32[2,2,4], index: 1, kind: output, shape index: {}]  }
   0x1 LB: > { %s375_s7 = sadd.s32 4294967295, %s400_s6   ;;  %p379_p0 = scmp.ge.s32.totalorder %s400_s6, 1  ;;  %s400_s6 = sphi %s412_s6, %s11_s6  }
   0x2   : > { %p87_p1 = scmp.lt.s32.totalorder %s400_s6, 3 }
   0x4   : > { %p88_p2 = pnand %p379_p0, %p87_p1 }
   0x5   : > { %p106_p3 = scmp.lt.s32.totalorder (!%p88_p2), %s375_s7, 1  ;;  %vm147_vm0 = vcmask (!%p88_p2), 31744   ;;  %vm318_vm1 = vcmask (!%p88_p2), 1040384   ;;  %vm320_vm2 = vcmask (!%p88_p2), 25600  }
   0x6   : > { %91 = sbr.rel (%p88_p2) target bundleno = 99 (0x63), region = 24 }
   0xd   : > { %s534_s7 = smov (!%p106_p3, %s375_s7), 1 }
   0xe   : > { %s385_s8 = sshll.u32 %s534_s7, 8  ;;  %s382_s12 = sshll.u32 %s534_s7, 1 }
   0xf   : > { %s426_s11 = scalar_lea.vmem %s531_s0, %s385_s8  ;;  %s114_s15 = scalar_lea.vmem %s532_s1, %s382_s12 }
  0x10   : > { %v115_v0 = vld [vmem:[%s426_s11] sm:$0xff]  ;;  %v116_v1 = vld [vmem:[%s426_s11 + $0x8] sm:$0xff]  ;;  %v117_v2 = vld [vmem:[%s426_s11 + $0x10] sm:$0xff] }
  0x11   : > { %v148_v3 = vsel %vm147_vm0, %v115_v0, 0.0  ;;  %v149_v4 = vsel %vm147_vm0, %v116_v1, 0.0  ;;  %v151_v5 = vsel %vm147_vm0, %v117_v2, 0.0  ;;  %v118_v6 = vld [vmem:[%s426_s11 + $0x18] sm:$0xff]  ;;  %v119_v9 = vld [vmem:[%s426_s11 + $0x20] sm:$0xff]  ;;  %v120_v12 = vld [vmem:[%s426_s11 + $0x28] sm:$0xff]  ;;  %v217_v27 = vmul.f32 %v115_v0, %v115_v0 }
  0x12   : > { %v150_v7 = vadd.f32 %v149_v4, %v148_v3  ;;  %v153_v8 = vsel %vm147_vm0, %v118_v6, 0.0  ;;  %v155_v11 = vsel %vm147_vm0, %v119_v9, 0.0  ;;  %v157_v14 = vsel %vm147_vm0, %v120_v12, 0.0  ;;  %v121_v15 = vld [vmem:[%s426_s11 + $0x30] sm:$0xff]  ;;  %v122_v18 = vld [vmem:[%s426_s11 + $0x38] sm:$0xff]  ;;  %v123_v21 = vld [vmem:[%s426_s11 + $0x40] sm:$0xff] }
  0x13   : > { %v159_v17 = vsel %vm147_vm0, %v121_v15, 0.0  ;;  %v161_v20 = vsel %vm147_vm0, %v122_v18, 0.0  ;;  %v163_v23 = vsel %vm147_vm0, %v123_v21, 0.0  ;;  %v124_v24 = vld [vmem:[%s426_s11 + $0x48] sm:$0xff]  ;;  %v218_v28 = vmul.f32 %v116_v1, %v116_v1  ;;  %v125_v30 = vld [vmem:[%s426_s11 + $0x50] sm:$0xff]  ;;  %v126_v32 = vld [vmem:[%s426_s11 + $0x58] sm:$0xff] }
  0x14   : > { %v152_v10 = vadd.f32 %v151_v5, %v150_v7  ;;  %v165_v26 = vsel %vm147_vm0, %v124_v24, 0.0  ;;  %v219_v29 = vmul.f32 %v117_v2, %v117_v2  ;;  %v167_v33 = vsel %vm147_vm0, %v125_v30, 0.0  ;;  %v127_v41 = vld [vmem:[%s426_s11 + $0x60] sm:$0xff]  ;;  %v128_v47 = vld [vmem:[%s426_s11 + $0x68] sm:$0xff]  ;;  %v129_v53 = vld [vmem:[%s426_s11 + $0x70] sm:$0xff] }
  0x15   : > { %v220_v34 = vmul.f32 %v118_v6, %v118_v6  ;;  %v169_v36 = vsel %vm147_vm0, %v126_v32, 0.0  ;;  %v221_v37 = vmul.f32 %v119_v9, %v119_v9  ;;  %v249_v38 = vsel %vm147_vm0, %v217_v27, 0.0  ;;  %v130_v59 = vld [vmem:[%s426_s11 + $0x78] sm:$0xff]  ;;  %v131_v1 = vld [vmem:[%s426_s11 + $0x80] sm:$0xff]  ;;  %v132_v7 = vld [vmem:[%s426_s11 + $0x88] sm:$0xff] }
  0x16   : > { %v154_v13 = vadd.f32 %v153_v8, %v152_v10  ;;  %v250_v39 = vsel %vm147_vm0, %v218_v28, 0.0  ;;  %v252_v40 = vsel %vm147_vm0, %v219_v29, 0.0  ;;  %v171_v44 = vsel %vm147_vm0, %v127_v41, 0.0 }
  0x17   : > { %v251_v43 = vadd.f32 %v250_v39, %v249_v38  ;;  %v222_v45 = vmul.f32 %v120_v12, %v120_v12  ;;  %v254_v46 = vsel %vm147_vm0, %v220_v34, 0.0  ;;  %v173_v50 = vsel %vm147_vm0, %v128_v47, 0.0 }
  0x18   : > { %v156_v16 = vadd.f32 %v155_v11, %v154_v13  ;;  %v223_v51 = vmul.f32 %v121_v15, %v121_v15  ;;  %v256_v52 = vsel %vm147_vm0, %v221_v37, 0.0  ;;  %v175_v56 = vsel %vm147_vm0, %v129_v53, 0.0  ;;  %v133_v13 = vld [vmem:[%s426_s11 + $0x90] sm:$0xff] }
  0x19   : > { %v253_v49 = vadd.f32 %v252_v40, %v251_v43  ;;  %v224_v57 = vmul.f32 %v122_v18, %v122_v18  ;;  %v258_v58 = vsel %vm147_vm0, %v222_v45, 0.0  ;;  %v177_v62 = vsel %vm147_vm0, %v130_v59, 0.0  ;;  %v137_v37 = vld [vmem:[%s426_s11 + $0xb0] sm:$0xff]  ;;  %v138_v43 = vld [vmem:[%s426_s11 + $0xb8] sm:$0xff] }
  0x1a   : > { %v158_v19 = vadd.f32 %v157_v14, %v156_v16  ;;  %v225_v63 = vmul.f32 %v123_v21, %v123_v21  ;;  %v260_v0 = vsel %vm147_vm0, %v223_v51, 0.0  ;;  %v179_v4 = vsel %vm147_vm0, %v131_v1, 0.0 }
  0x1b   : > { %v255_v55 = vadd.f32 %v254_v46, %v253_v49  ;;  %v226_v5 = vmul.f32 %v124_v24, %v124_v24  ;;  %v262_v6 = vsel %vm147_vm0, %v224_v57, 0.0  ;;  %v181_v10 = vsel %vm147_vm0, %v132_v7, 0.0  ;;  %v139_v49 = vld [vmem:[%s426_s11 + $0xc0] sm:$0xff] }
  0x1c   : > { %v160_v22 = vadd.f32 %v159_v17, %v158_v19  ;;  %v227_v11 = vmul.f32 %v125_v30, %v125_v30  ;;  %v264_v12 = vsel %vm147_vm0, %v225_v63, 0.0  ;;  %v183_v16 = vsel %vm147_vm0, %v133_v13, 0.0  ;;  %v134_v19 = vld [vmem:[%s426_s11 + $0x98] sm:$0xff] }
  0x1d   : > { %v257_v61 = vadd.f32 %v256_v52, %v255_v55  ;;  %v228_v17 = vmul.f32 %v126_v32, %v126_v32  ;;  %v266_v18 = vsel %vm147_vm0, %v226_v5, 0.0  ;;  %v230_v29 = vmul.f32 %v128_v47, %v128_v47  ;;  %v140_v55 = vld [vmem:[%s426_s11 + $0xc8] sm:$0xff] }
  0x1e   : > { %v162_v25 = vadd.f32 %v161_v20, %v160_v22  ;;  %v185_v22 = vsel %vm147_vm0, %v134_v19, 0.0  ;;  %v268_v24 = vsel %vm147_vm0, %v227_v11, 0.0  ;;  %v191_v40 = vsel %vm147_vm0, %v137_v37, 0.0 }
  0x1f   : > { %v259_v3 = vadd.f32 %v258_v58, %v257_v61  ;;  %v270_v30 = vsel %vm147_vm0, %v228_v17, 0.0  ;;  %v193_v46 = vsel %vm147_vm0, %v138_v43, 0.0  ;;  %v233_v47 = vmul.f32 %v131_v1, %v131_v1  ;;  %v141_v61 = vld [vmem:[%s426_s11 + $0xd0] sm:$0xff] }
  0x20   : > { %v164_v31 = vadd.f32 %v163_v23, %v162_v25  ;;  %v229_v23 = vmul.f32 %v127_v41, %v127_v41  ;;  %v135_v25 = vld [vmem:[%s426_s11 + $0xa0] sm:$0xff]  ;;  %v232_v41 = vmul.f32 %v130_v59, %v130_v59  ;;  %v195_v52 = vsel %vm147_vm0, %v139_v49, 0.0 }
  0x21   : > { %v261_v9 = vadd.f32 %v260_v0, %v259_v3  ;;  %v187_v28 = vsel %vm147_vm0, %v135_v25, 0.0  ;;  %v197_v58 = vsel %vm147_vm0, %v140_v55, 0.0  ;;  %v235_v59 = vmul.f32 %v133_v13, %v133_v13  ;;  %v142_v3 = vld [vmem:[%s426_s11 + $0xd8] sm:$0xff] }
  0x22   : > { %v166_v35 = vadd.f32 %v165_v26, %v164_v31  ;;  %v136_v31 = vld [vmem:[%s426_s11 + $0xa8] sm:$0xff]  ;;  %v199_v0 = vsel %vm147_vm0, %v141_v61, 0.0  ;;  %v236_v1 = vmul.f32 %v134_v19, %v134_v19  ;;  %v239_v19 = vmul.f32 %v137_v37, %v137_v37 }
  0x23   : > { %v263_v15 = vadd.f32 %v262_v6, %v261_v9  ;;  %v189_v34 = vsel %vm147_vm0, %v136_v31, 0.0  ;;  %v201_v6 = vsel %vm147_vm0, %v142_v3, 0.0  ;;  %v143_v9 = vld [vmem:[%s426_s11 + $0xe0] sm:$0xff]  ;;  %v238_v13 = vmul.f32 %v136_v31, %v136_v31 }
  0x24   : > { %v168_v42 = vadd.f32 %v167_v33, %v166_v35  ;;  %v231_v35 = vmul.f32 %v129_v53, %v129_v53  ;;  %v234_v53 = vmul.f32 %v132_v7, %v132_v7  ;;  %v237_v7 = vmul.f32 %v135_v25, %v135_v25  ;;  %v145_v25 = vld [vmem:[%s426_s11 + $0xf0] sm:$0xff] }
  0x25   : > { %v265_v21 = vadd.f32 %v264_v12, %v263_v15  ;;  %v203_v12 = vsel %vm147_vm0, %v143_v9, 0.0  ;;  %v144_v15 = vld [vmem:[%s426_s11 + $0xe8] sm:$0xff] }
  0x26   : > { %v170_v48 = vadd.f32 %v169_v36, %v168_v42  ;;  %v272_v36 = vsel %vm147_vm0, %v229_v23, 0.0  ;;  %v274_v42 = vsel %vm147_vm0, %v230_v29, 0.0  ;;  %v240_v23 = vmul.f32 %v138_v43, %v138_v43 }
  0x27   : > { %v267_v27 = vadd.f32 %v266_v18, %v265_v21  ;;  %v205_v18 = vsel %vm147_vm0, %v144_v15, 0.0  ;;  %v241_v29 = vmul.f32 %v139_v49, %v139_v49 }
  0x28   : > { %v172_v54 = vadd.f32 %v171_v44, %v170_v48  ;;  %v276_v48 = vsel %vm147_vm0, %v231_v35, 0.0 }
  0x29   : > { %v269_v33 = vadd.f32 %v268_v24, %v267_v27  ;;  %v290_v24 = vsel %vm147_vm0, %v238_v13, 0.0 }
  0x2a   : > { %v174_v60 = vadd.f32 %v173_v50, %v172_v54  ;;  %v278_v54 = vsel %vm147_vm0, %v232_v41, 0.0  ;;  %v244_v41 = vmul.f32 %v142_v3, %v142_v3 }
  0x2b   : > { %v271_v39 = vadd.f32 %v270_v30, %v269_v33  ;;  %v292_v30 = vsel %vm147_vm0, %v239_v19, 0.0  ;;  %v294_v33 = vsel %vm147_vm0, %v240_v23, 0.0 }
  0x2c   : > { %v176_v2 = vadd.f32 %v175_v56, %v174_v60  ;;  %v280_v60 = vsel %vm147_vm0, %v233_v47, 0.0  ;;  %v302_v49 = vsel %vm147_vm0, %v244_v41, 0.0 }
  0x2d   : > { %v273_v45 = vadd.f32 %v272_v36, %v271_v39  ;;  %v296_v39 = vsel %vm147_vm0, %v241_v29, 0.0 }
  0x2e   : > { %v178_v8 = vadd.f32 %v177_v62, %v176_v2  ;;  %v282_v2 = vsel %vm147_vm0, %v234_v53, 0.0 }
  0x2f   : > { %v275_v51 = vadd.f32 %v274_v42, %v273_v45  ;;  %v245_v45 = vmul.f32 %v143_v9, %v143_v9 }
  0x30   : > { %v180_v14 = vadd.f32 %v179_v4, %v178_v8  ;;  %v284_v8 = vsel %vm147_vm0, %v235_v59, 0.0 }
  0x31   : > { %v277_v57 = vadd.f32 %v276_v48, %v275_v51  ;;  %v246_v48 = vmul.f32 %v144_v15, %v144_v15  ;;  %v304_v53 = vsel %vm147_vm0, %v245_v45, 0.0 }
  0x32   : > { %v182_v20 = vadd.f32 %v181_v10, %v180_v14  ;;  %v286_v14 = vsel %vm147_vm0, %v236_v1, 0.0 }
  0x33   : > { %v279_v63 = vadd.f32 %v278_v54, %v277_v57 }
  0x34   : > { %v184_v26 = vadd.f32 %v183_v16, %v182_v20  ;;  %v288_v20 = vsel %vm147_vm0, %v237_v7, 0.0 }
  0x35   : > { %v281_v5 = vadd.f32 %v280_v60, %v279_v63 }
  0x36   : > { %v186_v32 = vadd.f32 %v185_v22, %v184_v26 }
  0x37   : > { %v283_v11 = vadd.f32 %v282_v2, %v281_v5 }
  0x38   : > { %v188_v38 = vadd.f32 %v187_v28, %v186_v32  ;;  %v207_v28 = vsel %vm147_vm0, %v145_v25, 0.0  ;;  %v242_v32 = vmul.f32 %v140_v55, %v140_v55 }
  0x39   : > { %v285_v17 = vadd.f32 %v284_v8, %v283_v11 }
  0x3a   : > { %v190_v44 = vadd.f32 %v189_v34, %v188_v38  ;;  %v146_v34 = vld [vmem:[%s426_s11 + $0xf8] sm:$0xff]  ;;  %v243_v38 = vmul.f32 %v141_v61, %v141_v61  ;;  %v298_v42 = vsel %vm147_vm0, %v242_v32, 0.0 }
  0x3b   : > { %v287_v22 = vadd.f32 %v286_v14, %v285_v17  ;;  %v209_v37 = vsel %vm147_vm0, %v146_v34, 0.0  ;;  %v248_v55 = vmul.f32 %v146_v34, %v146_v34 }
  0x3c   : > { %v192_v50 = vadd.f32 %v191_v40, %v190_v44 }
  0x3d   : > { %v289_v27 = vadd.f32 %v288_v20, %v287_v22  ;;  %v310_v61 = vsel %vm147_vm0, %v248_v55, 0.0 }
  0x3e   : > { %v194_v56 = vadd.f32 %v193_v46, %v192_v50  ;;  %v300_v46 = vsel %vm147_vm0, %v243_v38, 0.0 }
  0x3f   : > { %v291_v31 = vadd.f32 %v290_v24, %v289_v27 }
  0x40   : > { %v196_v62 = vadd.f32 %v195_v52, %v194_v56  ;;  %v247_v52 = vmul.f32 %v145_v25, %v145_v25  ;;  %v306_v56 = vsel %vm147_vm0, %v246_v48, 0.0 }
  0x41   : > { %v293_v36 = vadd.f32 %v292_v30, %v291_v31 }
  0x42   : > { %v198_v4 = vadd.f32 %v197_v58, %v196_v62  ;;  %v308_v59 = vsel %vm147_vm0, %v247_v52, 0.0 }
  0x43   : > { %v295_v40 = vadd.f32 %v294_v33, %v293_v36 }
  0x44   : > { %v200_v10 = vadd.f32 %v199_v0, %v198_v4 }
  0x45   : > { %v297_v44 = vadd.f32 %v296_v39, %v295_v40 }
  0x46   : > { %v202_v16 = vadd.f32 %v201_v6, %v200_v10 }
  0x47   : > { %v299_v47 = vadd.f32 %v298_v42, %v297_v44 }
  0x48   : > { %v204_v21 = vadd.f32 %v203_v12, %v202_v16 }
  0x49   : > { %v301_v51 = vadd.f32 %v300_v46, %v299_v47 }
  0x4a   : > { %v206_v26 = vadd.f32 %v205_v18, %v204_v21 }
  0x4b   : > { %v303_v54 = vadd.f32 %v302_v49, %v301_v51 }
  0x4c   : > { %v208_v35 = vadd.f32 %v207_v28, %v206_v26 }
  0x4d   : > { %v305_v58 = vadd.f32 %v304_v53, %v303_v54 }
  0x4e   : > { %v210_v43 = vadd.f32 %v209_v37, %v208_v35 }
  0x4f   : > { %v307_v60 = vadd.f32 %v306_v56, %v305_v58 }
  0x50   : > { %v211_v50 = vrot.slane %v210_v43, 4 }
  0x51   : > { %v309_v63 = vadd.f32 %v308_v59, %v307_v60 }
  0x52   : > { %v212_v57 = vadd.f32 %v211_v50, %v210_v43 }
  0x53   : > { %v311_v0 = vadd.f32 %v310_v61, %v309_v63 }
  0x54   : > { %v213_v62 = vrot.slane %v212_v57, 2 }
  0x55   : > { %v312_v2 = vrot.slane %v311_v0, 4 }
  0x56   : > { %v214_v1 = vadd.f32 %v213_v62, %v212_v57 }
  0x57   : > { %v313_v3 = vadd.f32 %v312_v2, %v311_v0 }
  0x58   : > { %v215_v4 = vrot.slane %v214_v1, 1 }
  0x59   : > { %v314_v5 = vrot.slane %v313_v3, 2 }
  0x5a   : > { %v216_v7 = vadd.f32 %v215_v4, %v214_v1 }
  0x5b   : > { %v315_v6 = vadd.f32 %v314_v5, %v313_v3 }
  0x5d   : > { %v316_v8 = vrot.slane %v315_v6, 1 }
  0x5f   : > { %v317_v9 = vadd.f32 %v316_v8, %v315_v6 }
  0x61   : > { %v319_v10 = vsel %vm318_vm1, %v216_v7, %v317_v9 }
  0x62   : > { %321 = vst.msk [vmem:[%s114_s15] sm:$0x3] %vm320_vm2, %v319_v10 }
  0x63 PF: > { %s11_s6 = sadd.s32 1, %s400_s6  }
  0x64   : > { %p8_p4 = scmp.ge.s32.totalorder %s11_s6, 4  }
  0x66   :  { %10 = sbr.rel (!%p8_p4) target bundleno = 1 (0x1), region = 54 }

// kernel: double_conv_forward.5
= control target key start
LH: loop header
LB: loop body
LE: loop exit
PB: predicated region body
PF: predicated region fallthrough
CT: control target
= control target key end

     0   :  { %s2990_s18 = smov 0   ;;  %s4681_s0 = inlined_call_operand.vmem [shape: f32[2,16,16,8], index: 0, kind: input, shape index: {}]   ;;  %s4682_s1 = inlined_call_operand.vmem [shape: f32[2,256,8], index: 1, kind: input, shape index: {}]   ;;  %s4683_s2 = inlined_call_operand.vmem [shape: f32[2,8], index: 2, kind: input, shape index: {}]   ;;  %s4684_s3 = inlined_call_operand.vmem [shape: bf16[72,8], index: 3, kind: input, shape index: {}]   ;;  %s4685_s4 = inlined_call_operand.vmem [shape: f32[1,8], index: 4, kind: input, shape index: {}]   ;;  %s4686_s5 = inlined_call_operand.vmem [shape: f32[2,256,8], index: 5, kind: output, shape index: {}]  }
   0x1 LB: > { %s2193_s19 = sadd.s32 4294967295, %s2949_s18   ;;  %p2197_p0 = scmp.ge.s32.totalorder %s2949_s18, 1  ;;  %s2949_s18 = sphi %s2990_s18, %s15_s18  }
   0x2   : > { %p197_p1 = scmp.lt.s32.totalorder %s2949_s18, 3 }
   0x4   : > { %p198_p2 = pnand %p2197_p0, %p197_p1 }
   0x6   : > { %201 = sbr.rel (%p198_p2) target bundleno = 654 (0x28e), region = 40 }
   0xd   : > { %p230_p3 = scmp.lt.s32.totalorder %s2193_s19, 1  ;;  %v279_v0 = vlaneseq  ;;  %v278_v1 = vld [vmem:[%s4683_s2] sm:$0x3]  ;;  %vm415_vm0 = vcmask 1040384   ;;  %v4687_v13 = vmov 0.0   ;;  %vm574_vm1 = vcmask 1046528  }
   0xe   : > { %v3020_v14 = vrot.slane %v4687_v13, 1  ;;  %v3023_v15 = vrot.slane %v4687_v13, 2  ;;  %s2952_s26 = smov 8   ;;  %vm652_vm2 = vcmask 1045504   ;;  %s2953_s27 = smov 16   ;;  %vm1865_vm3 = vcmask 1043456  }
   0xf   : > { %s4937_s19 = smov (!%p230_p3, %s2193_s19), 1  ;;  %v280_v2 = vshrl.u32 %v279_v0, 7  ;;  %s2954_s28 = smov 24   ;;  %vm1495_vm4 = vcmask 64512   ;;  %vm1527_vm5 = vcmask 130048   ;;  %vm1559_vm6 = vcmask 195584  }
  0x10   : > { %s3001_s22 = sshll.u32 %s4937_s19, 8  ;;  %4778 = vst [vmem:[#allocation4_spill] sm:$0xff] %v3020_v14  ;;  %4779 = vst [vmem:[#allocation5_spill] sm:$0xff] %v3023_v15  ;;  %s2955_s29 = smov 32   ;;  %vm1592_vm7 = vcmask 261120   ;;  %vm1625_vm8 = vcmask 326656  }
  0x11   : > { %v281_v3 = vsub.s32 0, %v280_v2  ;;  %v317_v4 = vsub.s32 1, %v280_v2  ;;  %s3007_s25 = scalar_lea.vmem %s4681_s0, %s3001_s22  ;;  %s2956_s7 = smov 40   ;;  %vm1658_vm9 = vcmask 392192   ;;  %vm1691_vm10 = vcmask 457728  }
  0x12   : > { %v248_v5 = vld [vmem:[%s3007_s25 + $0x10] sm:$0xff]  ;;  %v249_v6 = vld [vmem:[%s3007_s25 + $0x18] sm:$0xff]  ;;  %v250_v7 = vld [vmem:[%s3007_s25 + $0x20] sm:$0xff]  ;;  %s2957_s12 = smov 48   ;;  %s2958_s17 = smov 56   ;;  %vm1724_vm11 = vcmask 523264  }
  0x13   : > { %v3012_v8 = vrot.slane %v278_v1, %v281_v3  ;;  %v3014_v9 = vrot.slane %v278_v1, %v317_v4  ;;  %v251_v10 = vld [vmem:[%s3007_s25 + $0x28] sm:$0xff]  ;;  %v246_v11 = vld [vmem:[%s3007_s25] sm:$0xff]  ;;  %v252_v20 = vld [vmem:[%s3007_s25 + $0x30] sm:$0xff]  ;;  %s2959_s19 = smov 64   ;;  %vm1816_vm12 = vcmask 588800   ;;  %s4537_s23 = scalar_lea.vmem %s4682_s1, %s3001_s22 }
  0x14   : > { %v247_v12 = vld [vmem:[%s3007_s25 + $0x8] sm:$0xff]  ;;  %v253_v21 = vld [vmem:[%s3007_s25 + $0x38] sm:$0xff] }
  0x15   : > { %4776 = vst [vmem:[#allocation2_spill] sm:$0xff] %v3012_v8  ;;  %4777 = vst [vmem:[#allocation3_spill] sm:$0xff] %v3014_v9  ;;  %v285_v16 = vmul.f32 %v3012_v8, %v248_v5  ;;  %v286_v17 = vmul.f32 %v3012_v8, %v249_v6  ;;  %v287_v18 = vmul.f32 %v3012_v8, %v250_v7  ;;  %v254_v6 = vld [vmem:[%s3007_s25 + $0x40] sm:$0xff] }
  0x16   : > { %v288_v19 = vmul.f32 %v3012_v8, %v251_v10  ;;  %v283_v22 = vmul.f32 %v3012_v8, %v246_v11  ;;  %v284_v23 = vmul.f32 %v3012_v8, %v247_v12  ;;  %v289_v24 = vmul.f32 %v3012_v8, %v252_v20 }
  0x17   : > { %v290_v25 = vmul.f32 %v3012_v8, %v253_v21  ;;  %v321_v26 = vadd.f32 %v3014_v9, %v285_v16  ;;  %v322_v27 = vadd.f32 %v3014_v9, %v286_v17  ;;  %v323_v28 = vadd.f32 %v3014_v9, %v287_v18  ;;  %v255_v16 = vld [vmem:[%s3007_s25 + $0x48] sm:$0xff]  ;;  %v256_v17 = vld [vmem:[%s3007_s25 + $0x50] sm:$0xff]  ;;  %v257_v18 = vld [vmem:[%s3007_s25 + $0x58] sm:$0xff] }
  0x18   : > { %v324_v29 = vadd.f32 %v3014_v9, %v288_v19  ;;  %v319_v30 = vadd.f32 %v3014_v9, %v283_v22  ;;  %v320_v31 = vadd.f32 %v3014_v9, %v284_v23  ;;  %v325_v32 = vadd.f32 %v3014_v9, %v289_v24 }
  0x19   : > { %v326_v33 = vadd.f32 %v3014_v9, %v290_v25  ;;  %v353_v34 = vmax.f32 %v321_v26, 0.0  ;;  %v354_v35 = vmax.f32 %v322_v27, 0.0  ;;  %v355_v36 = vmax.f32 %v323_v28, 0.0 }
  0x1a   : > { %v356_v37 = vmax.f32 %v324_v29, 0.0  ;;  %v351_v38 = vmax.f32 %v319_v30, 0.0  ;;  %v352_v39 = vmax.f32 %v320_v31, 0.0  ;;  %v357_v40 = vmax.f32 %v325_v32, 0.0  ;;  %v258_v31 = vld [vmem:[%s3007_s25 + $0x60] sm:$0xff]  ;;  %v259_v32 = vld [vmem:[%s3007_s25 + $0x68] sm:$0xff] }
  0x1b   : > { %v358_v41 = vmax.f32 %v326_v33, 0.0  ;;  %v419_v42 = vrot.slane %v353_v34, 7  ;;  %v420_v43 = vrot.slane %v354_v35, 7  ;;  %v422_v44 = vrot.slane %v355_v36, 7 }
  0x1c   : > { %v423_v45 = vrot.slane %v356_v37, 7  ;;  %v416_v46 = vrot.slane %v351_v38, 7  ;;  %v417_v47 = vrot.slane %v352_v39, 7  ;;  %v425_v48 = vrot.slane %v357_v40, 7  ;;  %v260_v37 = vld [vmem:[%s3007_s25 + $0x70] sm:$0xff] }
  0x1d   : > { %v426_v49 = vrot.slane %v358_v41, 7  ;;  %v3044_v50 = vsel %vm415_vm0, %v419_v42, %v420_v43  ;;  %v3050_v52 = vsel %vm415_vm0, 0.0, %v422_v44  ;;  %v3053_v53 = vsel %vm415_vm0, %v420_v43, 0.0 }
  0x1e   : > { %4780 = vst [vmem:[#allocation6_spill] sm:$0xff] %v3044_v50  ;;  %v3047_v51 = vsel %vm415_vm0, %v422_v44, %v423_v45  ;;  %4782 = vst [vmem:[#allocation8_spill] sm:$0xff] %v3050_v52  ;;  %v583_v54 = vrot.slane %v3044_v50, 1  ;;  %v585_v55 = vrot.slane %v3053_v53, 1  ;;  %v587_v56 = vrot.slane %v3050_v52, 1 }
  0x1f   : > { %4781 = vst [vmem:[#allocation7_spill] sm:$0xff] %v3047_v51  ;;  %v588_v57 = vrot.slane %v3047_v51, 1  ;;  %v3061_v59 = vsel %vm415_vm0, %v416_v46, %v417_v47  ;;  %v3064_v60 = vsel %vm415_vm0, 0.0, %v416_v46  ;;  %v3067_v61 = vsel %vm415_vm0, %v417_v47, 0.0 }
  0x20   : > { %4783 = vst [vmem:[#allocation9_spill] sm:$0xff] %v3061_v59  ;;  %4784 = vst [vmem:[#allocation10_spill] sm:$0xff] %v3064_v60  ;;  %v3070_v62 = vsel %vm574_vm1, %v583_v54, %v585_v55  ;;  %v577_v0 = vrot.slane %v3064_v60, 1  ;;  %v578_v1 = vrot.slane %v3061_v59, 1  ;;  %v580_v3 = vrot.slane %v3067_v61, 1 }
  0x21   : > { %4785 = vst [vmem:[#allocation11_spill] sm:$0xff] %v3070_v62  ;;  %v3073_v63 = vsel %vm574_vm1, %v587_v56, %v588_v57  ;;  %v3081_v4 = vsel %vm415_vm0, %v425_v48, %v426_v49  ;;  %v3084_v5 = vsel %vm415_vm0, 0.0, %v425_v48  ;;  %v3091_v10 = vsel %vm415_vm0, %v423_v45, 0.0 }
  0x22   : > { %4786 = vst [vmem:[#allocation12_spill] sm:$0xff] %v3073_v63  ;;  %v2333_v2 = vpack.i.bf16 %v3073_v63, %v3070_v62  ;;  %v3088_v7 = vsel %vm574_vm1, %v577_v0, %v578_v1  ;;  %v592_v11 = vrot.slane %v3084_v5, 1  ;;  %v593_v12 = vrot.slane %v3081_v4, 1 }
  0x23   : > { %4787 = vst [vmem:[#allocation13_spill] sm:$0xff] %v3088_v7  ;;  %v3100_v19 = vsel %vm574_vm1, %v578_v1, %v580_v3  ;;  %v2323_v20 = vpack.i.bf16 %v3088_v7, %v3020_v14  ;;  %v590_v21 = vrot.slane %v3091_v10, 1  ;;  %v3106_v22 = vsel %vm415_vm0, 0.0, %v419_v42  ;;  %v261_v42 = vld [vmem:[%s3007_s25 + $0x78] sm:$0xff] }
  0x24   : > { %2334 = vrot.lane.b32.xlu1 %v2333_v2, %s2952_s26  ;;  %4788 = vst [vmem:[#allocation14_spill] sm:$0xff] %v3100_v19  ;;  %4789 = vst [vmem:[#allocation15_spill] sm:$0xff] %v3106_v22  ;;  %v3111_v24 = vsel %vm574_vm1, %v592_v11, %v593_v12  ;;  %v582_v25 = vrot.slane %v3106_v22, 1  ;;  %v291_v26 = vmul.f32 %v3012_v8, %v254_v6  ;;  %v3131_v36 = vsel %vm415_vm0, %v426_v49, 0.0 }
  0x25   : > { %4790 = vst [vmem:[#allocation16_spill] sm:$0xff] %v3111_v24  ;;  %2324 = vrot.lane.b32.xlu0 %v2323_v20, %s2952_s26  ;;  %v3117_v27 = vsel %vm574_vm1, %v588_v57, %v590_v21  ;;  %v292_v28 = vmul.f32 %v3012_v8, %v255_v16  ;;  %v293_v29 = vmul.f32 %v3012_v8, %v256_v17  ;;  %v595_v44 = vrot.slane %v3131_v36, 1 }
  0x26   : > { %4791 = vst [vmem:[#allocation17_spill] sm:$0xff] %v3117_v27  ;;  %v294_v30 = vmul.f32 %v3012_v8, %v257_v18  ;;  %v2338_v33 = vpack.i.bf16 %v3111_v24, %v3117_v27  ;;  %v3127_v34 = vsel %vm574_vm1, %v582_v25, %v583_v54  ;;  %v327_v35 = vadd.f32 %v3014_v9, %v291_v26  ;;  %v274_v27 = vld [vmem:[%s3007_s25 + $0xe0] sm:$0xff] }
  0x27   : > { %4792 = vst [vmem:[#allocation18_spill] sm:$0xff] %v3127_v34  ;;  %v2328_v38 = vpack.i.bf16 %v3127_v34, %v3100_v19  ;;  %v328_v39 = vadd.f32 %v3014_v9, %v292_v28  ;;  %v329_v40 = vadd.f32 %v3014_v9, %v293_v29  ;;  %v295_v45 = vmul.f32 %v3012_v8, %v258_v31 }
  0x28   : > { %v330_v41 = vadd.f32 %v3014_v9, %v294_v30  ;;  %2339 = vrot.lane.b32.xlu1 %v2338_v33, %s2952_s26  ;;  %v359_v43 = vmax.f32 %v327_v35, 0.0  ;;  %v296_v46 = vmul.f32 %v3012_v8, %v259_v32  ;;  %v297_v54 = vmul.f32 %v3012_v8, %v260_v37 }
  0x29   : > { %2329 = vrot.lane.b32.xlu0 %v2328_v38, %s2952_s26  ;;  %v360_v47 = vmax.f32 %v328_v39, 0.0  ;;  %v361_v48 = vmax.f32 %v329_v40, 0.0  ;;  %v3147_v56 = vsel %vm574_vm1, %v593_v12, %v595_v44  ;;  %v298_v57 = vmul.f32 %v3012_v8, %v261_v42 }
  0x2a   : > { %v362_v49 = vmax.f32 %v330_v41, 0.0  ;;  %v428_v55 = vrot.slane %v359_v43, 7  ;;  %4793 = vst [vmem:[#allocation19_spill] sm:$0xff] %v3147_v56  ;;  %v331_v0 = vadd.f32 %v3014_v9, %v295_v45  ;;  %v332_v6 = vadd.f32 %v3014_v9, %v296_v46 }
  0x2b   : > { %v429_v1 = vrot.slane %v360_v47, 7  ;;  %v431_v2 = vrot.slane %v361_v48, 7  ;;  %v333_v16 = vadd.f32 %v3014_v9, %v297_v54  ;;  %v334_v17 = vadd.f32 %v3014_v9, %v298_v57  ;;  %v263_v54 = vld [vmem:[%s3007_s25 + $0x88] sm:$0xff] }
  0x2c   : > { %v432_v3 = vrot.slane %v362_v49, 7  ;;  %v3153_v11 = vsel %vm415_vm0, 0.0, %v428_v55  ;;  %v363_v18 = vmax.f32 %v331_v0, 0.0  ;;  %v364_v32 = vmax.f32 %v332_v6, 0.0  ;;  %v262_v49 = vld [vmem:[%s3007_s25 + $0x80] sm:$0xff] }
  0x2d   : > { %4794 = vst [vmem:[#allocation20_spill] sm:$0xff] %v3153_v11  ;;  %v3158_v12 = vsel %vm415_vm0, %v428_v55, %v429_v1  ;;  %v3164_v21 = vsel %vm415_vm0, 0.0, %v431_v2  ;;  %v3167_v25 = vsel %vm415_vm0, %v429_v1, 0.0  ;;  %v597_v31 = vrot.slane %v3153_v11, 1 }
  0x2e   : > { %4795 = vst [vmem:[#allocation21_spill] sm:$0xff] %v3158_v12  ;;  %v3161_v20 = vsel %vm415_vm0, %v431_v2, %v432_v3  ;;  %v598_v26 = vrot.slane %v3158_v12, 1  ;;  %v600_v28 = vrot.slane %v3167_v25, 1  ;;  %v602_v29 = vrot.slane %v3164_v21, 1  ;;  %v264_v2 = vld [vmem:[%s3007_s25 + $0x90] sm:$0xff] }
  0x2f   : > { %v603_v30 = vrot.slane %v3161_v20, 1  ;;  %v365_v33 = vmax.f32 %v333_v16, 0.0  ;;  %v366_v35 = vmax.f32 %v334_v17, 0.0  ;;  %v434_v39 = vrot.slane %v363_v18, 7 }
  0x30   : > { %v3175_v37 = vsel %vm574_vm1, %v598_v26, %v600_v28  ;;  %v3181_v40 = vsel %vm415_vm0, %v432_v3, 0.0  ;;  %v3186_v42 = vsel %vm574_vm1, %v597_v31, %v598_v26  ;;  %v435_v43 = vrot.slane %v364_v32, 7  ;;  %v265_v3 = vld [vmem:[%s3007_s25 + $0x98] sm:$0xff] }
  0x31   : > { %4796 = vst [vmem:[#allocation22_spill] sm:$0xff] %v3175_v37  ;;  %v3178_v38 = vsel %vm574_vm1, %v602_v29, %v603_v30  ;;  %4798 = vst [vmem:[#allocation24_spill] sm:$0xff] %v3186_v42  ;;  %v437_v44 = vrot.slane %v365_v33, 7  ;;  %v2343_v45 = vpack.i.bf16 %v3186_v42, %v3147_v56  ;;  %v438_v46 = vrot.slane %v366_v35, 7 }
  0x32   : > { %4797 = vst [vmem:[#allocation23_spill] sm:$0xff] %v3178_v38  ;;  %v2348_v41 = vpack.i.bf16 %v3178_v38, %v3175_v37  ;;  %v3191_v47 = vsel %vm415_vm0, 0.0, %v434_v39  ;;  %v605_v48 = vrot.slane %v3181_v40, 1  ;;  %v3198_v55 = vsel %vm415_vm0, %v434_v39, %v435_v43 }
  0x33   : > { %4799 = vst [vmem:[#allocation25_spill] sm:$0xff] %v3198_v55  ;;  %v3201_v57 = vsel %vm415_vm0, 0.0, %v437_v44  ;;  %v3204_v0 = vsel %vm415_vm0, %v435_v43, 0.0  ;;  %v607_v1 = vrot.slane %v3191_v47, 1  ;;  %2344 = vrot.lane.b32.xlu0 %v2343_v45, %s2952_s26  ;;  %v3211_v6 = vsel %vm415_vm0, %v437_v44, %v438_v46 }
  0x34   : > { %2349 = vrot.lane.b32.xlu1 %v2348_v41, %s2952_s26  ;;  %4800 = vst [vmem:[#allocation26_spill] sm:$0xff] %v3201_v57  ;;  %4801 = vst [vmem:[#allocation27_spill] sm:$0xff] %v3211_v6  ;;  %v608_v16 = vrot.slane %v3198_v55, 1  ;;  %v610_v17 = vrot.slane %v3204_v0, 1  ;;  %v612_v18 = vrot.slane %v3201_v57, 1  ;;  %v613_v26 = vrot.slane %v3211_v6, 1 }
  0x35   : > { %v3218_v28 = vsel %vm574_vm1, %v603_v30, %v605_v48  ;;  %v299_v29 = vmul.f32 %v3012_v8, %v262_v49  ;;  %v300_v31 = vmul.f32 %v3012_v8, %v263_v54  ;;  %v301_v35 = vmul.f32 %v3012_v8, %v264_v2  ;;  %v266_v41 = vld [vmem:[%s3007_s25 + $0xa0] sm:$0xff]  ;;  %v267_v48 = vld [vmem:[%s3007_s25 + $0xa8] sm:$0xff]  ;;  %v268_v49 = vld [vmem:[%s3007_s25 + $0xb0] sm:$0xff] }
  0x36   : > { %4802 = vst [vmem:[#allocation28_spill] sm:$0xff] %v3218_v28  ;;  %v3223_v32 = vsel %vm574_vm1, %v608_v16, %v610_v17  ;;  %v3226_v33 = vsel %vm574_vm1, %v607_v1, %v608_v16  ;;  %v302_v39 = vmul.f32 %v3012_v8, %v265_v3  ;;  %v3232_v43 = vsel %vm574_vm1, %v612_v18, %v613_v26  ;;  %v269_v16 = vld [vmem:[%s3007_s25 + $0xb8] sm:$0xff] }
  0x37   : > { %4803 = vst [vmem:[#allocation29_spill] sm:$0xff] %v3223_v32  ;;  %4804 = vst [vmem:[#allocation30_spill] sm:$0xff] %v3226_v33  ;;  %v2353_v30 = vpack.i.bf16 %v3226_v33, %v3218_v28  ;;  %v335_v44 = vadd.f32 %v3014_v9, %v299_v29  ;;  %v336_v45 = vadd.f32 %v3014_v9, %v300_v31  ;;  %v3245_v3 = vsel %vm415_vm0, %v438_v46, 0.0 }
  0x38   : > { %4805 = vst [vmem:[#allocation31_spill] sm:$0xff] %v3232_v43  ;;  %v2358_v54 = vpack.i.bf16 %v3232_v43, %v3223_v32  ;;  %v337_v1 = vadd.f32 %v3014_v9, %v301_v35  ;;  %v338_v2 = vadd.f32 %v3014_v9, %v302_v39  ;;  %v615_v29 = vrot.slane %v3245_v3, 1 }
  0x39   : > { %2354 = vrot.lane.b32.xlu0 %v2353_v30, %s2952_s26  ;;  %v367_v17 = vmax.f32 %v335_v44, 0.0  ;;  %v368_v18 = vmax.f32 %v336_v45, 0.0  ;;  %v303_v31 = vmul.f32 %v3012_v8, %v266_v41  ;;  %v304_v35 = vmul.f32 %v3012_v8, %v267_v48 }
  0x3a   : > { %2359 = vrot.lane.b32.xlu1 %v2358_v54, %s2952_s26  ;;  %v369_v13 = vmax.f32 %v337_v1, 0.0  ;;  %v370_v23 = vmax.f32 %v338_v2, 0.0  ;;  %v305_v39 = vmul.f32 %v3012_v8, %v268_v49  ;;  %v3255_v14 = vsel %vm574_vm1, %v613_v26, %v615_v29 }
  0x3b   : > { %v440_v58 = vrot.slane %v367_v17, 7  ;;  %v441_v46 = vrot.slane %v368_v18, 7  ;;  %4806 = vst [vmem:[#allocation32_spill] sm:$0xff] %v3255_v14  ;;  %v306_v30 = vmul.f32 %v3012_v8, %v269_v16  ;;  %v339_v43 = vadd.f32 %v3014_v9, %v303_v31 }
  0x3c   : > { %v443_v44 = vrot.slane %v369_v13, 7  ;;  %v444_v45 = vrot.slane %v370_v23, 7  ;;  %v340_v41 = vadd.f32 %v3014_v9, %v304_v35  ;;  %v341_v26 = vadd.f32 %v3014_v9, %v305_v39 }
  0x3d   : > { %v3261_v54 = vsel %vm415_vm0, %v440_v58, %v441_v46  ;;  %v3264_v48 = vsel %vm415_vm0, %v441_v46, 0.0  ;;  %v3267_v49 = vsel %vm415_vm0, 0.0, %v440_v58  ;;  %v342_v18 = vadd.f32 %v3014_v9, %v306_v30  ;;  %v270_v46 = vld [vmem:[%s3007_s25 + $0xc0] sm:$0xff]  ;;  %v271_v30 = vld [vmem:[%s3007_s25 + $0xc8] sm:$0xff] }
  0x3e   : > { %4807 = vst [vmem:[#allocation33_spill] sm:$0xff] %v3261_v54  ;;  %4808 = vst [vmem:[#allocation34_spill] sm:$0xff] %v3267_v49  ;;  %v3271_v1 = vsel %vm415_vm0, %v443_v44, %v444_v45  ;;  %v3274_v13 = vsel %vm415_vm0, 0.0, %v443_v44  ;;  %v618_v23 = vrot.slane %v3261_v54, 1  ;;  %v620_v2 = vrot.slane %v3264_v48, 1 }
  0x3f   : > { %4809 = vst [vmem:[#allocation35_spill] sm:$0xff] %v3271_v1  ;;  %4810 = vst [vmem:[#allocation36_spill] sm:$0xff] %v3274_v13  ;;  %v622_v16 = vrot.slane %v3274_v13, 1  ;;  %v623_v17 = vrot.slane %v3271_v1, 1  ;;  %v617_v58 = vrot.slane %v3267_v49, 1  ;;  %v371_v31 = vmax.f32 %v339_v43, 0.0 }
  0x40   : > { %v3283_v29 = vsel %vm574_vm1, %v618_v23, %v620_v2  ;;  %v372_v35 = vmax.f32 %v340_v41, 0.0  ;;  %v373_v39 = vmax.f32 %v341_v26, 0.0  ;;  %v374_v33 = vmax.f32 %v342_v18, 0.0 }
  0x41   : > { %4811 = vst [vmem:[#allocation37_spill] sm:$0xff] %v3283_v29  ;;  %v3287_v44 = vsel %vm574_vm1, %v622_v16, %v623_v17  ;;  %v3290_v32 = vsel %vm574_vm1, %v617_v58, %v618_v23  ;;  %v3293_v28 = vsel %vm415_vm0, %v444_v45, 0.0  ;;  %v446_v41 = vrot.slane %v371_v31, 7  ;;  %v272_v31 = vld [vmem:[%s3007_s25 + $0xd0] sm:$0xff] }
  0x42   : > { %4812 = vst [vmem:[#allocation38_spill] sm:$0xff] %v3290_v32  ;;  %v2368_v2 = vpack.i.bf16 %v3287_v44, %v3283_v29  ;;  %v2363_v43 = vpack.i.bf16 %v3290_v32, %v3255_v14  ;;  %v447_v26 = vrot.slane %v372_v35, 7  ;;  %v449_v16 = vrot.slane %v373_v39, 7 }
  0x43   : > { %v450_v38 = vrot.slane %v374_v33, 7  ;;  %v625_v23 = vrot.slane %v3293_v28, 1  ;;  %v307_v58 = vmul.f32 %v3012_v8, %v270_v46  ;;  %v3311_v14 = vsel %vm415_vm0, 0.0, %v446_v41  ;;  %v273_v33 = vld [vmem:[%s3007_s25 + $0xd8] sm:$0xff] }
  0x44   : > { %2369 = vrot.lane.b32.xlu1 %v2368_v2, %s2952_s26  ;;  %2364 = vrot.lane.b32.xlu0 %v2363_v43, %s2952_s26  ;;  %v3305_v45 = vsel %vm415_vm0, %v446_v41, %v447_v26  ;;  %v3308_v18 = vsel %vm415_vm0, %v447_v26, 0.0  ;;  %4814 = vst [vmem:[#allocation40_spill] sm:$0xff] %v3311_v14  ;;  %v308_v35 = vmul.f32 %v3012_v8, %v271_v30  ;;  %v3320_v46 = vsel %vm415_vm0, 0.0, %v449_v16 }
  0x45   : > { %4813 = vst [vmem:[#allocation39_spill] sm:$0xff] %v3305_v45  ;;  %v3317_v39 = vsel %vm415_vm0, %v449_v16, %v450_v38  ;;  %v628_v2 = vrot.slane %v3305_v45, 1  ;;  %v630_v43 = vrot.slane %v3308_v18, 1  ;;  %v632_v26 = vrot.slane %v3320_v46, 1 }
  0x46   : > { %v633_v41 = vrot.slane %v3317_v39, 1  ;;  %v3327_v37 = vsel %vm574_vm1, %v623_v17, %v625_v23  ;;  %v627_v30 = vrot.slane %v3311_v14, 1  ;;  %v309_v16 = vmul.f32 %v3012_v8, %v272_v31 }
  0x47   : > { %v3331_v42 = vsel %vm574_vm1, %v628_v2, %v630_v43  ;;  %v310_v56 = vmul.f32 %v3012_v8, %v273_v33  ;;  %v343_v24 = vadd.f32 %v3014_v9, %v307_v58  ;;  %v344_v17 = vadd.f32 %v3014_v9, %v308_v35  ;;  %v275_v43 = vld [vmem:[%s3007_s25 + $0xe8] sm:$0xff] }
  0x48   : > { %v3338_v63 = vsel %vm574_vm1, %v632_v26, %v633_v41  ;;  %v3341_v62 = vsel %vm574_vm1, %v627_v30, %v628_v2  ;;  %v3345_v23 = vsel %vm415_vm0, %v450_v38, 0.0  ;;  %v345_v58 = vadd.f32 %v3014_v9, %v309_v16 }
  0x49   : > { %4815 = vst [vmem:[#allocation41_spill] sm:$0xff] %v3338_v63  ;;  %v2378_v31 = vpack.i.bf16 %v3338_v63, %v3331_v42  ;;  %v2373_v33 = vpack.i.bf16 %v3341_v62, %v3327_v37  ;;  %v346_v26 = vadd.f32 %v3014_v9, %v310_v56  ;;  %v375_v29 = vmax.f32 %v343_v24, 0.0 }
  0x4a   : > { %v376_v7 = vmax.f32 %v344_v17, 0.0  ;;  %v635_v2 = vrot.slane %v3345_v23, 1  ;;  %v311_v35 = vmul.f32 %v3012_v8, %v274_v27  ;;  %v377_v38 = vmax.f32 %v345_v58, 0.0 }
  0x4b   : > { %2379 = vrot.lane.b32.xlu1 %v2378_v31, %s2952_s26  ;;  %2374 = vrot.lane.b32.xlu0 %v2373_v33, %s2952_s26  ;;  %v378_v30 = vmax.f32 %v346_v26, 0.0  ;;  %v312_v19 = vmul.f32 %v3012_v8, %v275_v43  ;;  %v656_v32 = vrot.slane %v3061_v59, 2  ;;  %v452_v34 = vrot.slane %v375_v29, 7 }
  0x4c   : > { %v453_v16 = vrot.slane %v376_v7, 7  ;;  %v3361_v56 = vsel %vm574_vm1, %v633_v41, %v635_v2  ;;  %v347_v24 = vadd.f32 %v3014_v9, %v311_v35  ;;  %v455_v17 = vrot.slane %v377_v38, 7 }
  0x4d   : > { %4816 = vst [vmem:[#allocation42_spill] sm:$0xff] %v3361_v56  ;;  %v456_v63 = vrot.slane %v378_v30, 7  ;;  %v348_v27 = vadd.f32 %v3014_v9, %v312_v19  ;;  %v658_v31 = vrot.slane %v3067_v61, 2  ;;  %v3373_v29 = vsel %vm415_vm0, 0.0, %v452_v34 }
  0x4e   : > { %v3367_v33 = vsel %vm415_vm0, %v452_v34, %v453_v16  ;;  %v3370_v43 = vsel %vm415_vm0, %v453_v16, 0.0  ;;  %v379_v7 = vmax.f32 %v347_v24, 0.0  ;;  %v3379_v58 = vsel %vm415_vm0, 0.0, %v455_v17 }
  0x4f   : > { %v3376_v41 = vsel %vm415_vm0, %v455_v17, %v456_v63  ;;  %v638_v19 = vrot.slane %v3367_v33, 1  ;;  %v640_v61 = vrot.slane %v3370_v43, 1  ;;  %v642_v26 = vrot.slane %v3379_v58, 1 }
  0x50   : > { %v643_v2 = vrot.slane %v3376_v41, 1  ;;  %v637_v35 = vrot.slane %v3373_v29, 1  ;;  %v380_v38 = vmax.f32 %v348_v27, 0.0  ;;  %v458_v30 = vrot.slane %v379_v7, 7 }
  0x51   : > { %v3387_v34 = vsel %vm574_vm1, %v638_v19, %v640_v61  ;;  %v3390_v16 = vsel %vm415_vm0, %v456_v63, 0.0  ;;  %v3393_v24 = vsel %vm652_vm2, %v656_v32, %v658_v31  ;;  %v660_v31 = vrot.slane %v3106_v22, 2 }
  0x52   : > { %4817 = vst [vmem:[#allocation43_spill] sm:$0xff] %v3387_v34  ;;  %v3396_v17 = vsel %vm574_vm1, %v642_v26, %v643_v2  ;;  %v3399_v9 = vsel %vm574_vm1, %v637_v35, %v638_v19  ;;  %v459_v8 = vrot.slane %v380_v38, 7  ;;  %v645_v59 = vrot.slane %v3390_v16, 1 }
  0x53   : > { %4818 = vst [vmem:[#allocation44_spill] sm:$0xff] %v3396_v17  ;;  %4819 = vst [vmem:[#allocation45_spill] sm:$0xff] %v3399_v9  ;;  %v2388_v27 = vpack.i.bf16 %v3396_v17, %v3387_v34  ;;  %v2383_v7 = vpack.i.bf16 %v3399_v9, %v3361_v56  ;;  %v3407_v63 = vsel %vm415_vm0, 0.0, %v458_v30  ;;  %v661_v34 = vrot.slane %v3044_v50, 2 }
  0x54   : > { %4820 = vst [vmem:[#allocation46_spill] sm:$0xff] %v3407_v63  ;;  %v3411_v61 = vsel %vm415_vm0, %v458_v30, %v459_v8  ;;  %v3414_v19 = vsel %vm415_vm0, %v459_v8, 0.0  ;;  %v647_v26 = vrot.slane %v3407_v63, 1  ;;  %v3418_v35 = vsel %vm574_vm1, %v643_v2, %v645_v59 }
  0x55   : > { %4821 = vst [vmem:[#allocation47_spill] sm:$0xff] %v3411_v61  ;;  %2389 = vrot.lane.b32.xlu1 %v2388_v27, %s2952_s26  ;;  %2384 = vrot.lane.b32.xlu0 %v2383_v7, %s2952_s26  ;;  %v648_v38 = vrot.slane %v3411_v61, 1  ;;  %v650_v17 = vrot.slane %v3414_v19, 1  ;;  %v655_v30 = vrot.slane %v3064_v60, 2  ;;  %v666_v8 = vrot.slane %v3047_v51, 2 }
  0x56   : > { %v668_v9 = vrot.slane %v3091_v10, 2  ;;  %v670_v22 = vrot.slane %v3084_v5, 2  ;;  %v671_v59 = vrot.slane %v3081_v4, 2  ;;  %v3433_v7 = vsel %vm652_vm2, %v660_v31, %v661_v34 }
  0x57   : > { %v649_v2 = vsel %vm574_vm1, %v647_v26, %v648_v38  ;;  %v651_v27 = vsel %vm574_vm1, %v648_v38, %v650_v17  ;;  %v3436_v56 = vsel %vm652_vm2, %v655_v30, %v656_v32  ;;  %v2403_v10 = vpack.i.bf16 %v3433_v7, %v3393_v24 }
  0x58   : > { %v3438_v50 = vpack.i.bf16 %v651_v27, %v649_v2  ;;  %v2393_v51 = vpack.i.bf16 %v649_v2, %v3418_v35  ;;  %v2398_v26 = vpack.i.bf16 %v3436_v56, %v3023_v15  ;;  %v3447_v17 = vsel %vm652_vm2, %v666_v8, %v668_v9 }
  0x59   : > { %802 = vrot.lane.b32.xlu1 %v651_v27, %s2952_s26  ;;  %v3450_v31 = vsel %vm652_vm2, %v670_v22, %v671_v59  ;;  %v4823_v32 = vrot.slane %v3053_v53, 2  ;;  %v665_v30 = vrot.slane %v3050_v52, 2  ;;  %v676_v2 = vrot.slane %v3158_v12, 2 }
  0x5a   : > { %4822 = vst [vmem:[#allocation48_spill] sm:$0xff] %v3438_v50  ;;  %2394 = vrot.lane.b32.xlu0 %v2393_v51, %s2952_s26  ;;  %v678_v27 = vrot.slane %v3167_v25, 2  ;;  %v680_v15 = vrot.slane %v3164_v21, 2  ;;  %v681_v9 = vrot.slane %v3161_v20, 2  ;;  %v673_v22 = vrot.slane %v3131_v36, 2 }
  0x5b   : > { %v3456_v38 = vsel %vm652_vm2, %v661_v34, %v4823_v32  ;;  %v675_v50 = vrot.slane %v3153_v11, 2  ;;  %v3466_v51 = vsel %vm652_vm2, %v665_v30, %v666_v8  ;;  %v686_v53 = vrot.slane %v3198_v55, 2 }
  0x5c   : > { %v688_v34 = vrot.slane %v3204_v0, 2  ;;  %v2413_v25 = vpack.i.bf16 %v3450_v31, %v3447_v17  ;;  %v2408_v32 = vpack.i.bf16 %v3466_v51, %v3456_v38  ;;  %v3476_v36 = vsel %vm652_vm2, %v676_v2, %v678_v27 }
  0x5d   : > { %2404 = vrot.lane.b32.xlu1 %v2403_v10, %s2953_s27  ;;  %v3480_v8 = vsel %vm652_vm2, %v680_v15, %v681_v9  ;;  %v3483_v30 = vsel %vm652_vm2, %v671_v59, %v673_v22  ;;  %v3486_v0 = vsel %vm652_vm2, %v675_v50, %v676_v2  ;;  %v690_v10 = vrot.slane %v3201_v57, 2 }
  0x5e   : > { %2399 = vrot.lane.b32.xlu0 %v2398_v26, %s2953_s27  ;;  %v3490_v55 = vsel %vm652_vm2, %v686_v53, %v688_v34  ;;  %v691_v12 = vrot.slane %v3211_v6, 2  ;;  %v683_v27 = vrot.slane %v3181_v40, 2  ;;  %v685_v26 = vrot.slane %v3191_v47, 2 }
  0x5f   : > { %v696_v15 = vrot.slane %v3261_v54, 2  ;;  %v698_v11 = vrot.slane %v3264_v48, 2  ;;  %v700_v59 = vrot.slane %v3274_v13, 2  ;;  %v701_v50 = vrot.slane %v3271_v1, 2 }
  0x60   : > { %v2423_v2 = vpack.i.bf16 %v3480_v8, %v3476_v36  ;;  %v3503_v22 = vsel %vm652_vm2, %v690_v10, %v691_v12  ;;  %v693_v40 = vrot.slane %v3245_v3, 2  ;;  %v695_v34 = vrot.slane %v3267_v49, 2 }
  0x61   : > { %2414 = vrot.lane.b32.xlu1 %v2413_v25, %s2953_s27  ;;  %4824 = vst [vmem:[#allocation49_spill] sm:$0xff] %v3503_v22  ;;  %v2418_v48 = vpack.i.bf16 %v3486_v0, %v3483_v30  ;;  %v2433_v54 = vpack.i.bf16 %v3503_v22, %v3490_v55  ;;  %v3513_v25 = vsel %vm652_vm2, %v681_v9, %v683_v27  ;;  %v706_v49 = vrot.slane %v3305_v45, 2 }
  0x62   : > { %2409 = vrot.lane.b32.xlu0 %v2408_v32, %s2953_s27  ;;  %v3516_v1 = vsel %vm652_vm2, %v685_v26, %v686_v53  ;;  %v3519_v10 = vsel %vm652_vm2, %v696_v15, %v698_v11  ;;  %v702_v3 = vsel %vm652_vm2, %v700_v59, %v701_v50  ;;  %v708_v32 = vrot.slane %v3308_v18, 2 }
  0x63   : > { %4825 = vst [vmem:[#allocation50_spill] sm:$0xff] %v3519_v10  ;;  %v3526_v13 = vsel %vm652_vm2, %v691_v12, %v693_v40  ;;  %v3529_v9 = vsel %vm652_vm2, %v695_v34, %v696_v15  ;;  %v710_v53 = vrot.slane %v3320_v46, 2  ;;  %v711_v27 = vrot.slane %v3317_v39, 2 }
  0x64   : > { %4826 = vst [vmem:[#allocation51_spill] sm:$0xff] %v3526_v13  ;;  %4827 = vst [vmem:[#allocation52_spill] sm:$0xff] %v3529_v9  ;;  %v2428_v11 = vpack.i.bf16 %v3516_v1, %v3513_v25  ;;  %v703_v26 = vrot.slane %v3293_v28, 2  ;;  %v705_v18 = vrot.slane %v3311_v14, 2  ;;  %v2443_v59 = vpack.i.bf16 %v702_v3, %v3519_v10 }
  0x65   : > { %2424 = vrot.lane.b32.xlu1 %v2423_v2, %s2953_s27  ;;  %v2438_v12 = vpack.i.bf16 %v3529_v9, %v3526_v13  ;;  %v709_v15 = vsel %vm652_vm2, %v706_v49, %v708_v32  ;;  %v716_v2 = vrot.slane %v3367_v33, 2  ;;  %v718_v40 = vrot.slane %v3370_v43, 2 }
  0x66   : > { %2419 = vrot.lane.b32.xlu0 %v2418_v48, %s2953_s27  ;;  %v712_v34 = vsel %vm652_vm2, %v710_v53, %v711_v27  ;;  %v725_v48 = vrot.slane %v3407_v63, 2  ;;  %v726_v28 = vrot.slane %v3411_v61, 2  ;;  %v728_v22 = vrot.slane %v3414_v19, 2 }
  0x67   : > { %v704_v13 = vsel %vm652_vm2, %v701_v50, %v703_v26  ;;  %v707_v32 = vsel %vm652_vm2, %v705_v18, %v706_v49  ;;  %v720_v10 = vrot.slane %v3379_v58, 2  ;;  %v721_v43 = vrot.slane %v3376_v41, 2 }
  0x68   : > { %v715_v53 = vrot.slane %v3373_v29, 2  ;;  %v727_v9 = vsel %vm652_vm2, %v725_v48, %v726_v28  ;;  %v729_v61 = vsel %vm652_vm2, %v726_v28, %v728_v22  ;;  %v2453_v19 = vpack.i.bf16 %v712_v34, %v709_v15 }
  0x69   : > { %2434 = vrot.lane.b32.xlu1 %v2433_v54, %s2953_s27  ;;  %v713_v54 = vrot.slane %v3345_v23, 2  ;;  %v3558_v63 = vpack.i.bf16 %v729_v61, %v727_v9  ;;  %v2448_v49 = vpack.i.bf16 %v707_v32, %v704_v13  ;;  %v719_v50 = vsel %vm652_vm2, %v716_v2, %v718_v40 }
  0x6a   : > { %2429 = vrot.lane.b32.xlu0 %v2428_v11, %s2953_s27  ;;  %v722_v11 = vsel %vm652_vm2, %v720_v10, %v721_v43  ;;  %v717_v26 = vsel %vm652_vm2, %v715_v53, %v716_v2  ;;  %v723_v18 = vrot.slane %v3390_v16, 2  ;;  %v3577_v10 = vpack.i.bf16 %v3456_v38, %v3433_v7  ;;  %v4828_v7 = vld [vmem:[#allocation41_spill] sm:$0xff]  ;;  %v4829_v38 = vld [vmem:[#allocation42_spill] sm:$0xff]  ;;  %v276_v53 = vld [vmem:[%s3007_s25 + $0xf0] sm:$0xff] }
  0x6b   : > { %v714_v23 = vsel %vm652_vm2, %v711_v27, %v713_v54  ;;  %v2463_v22 = vpack.i.bf16 %v722_v11, %v719_v50  ;;  %v3583_v16 = vpack.i.bf16 %v3331_v42, %v3341_v62  ;;  %v3588_v2 = vpack.i.bf16 %v709_v15, %v707_v32  ;;  %v4830_v62 = vld [vmem:[#allocation15_spill] sm:$0xff]  ;;  %v4831_v42 = vld [vmem:[#allocation6_spill] sm:$0xff] }
  0x6c   : > { %v2458_v40 = vpack.i.bf16 %v717_v26, %v714_v23  ;;  %v724_v27 = vsel %vm652_vm2, %v721_v43, %v723_v18  ;;  %v3592_v48 = vpack.i.bf16 %v3447_v17, %v3466_v51  ;;  %v3596_v28 = vpack.i.bf16 %v4829_v38, %v4828_v7  ;;  %v4833_v51 = vld [vmem:[#allocation45_spill] sm:$0xff]  ;;  %v4834_v32 = vld [vmem:[#allocation43_spill] sm:$0xff] }
  0x6d   : > { %2444 = vrot.lane.b32.xlu1 %v2443_v59, %s2953_s27  ;;  %v3570_v59 = vpack.i.bf16 %v3327_v37, %v3287_v44  ;;  %v3585_v37 = vpack.i.bf16 %v704_v13, %v702_v3  ;;  %v2468_v44 = vpack.i.bf16 %v727_v9, %v724_v27  ;;  %v3601_v13 = vpack.i.bf16 %v4831_v42, %v4830_v62  ;;  %v4832_v3 = vld [vmem:[#allocation9_spill] sm:$0xff]  ;;  %v4851_v42 = vld [vmem:[#allocation47_spill] sm:$0xff] }
  0x6e   : > { %2439 = vrot.lane.b32.xlu0 %v2438_v12, %s2953_s27  ;;  %v2473_v9 = vpack.i.bf16 %v4832_v3, %v3064_v60  ;;  %v3606_v15 = vpack.i.bf16 %v714_v23, %v712_v34  ;;  %v3610_v17 = vpack.i.bf16 %v3483_v30, %v3450_v31  ;;  %v3614_v43 = vpack.i.bf16 %v4834_v32, %v4833_v51  ;;  %v4835_v34 = vld [vmem:[#allocation7_spill] sm:$0xff] }
  0x6f   : > { %v3622_v54 = vpack.i.bf16 %v719_v50, %v717_v26  ;;  %v3627_v31 = vpack.i.bf16 %v4835_v34, %v3050_v52  ;;  %v3631_v30 = vpack.i.bf16 %v3476_v36, %v3486_v0  ;;  %v3639_v18 = vpack.i.bf16 %v724_v27, %v722_v11  ;;  %v4837_v36 = vld [vmem:[#allocation20_spill] sm:$0xff]  ;;  %v4838_v0 = vld [vmem:[#allocation21_spill] sm:$0xff]  ;;  %v4839_v11 = vld [vmem:[#allocation2_spill] sm:$0xff] }
  0x70   : > { %v3643_v50 = vpack.i.bf16 %v3513_v25, %v3480_v8  ;;  %v3649_v26 = vpack.i.bf16 %v3161_v20, %v3164_v21  ;;  %v3663_v8 = vpack.i.bf16 %v3211_v6, %v3201_v57  ;;  %v4841_v25 = vld [vmem:[#allocation25_spill] sm:$0xff]  ;;  %v4844_v51 = vld [vmem:[#allocation35_spill] sm:$0xff]  ;;  %v4850_v34 = vld [vmem:[#allocation46_spill] sm:$0xff] }
  0x71   : > { %2454 = vrot.lane.b32.xlu1 %v2453_v19, %s2953_s27  ;;  %v277_v19 = vld [vmem:[%s3007_s25 + $0xf8] sm:$0xff]  ;;  %v3669_v27 = vpack.i.bf16 %v4841_v25, %v3191_v47  ;;  %v3724_v52 = vpack.i.bf16 %v4851_v42, %v4850_v34  ;;  %v4858_v60 = vld [vmem:[#allocation11_spill] sm:$0xff] }
  0x72   : > { %2449 = vrot.lane.b32.xlu0 %v2448_v49, %s2953_s27  ;;  %v4836_v49 = vld [vmem:[#allocation44_spill] sm:$0xff]  ;;  %4840 = vst [vmem:[#allocation41_spill] sm:$0xff] %v3663_v8 }
  0x73   : > { %v3637_v23 = vpack.i.bf16 %v3418_v35, %v4836_v49  ;;  %v3655_v35 = vpack.i.bf16 %v4838_v0, %v4837_v36 }
  0x75   : > { %2464 = vrot.lane.b32.xlu1 %v2463_v22, %s2953_s27  ;;  %v313_v22 = vmul.f32 %v4839_v11, %v276_v53  ;;  %v4845_v53 = vld [vmem:[#allocation34_spill] sm:$0xff] }
  0x76   : > { %2459 = vrot.lane.b32.xlu0 %v2458_v40, %s2953_s27  ;;  %v314_v40 = vmul.f32 %v4839_v11, %v277_v19  ;;  %v4846_v19 = vld [vmem:[#allocation33_spill] sm:$0xff] }
  0x77   : > { %v3683_v49 = vpack.i.bf16 %v4846_v19, %v4845_v53 }
  0x79   : > { %895 = vrot.lane.b32.xlu1 %v729_v61, %s2953_s27  ;;  %v3620_v61 = vpack.i.bf16 %v3081_v4, %v3084_v5  ;;  %4847 = vst [vmem:[#allocation42_spill] sm:$0xff] %v3683_v49 }
  0x7a   : > { %2469 = vrot.lane.b32.xlu0 %v2468_v44, %s2953_s27  ;;  %v4842_v44 = vld [vmem:[#allocation3_spill] sm:$0xff] }
  0x7b   : > { %v349_v7 = vadd.f32 %v4842_v44, %v313_v22  ;;  %v350_v38 = vadd.f32 %v4842_v44, %v314_v40  ;;  %v3689_v22 = vpack.i.bf16 %v3317_v39, %v3320_v46  ;;  %v3695_v40 = vpack.i.bf16 %v3305_v45, %v3311_v14 }
  0x7c   : > { %v3711_v14 = vpack.i.bf16 %v3367_v33, %v3373_v29 }
  0x7d   : > { %2479 = vrot.lane.b32.xlu1 %v3601_v13, %s2954_s28  ;;  %v381_v11 = vmax.f32 %v349_v7, 0.0  ;;  %v382_v12 = vmax.f32 %v350_v38, 0.0  ;;  %v3699_v7 = vpack.i.bf16 %v3490_v55, %v3516_v1  ;;  %v3705_v38 = vpack.i.bf16 %v3376_v41, %v3379_v58 }
  0x7e   : > { %2474 = vrot.lane.b32.xlu0 %v2473_v9, %s2954_s28  ;;  %v4843_v9 = vld [vmem:[#allocation36_spill] sm:$0xff] }
  0x7f   : > { %v3677_v32 = vpack.i.bf16 %v4844_v51, %v4843_v9  ;;  %v461_v44 = vrot.slane %v381_v11, 7  ;;  %v462_v51 = vrot.slane %v382_v12, 7  ;;  %4848 = vst [vmem:[#allocation45_spill] sm:$0xff] %v3699_v7 }
  0x81   : > { %2489 = vrot.lane.b32.xlu1 %v3620_v61, %s2954_s28  ;;  %v463_v12 = vsel %vm415_vm0, %v461_v44, %v462_v51  ;;  %v526_v11 = vsel %vm415_vm0, 0.0, %v461_v44  ;;  %v542_v45 = vsel %vm415_vm0, %v462_v51, 0.0  ;;  %v4852_v51 = vld [vmem:[#allocation18_spill] sm:$0xff] }
  0x82   : > { %2484 = vrot.lane.b32.xlu0 %v3627_v31, %s2954_s28  ;;  %v732_v55 = vrot.slane %v526_v11, 1  ;;  %v733_v1 = vrot.slane %v463_v12, 1  ;;  %v3718_v9 = vpack.i.bf16 %v463_v12, %v526_v11  ;;  %v735_v62 = vrot.slane %v542_v45, 1 }
  0x83   : > { %v737_v19 = vrot.slane %v526_v11, 2  ;;  %v738_v57 = vrot.slane %v463_v12, 2  ;;  %v740_v3 = vrot.slane %v542_v45, 2  ;;  %v4860_v12 = vld [vmem:[#allocation52_spill] sm:$0xff] }
  0x84   : > { %4849 = vst [vmem:[#allocation43_spill] sm:$0xff] %v3718_v9  ;;  %v736_v44 = vsel %vm574_vm1, %v733_v1, %v735_v62  ;;  %v4855_v62 = vld [vmem:[#allocation13_spill] sm:$0xff] }
  0x85   : > { %2499 = vrot.lane.b32.xlu1 %v3649_v26, %s2954_s28 }
  0x86   : > { %2494 = vrot.lane.b32.xlu0 %v3655_v35, %s2954_s28 }
  0x89   : > { %2509 = vrot.lane.b32.xlu1 %v3663_v8, %s2954_s28  ;;  %v4853_v8 = vld [vmem:[#allocation38_spill] sm:$0xff] }
  0x8a   : > { %2504 = vrot.lane.b32.xlu0 %v3669_v27, %s2954_s28  ;;  %v2558_v6 = vpack.i.bf16 %v4853_v8, %v4852_v51 }
  0x8d   : > { %2519 = vrot.lane.b32.xlu1 %v3677_v32, %s2954_s28 }
  0x8e   : > { %2514 = vrot.lane.b32.xlu0 %v3683_v49, %s2954_s28  ;;  %v734_v49 = vsel %vm574_vm1, %v732_v55, %v733_v1  ;;  %v4854_v55 = vld [vmem:[#allocation14_spill] sm:$0xff] }
  0x8f   : > { %v3732_v53 = vpack.i.bf16 %v736_v44, %v734_v49  ;;  %v4856_v1 = vpack.i.bf16 %v4854_v55, %v4855_v62  ;;  %v739_v49 = vsel %vm652_vm2, %v737_v19, %v738_v57  ;;  %v741_v44 = vsel %vm652_vm2, %v738_v57, %v740_v3  ;;  %v2938_v19 = vld [vmem:[%s4684_s3] sm:$0xff]   ;;  %v2939_v3 = vld [vmem:[%s4684_s3 + $0x8] sm:$0xff]  }
  0x90   : > { %v3745_v8 = vpack.i.bf16 %v741_v44, %v739_v49  ;;  %v4864_v57 = vpack.i.bf16 %v3393_v24, %v3436_v56  ;;  %2252 = vmatprep.subr.bf16.mxu0 %v2938_v19  ;;  %2294 = vmatprep.subr.bf16.mxu1 %v2938_v19  ;;  %v2940_v56 = vld [vmem:[%s4684_s3 + $0x10] sm:$0xff]   ;;  %v2941_v49 = vld [vmem:[%s4684_s3 + $0x18] sm:$0xff]  }
  0x91   : > { %2529 = vrot.lane.b32.xlu1 %v3689_v22, %s2954_s28  ;;  %2253 = vmatpush3.bf16.msra.mxu0 %v2938_v19 }
  0x92   : > { %2524 = vrot.lane.b32.xlu0 %v3695_v40, %s2954_s28  ;;  %4859 = vst [vmem:[#allocation44_spill] sm:$0xff] %v3745_v8  ;;  %2299 = vmatpush3.bf16.msra.mxu1 %v2938_v19 }
  0x93   : > { %2254 = vmatprep.subr.bf16.mxu0 %v2939_v3  ;;  %2295 = vmatprep.subr.bf16.mxu1 %v2939_v3 }
  0x95   : > { %2539 = vrot.lane.b32.xlu1 %v3705_v38, %s2954_s28  ;;  %2255 = vmatpush3.bf16.msra.mxu0 %v2939_v3 }
  0x96   : > { %2534 = vrot.lane.b32.xlu0 %v3711_v14, %s2954_s28  ;;  %v3754_v11 = vpop.permute.xlu1 %2334  ;;  %2300 = vmatpush3.bf16.msra.mxu1 %v2939_v3  ;;  %v4869_v3 = vld [vmem:[#allocation16_spill] sm:$0xff] }
  0x97   : > { %4863 = vst [vmem:[#allocation21_spill] sm:$0xff] %v3754_v11  ;;  %v3756_v55 = vpop.permute.xlu0 %2324  ;;  %2256 = vmatprep.subr.bf16.mxu0 %v2940_v56  ;;  %2296 = vmatprep.subr.bf16.mxu1 %v2940_v56 }
  0x99   : > { %2549 = vrot.lane.b32.xlu1 %v3718_v9, %s2954_s28  ;;  %v4857_v9 = vld [vmem:[#allocation37_spill] sm:$0xff]  ;;  %2257 = vmatpush3.bf16.msra.mxu0 %v2940_v56 }
  0x9a   : > { %2544 = vrot.lane.b32.xlu0 %v3724_v52, %s2954_s28  ;;  %v2563_v7 = vpack.i.bf16 %v4858_v60, %v4857_v9  ;;  %2301 = vmatpush3.bf16.msra.mxu1 %v2940_v56  ;;  %s4552_s28 = scalar_lea.vmem %s4686_s5, %s3001_s22 }
  0x9b   : > { %v3774_v62 = vpop.permute.xlu0 %2329  ;;  %2258 = vmatprep.subr.bf16.mxu0 %v2941_v49  ;;  %2297 = vmatprep.subr.bf16.mxu1 %v2941_v49 }
  0x9d   : > { %2559 = vrot.lane.b32.xlu1 %v2558_v6, %s2955_s29  ;;  %v4861_v6 = vld [vmem:[#allocation50_spill] sm:$0xff]  ;;  %2259 = vmatpush3.bf16.msra.mxu0 %v2941_v49 }
  0x9e   : > { %2554 = vrot.lane.b32.xlu0 %v4856_v1, %s2955_s29  ;;  %v3751_v45 = vpack.i.bf16 %v4861_v6, %v4860_v12  ;;  %2302 = vmatpush3.bf16.msra.mxu1 %v2941_v49 }
  0xa0   : > { %4862 = vst [vmem:[#allocation20_spill] sm:$0xff] %v3751_v45 }
  0xa1   : > { %2569 = vrot.lane.b32.xlu1 %v3570_v59, %s2955_s29 }
  0xa2   : > { %2564 = vrot.lane.b32.xlu0 %v2563_v7, %s2955_s29  ;;  %v3772_v7 = vpop.permute.xlu1 %2339 }
  0xa3   : > { %4865 = vst [vmem:[#allocation2_spill] sm:$0xff] %v3772_v7 }
  0xa5   : > { %2579 = vrot.lane.b32.xlu1 %v3751_v45, %s2956_s7  ;;  %v3787_v1 = vpop.permute.xlu0 %2344 }
  0xa6   : > { %2574 = vrot.lane.b32.xlu0 %v4864_v57, %s2956_s7  ;;  %v3785_v24 = vpop.permute.xlu1 %2349 }
  0xa9   : > { %2589 = vrot.lane.b32.xlu1 %v3585_v37, %s2956_s7 }
  0xaa   : > { %2584 = vrot.lane.b32.xlu0 %v3577_v10, %s2956_s7 }
  0xac   : > { %v3803_v44 = vpop.permute.xlu1 %2359 }
  0xad   : > { %2599 = vrot.lane.b32.xlu1 %v3677_v32, %s2957_s12  ;;  %v2942_v32 = vld [vmem:[%s4684_s3 + $0x20] ss:$0 sps:$4 sm:$0xff]  }
  0xae   : > { %2594 = vrot.lane.b32.xlu0 %v3601_v13, %s2957_s12  ;;  %v2613_v13 = vpack.i.bf16 %v4858_v60, %v4852_v51  ;;  %v4866_v60 = vld [vmem:[#allocation12_spill] sm:$0xff]  ;;  %2304 = vmatprep.subr.msk.bf16.mxu0 %vm1865_vm3, %v2942_v32  ;;  %v1867_v12 = vsel %vm1865_vm3, %v2942_v32, 0 }
  0xaf   : > { %2305 = vmatprep.subr.msk.bf16.mxu1 %vm1865_vm3, %v2942_v32  ;;  %2261 = vmatpush3.bf16.msra.mxu0 %v1867_v12 }
  0xb0   : > { %2303 = vmatpush3.bf16.msra.mxu1 %v1867_v12 }
  0xb1   : > { %2609 = vrot.lane.b32.xlu1 %v3695_v40, %s2957_s12  ;;  %v3805_v40 = vpop.permute.xlu0 %2354 }
  0xb2   : > { %2604 = vrot.lane.b32.xlu0 %v3627_v31, %s2957_s12  ;;  %v4867_v31 = vld [vmem:[#allocation17_spill] sm:$0xff] }
  0xb3   : > { %v2623_v51 = vpack.i.bf16 %v4867_v31, %v4866_v60 }
  0xb5   : > { %2619 = vrot.lane.b32.xlu1 %v3570_v59, %s2958_s17 }
  0xb6   : > { %2614 = vrot.lane.b32.xlu0 %v2613_v13, %s2958_s17  ;;  %v3813_v59 = vpop.permute.xlu1 %2369  ;;  %v3815_v6 = vpop.permute.xlu0 %2364 }
  0xb9   : > { %2629 = vrot.lane.b32.xlu1 %v3583_v16, %s2958_s17 }
  0xba   : > { %2624 = vrot.lane.b32.xlu0 %v2623_v51, %s2958_s17 }
  0xbd   : > { %2639 = vrot.lane.b32.xlu1 %v3585_v37, %s2959_s19  ;;  %v3823_v19 = vpop.permute.xlu1 %2379  ;;  %v3825_v57 = vpop.permute.xlu0 %2374  ;;  %v4870_v37 = vld [vmem:[#allocation19_spill] sm:$0xff] }
  0xbe   : > { %2634 = vrot.lane.b32.xlu0 %v3577_v10, %s2959_s19  ;;  %4868 = vst [vmem:[#allocation25_spill] sm:$0xff] %v3825_v57  ;;  %v2663_v56 = vpack.i.bf16 %v4870_v37, %v4869_v3 }
  0xc1   : > { %2649 = vrot.lane.b32.xlu1 %v3588_v2, %s2959_s19 }
  0xc2   : > { %2644 = vrot.lane.b32.xlu0 %v3592_v48, %s2959_s19 }
  0xc5   : > { %2659 = vrot.lane.b32.xlu1 %v3583_v16, %s2955_s29 }
  0xc6   : > { %2654 = vrot.lane.b32.xlu0 %v2623_v51, %s2955_s29 }
  0xc7   : > { %v3834_v49 = vpop.permute.xlu1 %2389  ;;  %v3836_v10 = vpop.permute.xlu0 %2384 }
  0xc9   : > { %2669 = vrot.lane.b32.xlu1 %v3596_v28, %s2955_s29 }
  0xca   : > { %2664 = vrot.lane.b32.xlu0 %v2663_v56, %s2955_s29 }
  0xcb   : > { %v803_v13 = vpop.permute.xlu1 %802 }
  0xcc   : > { %v2395_v32 = vpop.permute.xlu0 %2394 }
  0xcd   : > { %2679 = vrot.lane.b32.xlu1 %v3588_v2, %s2956_s7 }
  0xce   : > { %2674 = vrot.lane.b32.xlu0 %v3592_v48, %s2956_s7 }
  0xcf   : > { %v3845_v16 = vpop.permute.xlu1 %2404 }
  0xd0   : > { %v3847_v60 = vpop.permute.xlu0 %2399 }
  0xd1   : > { %2689 = vrot.lane.b32.xlu1 %v3606_v15, %s2956_s7 }
  0xd2   : > { %2684 = vrot.lane.b32.xlu0 %v3610_v17, %s2956_s7 }
  0xd3   : > { %v3853_v31 = vpop.permute.xlu1 %2414 }
  0xd4   : > { %4871 = vst [vmem:[#allocation3_spill] sm:$0xff] %v3853_v31  ;;  %v3855_v51 = vpop.permute.xlu0 %2409 }
  0xd5   : > { %4872 = vst [vmem:[#allocation46_spill] sm:$0xff] %v3855_v51  ;;  %2699 = vrot.lane.b32.xlu1 %v3689_v22, %s2957_s12  ;;  %v4874_v22 = vld [vmem:[#allocation22_spill] sm:$0xff] }
  0xd6   : > { %2694 = vrot.lane.b32.xlu0 %v3620_v61, %s2957_s12  ;;  %v4873_v61 = vld [vmem:[#allocation24_spill] sm:$0xff] }
  0xd7   : > { %v3861_v2 = vpop.permute.xlu1 %2424  ;;  %v2723_v37 = vpack.i.bf16 %v4874_v22, %v4873_v61  ;;  %v2397_v61 = vunpack.i.h.bf16 %v2395_v32  ;;  %v2396_v22 = vunpack.i.l.bf16 %v2395_v32 }
  0xd8   : > { %v3863_v48 = vpop.permute.xlu0 %2419 }
  0xd9   : > { %2709 = vrot.lane.b32.xlu1 %v3711_v14, %s2957_s12  ;;  %v1525_v32 = vsel %vm1495_vm4, %v4850_v34, %v2397_v61  ;;  %v2342_v34 = vunpack.i.h.bf16 %v3772_v7  ;;  %v2346_v61 = vunpack.i.l.bf16 %v3787_v1  ;;  %v2357_v7 = vunpack.i.h.bf16 %v3805_v40 }
  0xda   : > { %2704 = vrot.lane.b32.xlu0 %v3655_v35, %s2957_s12 }
  0xdb   : > { %v3869_v12 = vpop.permute.xlu1 %2434 }
  0xdc   : > { %v3871_v3 = vpop.permute.xlu0 %2429 }
  0xdd   : > { %2719 = vrot.lane.b32.xlu1 %v3596_v28, %s2958_s17 }
  0xde   : > { %2714 = vrot.lane.b32.xlu0 %v2663_v56, %s2958_s17 }
  0xdf   : > { %v3878_v51 = vpop.permute.xlu1 %2444 }
  0xe0   : > { %4875 = vst [vmem:[#allocation47_spill] sm:$0xff] %v3878_v51  ;;  %v3880_v57 = vpop.permute.xlu0 %2439 }
  0xe1   : > { %4876 = vst [vmem:[#allocation18_spill] sm:$0xff] %v3880_v57  ;;  %2729 = vrot.lane.b32.xlu1 %v3614_v43, %s2958_s17  ;;  %v1524_v57 = vsel %vm1495_vm4, %v3376_v41, %v2396_v22  ;;  %v2351_v41 = vunpack.i.l.bf16 %v3785_v24  ;;  %v2422_v22 = vunpack.i.h.bf16 %v3863_v48 }
  0xe2   : > { %2724 = vrot.lane.b32.xlu0 %v2723_v37, %s2958_s17 }
  0xe3   : > { %v3885_v14 = vpop.permute.xlu1 %2454 }
  0xe4   : > { %v3887_v35 = vpop.permute.xlu0 %2449 }
  0xe5   : > { %4877 = vst [vmem:[#allocation14_spill] sm:$0xff] %v3887_v35  ;;  %2739 = vrot.lane.b32.xlu1 %v3606_v15, %s2959_s19  ;;  %v1526_v35 = vsel %vm1495_vm4, %v4851_v42, %v803_v13  ;;  %v4878_v42 = vld [vmem:[#allocation23_spill] sm:$0xff]  ;;  %v4879_v13 = vld [vmem:[#allocation28_spill] sm:$0xff] }
  0xe6   : > { %2734 = vrot.lane.b32.xlu0 %v3610_v17, %s2959_s19  ;;  %v3915_v51 = vpack.i.bf16 %v4879_v13, %v4878_v42  ;;  %v1503_v42 = vsel %vm1495_vm4, %v3084_v5, %v2342_v34  ;;  %v2352_v13 = vunpack.i.h.bf16 %v3785_v24  ;;  %v2361_v5 = vunpack.i.l.bf16 %v3803_v44 }
  0xe7   : > { %v3893_v28 = vpop.permute.xlu1 %2464 }
  0xe8   : > { %v3895_v56 = vpop.permute.xlu0 %2459 }
  0xe9   : > { %2749 = vrot.lane.b32.xlu1 %v3622_v54, %s2959_s19 }
  0xea   : > { %2744 = vrot.lane.b32.xlu0 %v3631_v30, %s2959_s19 }
  0xeb   : > { %v896_v15 = vpop.permute.xlu1 %895 }
  0xec   : > { %v3904_v17 = vsel %vm1527_vm5, %v1526_v35, %v896_v15  ;;  %v2470_v11 = vpop.permute.xlu0 %2469 }
  0xed   : > { %v2472_v45 = vunpack.i.h.bf16 %v2470_v11  ;;  %v2471_v8 = vunpack.i.l.bf16 %v2470_v11  ;;  %2759 = vrot.lane.b32.xlu1 %v3614_v43, %s2955_s29 }
  0xee   : > { %2754 = vrot.lane.b32.xlu0 %v2723_v37, %s2955_s29  ;;  %v2347_v37 = vunpack.i.h.bf16 %v3787_v1  ;;  %v1506_v1 = vsel %vm1495_vm4, %v4838_v0, %v2351_v41  ;;  %v2356_v0 = vunpack.i.l.bf16 %v3805_v40 }
  0xef   : > { %v3918_v35 = vsel %vm1527_vm5, %v1524_v57, %v2471_v8  ;;  %v3921_v11 = vsel %vm1527_vm5, %v1525_v32, %v2472_v45  ;;  %v3923_v15 = vpop.permute.xlu1 %2479  ;;  %v2417_v8 = vunpack.i.h.bf16 %v3853_v31  ;;  %v2426_v57 = vunpack.i.l.bf16 %v3861_v2 }
  0xf0   : > { %4880 = vst [vmem:[#allocation13_spill] sm:$0xff] %v3923_v15  ;;  %v3925_v43 = vpop.permute.xlu0 %2474  ;;  %v1504_v31 = vsel %vm1495_vm4, %v3081_v4, %v2346_v61 }
  0xf1   : > { %4881 = vst [vmem:[#allocation37_spill] sm:$0xff] %v3925_v43  ;;  %2769 = vrot.lane.b32.xlu1 %v3637_v23, %s2955_s29  ;;  %v1535_v24 = vsel %vm1527_vm5, %v1503_v42, %v2417_v8 }
  0xf2   : > { %2764 = vrot.lane.b32.xlu0 %v3915_v51, %s2955_s29 }
  0xf3   : > { %v3936_v45 = vpop.permute.xlu1 %2489 }
  0xf4   : > { %4882 = vst [vmem:[#allocation11_spill] sm:$0xff] %v3936_v45  ;;  %v3940_v32 = vpop.permute.xlu0 %2484  ;;  %v1505_v45 = vsel %vm1495_vm4, %v4837_v36, %v2347_v37  ;;  %v1538_v36 = vsel %vm1527_vm5, %v1506_v1, %v2426_v57  ;;  %v1507_v57 = vsel %vm1495_vm4, %v3164_v21, %v2352_v13  ;;  %v1508_v1 = vsel %vm1495_vm4, %v3161_v20, %v2356_v0 }
  0xf5   : > { %4883 = vst [vmem:[#allocation52_spill] sm:$0xff] %v3940_v32  ;;  %2779 = vrot.lane.b32.xlu1 %v3622_v54, %s2956_s7  ;;  %v2421_v32 = vunpack.i.l.bf16 %v3863_v48  ;;  %v2427_v54 = vunpack.i.h.bf16 %v3861_v2  ;;  %v1537_v4 = vsel %vm1527_vm5, %v1505_v45, %v2422_v22  ;;  %v2436_v48 = vunpack.i.l.bf16 %v3869_v12 }
  0xf6   : > { %2774 = vrot.lane.b32.xlu0 %v3631_v30, %s2956_s7  ;;  %v2432_v30 = vunpack.i.h.bf16 %v3871_v3  ;;  %v2431_v2 = vunpack.i.l.bf16 %v3871_v3  ;;  %v1509_v22 = vsel %vm1495_vm4, %v3191_v47, %v2357_v7 }
  0xf7   : > { %v2500_v34 = vpop.permute.xlu1 %2499  ;;  %v1536_v40 = vsel %vm1527_vm5, %v1504_v31, %v2421_v32  ;;  %v1510_v32 = vsel %vm1495_vm4, %v4841_v25, %v2361_v5 }
  0xf8   : > { %v2502_v41 = vunpack.i.h.bf16 %v2500_v34  ;;  %v2501_v37 = vunpack.i.l.bf16 %v2500_v34  ;;  %v2495_v61 = vpop.permute.xlu0 %2494  ;;  %v1542_v21 = vsel %vm1527_vm5, %v1510_v32, %v2436_v48  ;;  %v1541_v47 = vsel %vm1527_vm5, %v1509_v22, %v2432_v30 }
  0xf9   : > { %v2497_v43 = vunpack.i.h.bf16 %v2495_v61  ;;  %v2496_v15 = vunpack.i.l.bf16 %v2495_v61  ;;  %2789 = vrot.lane.b32.xlu1 %v3639_v18, %s2956_s7  ;;  %v1540_v13 = vsel %vm1527_vm5, %v1508_v1, %v2431_v2  ;;  %v2386_v61 = vunpack.i.l.bf16 %v3836_v10  ;;  %v4886_v2 = vld [vmem:[#allocation30_spill] sm:$0xff] }
  0xfa   : > { %v3970_v8 = vsel %vm1559_vm6, %v1537_v4, %v2501_v37  ;;  %v3973_v45 = vsel %vm1559_vm6, %v1538_v36, %v2502_v41  ;;  %2784 = vrot.lane.b32.xlu0 %v3643_v50, %s2956_s7  ;;  %v2387_v41 = vunpack.i.h.bf16 %v3836_v10  ;;  %v2457_v48 = vunpack.i.h.bf16 %v3885_v14 }
  0xfb   : > { %v3982_v42 = vsel %vm1559_vm6, %v1535_v24, %v2496_v15  ;;  %v3985_v31 = vsel %vm1559_vm6, %v1536_v40, %v2497_v43  ;;  %v2510_v3 = vpop.permute.xlu1 %2509  ;;  %v1539_v43 = vsel %vm1527_vm5, %v1507_v57, %v2427_v54  ;;  %v2382_v54 = vunpack.i.h.bf16 %v3823_v19  ;;  %v4887_v57 = vld [vmem:[#allocation29_spill] sm:$0xff] }
  0xfc   : > { %v2512_v34 = vunpack.i.h.bf16 %v2510_v3  ;;  %v2511_v36 = vunpack.i.l.bf16 %v2510_v3  ;;  %v2505_v4 = vpop.permute.xlu0 %2504  ;;  %v2466_v40 = vunpack.i.l.bf16 %v3893_v28  ;;  %v2823_v22 = vpack.i.bf16 %v4887_v57, %v4886_v2 }
  0xfd   : > { %v2507_v7 = vunpack.i.h.bf16 %v2505_v4  ;;  %v2506_v15 = vunpack.i.l.bf16 %v2505_v4  ;;  %2799 = vrot.lane.b32.xlu1 %v3705_v38, %s2957_s12  ;;  %v1519_v10 = vsel %vm1495_vm4, %v3320_v46, %v2382_v54  ;;  %v2392_v3 = vunpack.i.h.bf16 %v3834_v49 }
  0xfe   : > { %v3998_v25 = vsel %vm1559_vm6, %v1541_v47, %v2511_v36  ;;  %v4001_v20 = vsel %vm1559_vm6, %v1542_v21, %v2512_v34  ;;  %2794 = vrot.lane.b32.xlu0 %v3649_v26, %s2957_s12  ;;  %v2391_v26 = vunpack.i.l.bf16 %v3834_v49  ;;  %v1521_v1 = vsel %vm1495_vm4, %v3373_v29, %v2387_v41 }
  0xff   : > { %4884 = vst [vmem:[#allocation50_spill] sm:$0xff] %v3998_v25  ;;  %4885 = vst [vmem:[#allocation12_spill] sm:$0xff] %v4001_v20  ;;  %v4006_v5 = vsel %vm1559_vm6, %v1539_v43, %v2506_v15  ;;  %v4009_v0 = vsel %vm1559_vm6, %v1540_v13, %v2507_v7  ;;  %v4011_v38 = vpop.permute.xlu1 %2519  ;;  %v2467_v29 = vunpack.i.h.bf16 %v3893_v28 }
 0x100   : > { %v4013_v24 = vpop.permute.xlu0 %2514  ;;  %v1522_v32 = vsel %vm1495_vm4, %v3367_v33, %v2391_v26  ;;  %v4888_v33 = vld [vmem:[#allocation48_spill] sm:$0xff] }
 0x101   : > { %2809 = vrot.lane.b32.xlu1 %v3724_v52, %s2957_s12  ;;  %v2462_v52 = vunpack.i.h.bf16 %v3895_v56  ;;  %v1554_v21 = vsel %vm1527_vm5, %v1522_v32, %v2466_v40 }
 0x102   : > { %2804 = vrot.lane.b32.xlu0 %v3669_v27, %s2957_s12  ;;  %v2461_v27 = vunpack.i.l.bf16 %v3895_v56  ;;  %v1520_v56 = vsel %vm1495_vm4, %v3317_v39, %v2386_v61  ;;  %v1523_v61 = vsel %vm1495_vm4, %v3379_v58, %v2392_v3  ;;  %v2331_v3 = vunpack.i.l.bf16 %v3774_v62 }
 0x103   : > { %v4022_v37 = vpop.permute.xlu1 %2529  ;;  %v1553_v46 = vsel %vm1527_vm5, %v1521_v1, %v2462_v52  ;;  %v1555_v52 = vsel %vm1527_vm5, %v1523_v61, %v2467_v29  ;;  %v2362_v1 = vunpack.i.h.bf16 %v3803_v44  ;;  %v2371_v44 = vunpack.i.l.bf16 %v3813_v59 }
 0x104   : > { %v4026_v30 = vpop.permute.xlu0 %2524  ;;  %v1552_v7 = vsel %vm1527_vm5, %v1520_v56, %v2461_v27  ;;  %v4893_v56 = vld [vmem:[#allocation32_spill] sm:$0xff]  ;;  %v2367_v29 = vunpack.i.h.bf16 %v3815_v6  ;;  %v2402_v61 = vunpack.i.h.bf16 %v3847_v60 }
 0x105   : > { %2819 = vrot.lane.b32.xlu1 %v3637_v23, %s2958_s17 }
 0x106   : > { %2814 = vrot.lane.b32.xlu0 %v3915_v51, %s2958_s17  ;;  %v1551_v51 = vsel %vm1527_vm5, %v1519_v10, %v2457_v48 }
 0x107   : > { %v2540_v23 = vpop.permute.xlu1 %2539 }
 0x108   : > { %v2542_v34 = vunpack.i.h.bf16 %v2540_v23  ;;  %v2541_v36 = vunpack.i.l.bf16 %v2540_v23  ;;  %v2535_v4 = vpop.permute.xlu0 %2534  ;;  %v4892_v23 = vld [vmem:[#allocation31_spill] sm:$0xff] }
 0x109   : > { %v2537_v49 = vunpack.i.h.bf16 %v2535_v4  ;;  %v2536_v47 = vunpack.i.l.bf16 %v2535_v4  ;;  %2829 = vrot.lane.b32.xlu1 %v4888_v33, %s2958_s17  ;;  %v4895_v4 = vld [vmem:[#allocation9_spill] sm:$0xff] }
 0x10a   : > { %v4054_v39 = vsel %vm1559_vm6, %v1553_v46, %v2541_v36  ;;  %v4057_v15 = vsel %vm1559_vm6, %v1554_v21, %v2542_v34  ;;  %2824 = vrot.lane.b32.xlu0 %v2823_v22, %s2958_s17  ;;  %v4894_v34 = vld [vmem:[#allocation10_spill] sm:$0xff]  ;;  %v1498_v21 = vsel %vm1495_vm4, %v4895_v4, %v2331_v3 }
 0x10b   : > { %v4061_v43 = vsel %vm1559_vm6, %v1551_v51, %v2536_v47  ;;  %v4064_v13 = vsel %vm1559_vm6, %v1552_v7, %v2537_v49  ;;  %v2550_v54 = vpop.permute.xlu1 %2549  ;;  %v4109_v51 = vpack.i.bf16 %v4893_v56, %v4892_v23  ;;  %v4896_v49 = vld [vmem:[#allocation49_spill] sm:$0xff]  ;;  %v4897_v47 = vld [vmem:[#allocation51_spill] sm:$0xff]  ;;  %v2366_v7 = vunpack.i.l.bf16 %v3815_v6 }
 0x10c   : > { %v2552_v26 = vunpack.i.h.bf16 %v2550_v54  ;;  %v2551_v41 = vunpack.i.l.bf16 %v2550_v54  ;;  %v2545_v28 = vpop.permute.xlu0 %2544  ;;  %v2406_v54 = vunpack.i.l.bf16 %v3845_v16  ;;  %v4902_v56 = vld [vmem:[#allocation13_spill] sm:$0xff]  ;;  %v4905_v6 = vld [vmem:[#allocation27_spill] sm:$0xff] }
 0x10d   : > { %v2547_v48 = vunpack.i.h.bf16 %v2545_v28  ;;  %v2546_v40 = vunpack.i.l.bf16 %v2545_v28  ;;  %2839 = vrot.lane.b32.xlu1 %v3639_v18, %s2959_s19  ;;  %v2482_v4 = vunpack.i.h.bf16 %v4902_v56  ;;  %v1512_v25 = vsel %vm1495_vm4, %v4905_v6, %v2366_v7 }
 0x10e   : > { %v4073_v27 = vsel %vm1559_vm6, %v3904_v17, %v2552_v26  ;;  %v4077_v2 = vsel %vm1559_vm6, %v3921_v11, %v2551_v41  ;;  %2834 = vrot.lane.b32.xlu0 %v3643_v50, %s2959_s19  ;;  %v4891_v17 = vld [vmem:[#allocation45_spill] sm:$0xff]  ;;  %v2327_v11 = vunpack.i.h.bf16 %v3756_v55  ;;  %v2326_v50 = vunpack.i.l.bf16 %v3756_v55  ;;  %v4898_v41 = vld [vmem:[#allocation26_spill] sm:$0xff] }
 0x10f   : > { %4889 = vst [vmem:[#allocation17_spill] sm:$0xff] %v4073_v27  ;;  %4890 = vst [vmem:[#allocation16_spill] sm:$0xff] %v4077_v2  ;;  %v4082_v58 = vsel %vm1559_vm6, %v1555_v52, %v2546_v40  ;;  %v4086_v57 = vsel %vm1559_vm6, %v3918_v35, %v2547_v48  ;;  %v4088_v18 = vpop.permute.xlu1 %2559  ;;  %v2401_v26 = vunpack.i.l.bf16 %v3847_v60  ;;  %v1511_v28 = vsel %vm1495_vm4, %v4898_v41, %v2362_v1  ;;  %v4899_v40 = vld [vmem:[#allocation38_spill] sm:$0xff]  ;;  %v4900_v52 = vld [vmem:[#allocation47_spill] sm:$0xff] }
 0x110   : > { %v4090_v10 = vpop.permute.xlu0 %2554  ;;  %v1497_v55 = vsel %vm1495_vm4, %v4894_v34, %v2327_v11  ;;  %v1496_v36 = vsel %vm1495_vm4, 0.0, %v2326_v50  ;;  %v2437_v48 = vunpack.i.h.bf16 %v3869_v12  ;;  %v2446_v11 = vunpack.i.l.bf16 %v4900_v52  ;;  %v4901_v50 = vld [vmem:[#allocation18_spill] sm:$0xff]  ;;  %v4903_v60 = vld [vmem:[#allocation33_spill] sm:$0xff] }
 0x111   : > { %2849 = vrot.lane.b32.xlu1 %v3558_v63, %s2959_s19  ;;  %v2442_v3 = vunpack.i.h.bf16 %v4901_v50  ;;  %v2441_v23 = vunpack.i.l.bf16 %v4901_v50  ;;  %v2481_v34 = vunpack.i.l.bf16 %v4902_v56  ;;  %v1514_v12 = vsel %vm1495_vm4, %v4903_v60, %v2371_v44  ;;  %v4906_v60 = vld [vmem:[#allocation37_spill] sm:$0xff] }
 0x112   : > { %2844 = vrot.lane.b32.xlu0 %v4891_v17, %s2959_s19  ;;  %v1530_v50 = vsel %vm1527_vm5, %v1498_v21, %v2406_v54  ;;  %v1528_v27 = vsel %vm1527_vm5, %v1496_v36, %v2401_v26  ;;  %v1529_v44 = vsel %vm1527_vm5, %v1497_v55, %v2402_v61  ;;  %v1543_v56 = vsel %vm1527_vm5, %v1511_v28, %v2437_v48 }
 0x113   : > { %v4099_v32 = vpop.permute.xlu1 %2569  ;;  %v2477_v20 = vunpack.i.h.bf16 %v4906_v60  ;;  %v2476_v2 = vunpack.i.l.bf16 %v4906_v60  ;;  %v1544_v21 = vsel %vm1527_vm5, %v1512_v25, %v2441_v23  ;;  %v1562_v7 = vsel %vm1559_vm6, %v1529_v44, %v2481_v34  ;;  %v4908_v60 = vld [vmem:[#allocation43_spill] sm:$0xff] }
 0x114   : > { %v4101_v35 = vpop.permute.xlu0 %2564  ;;  %v1563_v55 = vsel %vm1559_vm6, %v1530_v50, %v2482_v4  ;;  %v2522_v54 = vunpack.i.h.bf16 %v4011_v38  ;;  %v2521_v26 = vunpack.i.l.bf16 %v4011_v38  ;;  %v2516_v28 = vunpack.i.l.bf16 %v4013_v24 }
 0x115   : > { %2859 = vrot.lane.b32.xlu1 %v4888_v33, %s2955_s29  ;;  %v4120_v33 = vpack.i.bf16 %v4897_v47, %v4896_v49  ;;  %v4904_v47 = vld [vmem:[#allocation34_spill] sm:$0xff]  ;;  %v2562_v25 = vunpack.i.h.bf16 %v4088_v18  ;;  %v2561_v48 = vunpack.i.l.bf16 %v4088_v18  ;;  %v2556_v6 = vunpack.i.l.bf16 %v4090_v10 }
 0x116   : > { %2854 = vrot.lane.b32.xlu0 %v2823_v22, %s2955_s29  ;;  %v1513_v41 = vsel %vm1495_vm4, %v4904_v47, %v2367_v29  ;;  %v1546_v29 = vsel %vm1527_vm5, %v1514_v12, %v2446_v11  ;;  %v4907_v11 = vld [vmem:[#allocation44_spill] sm:$0xff]  ;;  %v1561_v23 = vsel %vm1559_vm6, %v1528_v27, %v2477_v20  ;;  %v2557_v38 = vunpack.i.h.bf16 %v4090_v10 }
 0x117   : > { %v4116_v46 = vpop.permute.xlu1 %2579  ;;  %v1545_v36 = vsel %vm1527_vm5, %v1513_v41, %v2442_v3  ;;  %v1560_v3 = vsel %vm1559_vm6, %v1528_v27, %v2476_v2  ;;  %v2571_v34 = vunpack.i.l.bf16 %v4099_v32  ;;  %v2567_v18 = vunpack.i.h.bf16 %v4101_v35 }
 0x118   : > { %v4123_v22 = vpop.permute.xlu0 %2574  ;;  %v2566_v12 = vunpack.i.l.bf16 %v4101_v35  ;;  %v2581_v4 = vunpack.i.l.bf16 %v4116_v46  ;;  %v1578_v2 = vsel %vm1559_vm6, %v1545_v36, %v2521_v26  ;;  %v1579_v20 = vsel %vm1559_vm6, %v1546_v29, %v2522_v54  ;;  %v4909_v54 = vld [vmem:[#allocation41_spill] sm:$0xff] }
 0x119   : > { %2869 = vrot.lane.b32.xlu1 %v3732_v53, %s2955_s29  ;;  %v1576_v27 = vsel %vm1559_vm6, %v1543_v56, %v2516_v28  ;;  %v2582_v10 = vunpack.i.h.bf16 %v4116_v46  ;;  %v1595_v50 = vsel %vm1592_vm7, %v1562_v7, %v2561_v48  ;;  %v1593_v44 = vsel %vm1592_vm7, %v1560_v3, %v2556_v6 }
 0x11a   : > { %2864 = vrot.lane.b32.xlu0 %v4109_v51, %s2955_s29  ;;  %v1609_v35 = vsel %vm1592_vm7, %v1576_v27, %v2562_v25  ;;  %v1594_v29 = vsel %vm1592_vm7, %v1561_v23, %v2557_v38  ;;  %v1611_v56 = vsel %vm1592_vm7, %v1578_v2, %v2571_v34  ;;  %v2577_v46 = vunpack.i.h.bf16 %v4123_v22  ;;  %v4911_v2 = vld [vmem:[#allocation42_spill] sm:$0xff] }
 0x11b   : > { %v4143_v1 = vpop.permute.xlu1 %2589  ;;  %v2576_v36 = vunpack.i.l.bf16 %v4123_v22  ;;  %v1596_v7 = vsel %vm1592_vm7, %v1563_v55, %v2567_v18  ;;  %v1642_v28 = vsel %vm1625_vm8, %v1609_v35, %v2581_v4 }
 0x11c   : > { %v4148_v49 = vpop.permute.xlu0 %2584  ;;  %v2592_v48 = vunpack.i.h.bf16 %v4143_v1  ;;  %v2591_v6 = vunpack.i.l.bf16 %v4143_v1 }
 0x11d   : > { %2879 = vrot.lane.b32.xlu1 %v3558_v63, %s2956_s7  ;;  %v2586_v22 = vunpack.i.l.bf16 %v4148_v49  ;;  %v2587_v23 = vunpack.i.h.bf16 %v4148_v49  ;;  %v1626_v18 = vsel %vm1625_vm8, %v1593_v44, %v2576_v36 }
 0x11e   : > { %2874 = vrot.lane.b32.xlu0 %v4891_v17, %s2956_s7  ;;  %v2517_v17 = vunpack.i.h.bf16 %v4013_v24  ;;  %v2572_v24 = vunpack.i.h.bf16 %v4099_v32 }
 0x11f   : > { %v4168_v63 = vpop.permute.xlu1 %2599  ;;  %v1628_v44 = vsel %vm1625_vm8, %v1595_v50, %v2586_v22 }
 0x120   : > { %v4174_v61 = vpop.permute.xlu0 %2594  ;;  %v1577_v32 = vsel %vm1559_vm6, %v1544_v21, %v2517_v17  ;;  %v1612_v21 = vsel %vm1592_vm7, %v1579_v20, %v2572_v24  ;;  %v2602_v38 = vunpack.i.h.bf16 %v4168_v63  ;;  %v2601_v55 = vunpack.i.l.bf16 %v4168_v63 }
 0x121   : > { %2889 = vrot.lane.b32.xlu1 %v4907_v11, %s2956_s7  ;;  %v1610_v26 = vsel %vm1592_vm7, %v1577_v32, %v2566_v12  ;;  %v2596_v34 = vunpack.i.l.bf16 %v4174_v61  ;;  %v4910_v24 = vmov 0.0   ;;  %v1627_v12 = vsel %vm1625_vm8, %v1594_v29, %v2577_v46 }
 0x122   : > { %2884 = vrot.lane.b32.xlu0 %v4120_v33, %s2956_s7  ;;  %v1643_v25 = vsel %vm1625_vm8, %v1610_v26, %v2582_v10  ;;  %v2597_v1 = vunpack.i.h.bf16 %v4174_v61  ;;  %v1644_v32 = vsel %vm1625_vm8, %v1611_v56, %v2591_v6  ;;  %v1645_v35 = vsel %vm1625_vm8, %v1612_v21, %v2592_v48 }
 0x123   : > { %v2610_v47 = vpop.permute.xlu1 %2609  ;;  %v1629_v61 = vsel %vm1625_vm8, %v1596_v7, %v2587_v23  ;;  %v1675_v46 = vsel %vm1658_vm9, %v1642_v28, %v2601_v55  ;;  %v1676_v36 = vsel %vm1658_vm9, %v1643_v25, %v2602_v38 }
 0x124   : > { %v4196_v41 = vpop.permute.xlu0 %2604  ;;  %v2611_v4 = vunpack.i.l.bf16 %v2610_v47  ;;  %v2612_v49 = vunpack.i.h.bf16 %v2610_v47  ;;  %v1659_v47 = vsel %vm1658_vm9, %v1626_v18, %v2596_v34 }
 0x125   : > { %2899 = vrot.lane.b32.xlu1 %v4908_v60, %s2957_s12  ;;  %v2606_v20 = vunpack.i.l.bf16 %v4196_v41  ;;  %v2607_v21 = vunpack.i.h.bf16 %v4196_v41 }
 0x126   : > { %2894 = vrot.lane.b32.xlu0 %v4909_v54, %s2957_s12  ;;  %v1660_v54 = vsel %vm1658_vm9, %v1627_v12, %v2597_v1  ;;  %v1677_v56 = vsel %vm1658_vm9, %v1644_v32, %v2611_v4  ;;  %v1678_v7 = vsel %vm1658_vm9, %v1645_v35, %v2612_v49 }
 0x127   : > { %v2620_v17 = vpop.permute.xlu1 %2619  ;;  %v1661_v26 = vsel %vm1658_vm9, %v1628_v44, %v2606_v20  ;;  %v1662_v4 = vsel %vm1658_vm9, %v1629_v61, %v2607_v21 }
 0x128   : > { %v2615_v3 = vpop.permute.xlu0 %2614  ;;  %v2622_v63 = vunpack.i.h.bf16 %v2620_v17  ;;  %v2621_v27 = vunpack.i.l.bf16 %v2620_v17 }
 0x129   : > { %1276 = vrot.lane.b32.xlu1 %v4910_v24, %s2957_s12  ;;  %v2616_v60 = vunpack.i.l.bf16 %v2615_v3  ;;  %v2617_v50 = vunpack.i.h.bf16 %v2615_v3  ;;  %v4913_v24 = vpack.i.bf16 %v4857_v9, %v4899_v40 }
 0x12a   : > { %2904 = vrot.lane.b32.xlu0 %v4911_v2, %s2957_s12  ;;  %v1708_v17 = vsel %vm1691_vm10, %v1675_v46, %v2621_v27  ;;  %v1709_v25 = vsel %vm1691_vm10, %v1676_v36, %v2622_v63 }
 0x12b   : > { %v2630_v10 = vpop.permute.xlu1 %2629  ;;  %v1692_v23 = vsel %vm1691_vm10, %v1659_v47, %v2616_v60  ;;  %v1693_v18 = vsel %vm1691_vm10, %v1660_v54, %v2617_v50 }
 0x12c   : > { %v2625_v29 = vpop.permute.xlu0 %2624  ;;  %v2632_v41 = vunpack.i.h.bf16 %v2630_v10 }
 0x12d   : > { %2914 = vrot.lane.b32.xlu1 %v3732_v53, %s2958_s17  ;;  %v2631_v53 = vunpack.i.l.bf16 %v2630_v10  ;;  %v2626_v3 = vunpack.i.l.bf16 %v2625_v29  ;;  %v2627_v34 = vunpack.i.h.bf16 %v2625_v29 }
 0x12e   : > { %2909 = vrot.lane.b32.xlu0 %v4109_v51, %s2958_s17  ;;  %v4912_v51 = vld [vmem:[#allocation4_spill] sm:$0xff]  ;;  %v1711_v35 = vsel %vm1691_vm10, %v1678_v7, %v2632_v41  ;;  %v4914_v7 = vld [vmem:[#allocation5_spill] sm:$0xff] }
 0x12f   : > { %v2640_v28 = vpop.permute.xlu1 %2639  ;;  %v1710_v27 = vsel %vm1691_vm10, %v1677_v56, %v2631_v53  ;;  %v1694_v44 = vsel %vm1691_vm10, %v1661_v26, %v2626_v3  ;;  %v1695_v61 = vsel %vm1691_vm10, %v1662_v4, %v2627_v34  ;;  %v4915_v26 = vld [vmem:[#allocation20_spill] sm:$0xff]  ;;  %v2381_v34 = vunpack.i.l.bf16 %v3823_v19  ;;  %v4921_v4 = vld [vmem:[#allocation3_spill] sm:$0xff] }
 0x130   : > { %v2642_v48 = vunpack.i.h.bf16 %v2640_v28  ;;  %v2641_v6 = vunpack.i.l.bf16 %v2640_v28  ;;  %v2635_v22 = vpop.permute.xlu0 %2634  ;;  %v4916_v28 = vld [vmem:[#allocation21_spill] sm:$0xff]  ;;  %v4918_v41 = vld [vmem:[#allocation8_spill] sm:$0xff] }
 0x131   : > { %v2637_v38 = vunpack.i.h.bf16 %v2635_v22  ;;  %v2636_v55 = vunpack.i.l.bf16 %v2635_v22  ;;  %1369 = vrot.lane.b32.xlu1 %v4912_v51, %s2958_s17  ;;  %v2332_v22 = vunpack.i.h.bf16 %v3774_v62  ;;  %v2372_v51 = vunpack.i.h.bf16 %v3813_v59 }
 0x132   : > { %2919 = vrot.lane.b32.xlu0 %v4913_v24, %s2958_s17  ;;  %v1741_v12 = vsel %vm1724_vm11, %v1708_v17, %v2641_v6  ;;  %v1742_v1 = vsel %vm1724_vm11, %v1709_v25, %v2642_v48  ;;  %v2337_v17 = vunpack.i.h.bf16 %v4916_v28  ;;  %v2336_v25 = vunpack.i.l.bf16 %v4916_v28  ;;  %v4917_v48 = vld [vmem:[#allocation2_spill] sm:$0xff] }
 0x133   : > { %v2650_v2 = vpop.permute.xlu1 %2649  ;;  %v1725_v49 = vsel %vm1724_vm11, %v1692_v23, %v2636_v55  ;;  %v1726_v20 = vsel %vm1724_vm11, %v1693_v18, %v2637_v38  ;;  %v1765_v63 = vpack.c.bf16 %v1742_v1, %v1741_v12  ;;  %v2341_v6 = vunpack.i.l.bf16 %v4917_v48  ;;  %v4919_v38 = vld [vmem:[#allocation6_spill] sm:$0xff]  ;;  %v4920_v18 = vld [vmem:[#allocation25_spill] sm:$0xff]  ;;  %v4931_v48 = vld [vmem:[#allocation52_spill] sm:$0xff] }
 0x134   : > { %v2652_v10 = vunpack.i.h.bf16 %v2650_v2  ;;  %v2651_v32 = vunpack.i.l.bf16 %v2650_v2  ;;  %v2645_v9 = vpop.permute.xlu0 %2644  ;;  %v1757_v40 = vpack.c.bf16 %v1726_v20, %v1725_v49  ;;  %v1501_v3 = vsel %vm1495_vm4, %v4918_v41, %v2337_v17  ;;  %v4922_v49 = vld [vmem:[#allocation7_spill] sm:$0xff] }
 0x135   : > { %v2647_v60 = vunpack.i.h.bf16 %v2645_v9  ;;  %v2646_v29 = vunpack.i.l.bf16 %v2645_v9  ;;  %2929 = vrot.lane.b32.xlu1 %v4907_v11, %s2959_s19  ;;  %2278 = vmatprep.mubr.msk.bf16.mxu1 %vm1816_vm12, %v1765_v63  ;;  %v1500_v55 = vsel %vm1495_vm4, %v4919_v38, %v2336_v25  ;;  %v2377_v12 = vunpack.i.h.bf16 %v4920_v18  ;;  %v4923_v63 = vld [vmem:[#allocation15_spill] sm:$0xff] }
 0x136   : > { %v1743_v46 = vsel %vm1724_vm11, %v1710_v27, %v2651_v32  ;;  %v1744_v36 = vsel %vm1724_vm11, %v1711_v35, %v2652_v10  ;;  %2924 = vrot.lane.b32.xlu0 %v4120_v33, %s2959_s19  ;;  %2262 = vmatprep.mubr.msk.bf16.mxu0 %vm1816_vm12, %v1757_v40  ;;  %v2376_v1 = vunpack.i.l.bf16 %v4920_v18  ;;  %v2407_v62 = vunpack.i.h.bf16 %v3845_v16  ;;  %v4924_v10 = vld [vmem:[#allocation46_spill] sm:$0xff] }
 0x137   : > { %v1766_v47 = vpack.c.bf16 %v1744_v36, %v1743_v46  ;;  %v1727_v54 = vsel %vm1724_vm11, %v1694_v44, %v2646_v29  ;;  %v1728_v56 = vsel %vm1724_vm11, %v1695_v61, %v2647_v60  ;;  %v4275_v21 = vpop.permute.xlu1 %2659  ;;  %v2416_v2 = vunpack.i.l.bf16 %v4921_v4  ;;  %v4925_v40 = vld [vmem:[#allocation14_spill] sm:$0xff]  ;;  %v4926_v60 = vld [vmem:[#allocation36_spill] sm:$0xff]  ;;  %v4927_v61 = vld [vmem:[#allocation39_spill] sm:$0xff] }
 0x138   : > { %v1758_v11 = vpack.c.bf16 %v1728_v56, %v1727_v54  ;;  %v4277_v50 = vpop.permute.xlu0 %2654  ;;  %v1502_v20 = vsel %vm1495_vm4, %v4922_v49, %v2341_v6  ;;  %v1499_v27 = vsel %vm1495_vm4, %v4923_v63, %v2332_v22  ;;  %v2412_v59 = vunpack.i.h.bf16 %v4924_v10  ;;  %v4928_v36 = vld [vmem:[#allocation11_spill] sm:$0xff] }
 0x139   : > { %1462 = vrot.lane.b32.xlu1 %v4914_v7, %s2959_s19  ;;  %2279 = vmatmul.mubr.msk.bf16.vlgmr.msra.gmra.mrb[0].mxu1 %vm1816_vm12, %v1766_v47  ;;  %v2411_v19 = vunpack.i.l.bf16 %v4924_v10  ;;  %v2447_v32 = vunpack.i.h.bf16 %v4900_v52  ;;  %v2456_v9 = vunpack.i.l.bf16 %v3885_v14  ;;  %v2452_v35 = vunpack.i.h.bf16 %v4925_v40  ;;  %v4929_v52 = vld [vmem:[#allocation40_spill] sm:$0xff] }
 0x13a   : > { %2934 = vrot.lane.b32.xlu0 %v4915_v26, %s2959_s19  ;;  %2263 = vmatmul.mubr.msk.bf16.vlgmr.msra.gmra.mrb[0].mxu0 %vm1816_vm12, %v1758_v11  ;;  %v2451_v16 = vunpack.i.l.bf16 %v4925_v40  ;;  %v1515_v29 = vsel %vm1495_vm4, %v4926_v60, %v2372_v51  ;;  %v1518_v46 = vsel %vm1495_vm4, %v4927_v61, %v2381_v34  ;;  %v2492_v47 = vunpack.i.h.bf16 %v4928_v36  ;;  %v4930_v11 = vld [vmem:[#allocation35_spill] sm:$0xff] }
 0x13b   : > { %v4285_v33 = vpop.permute.xlu1 %2669  ;;  %v2491_v54 = vunpack.i.l.bf16 %v4928_v36  ;;  %v1517_v14 = vsel %vm1495_vm4, %v4929_v52, %v2377_v12  ;;  %v1516_v7 = vsel %vm1495_vm4, %v4930_v11, %v2376_v1  ;;  %v1531_v26 = vsel %vm1527_vm5, %v1499_v27, %v2407_v62 }
 0x13c   : > { %v4289_v53 = vpop.permute.xlu0 %2664  ;;  %v1534_v28 = vsel %vm1527_vm5, %v1502_v20, %v2416_v2  ;;  %v1533_v17 = vsel %vm1527_vm5, %v1501_v3, %v2412_v59  ;;  %v1532_v25 = vsel %vm1527_vm5, %v1500_v55, %v2411_v19  ;;  %v2487_v6 = vunpack.i.h.bf16 %v4931_v48 }
 0x13d   : > { %v2486_v22 = vunpack.i.l.bf16 %v4931_v48  ;;  %v1547_v41 = vsel %vm1527_vm5, %v1515_v29, %v2447_v32  ;;  %v1550_v38 = vsel %vm1527_vm5, %v1518_v46, %v2456_v9  ;;  %v1548_v51 = vsel %vm1527_vm5, %v1516_v7, %v2451_v16 }
 0x13e   : > { %v1549_v34 = vsel %vm1527_vm5, %v1517_v14, %v2452_v35  ;;  %v1566_v12 = vsel %vm1559_vm6, %v1533_v17, %v2491_v54  ;;  %v1567_v3 = vsel %vm1559_vm6, %v1534_v28, %v2492_v47  ;;  %v2527_v55 = vunpack.i.h.bf16 %v4026_v30 }
 0x13f   : > { %v4293_v23 = vpop.permute.xlu1 %2679  ;;  %v2526_v1 = vunpack.i.l.bf16 %v4026_v30  ;;  %v2532_v4 = vunpack.i.h.bf16 %v4022_v37  ;;  %v2531_v2 = vunpack.i.l.bf16 %v4022_v37  ;;  %v2662_v49 = vunpack.i.h.bf16 %v4275_v21 }
 0x140   : > { %v4301_v24 = vpop.permute.xlu0 %2674  ;;  %v2661_v20 = vunpack.i.l.bf16 %v4275_v21  ;;  %v1564_v63 = vsel %vm1559_vm6, %v1531_v26, %v2486_v22  ;;  %v1565_v27 = vsel %vm1559_vm6, %v1532_v25, %v2487_v6  ;;  %v2657_v10 = vunpack.i.h.bf16 %v4277_v50 }
 0x141   : > { %v2656_v59 = vunpack.i.l.bf16 %v4277_v50  ;;  %v2672_v19 = vunpack.i.h.bf16 %v4285_v33  ;;  %v2671_v30 = vunpack.i.l.bf16 %v4285_v33  ;;  %v2667_v32 = vunpack.i.h.bf16 %v4289_v53 }
 0x142   : > { %v2666_v37 = vunpack.i.l.bf16 %v4289_v53  ;;  %v1580_v40 = vsel %vm1559_vm6, %v1547_v41, %v2526_v1  ;;  %v1581_v21 = vsel %vm1559_vm6, %v1548_v51, %v2527_v55  ;;  %v2682_v35 = vunpack.i.h.bf16 %v4293_v23 }
 0x143   : > { %v4317_v44 = vpop.permute.xlu1 %2689  ;;  %v2681_v16 = vunpack.i.l.bf16 %v4293_v23  ;;  %v1582_v50 = vsel %vm1559_vm6, %v1549_v34, %v2531_v2  ;;  %v1583_v29 = vsel %vm1559_vm6, %v1550_v38, %v2532_v4  ;;  %v1613_v33 = vsel %vm1592_vm7, %v1580_v40, %v2661_v20 }
 0x144   : > { %v4325_v56 = vpop.permute.xlu0 %2684  ;;  %v1614_v61 = vsel %vm1592_vm7, %v1581_v21, %v2662_v49  ;;  %v1597_v53 = vsel %vm1592_vm7, %v1564_v63, %v2656_v59  ;;  %v1598_v46 = vsel %vm1592_vm7, %v1565_v27, %v2657_v10  ;;  %v2677_v36 = vunpack.i.h.bf16 %v4301_v24 }
 0x145   : > { %v2676_v47 = vunpack.i.l.bf16 %v4301_v24  ;;  %v1615_v23 = vsel %vm1592_vm7, %v1582_v50, %v2671_v30  ;;  %v1616_v54 = vsel %vm1592_vm7, %v1583_v29, %v2672_v19  ;;  %v1600_v52 = vsel %vm1592_vm7, %v1567_v3, %v2667_v32 }
 0x146   : > { %v1599_v14 = vsel %vm1592_vm7, %v1566_v12, %v2666_v37  ;;  %v1646_v7 = vsel %vm1625_vm8, %v1613_v33, %v2681_v16  ;;  %v1647_v26 = vsel %vm1625_vm8, %v1614_v61, %v2682_v35  ;;  %v2692_v28 = vunpack.i.h.bf16 %v4317_v44 }
 0x147   : > { %v4341_v18 = vpop.permute.xlu1 %2699  ;;  %v2691_v17 = vunpack.i.l.bf16 %v4317_v44  ;;  %v2687_v24 = vunpack.i.h.bf16 %v4325_v56  ;;  %v2686_v48 = vunpack.i.l.bf16 %v4325_v56  ;;  %v1630_v41 = vsel %vm1625_vm8, %v1597_v53, %v2676_v47 }
 0x148   : > { %v2695_v62 = vpop.permute.xlu0 %2694  ;;  %v2702_v6 = vunpack.i.h.bf16 %v4341_v18  ;;  %v2701_v22 = vunpack.i.l.bf16 %v4341_v18  ;;  %v1631_v38 = vsel %vm1625_vm8, %v1598_v46, %v2677_v36  ;;  %v1649_v2 = vsel %vm1625_vm8, %v1616_v54, %v2692_v28 }
 0x149   : > { %v2697_v51 = vunpack.i.h.bf16 %v2695_v62  ;;  %v2696_v34 = vunpack.i.l.bf16 %v2695_v62  ;;  %v1648_v4 = vsel %vm1625_vm8, %v1615_v23, %v2691_v17  ;;  %v1632_v18 = vsel %vm1625_vm8, %v1599_v14, %v2686_v48 }
 0x14a   : > { %v1633_v63 = vsel %vm1625_vm8, %v1600_v52, %v2687_v24  ;;  %v1679_v27 = vsel %vm1658_vm9, %v1646_v7, %v2701_v22  ;;  %v1680_v62 = vsel %vm1658_vm9, %v1647_v26, %v2702_v6 }
 0x14b   : > { %v2710_v9 = vpop.permute.xlu1 %2709  ;;  %v1663_v10 = vsel %vm1658_vm9, %v1630_v41, %v2696_v34  ;;  %v1664_v59 = vsel %vm1658_vm9, %v1631_v38, %v2697_v51 }
 0x14c   : > { %v4363_v60 = vpop.permute.xlu0 %2704  ;;  %v2712_v12 = vunpack.i.h.bf16 %v2710_v9  ;;  %v2711_v3 = vunpack.i.l.bf16 %v2710_v9 }
 0x14d   : > { %v2707_v19 = vunpack.i.h.bf16 %v4363_v60  ;;  %v2706_v30 = vunpack.i.l.bf16 %v4363_v60 }
 0x14e   : > { %v1681_v32 = vsel %vm1658_vm9, %v1648_v4, %v2711_v3  ;;  %v1682_v37 = vsel %vm1658_vm9, %v1649_v2, %v2712_v12 }
 0x14f   : > { %v2720_v11 = vpop.permute.xlu1 %2719  ;;  %v1665_v52 = vsel %vm1658_vm9, %v1632_v18, %v2706_v30  ;;  %v1666_v28 = vsel %vm1658_vm9, %v1633_v63, %v2707_v19 }
 0x150   : > { %v2715_v25 = vpop.permute.xlu0 %2714  ;;  %v2722_v55 = vunpack.i.h.bf16 %v2720_v11  ;;  %v2721_v1 = vunpack.i.l.bf16 %v2720_v11 }
 0x151   : > { %v2717_v56 = vunpack.i.h.bf16 %v2715_v25  ;;  %v2716_v49 = vunpack.i.l.bf16 %v2715_v25 }
 0x152   : > { %v1712_v9 = vsel %vm1691_vm10, %v1679_v27, %v2721_v1  ;;  %v1713_v40 = vsel %vm1691_vm10, %v1680_v62, %v2722_v55 }
 0x153   : > { %v2730_v44 = vpop.permute.xlu1 %2729  ;;  %v1696_v35 = vsel %vm1691_vm10, %v1663_v10, %v2716_v49  ;;  %v1697_v16 = vsel %vm1691_vm10, %v1664_v59, %v2717_v56 }
 0x154   : > { %v2725_v20 = vpop.permute.xlu0 %2724  ;;  %v2732_v61 = vunpack.i.h.bf16 %v2730_v44  ;;  %v2731_v53 = vunpack.i.l.bf16 %v2730_v44 }
 0x155   : > { %v2727_v36 = vunpack.i.h.bf16 %v2725_v20  ;;  %v2726_v47 = vunpack.i.l.bf16 %v2725_v20 }
 0x156   : > { %v1714_v6 = vsel %vm1691_vm10, %v1681_v32, %v2731_v53  ;;  %v1715_v22 = vsel %vm1691_vm10, %v1682_v37, %v2732_v61 }
 0x157   : > { %v2740_v21 = vpop.permute.xlu1 %2739  ;;  %v1698_v51 = vsel %vm1691_vm10, %v1665_v52, %v2726_v47  ;;  %v1699_v34 = vsel %vm1691_vm10, %v1666_v28, %v2727_v36 }
 0x158   : > { %v2742_v50 = vunpack.i.h.bf16 %v2740_v21  ;;  %v2741_v29 = vunpack.i.l.bf16 %v2740_v21  ;;  %v2735_v33 = vpop.permute.xlu0 %2734 }
 0x159   : > { %v2737_v46 = vunpack.i.h.bf16 %v2735_v33  ;;  %v2736_v60 = vunpack.i.l.bf16 %v2735_v33 }
 0x15a   : > { %v1745_v23 = vsel %vm1724_vm11, %v1712_v9, %v2741_v29  ;;  %v1746_v54 = vsel %vm1724_vm11, %v1713_v40, %v2742_v50 }
 0x15b   : > { %v1767_v14 = vpack.c.bf16 %v1746_v54, %v1745_v23  ;;  %v1729_v11 = vsel %vm1724_vm11, %v1696_v35, %v2736_v60  ;;  %v1730_v7 = vsel %vm1724_vm11, %v1697_v16, %v2737_v46  ;;  %v2750_v26 = vpop.permute.xlu1 %2749 }
 0x15c   : > { %v1759_v17 = vpack.c.bf16 %v1730_v7, %v1729_v11  ;;  %v2752_v25 = vunpack.i.h.bf16 %v2750_v26  ;;  %v2751_v24 = vunpack.i.l.bf16 %v2750_v26  ;;  %v2745_v48 = vpop.permute.xlu0 %2744 }
 0x15d   : > { %v2747_v41 = vunpack.i.h.bf16 %v2745_v48  ;;  %v2746_v38 = vunpack.i.l.bf16 %v2745_v48  ;;  %2282 = vmatprep.mubr.msk.bf16.mxu1 %vm1816_vm12, %v1767_v14 }
 0x15e   : > { %v1747_v12 = vsel %vm1724_vm11, %v1714_v6, %v2751_v24  ;;  %v1748_v3 = vsel %vm1724_vm11, %v1715_v22, %v2752_v25  ;;  %2266 = vmatprep.mubr.msk.bf16.mxu0 %vm1816_vm12, %v1759_v17 }
 0x15f   : > { %v1768_v55 = vpack.c.bf16 %v1748_v3, %v1747_v12  ;;  %v1731_v1 = vsel %vm1724_vm11, %v1698_v51, %v2746_v38  ;;  %v1732_v44 = vsel %vm1724_vm11, %v1699_v34, %v2747_v41  ;;  %v2760_v4 = vpop.permute.xlu1 %2759 }
 0x160   : > { %v1760_v2 = vpack.c.bf16 %v1732_v44, %v1731_v1  ;;  %v2755_v56 = vpop.permute.xlu0 %2754  ;;  %v2762_v19 = vunpack.i.h.bf16 %v2760_v4  ;;  %v2761_v30 = vunpack.i.l.bf16 %v2760_v4 }
 0x161   : > { %2283 = vmatmul.mubr.msk.bf16.gmra.mrb[4].mxu1 %vm1816_vm12, %v1768_v55  ;;  %v2757_v32 = vunpack.i.h.bf16 %v2755_v56  ;;  %v2756_v37 = vunpack.i.l.bf16 %v2755_v56 }
 0x162   : > { %2267 = vmatmul.mubr.msk.bf16.gmra.mrb[4].mxu0 %vm1816_vm12, %v1760_v2  ;;  %v1617_v61 = vsel %vm1592_vm7, %v4061_v43, %v2761_v30  ;;  %v1618_v53 = vsel %vm1592_vm7, %v4064_v13, %v2762_v19 }
 0x163   : > { %v2770_v49 = vpop.permute.xlu1 %2769  ;;  %v1601_v46 = vsel %vm1592_vm7, %v3982_v42, %v2756_v37  ;;  %v1602_v60 = vsel %vm1592_vm7, %v3985_v31, %v2757_v32 }
 0x164   : > { %v2765_v20 = vpop.permute.xlu0 %2764  ;;  %v2772_v9 = vunpack.i.h.bf16 %v2770_v49  ;;  %v2771_v40 = vunpack.i.l.bf16 %v2770_v49 }
 0x165   : > { %v2767_v21 = vunpack.i.h.bf16 %v2765_v20  ;;  %v2766_v35 = vunpack.i.l.bf16 %v2765_v20 }
 0x166   : > { %v1619_v23 = vsel %vm1592_vm7, %v4054_v39, %v2771_v40  ;;  %v1620_v54 = vsel %vm1592_vm7, %v4057_v15, %v2772_v9 }
 0x167   : > { %v2780_v18 = vpop.permute.xlu1 %2779  ;;  %v1604_v43 = vsel %vm1592_vm7, %v3973_v45, %v2767_v21  ;;  %v1603_v13 = vsel %vm1592_vm7, %v3970_v8, %v2766_v35 }
 0x168   : > { %v2775_v63 = vpop.permute.xlu0 %2774  ;;  %v2782_v50 = vunpack.i.h.bf16 %v2780_v18  ;;  %v2781_v29 = vunpack.i.l.bf16 %v2780_v18 }
 0x169   : > { %v2777_v36 = vunpack.i.h.bf16 %v2775_v63  ;;  %v2776_v47 = vunpack.i.l.bf16 %v2775_v63 }
 0x16a   : > { %v1650_v42 = vsel %vm1625_vm8, %v1617_v61, %v2781_v29  ;;  %v1651_v14 = vsel %vm1625_vm8, %v1618_v53, %v2782_v50 }
 0x16b   : > { %v2790_v27 = vpop.permute.xlu1 %2789  ;;  %v1634_v15 = vsel %vm1625_vm8, %v1601_v46, %v2776_v47  ;;  %v1635_v25 = vsel %vm1625_vm8, %v1602_v60, %v2777_v36 }
 0x16c   : > { %v2785_v62 = vpop.permute.xlu0 %2784  ;;  %v2792_v31 = vunpack.i.h.bf16 %v2790_v27  ;;  %v2791_v11 = vunpack.i.l.bf16 %v2790_v27 }
 0x16d   : > { %v2787_v26 = vunpack.i.h.bf16 %v2785_v62  ;;  %v2786_v28 = vunpack.i.l.bf16 %v2785_v62 }
 0x16e   : > { %v1652_v38 = vsel %vm1625_vm8, %v1619_v23, %v2791_v11  ;;  %v1653_v51 = vsel %vm1625_vm8, %v1620_v54, %v2792_v31 }
 0x16f   : > { %v2800_v10 = vpop.permute.xlu1 %2799  ;;  %v1636_v55 = vsel %vm1625_vm8, %v1603_v13, %v2786_v28  ;;  %v1637_v1 = vsel %vm1625_vm8, %v1604_v43, %v2787_v26 }
 0x170   : > { %v2795_v59 = vpop.permute.xlu0 %2794  ;;  %v2802_v39 = vunpack.i.h.bf16 %v2800_v10  ;;  %v2801_v17 = vunpack.i.l.bf16 %v2800_v10 }
 0x171   : > { %v2797_v45 = vunpack.i.h.bf16 %v2795_v59  ;;  %v2796_v24 = vunpack.i.l.bf16 %v2795_v59 }
 0x172   : > { %v1683_v44 = vsel %vm1658_vm9, %v1650_v42, %v2801_v17  ;;  %v1684_v4 = vsel %vm1658_vm9, %v1651_v14, %v2802_v39 }
 0x173   : > { %v2810_v16 = vpop.permute.xlu1 %2809  ;;  %v1667_v2 = vsel %vm1658_vm9, %v1634_v15, %v2796_v24  ;;  %v1668_v56 = vsel %vm1658_vm9, %v1635_v25, %v2797_v45 }
 0x174   : > { %v4421_v33 = vpop.permute.xlu0 %2804  ;;  %v2812_v48 = vunpack.i.h.bf16 %v2810_v16  ;;  %v2811_v8 = vunpack.i.l.bf16 %v2810_v16 }
 0x175   : > { %v2807_v49 = vunpack.i.h.bf16 %v4421_v33  ;;  %v2806_v20 = vunpack.i.l.bf16 %v4421_v33 }
 0x176   : > { %v1685_v18 = vsel %vm1658_vm9, %v1652_v38, %v2811_v8  ;;  %v1686_v63 = vsel %vm1658_vm9, %v1653_v51, %v2812_v48 }
 0x177   : > { %v2820_v52 = vpop.permute.xlu1 %2819  ;;  %v1669_v61 = vsel %vm1658_vm9, %v1636_v55, %v2806_v20  ;;  %v1670_v47 = vsel %vm1658_vm9, %v1637_v1, %v2807_v49 }
 0x178   : > { %v2815_v7 = vpop.permute.xlu0 %2814  ;;  %v2822_v6 = vunpack.i.h.bf16 %v2820_v52  ;;  %v2821_v22 = vunpack.i.l.bf16 %v2820_v52 }
 0x179   : > { %v2817_v34 = vunpack.i.h.bf16 %v2815_v7  ;;  %v2816_v12 = vunpack.i.l.bf16 %v2815_v7 }
 0x17a   : > { %v1716_v27 = vsel %vm1691_vm10, %v1683_v44, %v2821_v22  ;;  %v1717_v62 = vsel %vm1691_vm10, %v1684_v4, %v2822_v6 }
 0x17b   : > { %v2830_v41 = vpop.permute.xlu1 %2829  ;;  %v1700_v59 = vsel %vm1691_vm10, %v1667_v2, %v2816_v12  ;;  %v1701_v19 = vsel %vm1691_vm10, %v1668_v56, %v2817_v34 }
 0x17c   : > { %v2825_v3 = vpop.permute.xlu0 %2824  ;;  %v2832_v9 = vunpack.i.h.bf16 %v2830_v41  ;;  %v2831_v40 = vunpack.i.l.bf16 %v2830_v41 }
 0x17d   : > { %v2827_v16 = vunpack.i.h.bf16 %v2825_v3  ;;  %v2826_v50 = vunpack.i.l.bf16 %v2825_v3 }
 0x17e   : > { %v1718_v52 = vsel %vm1691_vm10, %v1685_v18, %v2831_v40  ;;  %v1719_v42 = vsel %vm1691_vm10, %v1686_v63, %v2832_v9  ;;  %v4933_v40 = vld [vmem:[#allocation12_spill] sm:$0xff] }
 0x17f   : > { %v2840_v10 = vpop.permute.xlu1 %2839  ;;  %v1702_v11 = vsel %vm1691_vm10, %v1669_v61, %v2826_v50  ;;  %v1703_v7 = vsel %vm1691_vm10, %v1670_v47, %v2827_v16  ;;  %v4935_v50 = vld [vmem:[#allocation50_spill] sm:$0xff] }
 0x180   : > { %v2842_v30 = vunpack.i.h.bf16 %v2840_v10  ;;  %v2841_v32 = vunpack.i.l.bf16 %v2840_v10  ;;  %v2835_v37 = vpop.permute.xlu0 %2834 }
 0x181   : > { %v2837_v21 = vunpack.i.h.bf16 %v2835_v37  ;;  %v2836_v35 = vunpack.i.l.bf16 %v2835_v37 }
 0x182   : > { %v1749_v29 = vsel %vm1724_vm11, %v1716_v27, %v2841_v32  ;;  %v1750_v33 = vsel %vm1724_vm11, %v1717_v62, %v2842_v30  ;;  %v4932_v32 = vld [vmem:[#allocation16_spill] sm:$0xff] }
 0x183   : > { %v1769_v53 = vpack.c.bf16 %v1750_v33, %v1749_v29  ;;  %v1733_v46 = vsel %vm1724_vm11, %v1700_v59, %v2836_v35  ;;  %v1734_v60 = vsel %vm1724_vm11, %v1701_v19, %v2837_v21  ;;  %v2850_v36 = vpop.permute.xlu1 %2849 }
 0x184   : > { %v1761_v23 = vpack.c.bf16 %v1734_v60, %v1733_v46  ;;  %v2852_v54 = vunpack.i.h.bf16 %v2850_v36  ;;  %v2851_v43 = vunpack.i.l.bf16 %v2850_v36  ;;  %v2845_v13 = vpop.permute.xlu0 %2844 }
 0x185   : > { %v2847_v14 = vunpack.i.h.bf16 %v2845_v13  ;;  %v2846_v31 = vunpack.i.l.bf16 %v2845_v13  ;;  %2286 = vmatprep.mubr.msk.bf16.mxu1 %vm1816_vm12, %v1769_v53 }
 0x186   : > { %v1751_v26 = vsel %vm1724_vm11, %v1718_v52, %v2851_v43  ;;  %v1752_v28 = vsel %vm1724_vm11, %v1719_v42, %v2852_v54  ;;  %2270 = vmatprep.mubr.msk.bf16.mxu0 %vm1816_vm12, %v1761_v23 }
 0x187   : > { %v1770_v39 = vpack.c.bf16 %v1752_v28, %v1751_v26  ;;  %v1735_v17 = vsel %vm1724_vm11, %v1702_v11, %v2846_v31  ;;  %v1736_v15 = vsel %vm1724_vm11, %v1703_v7, %v2847_v14  ;;  %v2860_v25 = vpop.permute.xlu1 %2859 }
 0x188   : > { %v1762_v45 = vpack.c.bf16 %v1736_v15, %v1735_v17  ;;  %v2855_v24 = vpop.permute.xlu0 %2854  ;;  %v2861_v12 = vunpack.i.l.bf16 %v2860_v25  ;;  %v2862_v3 = vunpack.i.h.bf16 %v2860_v25 }
 0x189   : > { %2287 = vmatmul.mubr.msk.bf16.gmra.mrb[8].mxu1 %vm1816_vm12, %v1770_v39  ;;  %v2857_v55 = vunpack.i.h.bf16 %v2855_v24  ;;  %v2856_v1 = vunpack.i.l.bf16 %v2855_v24 }
 0x18a   : > { %2271 = vmatmul.mubr.msk.bf16.gmra.mrb[8].mxu0 %vm1816_vm12, %v1762_v45  ;;  %v1621_v20 = vsel %vm1592_vm7, %v4082_v58, %v2861_v12  ;;  %v1622_v63 = vsel %vm1592_vm7, %v4086_v57, %v2862_v3  ;;  %v4934_v57 = vld [vmem:[#allocation17_spill] sm:$0xff] }
 0x18b   : > { %v2870_v48 = vpop.permute.xlu1 %2869  ;;  %v1605_v27 = vsel %vm1592_vm7, %v4006_v5, %v2856_v1  ;;  %v1606_v62 = vsel %vm1592_vm7, %v4009_v0, %v2857_v55 }
 0x18c   : > { %v2865_v8 = vpop.permute.xlu0 %2864  ;;  %v2871_v44 = vunpack.i.l.bf16 %v2870_v48  ;;  %v2872_v2 = vunpack.i.h.bf16 %v2870_v48 }
 0x18d   : > { %v2867_v56 = vunpack.i.h.bf16 %v2865_v8  ;;  %v2866_v18 = vunpack.i.l.bf16 %v2865_v8 }
 0x18e   : > { %v1623_v37 = vsel %vm1592_vm7, %v4932_v32, %v2871_v44  ;;  %v1624_v16 = vsel %vm1592_vm7, %v4934_v57, %v2872_v2 }
 0x18f   : > { %v2880_v6 = vpop.permute.xlu1 %2879  ;;  %v1608_v58 = vsel %vm1592_vm7, %v4933_v40, %v2867_v56  ;;  %v1607_v0 = vsel %vm1592_vm7, %v4935_v50, %v2866_v18  ;;  %v4542_v50 = vld [vmem:[%s4685_s4] ss:$0 sm:$0xff] }
 0x190   : > { %v2875_v22 = vpop.permute.xlu0 %2874  ;;  %v2881_v10 = vunpack.i.l.bf16 %v2880_v6  ;;  %v2882_v59 = vunpack.i.h.bf16 %v2880_v6 }
 0x191   : > { %v2877_v19 = vunpack.i.h.bf16 %v2875_v22  ;;  %v2876_v30 = vunpack.i.l.bf16 %v2875_v22 }
 0x192   : > { %v1654_v53 = vsel %vm1625_vm8, %v1621_v20, %v2881_v10  ;;  %v1655_v47 = vsel %vm1625_vm8, %v1622_v63, %v2882_v59 }
 0x193   : > { %v2890_v41 = vpop.permute.xlu1 %2889  ;;  %v1638_v23 = vsel %vm1625_vm8, %v1605_v27, %v2876_v30  ;;  %v1639_v54 = vsel %vm1625_vm8, %v1606_v62, %v2877_v19 }
 0x194   : > { %v2885_v38 = vpop.permute.xlu0 %2884  ;;  %v2892_v21 = vunpack.i.h.bf16 %v2890_v41  ;;  %v2891_v35 = vunpack.i.l.bf16 %v2890_v41 }
 0x195   : > { %v2887_v29 = vunpack.i.h.bf16 %v2885_v38  ;;  %v2886_v33 = vunpack.i.l.bf16 %v2885_v38 }
 0x196   : > { %v1656_v52 = vsel %vm1625_vm8, %v1623_v37, %v2891_v35  ;;  %v1657_v42 = vsel %vm1625_vm8, %v1624_v16, %v2892_v21 }
 0x197   : > { %v2900_v51 = vpop.permute.xlu1 %2899  ;;  %v1640_v7 = vsel %vm1625_vm8, %v1607_v0, %v2886_v33  ;;  %v1641_v26 = vsel %vm1625_vm8, %v1608_v58, %v2887_v29  ;;  %v2048_v29 = vld [vmem:[%s4537_s23 + $0x90] sm:$0xff] }
 0x198   : > { %v2895_v34 = vpop.permute.xlu0 %2894  ;;  %v2901_v61 = vunpack.i.l.bf16 %v2900_v51  ;;  %v2902_v46 = vunpack.i.h.bf16 %v2900_v51 }
 0x199   : > { %v2897_v60 = vunpack.i.h.bf16 %v2895_v34  ;;  %v2896_v36 = vunpack.i.l.bf16 %v2895_v34 }
 0x19a   : > { %v1687_v28 = vsel %vm1658_vm9, %v1654_v53, %v2901_v61  ;;  %v1688_v17 = vsel %vm1658_vm9, %v1655_v47, %v2902_v46  ;;  %v2032_v61 = vld [vmem:[%s4537_s23 + $0x10] sm:$0xff] }
 0x19b   : > { %v1277_v4 = vpop.permute.xlu1 %1276  ;;  %v1671_v15 = vsel %vm1658_vm9, %v1638_v23, %v2896_v36  ;;  %v1672_v25 = vsel %vm1658_vm9, %v1639_v54, %v2897_v60  ;;  %v2046_v60 = vld [vmem:[%s4537_s23 + $0x80] sm:$0xff] }
 0x19c   : > { %v4477_v49 = vpop.permute.xlu0 %2904  ;;  %v1689_v45 = vsel %vm1658_vm9, %v1656_v52, %v1277_v4  ;;  %v1690_v24 = vsel %vm1658_vm9, %v1657_v42, %v1277_v4  ;;  %v2030_v23 = vld [vmem:[%s4537_s23] sm:$0xff] }
 0x19d   : > { %v2907_v48 = vunpack.i.h.bf16 %v4477_v49  ;;  %v2906_v8 = vunpack.i.l.bf16 %v4477_v49 }
 0x19f   : > { %v2915_v9 = vpop.permute.xlu1 %2914  ;;  %v1673_v10 = vsel %vm1658_vm9, %v1640_v7, %v2906_v8  ;;  %v1674_v37 = vsel %vm1658_vm9, %v1641_v26, %v2907_v48  ;;  %v2047_v26 = vld [vmem:[%s4537_s23 + $0x88] sm:$0xff] }
 0x1a0   : > { %v2910_v5 = vpop.permute.xlu0 %2909  ;;  %v2916_v43 = vunpack.i.l.bf16 %v2915_v9  ;;  %v2917_v14 = vunpack.i.h.bf16 %v2915_v9 }
 0x1a1   : > { %v2911_v31 = vunpack.i.l.bf16 %v2910_v5  ;;  %v2912_v39 = vunpack.i.h.bf16 %v2910_v5 }
 0x1a2   : > { %v1720_v6 = vsel %vm1691_vm10, %v1687_v28, %v2916_v43  ;;  %v1721_v41 = vsel %vm1691_vm10, %v1688_v17, %v2917_v14 }
 0x1a3   : > { %v1370_v13 = vpop.permute.xlu1 %1369  ;;  %v1704_v38 = vsel %vm1691_vm10, %v1671_v15, %v2911_v31  ;;  %v1705_v3 = vsel %vm1691_vm10, %v1672_v25, %v2912_v39  ;;  %v2033_v31 = vld [vmem:[%s4537_s23 + $0x18] sm:$0xff]  ;;  %v2031_v25 = vld [vmem:[%s4537_s23 + $0x8] sm:$0xff] }
 0x1a4   : > { %v2920_v11 = vpop.permute.xlu0 %2919  ;;  %v1722_v55 = vsel %vm1691_vm10, %v1689_v45, %v1370_v13  ;;  %v1723_v20 = vsel %vm1691_vm10, %v1690_v24, %v1370_v13  ;;  %v2049_v13 = vld [vmem:[%s4537_s23 + $0x98] sm:$0xff] }
 0x1a5   : > { %v2922_v4 = vunpack.i.h.bf16 %v2920_v11  ;;  %v2921_v2 = vunpack.i.l.bf16 %v2920_v11 }
 0x1a7   : > { %v2930_v22 = vpop.permute.xlu1 %2929  ;;  %v1706_v21 = vsel %vm1691_vm10, %v1673_v10, %v2921_v2  ;;  %v1707_v35 = vsel %vm1691_vm10, %v1674_v37, %v2922_v4  ;;  %v2034_v2 = vld [vmem:[%s4537_s23 + $0x20] sm:$0xff] }
 0x1a8   : > { %v2932_v51 = vunpack.i.h.bf16 %v2930_v22  ;;  %v2931_v34 = vunpack.i.l.bf16 %v2930_v22  ;;  %v2925_v12 = vpop.permute.xlu0 %2924 }
 0x1a9   : > { %v2927_v1 = vunpack.i.h.bf16 %v2925_v12  ;;  %v2926_v44 = vunpack.i.l.bf16 %v2925_v12  ;;  %v2036_v12 = vld [vmem:[%s4537_s23 + $0x30] sm:$0xff] }
 0x1aa   : > { %v1753_v56 = vsel %vm1724_vm11, %v1720_v6, %v2931_v34  ;;  %v1754_v49 = vsel %vm1724_vm11, %v1721_v41, %v2932_v51  ;;  %v2052_v51 = vld [vmem:[%s4537_s23 + $0xb0] sm:$0xff] }
 0x1ab   : > { %v1771_v18 = vpack.c.bf16 %v1754_v49, %v1753_v56  ;;  %v1737_v63 = vsel %vm1724_vm11, %v1704_v38, %v2926_v44  ;;  %v1738_v27 = vsel %vm1724_vm11, %v1705_v3, %v2927_v1  ;;  %v1463_v62 = vpop.permute.xlu1 %1462  ;;  %v2050_v1 = vld [vmem:[%s4537_s23 + $0xa0] sm:$0xff] }
 0x1ac   : > { %v1763_v59 = vpack.c.bf16 %v1738_v27, %v1737_v63  ;;  %v1755_v19 = vsel %vm1724_vm11, %v1722_v55, %v1463_v62  ;;  %v1756_v30 = vsel %vm1724_vm11, %v1723_v20, %v1463_v62  ;;  %v2935_v32 = vpop.permute.xlu0 %2934  ;;  %v2053_v20 = vld [vmem:[%s4537_s23 + $0xb8] sm:$0xff] }
 0x1ad   : > { %v1772_v9 = vpack.c.bf16 %v1756_v30, %v1755_v19  ;;  %v2937_v40 = vunpack.i.h.bf16 %v2935_v32  ;;  %v2936_v58 = vunpack.i.l.bf16 %v2935_v32  ;;  %2290 = vmatprep.mubr.msk.bf16.mxu1 %vm1816_vm12, %v1771_v18  ;;  %v2037_v62 = vld [vmem:[%s4537_s23 + $0x38] sm:$0xff]  ;;  %v2051_v19 = vld [vmem:[%s4537_s23 + $0xa8] sm:$0xff] }
 0x1ae   : > { %2274 = vmatprep.mubr.msk.bf16.mxu0 %vm1816_vm12, %v1763_v59 }
 0x1af   : > { %v1739_v57 = vsel %vm1724_vm11, %v1706_v21, %v2936_v58  ;;  %v1740_v16 = vsel %vm1724_vm11, %v1707_v35, %v2937_v40  ;;  %2291 = vmatmul.mubr.msk.bf16.gmra.mrb[12].mxu1 %vm1816_vm12, %v1772_v9  ;;  %v2035_v40 = vld [vmem:[%s4537_s23 + $0x28] sm:$0xff] }
 0x1b0   : > { %v1764_v5 = vpack.c.bf16 %v1740_v16, %v1739_v57 }
 0x1b2   : > { %2275 = vmatmul.mubr.msk.bf16.gmra.mrb[12].mxu0 %vm1816_vm12, %v1764_v5 }
 0x20c   : > { %v2280_v0 = vpop.f32.mrb[0].mxu1 }
 0x20d   : > { %v2264_v33 = vpop.f32.mrb[0].mxu0  ;;  %v1976_v53 = vadd.f32 %v2280_v0, %v4542_v50  ;;  %v1967_v46 = vpop.f32.mrb[1].mxu1 }
 0x20e   : > { %v1912_v36 = vadd.f32 %v2264_v33, %v4542_v50  ;;  %v1903_v47 = vpop.f32.mrb[1].mxu0  ;;  %v1968_v54 = vadd.f32 %v4542_v50, %v1967_v46  ;;  %v2281_v43 = vpop.f32.mrb[2].mxu1  ;;  %v2056_v33 = vld [vmem:[%s4537_s23 + $0xd0] sm:$0xff] }
 0x20f   : > { %v2080_v52 = vadd.f32 %v2048_v29, %v1976_v53  ;;  %v1904_v42 = vadd.f32 %v4542_v50, %v1903_v47  ;;  %v2265_v14 = vpop.f32.mrb[2].mxu0  ;;  %v1979_v11 = vadd.f32 %v2281_v43, %v4542_v50  ;;  %v1970_v7 = vpop.f32.mrb[3].mxu1  ;;  %v2040_v53 = vld [vmem:[%s4537_s23 + $0x50] sm:$0xff] }
 0x210   : > { %v2064_v28 = vadd.f32 %v2032_v61, %v1912_v36  ;;  %v2078_v39 = vadd.f32 %v2046_v60, %v1968_v54  ;;  %v1915_v17 = vadd.f32 %v2265_v14, %v4542_v50  ;;  %v1906_v15 = vpop.f32.mrb[3].mxu0  ;;  %v1971_v45 = vadd.f32 %v4542_v50, %v1970_v7  ;;  %v2054_v36 = vld [vmem:[%s4537_s23 + $0xc0] sm:$0xff] }
 0x211   : > { %2112 = vst.msk [vmem:[%s4552_s28 + $0x90] sm:$0xff] %vm1495_vm4, %v2080_v52  ;;  %v2062_v24 = vadd.f32 %v2030_v23, %v1904_v42  ;;  %v2081_v48 = vadd.f32 %v2049_v13, %v1979_v11  ;;  %v1907_v8 = vadd.f32 %v4542_v50, %v1906_v15  ;;  %v2038_v54 = vld [vmem:[%s4537_s23 + $0x40] sm:$0xff]  ;;  %v2057_v52 = vld [vmem:[%s4537_s23 + $0xd8] sm:$0xff] }
 0x212   : > { %2096 = vst.msk [vmem:[%s4552_s28 + $0x10] sm:$0xff] %vm1495_vm4, %v2064_v28  ;;  %2110 = vst.msk [vmem:[%s4552_s28 + $0x80] sm:$0xff] %vm1495_vm4, %v2078_v39  ;;  %v2065_v6 = vadd.f32 %v2033_v31, %v1915_v17  ;;  %v2079_v22 = vadd.f32 %v2047_v26, %v1971_v45  ;;  %v2041_v11 = vld [vmem:[%s4537_s23 + $0x58] sm:$0xff]  ;;  %v2055_v28 = vld [vmem:[%s4537_s23 + $0xc8] sm:$0xff] }
 0x213   : > { %2094 = vst.msk [vmem:[%s4552_s28] sm:$0xff] %vm1495_vm4, %v2062_v24  ;;  %2113 = vst.msk [vmem:[%s4552_s28 + $0x98] sm:$0xff] %vm1495_vm4, %v2081_v48  ;;  %v2063_v41 = vadd.f32 %v2031_v25, %v1907_v8  ;;  %v2039_v45 = vld [vmem:[%s4537_s23 + $0x48] sm:$0xff] }
 0x214   : > { %2097 = vst.msk [vmem:[%s4552_s28 + $0x18] sm:$0xff] %vm1495_vm4, %v2065_v6  ;;  %2111 = vst.msk [vmem:[%s4552_s28 + $0x88] sm:$0xff] %vm1495_vm4, %v2079_v22 }
 0x215   : > { %2095 = vst.msk [vmem:[%s4552_s28 + $0x8] sm:$0xff] %vm1495_vm4, %v2063_v41 }
 0x234   : > { %v2284_v38 = vpop.f32.mrb[4].mxu1 }
 0x235   : > { %v2268_v34 = vpop.f32.mrb[4].mxu0  ;;  %v1992_v3 = vadd.f32 %v2284_v38, %v4542_v50  ;;  %v1983_v55 = vpop.f32.mrb[5].mxu1 }
 0x236   : > { %v1928_v44 = vadd.f32 %v2268_v34, %v4542_v50  ;;  %v1919_v4 = vpop.f32.mrb[5].mxu0  ;;  %v1984_v56 = vadd.f32 %v4542_v50, %v1983_v55  ;;  %v2285_v49 = vpop.f32.mrb[6].mxu1  ;;  %v2060_v34 = vld [vmem:[%s4537_s23 + $0xf0] sm:$0xff]  ;;  %v2058_v55 = vld [vmem:[%s4537_s23 + $0xe0] sm:$0xff] }
 0x237   : > { %v2084_v18 = vadd.f32 %v2052_v51, %v1992_v3  ;;  %v1920_v63 = vadd.f32 %v4542_v50, %v1919_v4  ;;  %v2269_v27 = vpop.f32.mrb[6].mxu0  ;;  %v1995_v10 = vadd.f32 %v2285_v49, %v4542_v50  ;;  %v1986_v59 = vpop.f32.mrb[7].mxu1  ;;  %v2061_v4 = vld [vmem:[%s4537_s23 + $0xf8] sm:$0xff]  ;;  %v2044_v49 = vld [vmem:[%s4537_s23 + $0x70] sm:$0xff] }
 0x238   : > { %v2068_v30 = vadd.f32 %v2036_v12, %v1928_v44  ;;  %v2082_v32 = vadd.f32 %v2050_v1, %v1984_v56  ;;  %v1931_v37 = vadd.f32 %v2269_v27, %v4542_v50  ;;  %v1922_v9 = vpop.f32.mrb[7].mxu0  ;;  %v1987_v58 = vadd.f32 %v4542_v50, %v1986_v59  ;;  %v2042_v59 = vld [vmem:[%s4537_s23 + $0x60] sm:$0xff] }
 0x239   : > { %2116 = vst.msk [vmem:[%s4552_s28 + $0xb0] sm:$0xff] %vm1495_vm4, %v2084_v18  ;;  %v2066_v21 = vadd.f32 %v2034_v2, %v1920_v63  ;;  %v2085_v35 = vadd.f32 %v2053_v20, %v1995_v10  ;;  %v1923_v57 = vadd.f32 %v4542_v50, %v1922_v9  ;;  %v2059_v63 = vld [vmem:[%s4537_s23 + $0xe8] sm:$0xff]  ;;  %v2045_v9 = vld [vmem:[%s4537_s23 + $0x78] sm:$0xff] }
 0x23a   : > { %2100 = vst.msk [vmem:[%s4552_s28 + $0x30] sm:$0xff] %vm1495_vm4, %v2068_v30  ;;  %2114 = vst.msk [vmem:[%s4552_s28 + $0xa0] sm:$0xff] %vm1495_vm4, %v2082_v32  ;;  %v2069_v16 = vadd.f32 %v2037_v62, %v1931_v37  ;;  %v2083_v5 = vadd.f32 %v2051_v19, %v1987_v58 }
 0x23b   : > { %2098 = vst.msk [vmem:[%s4552_s28 + $0x20] sm:$0xff] %vm1495_vm4, %v2066_v21  ;;  %2117 = vst.msk [vmem:[%s4552_s28 + $0xb8] sm:$0xff] %vm1495_vm4, %v2085_v35  ;;  %v2067_v0 = vadd.f32 %v2035_v40, %v1923_v57  ;;  %v2043_v57 = vld [vmem:[%s4537_s23 + $0x68] sm:$0xff] }
 0x23c   : > { %2101 = vst.msk [vmem:[%s4552_s28 + $0x38] sm:$0xff] %vm1495_vm4, %v2069_v16  ;;  %2115 = vst.msk [vmem:[%s4552_s28 + $0xa8] sm:$0xff] %vm1495_vm4, %v2083_v5 }
 0x23d   : > { %2099 = vst.msk [vmem:[%s4552_s28 + $0x28] sm:$0xff] %vm1495_vm4, %v2067_v0 }
 0x25c   : > { %v2288_v29 = vpop.f32.mrb[8].mxu1 }
 0x25d   : > { %v2272_v61 = vpop.f32.mrb[8].mxu0  ;;  %v2008_v46 = vadd.f32 %v2288_v29, %v4542_v50  ;;  %v1999_v60 = vpop.f32.mrb[9].mxu1 }
 0x25e   : > { %v1944_v47 = vadd.f32 %v2272_v61, %v4542_v50  ;;  %v1935_v23 = vpop.f32.mrb[9].mxu0  ;;  %v2000_v43 = vadd.f32 %v4542_v50, %v1999_v60  ;;  %v2289_v13 = vpop.f32.mrb[10].mxu1 }
 0x25f   : > { %v2088_v42 = vadd.f32 %v2056_v33, %v2008_v46  ;;  %v1936_v14 = vadd.f32 %v4542_v50, %v1935_v23  ;;  %v2273_v31 = vpop.f32.mrb[10].mxu0  ;;  %v2011_v7 = vadd.f32 %v2289_v13, %v4542_v50  ;;  %v2002_v26 = vpop.f32.mrb[11].mxu1 }
 0x260   : > { %v2072_v39 = vadd.f32 %v2040_v53, %v1944_v47  ;;  %v2086_v17 = vadd.f32 %v2054_v36, %v2000_v43  ;;  %v1947_v15 = vadd.f32 %v2273_v31, %v4542_v50  ;;  %v1938_v25 = vpop.f32.mrb[11].mxu0  ;;  %v2003_v24 = vadd.f32 %v4542_v50, %v2002_v26 }
 0x261   : > { %2120 = vst.msk [vmem:[%s4552_s28 + $0xd0] sm:$0xff] %vm1495_vm4, %v2088_v42  ;;  %v2070_v48 = vadd.f32 %v2038_v54, %v1936_v14  ;;  %v2089_v8 = vadd.f32 %v2057_v52, %v2011_v7  ;;  %v1939_v6 = vadd.f32 %v4542_v50, %v1938_v25 }
 0x262   : > { %2104 = vst.msk [vmem:[%s4552_s28 + $0x50] sm:$0xff] %vm1495_vm4, %v2072_v39  ;;  %2118 = vst.msk [vmem:[%s4552_s28 + $0xc0] sm:$0xff] %vm1495_vm4, %v2086_v17  ;;  %v2073_v22 = vadd.f32 %v2041_v11, %v1947_v15  ;;  %v2087_v41 = vadd.f32 %v2055_v28, %v2003_v24 }
 0x263   : > { %2102 = vst.msk [vmem:[%s4552_s28 + $0x40] sm:$0xff] %vm1495_vm4, %v2070_v48  ;;  %2121 = vst.msk [vmem:[%s4552_s28 + $0xd8] sm:$0xff] %vm1495_vm4, %v2089_v8  ;;  %v2071_v38 = vadd.f32 %v2039_v45, %v1939_v6 }
 0x264   : > { %2105 = vst.msk [vmem:[%s4552_s28 + $0x58] sm:$0xff] %vm1495_vm4, %v2073_v22  ;;  %2119 = vst.msk [vmem:[%s4552_s28 + $0xc8] sm:$0xff] %vm1495_vm4, %v2087_v41 }
 0x265   : > { %2103 = vst.msk [vmem:[%s4552_s28 + $0x48] sm:$0xff] %vm1495_vm4, %v2071_v38 }
 0x282   : > { %v2292_v51 = vpop.f32.mrb[12].mxu1 }
 0x283   : > { %v2024_v12 = vadd.f32 %v2292_v51, %v4542_v50  ;;  %v2015_v3 = vpop.f32.mrb[13].mxu1 }
 0x284   : > { %v2016_v1 = vadd.f32 %v4542_v50, %v2015_v3  ;;  %v2293_v44 = vpop.f32.mrb[14].mxu1 }
 0x285   : > { %v2092_v2 = vadd.f32 %v2060_v34, %v2024_v12  ;;  %v2276_v56 = vpop.f32.mrb[12].mxu0  ;;  %v2027_v20 = vadd.f32 %v2293_v44, %v4542_v50  ;;  %v2018_v18 = vpop.f32.mrb[15].mxu1 }
 0x286   : > { %v2090_v27 = vadd.f32 %v2058_v55, %v2016_v1  ;;  %v1960_v62 = vadd.f32 %v2276_v56, %v4542_v50  ;;  %v1951_v10 = vpop.f32.mrb[13].mxu0  ;;  %v2019_v19 = vadd.f32 %v4542_v50, %v2018_v18 }
 0x287   : > { %2124 = vst.msk [vmem:[%s4552_s28 + $0xf0] sm:$0xff] %vm1495_vm4, %v2092_v2  ;;  %v2093_v30 = vadd.f32 %v2061_v4, %v2027_v20  ;;  %v1952_v32 = vadd.f32 %v4542_v50, %v1951_v10  ;;  %v2277_v37 = vpop.f32.mrb[14].mxu0 }
 0x288   : > { %2122 = vst.msk [vmem:[%s4552_s28 + $0xe0] sm:$0xff] %vm1495_vm4, %v2090_v27  ;;  %v2076_v40 = vadd.f32 %v2044_v49, %v1960_v62  ;;  %v2091_v58 = vadd.f32 %v2059_v63, %v2019_v19  ;;  %v1963_v21 = vadd.f32 %v2277_v37, %v4542_v50  ;;  %v1954_v35 = vpop.f32.mrb[15].mxu0 }
 0x289   : > { %2125 = vst.msk [vmem:[%s4552_s28 + $0xf8] sm:$0xff] %vm1495_vm4, %v2093_v30  ;;  %v2074_v16 = vadd.f32 %v2042_v59, %v1952_v32  ;;  %v1955_v5 = vadd.f32 %v4542_v50, %v1954_v35 }
 0x28a   : > { %2108 = vst.msk [vmem:[%s4552_s28 + $0x70] sm:$0xff] %vm1495_vm4, %v2076_v40  ;;  %2123 = vst.msk [vmem:[%s4552_s28 + $0xe8] sm:$0xff] %vm1495_vm4, %v2091_v58  ;;  %v2077_v0 = vadd.f32 %v2045_v9, %v1963_v21 }
 0x28b   : > { %2106 = vst.msk [vmem:[%s4552_s28 + $0x60] sm:$0xff] %vm1495_vm4, %v2074_v16  ;;  %v2075_v29 = vadd.f32 %v2043_v57, %v1955_v5 }
 0x28c   : > { %2109 = vst.msk [vmem:[%s4552_s28 + $0x78] sm:$0xff] %vm1495_vm4, %v2077_v0 }
 0x28d   : > { %2107 = vst.msk [vmem:[%s4552_s28 + $0x68] sm:$0xff] %vm1495_vm4, %v2075_v29 }
 0x28e PF: > { %s15_s18 = sadd.s32 1, %s2949_s18  }
 0x28f   : > { %p12_p4 = scmp.ge.s32.totalorder %s15_s18, 4  }
 0x291   :  { %14 = sbr.rel (!%p12_p4) target bundleno = 1 (0x1), region = 73 }

// kernel: double_conv_forward.4
= control target key start
LH: loop header
LB: loop body
LE: loop exit
PB: predicated region body
PF: predicated region fallthrough
CT: control target
= control target key end

     0   :  { %s3669_s21 = smov 0   ;;  %s5729_s0 = inlined_call_operand.vmem [shape: f32[2,16,16,4], index: 0, kind: input, shape index: {}]   ;;  %s5730_s1 = inlined_call_operand.vmem [shape: f32[4,4], index: 1, kind: input, shape index: {}]   ;;  %s5731_s2 = inlined_call_operand.vmem [shape: bf16[72,16], index: 2, kind: input, shape index: {}]   ;;  %s5732_s3 = inlined_call_operand.vmem [shape: f32[1,16], index: 3, kind: input, shape index: {}]   ;;  %s5733_s4 = inlined_call_operand.vmem [shape: f32[2,256,8], index: 4, kind: output, shape index: {0}]   ;;  %s5734_s5 = inlined_call_operand.vmem [shape: f32[2,256,8], index: 5, kind: output, shape index: {1}]   ;;  %s5735_s6 = inlined_call_operand.vmem [shape: f32[2,2,8], index: 6, kind: output, shape index: {2}]  }
   0x1 LB: > { %s2782_s22 = sadd.s32 4294967295, %s3621_s21   ;;  %p2786_p0 = scmp.ge.s32.totalorder %s3621_s21, 1  ;;  %s3621_s21 = sphi %s3669_s21, %s17_s21  }
   0x2   : > { %p217_p1 = scmp.lt.s32.totalorder %s3621_s21, 3 }
   0x4   : > { %p218_p2 = pnand %p2786_p0, %p217_p1 }
   0x6   : > { %221 = sbr.rel (%p218_p2) target bundleno = 889 (0x379), region = 36 }
   0xd   : > { %p256_p3 = scmp.lt.s32.totalorder %s2782_s22, 1  ;;  %v309_v0 = vlaneseq  ;;  %v308_v1 = vld [vmem:[%s5730_s1] sm:$0xf]  ;;  %s3623_s29 = smov 4   ;;  %vm613_vm0 = vcmask 31744   ;;  %vm678_vm1 = vcmask 1040384  }
   0xe   : > { %s3625_s30 = smov 24   ;;  %vm837_vm2 = vcmask 1046528   ;;  %s3626_s7 = smov 48   ;;  %vm915_vm3 = vcmask 1045504   ;;  %vm2128_vm4 = vcmask 1043456   ;;  %vm1758_vm5 = vcmask 64512  }
   0xf   : > { %s5974_s22 = smov (!%p256_p3, %s2782_s22), 1  ;;  %v310_v2 = vshrl.u32 %v309_v0, 7  ;;  %s3627_s8 = smov 8   ;;  %vm1790_vm6 = vcmask 130048   ;;  %vm1822_vm7 = vcmask 195584   ;;  %vm1855_vm8 = vcmask 261120  }
  0x10   : > { %s3683_s25 = sshll.u32 %s5974_s22, 8  ;;  %s3628_s9 = smov 16   ;;  %vm1888_vm9 = vcmask 326656   ;;  %vm1921_vm10 = vcmask 392192   ;;  %vm1954_vm11 = vcmask 457728   ;;  %vm1987_vm12 = vcmask 523264  }
  0x11   : > { %v311_v3 = vsub.s32 0, %v310_v2  ;;  %v347_v4 = vsub.s32 1, %v310_v2  ;;  %v383_v5 = vsub.s32 2, %v310_v2  ;;  %v419_v6 = vsub.s32 3, %v310_v2  ;;  %s3689_s28 = scalar_lea.vmem %s5729_s0, %s3683_s25  ;;  %s3629_s16 = smov 32  }
  0x12   : > { %v280_v7 = vld [vmem:[%s3689_s28 + $0x20] sm:$0xff]  ;;  %v281_v8 = vld [vmem:[%s3689_s28 + $0x28] sm:$0xff]  ;;  %v282_v23 = vld [vmem:[%s3689_s28 + $0x30] sm:$0xff]  ;;  %s3630_s19 = smov 40   ;;  %s3631_s24 = smov 56   ;;  %vm2079_vm13 = vcmask 588800  }
  0x13   : > { %v3693_v9 = vrot.slane %v308_v1, %v311_v3  ;;  %v3695_v10 = vrot.slane %v308_v1, %v347_v4  ;;  %v3697_v11 = vrot.slane %v308_v1, %v383_v5  ;;  %v3699_v12 = vrot.slane %v308_v1, %v419_v6  ;;  %v276_v13 = vld [vmem:[%s3689_s28] sm:$0xff]  ;;  %v277_v14 = vld [vmem:[%s3689_s28 + $0x8] sm:$0xff]  ;;  %v283_v26 = vld [vmem:[%s3689_s28 + $0x38] sm:$0xff]  ;;  %s3632_s26 = smov 64   ;;  %s5586_s11 = scalar_lea.vmem %s5734_s5, %s3683_s25 }
  0x14   : > { %v278_v29 = vld [vmem:[%s3689_s28 + $0x10] sm:$0xff]  ;;  %v279_v34 = vld [vmem:[%s3689_s28 + $0x18] sm:$0xff]  ;;  %v284_v39 = vld [vmem:[%s3689_s28 + $0x40] sm:$0xff]  ;;  %vm2485_vm14 = vcmask 130112   ;;  %vm2661_vm15 = vcmask 58368  }
  0x15   : > { %5819 = vst [vmem:[#allocation2_spill] sm:$0xff] %v3695_v10  ;;  %v3704_v15 = vmul.f32 %v3693_v9, %v281_v8  ;;  %v389_v16 = vmul.f32 %v3697_v11, %v280_v7  ;;  %v390_v17 = vmul.f32 %v3697_v11, %v281_v8  ;;  %v3709_v18 = vmul.f32 %v3693_v9, %v280_v7  ;;  %v285_v44 = vld [vmem:[%s3689_s28 + $0x48] sm:$0xff]  ;;  %v286_v49 = vld [vmem:[%s3689_s28 + $0x50] sm:$0xff]  ;;  %v287_v54 = vld [vmem:[%s3689_s28 + $0x58] sm:$0xff] }
  0x16   : > { %v3712_v19 = vmul.f32 %v3693_v9, %v277_v14  ;;  %v385_v20 = vmul.f32 %v3697_v11, %v276_v13  ;;  %v386_v21 = vmul.f32 %v3697_v11, %v277_v14  ;;  %v3717_v22 = vmul.f32 %v3693_v9, %v276_v13  ;;  %v288_v63 = vld [vmem:[%s3689_s28 + $0x60] sm:$0xff]  ;;  %v289_v4 = vld [vmem:[%s3689_s28 + $0x68] sm:$0xff]  ;;  %v290_v13 = vld [vmem:[%s3689_s28 + $0x70] sm:$0xff] }
  0x17   : > { %v425_v24 = vadd.f32 %v3699_v12, %v389_v16  ;;  %v426_v25 = vadd.f32 %v3699_v12, %v390_v17  ;;  %v3727_v32 = vmul.f32 %v3693_v9, %v283_v26  ;;  %v391_v33 = vmul.f32 %v3697_v11, %v282_v23 }
  0x18   : > { %v421_v27 = vadd.f32 %v3699_v12, %v385_v20  ;;  %v422_v28 = vadd.f32 %v3699_v12, %v386_v21  ;;  %v392_v37 = vmul.f32 %v3697_v11, %v283_v26  ;;  %v3733_v38 = vmul.f32 %v3693_v9, %v282_v23  ;;  %v291_v21 = vld [vmem:[%s3689_s28 + $0x78] sm:$0xff] }
  0x19   : > { %v457_v30 = vmax.f32 %v425_v24, 0.0  ;;  %v458_v31 = vmax.f32 %v426_v25, 0.0  ;;  %v427_v41 = vadd.f32 %v3699_v12, %v391_v33  ;;  %v3738_v42 = vmul.f32 %v3693_v9, %v279_v34  ;;  %v293_v33 = vld [vmem:[%s3689_s28 + $0x88] sm:$0xff] }
  0x1a   : > { %v453_v35 = vmax.f32 %v421_v27, 0.0  ;;  %v454_v36 = vmax.f32 %v422_v28, 0.0  ;;  %v387_v43 = vmul.f32 %v3697_v11, %v278_v29  ;;  %v428_v46 = vadd.f32 %v3699_v12, %v392_v37  ;;  %v292_v27 = vld [vmem:[%s3689_s28 + $0x80] sm:$0xff] }
  0x1b   : > { %v2925_v40 = vpack.i.bf16 %v458_v31, %v457_v30  ;;  %v388_v47 = vmul.f32 %v3697_v11, %v279_v34  ;;  %v3745_v48 = vmul.f32 %v3693_v9, %v278_v29  ;;  %v459_v50 = vmax.f32 %v427_v41, 0.0 }
  0x1c   : > { %v2915_v45 = vpack.i.bf16 %v454_v36, %v453_v35  ;;  %v423_v51 = vadd.f32 %v3699_v12, %v387_v43  ;;  %v3751_v52 = vmul.f32 %v3693_v9, %v285_v44  ;;  %v393_v53 = vmul.f32 %v3697_v11, %v284_v39 }
  0x1d   : > { %2926 = vrot.lane.b32.xlu1 %v2925_v40, %s3623_s29  ;;  %v460_v55 = vmax.f32 %v428_v46, 0.0  ;;  %v424_v56 = vadd.f32 %v3699_v12, %v388_v47  ;;  %v394_v57 = vmul.f32 %v3697_v11, %v285_v44  ;;  %v3759_v58 = vmul.f32 %v3693_v9, %v284_v39  ;;  %v294_v39 = vld [vmem:[%s3689_s28 + $0x90] sm:$0xff] }
  0x1e   : > { %2916 = vrot.lane.b32.xlu0 %v2915_v45, %s3623_s29  ;;  %v455_v59 = vmax.f32 %v423_v51, 0.0  ;;  %v429_v60 = vadd.f32 %v3699_v12, %v393_v53  ;;  %v3763_v61 = vmul.f32 %v3693_v9, %v287_v54  ;;  %v395_v62 = vmul.f32 %v3697_v11, %v286_v49  ;;  %v295_v45 = vld [vmem:[%s3689_s28 + $0x98] sm:$0xff] }
  0x1f   : > { %v2930_v0 = vpack.i.bf16 %v460_v55, %v459_v50  ;;  %v456_v1 = vmax.f32 %v424_v56, 0.0  ;;  %v430_v2 = vadd.f32 %v3699_v12, %v394_v57  ;;  %v396_v3 = vmul.f32 %v3697_v11, %v287_v54  ;;  %v296_v56 = vld [vmem:[%s3689_s28 + $0xa0] sm:$0xff] }
  0x20   : > { %v461_v5 = vmax.f32 %v429_v60, 0.0  ;;  %v431_v6 = vadd.f32 %v3699_v12, %v395_v62  ;;  %v3772_v7 = vmul.f32 %v3693_v9, %v286_v49  ;;  %v3775_v8 = vmul.f32 %v3693_v9, %v289_v4 }
  0x21   : > { %2931 = vrot.lane.b32.xlu1 %v2930_v0, %s3623_s29  ;;  %v2920_v14 = vpack.i.bf16 %v456_v1, %v455_v59  ;;  %v462_v16 = vmax.f32 %v430_v2, 0.0  ;;  %v432_v17 = vadd.f32 %v3699_v12, %v396_v3  ;;  %v397_v20 = vmul.f32 %v3697_v11, %v288_v63 }
  0x22   : > { %v463_v23 = vmax.f32 %v431_v6, 0.0  ;;  %v398_v24 = vmul.f32 %v3697_v11, %v289_v4  ;;  %v3784_v25 = vmul.f32 %v3693_v9, %v288_v63  ;;  %v3787_v26 = vmul.f32 %v3693_v9, %v291_v21  ;;  %v297_v63 = vld [vmem:[%s3689_s28 + $0xa8] sm:$0xff]  ;;  %v298_v4 = vld [vmem:[%s3689_s28 + $0xb0] sm:$0xff] }
  0x23   : > { %2921 = vrot.lane.b32.xlu0 %v2920_v14, %s3623_s29  ;;  %v2935_v28 = vpack.i.bf16 %v462_v16, %v461_v5  ;;  %v464_v29 = vmax.f32 %v432_v17, 0.0  ;;  %v433_v30 = vadd.f32 %v3699_v12, %v397_v20  ;;  %v399_v31 = vmul.f32 %v3697_v11, %v290_v13  ;;  %v299_v16 = vld [vmem:[%s3689_s28 + $0xb8] sm:$0xff] }
  0x24   : > { %v434_v34 = vadd.f32 %v3699_v12, %v398_v24  ;;  %v400_v35 = vmul.f32 %v3697_v11, %v291_v21  ;;  %v3797_v36 = vmul.f32 %v3693_v9, %v290_v13  ;;  %v3800_v37 = vmul.f32 %v3693_v9, %v293_v33  ;;  %v300_v24 = vld [vmem:[%s3689_s28 + $0xc0] sm:$0xff] }
  0x25   : > { %v2940_v40 = vpack.i.bf16 %v464_v29, %v463_v23  ;;  %v465_v41 = vmax.f32 %v433_v30, 0.0  ;;  %v435_v43 = vadd.f32 %v3699_v12, %v399_v31  ;;  %v401_v44 = vmul.f32 %v3697_v11, %v292_v27  ;;  %v301_v31 = vld [vmem:[%s3689_s28 + $0xc8] sm:$0xff] }
  0x26   : > { %v466_v46 = vmax.f32 %v434_v34, 0.0  ;;  %v436_v47 = vadd.f32 %v3699_v12, %v400_v35  ;;  %v402_v49 = vmul.f32 %v3697_v11, %v293_v33  ;;  %v3809_v50 = vmul.f32 %v3693_v9, %v292_v27 }
  0x27   : > { %2936 = vrot.lane.b32.xlu0 %v2935_v28, %s3623_s29  ;;  %2941 = vrot.lane.b32.xlu1 %v2940_v40, %s3623_s29  ;;  %v467_v51 = vmax.f32 %v435_v43, 0.0  ;;  %v437_v53 = vadd.f32 %v3699_v12, %v401_v44  ;;  %v3815_v54 = vmul.f32 %v3693_v9, %v295_v45  ;;  %v403_v55 = vmul.f32 %v3697_v11, %v294_v39  ;;  %v302_v40 = vld [vmem:[%s3689_s28 + $0xd0] sm:$0xff] }
  0x28   : > { %v2945_v57 = vpack.i.bf16 %v466_v46, %v465_v41  ;;  %v468_v59 = vmax.f32 %v436_v47, 0.0  ;;  %v438_v60 = vadd.f32 %v3699_v12, %v402_v49  ;;  %v404_v62 = vmul.f32 %v3697_v11, %v295_v45  ;;  %v303_v46 = vld [vmem:[%s3689_s28 + $0xd8] sm:$0xff] }
  0x29   : > { %v469_v0 = vmax.f32 %v437_v53, 0.0  ;;  %v439_v1 = vadd.f32 %v3699_v12, %v403_v55  ;;  %v3824_v2 = vmul.f32 %v3693_v9, %v294_v39  ;;  %v3827_v3 = vmul.f32 %v3693_v9, %v297_v63 }
  0x2a   : > { %v2950_v5 = vpack.i.bf16 %v468_v59, %v467_v51  ;;  %v470_v6 = vmax.f32 %v438_v60, 0.0  ;;  %v440_v13 = vadd.f32 %v3699_v12, %v404_v62  ;;  %v405_v14 = vmul.f32 %v3697_v11, %v296_v56  ;;  %v304_v60 = vld [vmem:[%s3689_s28 + $0xe0] sm:$0xff] }
  0x2b   : > { %2946 = vrot.lane.b32.xlu0 %v2945_v57, %s3623_s29  ;;  %v471_v17 = vmax.f32 %v439_v1, 0.0  ;;  %v406_v20 = vmul.f32 %v3697_v11, %v297_v63  ;;  %v3836_v21 = vmul.f32 %v3693_v9, %v296_v56  ;;  %v3839_v23 = vmul.f32 %v3693_v9, %v299_v16 }
  0x2c   : > { %2951 = vrot.lane.b32.xlu1 %v2950_v5, %s3623_s29  ;;  %v2955_v27 = vpack.i.bf16 %v470_v6, %v469_v0  ;;  %v472_v28 = vmax.f32 %v440_v13, 0.0  ;;  %v441_v29 = vadd.f32 %v3699_v12, %v405_v14  ;;  %v407_v30 = vmul.f32 %v3697_v11, %v298_v4 }
  0x2d   : > { %v442_v33 = vadd.f32 %v3699_v12, %v406_v20  ;;  %v408_v34 = vmul.f32 %v3697_v11, %v299_v16  ;;  %v3849_v35 = vmul.f32 %v3693_v9, %v298_v4  ;;  %v3852_v39 = vmul.f32 %v3693_v9, %v301_v31  ;;  %v305_v4 = vld [vmem:[%s3689_s28 + $0xe8] sm:$0xff] }
  0x2e   : > { %v2960_v41 = vpack.i.bf16 %v472_v28, %v471_v17  ;;  %v473_v43 = vmax.f32 %v441_v29, 0.0  ;;  %v443_v44 = vadd.f32 %v3699_v12, %v407_v30  ;;  %v409_v45 = vmul.f32 %v3697_v11, %v300_v24 }
  0x2f   : > { %2956 = vrot.lane.b32.xlu0 %v2955_v27, %s3623_s29  ;;  %v474_v47 = vmax.f32 %v442_v33, 0.0  ;;  %v444_v49 = vadd.f32 %v3699_v12, %v408_v34  ;;  %v410_v51 = vmul.f32 %v3697_v11, %v301_v31  ;;  %v3862_v53 = vmul.f32 %v3693_v9, %v300_v24  ;;  %v306_v34 = vld [vmem:[%s3689_s28 + $0xf0] sm:$0xff] }
  0x30   : > { %2961 = vrot.lane.b32.xlu1 %v2960_v41, %s3623_s29  ;;  %v475_v55 = vmax.f32 %v443_v44, 0.0  ;;  %v445_v56 = vadd.f32 %v3699_v12, %v409_v45  ;;  %v3867_v57 = vmul.f32 %v3693_v9, %v303_v46  ;;  %v411_v59 = vmul.f32 %v3697_v11, %v302_v40 }
  0x31   : > { %v2965_v62 = vpack.i.bf16 %v474_v47, %v473_v43  ;;  %v476_v63 = vmax.f32 %v444_v49, 0.0  ;;  %v446_v0 = vadd.f32 %v3699_v12, %v410_v51  ;;  %v412_v1 = vmul.f32 %v3697_v11, %v303_v46 }
  0x32   : > { %v477_v5 = vmax.f32 %v445_v56, 0.0  ;;  %v447_v6 = vadd.f32 %v3699_v12, %v411_v59  ;;  %v3876_v13 = vmul.f32 %v3693_v9, %v302_v40  ;;  %v3879_v14 = vmul.f32 %v3693_v9, %v305_v4  ;;  %v307_v40 = vld [vmem:[%s3689_s28 + $0xf8] sm:$0xff] }
  0x33   : > { %2966 = vrot.lane.b32.xlu0 %v2965_v62, %s3623_s29  ;;  %v2970_v16 = vpack.i.bf16 %v476_v63, %v475_v55  ;;  %v478_v17 = vmax.f32 %v446_v0, 0.0  ;;  %v448_v20 = vadd.f32 %v3699_v12, %v412_v1  ;;  %v413_v24 = vmul.f32 %v3697_v11, %v304_v60 }
  0x34   : > { %v479_v27 = vmax.f32 %v447_v6, 0.0  ;;  %v414_v28 = vmul.f32 %v3697_v11, %v305_v4  ;;  %v3886_v29 = vmul.f32 %v3693_v9, %v304_v60  ;;  %v3895_v45 = vmul.f32 %v3693_v9, %v307_v40 }
  0x35   : > { %2971 = vrot.lane.b32.xlu1 %v2970_v16, %s3623_s29  ;;  %v2975_v30 = vpack.i.bf16 %v478_v17, %v477_v5  ;;  %v480_v31 = vmax.f32 %v448_v20, 0.0  ;;  %v449_v33 = vadd.f32 %v3699_v12, %v413_v24  ;;  %v415_v47 = vmul.f32 %v3697_v11, %v306_v34 }
  0x36   : > { %v450_v41 = vadd.f32 %v3699_v12, %v414_v28  ;;  %5820 = vst [vmem:[#allocation3_spill] sm:$0xff] %v3895_v45  ;;  %v416_v49 = vmul.f32 %v3697_v11, %v307_v40  ;;  %v3900_v51 = vmul.f32 %v3693_v9, %v306_v34  ;;  %v354_v11 = vadd.f32 %v3695_v10, %v3704_v15 }
  0x37   : > { %2976 = vrot.lane.b32.xlu0 %v2975_v30, %s3623_s29  ;;  %v2980_v43 = vpack.i.bf16 %v480_v31, %v479_v27  ;;  %v481_v44 = vmax.f32 %v449_v33, 0.0  ;;  %v451_v56 = vadd.f32 %v3699_v12, %v415_v47  ;;  %v353_v9 = vadd.f32 %v3695_v10, %v3709_v18 }
  0x38   : > { %v482_v46 = vmax.f32 %v450_v41, 0.0  ;;  %5821 = vst [vmem:[#allocation4_spill] sm:$0xff] %v3900_v51  ;;  %v452_v59 = vadd.f32 %v3699_v12, %v416_v49  ;;  %v350_v0 = vadd.f32 %v3695_v10, %v3712_v19  ;;  %v349_v12 = vadd.f32 %v3695_v10, %v3717_v22 }
  0x39   : > { %2981 = vrot.lane.b32.xlu1 %v2980_v43, %s3623_s29  ;;  %v483_v60 = vmax.f32 %v451_v56, 0.0  ;;  %v355_v1 = vadd.f32 %v3695_v10, %v3733_v38  ;;  %v356_v4 = vadd.f32 %v3695_v10, %v3727_v32  ;;  %v351_v5 = vadd.f32 %v3695_v10, %v3745_v48 }
  0x3a   : > { %v2985_v55 = vpack.i.bf16 %v482_v46, %v481_v44  ;;  %v484_v62 = vmax.f32 %v452_v59, 0.0  ;;  %v352_v15 = vadd.f32 %v3695_v10, %v3738_v42  ;;  %v3925_v18 = vadd.f32 %v3695_v10, %v3759_v58 }
  0x3b   : > { %v3929_v19 = vadd.f32 %v3695_v10, %v3751_v52  ;;  %v3933_v22 = vadd.f32 %v3695_v10, %v3772_v7  ;;  %v3937_v32 = vadd.f32 %v3695_v10, %v3763_v61  ;;  %v3941_v38 = vadd.f32 %v3695_v10, %v3784_v25 }
  0x3c   : > { %2986 = vrot.lane.b32.xlu0 %v2985_v55, %s3623_s29  ;;  %v2990_v63 = vpack.i.bf16 %v484_v62, %v483_v60  ;;  %v3945_v42 = vadd.f32 %v3695_v10, %v3775_v8  ;;  %v3949_v48 = vadd.f32 %v3695_v10, %v3797_v36  ;;  %v3953_v52 = vadd.f32 %v3695_v10, %v3787_v26 }
  0x3d   : > { %v5736_v58 = vmov 0.0   ;;  %v3960_v7 = vadd.f32 %v3695_v10, %v3809_v50  ;;  %v3964_v8 = vadd.f32 %v3695_v10, %v3800_v37  ;;  %v3968_v36 = vadd.f32 %v3695_v10, %v3824_v2 }
  0x3e   : > { %2991 = vrot.lane.b32.xlu1 %v2990_v63, %s3623_s29  ;;  %v3956_v61 = vrot.slane %v5736_v58, 1  ;;  %v3972_v26 = vadd.f32 %v3695_v10, %v3815_v54  ;;  %v3976_v6 = vadd.f32 %v3695_v10, %v3836_v21  ;;  %v3980_v50 = vadd.f32 %v3695_v10, %v3827_v3 }
  0x3f   : > { %v3984_v20 = vadd.f32 %v3695_v10, %v3849_v35  ;;  %v3988_v2 = vadd.f32 %v3695_v10, %v3839_v23  ;;  %v3992_v21 = vadd.f32 %v3695_v10, %v3862_v53  ;;  %v3996_v3 = vadd.f32 %v3695_v10, %v3852_v39 }
  0x40   : > { %5822 = vst [vmem:[#allocation5_spill] sm:$0xff] %v3956_v61  ;;  %v4002_v35 = vadd.f32 %v3695_v10, %v3876_v13  ;;  %v4006_v23 = vadd.f32 %v3695_v10, %v3867_v57  ;;  %v4012_v41 = vadd.f32 %v3695_v10, %v3886_v29  ;;  %v4016_v13 = vadd.f32 %v3695_v10, %v3879_v14 }
  0x8f   : > { %v2927_v25 = vpop.permute.xlu1 %2926 }
  0x90   : > { %v2929_v16 = vunpack.i.h.bf16 %v2927_v25  ;;  %v2928_v37 = vunpack.i.l.bf16 %v2927_v25  ;;  %v2917_v17 = vpop.permute.xlu0 %2916 }
  0x91   : > { %v2919_v54 = vunpack.i.h.bf16 %v2917_v17  ;;  %v2918_v24 = vunpack.i.l.bf16 %v2917_v17 }
  0x92   : > { %v619_v27 = vsel %vm613_vm0, %v354_v11, %v2929_v16  ;;  %v618_v28 = vsel %vm613_vm0, %v353_v9, %v2928_v37 }
  0x93   : > { %v686_v30 = vrot.slane %v619_v27, 7  ;;  %v685_v31 = vrot.slane %v618_v28, 7  ;;  %v615_v53 = vsel %vm613_vm0, %v350_v0, %v2919_v54  ;;  %v614_v33 = vsel %vm613_vm0, %v349_v12, %v2918_v24  ;;  %v2932_v40 = vpop.permute.xlu1 %2931 }
  0x94   : > { %v680_v39 = vrot.slane %v615_v53, 7  ;;  %v679_v34 = vrot.slane %v614_v33, 7  ;;  %v2934_v43 = vunpack.i.h.bf16 %v2932_v40  ;;  %v2933_v44 = vunpack.i.l.bf16 %v2932_v40 }
  0x95   : > { %v4019_v57 = vsel %vm678_vm1, %v686_v30, 0.0  ;;  %v4022_v46 = vsel %vm678_vm1, %v685_v31, %v686_v30  ;;  %v2922_v49 = vpop.permute.xlu0 %2921  ;;  %v4034_v14 = vsel %vm678_vm1, 0.0, %v685_v31 }
  0x96   : > { %5823 = vst [vmem:[#allocation6_spill] sm:$0xff] %v4022_v46  ;;  %v4025_v47 = vsel %vm678_vm1, %v680_v39, 0.0  ;;  %v4028_v55 = vsel %vm678_vm1, %v679_v34, %v680_v39  ;;  %v4031_v29 = vsel %vm678_vm1, 0.0, %v679_v34  ;;  %5826 = vst [vmem:[#allocation9_spill] sm:$0xff] %v4034_v14  ;;  %v621_v56 = vsel %vm613_vm0, %v356_v4, %v2934_v43 }
  0x97   : > { %5824 = vst [vmem:[#allocation7_spill] sm:$0xff] %v4028_v55  ;;  %5825 = vst [vmem:[#allocation8_spill] sm:$0xff] %v4031_v29  ;;  %v620_v59 = vsel %vm613_vm0, %v355_v1, %v2933_v44  ;;  %v2924_v60 = vunpack.i.h.bf16 %v2922_v49  ;;  %v2923_v62 = vunpack.i.l.bf16 %v2922_v49  ;;  %v689_v63 = vrot.slane %v621_v56, 7 }
  0x98   : > { %v688_v11 = vrot.slane %v620_v59, 7  ;;  %v2995_v9 = vpack.i.bf16 %v4028_v55, %v4031_v29  ;;  %v4042_v0 = vpack.i.bf16 %v4022_v46, %v4034_v14  ;;  %v840_v16 = vrot.slane %v4031_v29, 1 }
  0x99   : > { %v617_v12 = vsel %vm613_vm0, %v352_v15, %v2924_v60  ;;  %v616_v25 = vsel %vm613_vm0, %v351_v5, %v2923_v62  ;;  %v4048_v4 = vsel %vm678_vm1, %v689_v63, 0.0  ;;  %v2937_v17 = vpop.permute.xlu0 %2936  ;;  %v2942_v54 = vpop.permute.xlu1 %2941 }
  0x9a   : > { %v683_v1 = vrot.slane %v617_v12, 7  ;;  %v682_v37 = vrot.slane %v616_v25, 7  ;;  %2996 = vrot.lane.b32.xlu0 %v2995_v9, %s3625_s30  ;;  %v4052_v24 = vsel %vm678_vm1, %v688_v11, %v689_v63  ;;  %v2939_v27 = vunpack.i.h.bf16 %v2937_v17 }
  0x9b   : > { %5827 = vst [vmem:[#allocation10_spill] sm:$0xff] %v4052_v24  ;;  %v2938_v28 = vunpack.i.l.bf16 %v2937_v17  ;;  %v2944_v15 = vunpack.i.h.bf16 %v2942_v54  ;;  %v2943_v30 = vunpack.i.l.bf16 %v2942_v54  ;;  %v4064_v33 = vsel %vm678_vm1, 0.0, %v688_v11 }
  0x9c   : > { %v4055_v5 = vsel %vm678_vm1, %v683_v1, 0.0  ;;  %v4058_v31 = vsel %vm678_vm1, %v682_v37, %v683_v1  ;;  %v4061_v53 = vsel %vm678_vm1, 0.0, %v682_v37  ;;  %5830 = vst [vmem:[#allocation13_spill] sm:$0xff] %v4064_v33  ;;  %v623_v39 = vsel %vm613_vm0, %v3929_v19, %v2939_v27 }
  0x9d   : > { %5828 = vst [vmem:[#allocation11_spill] sm:$0xff] %v4058_v31  ;;  %5829 = vst [vmem:[#allocation12_spill] sm:$0xff] %v4061_v53  ;;  %v622_v34 = vsel %vm613_vm0, %v3925_v18, %v2938_v28  ;;  %v625_v40 = vsel %vm613_vm0, %v3937_v32, %v2944_v15  ;;  %v624_v43 = vsel %vm613_vm0, %v3933_v22, %v2943_v30  ;;  %v692_v44 = vrot.slane %v623_v39, 7  ;;  %v2947_v60 = vpop.permute.xlu0 %2946 }
  0x9e   : > { %v691_v49 = vrot.slane %v622_v34, 7  ;;  %v695_v56 = vrot.slane %v625_v40, 7  ;;  %v694_v59 = vrot.slane %v624_v43, 7  ;;  %3006 = vrot.lane.b32.xlu0 %v4042_v0, %s3625_s30  ;;  %v2949_v62 = vunpack.i.h.bf16 %v2947_v60  ;;  %v2952_v63 = vpop.permute.xlu1 %2951 }
  0x9f   : > { %v2948_v19 = vunpack.i.l.bf16 %v2947_v60  ;;  %v3000_v18 = vpack.i.bf16 %v4058_v31, %v4061_v53  ;;  %v4080_v32 = vpack.i.bf16 %v4052_v24, %v4064_v33  ;;  %v4083_v22 = vsel %vm678_vm1, %v692_v44, 0.0 }
  0xa0   : > { %v4086_v11 = vsel %vm678_vm1, %v695_v56, 0.0  ;;  %v2954_v9 = vunpack.i.h.bf16 %v2952_v63  ;;  %v2953_v12 = vunpack.i.l.bf16 %v2952_v63  ;;  %v627_v25 = vsel %vm613_vm0, %v3945_v42, %v2949_v62 }
  0xa1   : > { %v626_v1 = vsel %vm613_vm0, %v3941_v38, %v2948_v19  ;;  %3001 = vrot.lane.b32.xlu1 %v3000_v18, %s3625_s30  ;;  %v4094_v37 = vsel %vm678_vm1, %v691_v49, %v692_v44  ;;  %v4097_v17 = vsel %vm678_vm1, 0.0, %v691_v49  ;;  %v698_v54 = vrot.slane %v627_v25, 7  ;;  %v2957_v43 = vpop.permute.xlu0 %2956 }
  0xa2   : > { %5831 = vst [vmem:[#allocation14_spill] sm:$0xff] %v4094_v37  ;;  %5832 = vst [vmem:[#allocation15_spill] sm:$0xff] %v4097_v17  ;;  %v697_v27 = vrot.slane %v626_v1, 7  ;;  %v629_v28 = vsel %vm613_vm0, %v3953_v52, %v2954_v9  ;;  %v628_v15 = vsel %vm613_vm0, %v3949_v48, %v2953_v12  ;;  %v4105_v38 = vpack.i.bf16 %v4094_v37, %v4097_v17 }
  0xa3   : > { %v701_v42 = vrot.slane %v629_v28, 7  ;;  %v700_v30 = vrot.slane %v628_v15, 7  ;;  %v4108_v39 = vsel %vm678_vm1, %v694_v59, %v695_v56  ;;  %v4111_v34 = vsel %vm678_vm1, %v698_v54, 0.0  ;;  %v2962_v28 = vpop.permute.xlu1 %2961 }
  0xa4   : > { %5833 = vst [vmem:[#allocation16_spill] sm:$0xff] %v4105_v38  ;;  %5834 = vst [vmem:[#allocation17_spill] sm:$0xff] %v4108_v39  ;;  %v4114_v40 = vsel %vm678_vm1, 0.0, %v694_v59  ;;  %v4117_v52 = vsel %vm678_vm1, %v697_v27, %v698_v54  ;;  %v4120_v48 = vsel %vm678_vm1, 0.0, %v697_v27  ;;  %3016 = vrot.lane.b32.xlu0 %v4105_v38, %s3625_s30  ;;  %v841_v62 = vrot.slane %v4028_v55, 1 }
  0xa5   : > { %5835 = vst [vmem:[#allocation18_spill] sm:$0xff] %v4114_v40  ;;  %5836 = vst [vmem:[#allocation19_spill] sm:$0xff] %v4117_v52  ;;  %v4123_v44 = vsel %vm678_vm1, %v701_v42, 0.0  ;;  %v4126_v49 = vsel %vm678_vm1, %v700_v30, %v701_v42  ;;  %v4129_v56 = vsel %vm678_vm1, 0.0, %v700_v30  ;;  %3011 = vrot.lane.b32.xlu1 %v4080_v32, %s3625_s30  ;;  %v4137_v59 = vpack.i.bf16 %v4108_v39, %v4114_v40 }
  0xa6   : > { %5837 = vst [vmem:[#allocation20_spill] sm:$0xff] %v4120_v48  ;;  %v4141_v60 = vpack.i.bf16 %v4117_v52, %v4120_v48  ;;  %v2959_v19 = vunpack.i.h.bf16 %v2957_v43  ;;  %v2958_v63 = vunpack.i.l.bf16 %v2957_v43  ;;  %v843_v9 = vrot.slane %v4025_v47, 1 }
  0xa7   : > { %5838 = vst [vmem:[#allocation21_spill] sm:$0xff] %v4137_v59  ;;  %v845_v12 = vrot.slane %v4061_v53, 1  ;;  %v4149_v25 = vsel %vm837_vm2, %v840_v16, %v841_v62  ;;  %v846_v1 = vrot.slane %v4058_v31, 1  ;;  %v848_v54 = vrot.slane %v4055_v5, 1  ;;  %v2972_v51 = vpop.permute.xlu1 %2971 }
  0xa8   : > { %5839 = vst [vmem:[#allocation22_spill] sm:$0xff] %v4141_v60  ;;  %5840 = vst [vmem:[#allocation23_spill] sm:$0xff] %v4149_v25  ;;  %v850_v27 = vrot.slane %v4034_v14, 1  ;;  %3026 = vrot.lane.b32.xlu0 %v4141_v60, %s3625_s30  ;;  %v3045_v15 = vpack.i.bf16 %v4149_v25, %v3956_v61  ;;  %v631_v16 = vsel %vm613_vm0, %v3964_v8, %v2959_v19  ;;  %v851_v30 = vrot.slane %v4022_v46, 1  ;;  %v2967_v60 = vpop.permute.xlu0 %2966 }
  0xa9   : > { %3021 = vrot.lane.b32.xlu1 %v4137_v59, %s3625_s30  ;;  %v630_v42 = vsel %vm613_vm0, %v3960_v7, %v2958_v63  ;;  %v704_v43 = vrot.slane %v631_v16, 7  ;;  %v4166_v38 = vsel %vm837_vm2, %v841_v62, %v843_v9  ;;  %v4169_v59 = vsel %vm837_vm2, %v845_v12, %v846_v1 }
  0xaa   : > { %v703_v58 = vrot.slane %v630_v42, 7  ;;  %5841 = vst [vmem:[#allocation24_spill] sm:$0xff] %v4166_v38  ;;  %v3050_v61 = vpack.i.bf16 %v4169_v59, %v4166_v38  ;;  %v4174_v45 = vsel %vm837_vm2, %v846_v1, %v848_v54  ;;  %v4177_v8 = vsel %vm837_vm2, %v850_v27, %v851_v30 }
  0xab   : > { %5842 = vst [vmem:[#allocation25_spill] sm:$0xff] %v4177_v8  ;;  %v2964_v7 = vunpack.i.h.bf16 %v2962_v28  ;;  %v4180_v19 = vsel %vm678_vm1, %v704_v43, 0.0  ;;  %v3055_v9 = vpack.i.bf16 %v4177_v8, %v4174_v45  ;;  %v2963_v1 = vunpack.i.l.bf16 %v2962_v28 }
  0xac   : > { %v4183_v62 = vsel %vm678_vm1, %v703_v58, %v704_v43  ;;  %v4186_v63 = vsel %vm678_vm1, 0.0, %v703_v58  ;;  %3036 = vrot.lane.b32.xlu0 %v4042_v0, %s3626_s7  ;;  %v2969_v54 = vunpack.i.h.bf16 %v2967_v60  ;;  %v2968_v27 = vunpack.i.l.bf16 %v2967_v60 }
  0xad   : > { %3031 = vrot.lane.b32.xlu1 %v3000_v18, %s3626_s7  ;;  %v633_v12 = vsel %vm613_vm0, %v3972_v26, %v2964_v7  ;;  %v853_v42 = vrot.slane %v4019_v57, 1  ;;  %v855_v58 = vrot.slane %v4064_v33, 1  ;;  %v856_v43 = vrot.slane %v4052_v24, 1 }
  0xae   : > { %v707_v16 = vrot.slane %v633_v12, 7  ;;  %v632_v10 = vsel %vm613_vm0, %v3968_v36, %v2963_v1  ;;  %v635_v18 = vsel %vm613_vm0, %v3980_v50, %v2969_v54  ;;  %v634_v0 = vsel %vm613_vm0, %v3976_v6, %v2968_v27  ;;  %v2977_v1 = vpop.permute.xlu0 %2976 }
  0xaf   : > { %v858_v26 = vrot.slane %v4048_v4, 1  ;;  %v706_v28 = vrot.slane %v632_v10, 7  ;;  %v710_v7 = vrot.slane %v635_v18, 7  ;;  %v709_v12 = vrot.slane %v634_v0, 7 }
  0xb0   : > { %v4206_v60 = vsel %vm678_vm1, %v707_v16, 0.0  ;;  %3046 = vrot.lane.b32.xlu0 %v3045_v15, %s3627_s8  ;;  %v4212_v36 = vsel %vm837_vm2, %v851_v30, %v853_v42  ;;  %v4215_v6 = vsel %vm837_vm2, %v855_v58, %v856_v43  ;;  %v860_v10 = vrot.slane %v4097_v17, 1 }
  0xb1   : > { %3041 = vrot.lane.b32.xlu1 %v4080_v32, %s3626_s7  ;;  %5843 = vst [vmem:[#allocation26_spill] sm:$0xff] %v4212_v36  ;;  %5844 = vst [vmem:[#allocation27_spill] sm:$0xff] %v4215_v6  ;;  %v4218_v50 = vsel %vm837_vm2, %v856_v43, %v858_v26  ;;  %v4222_v54 = vsel %vm678_vm1, %v706_v28, %v707_v16  ;;  %v4225_v32 = vsel %vm678_vm1, 0.0, %v706_v28  ;;  %v4228_v15 = vsel %vm678_vm1, %v710_v7, 0.0 }
  0xb2   : > { %5845 = vst [vmem:[#allocation28_spill] sm:$0xff] %v4218_v50  ;;  %5846 = vst [vmem:[#allocation29_spill] sm:$0xff] %v4222_v54  ;;  %v4231_v30 = vsel %vm678_vm1, %v709_v12, %v710_v7  ;;  %v4234_v27 = vsel %vm678_vm1, 0.0, %v709_v12  ;;  %v3060_v42 = vpack.i.bf16 %v4215_v6, %v4212_v36  ;;  %v861_v58 = vrot.slane %v4094_v37, 1 }
  0xb3   : > { %5847 = vst [vmem:[#allocation30_spill] sm:$0xff] %v4225_v32  ;;  %5848 = vst [vmem:[#allocation31_spill] sm:$0xff] %v4231_v30  ;;  %v2974_v43 = vunpack.i.h.bf16 %v2972_v51  ;;  %v2973_v16 = vunpack.i.l.bf16 %v2972_v51  ;;  %v2979_v18 = vunpack.i.h.bf16 %v2977_v1  ;;  %v2978_v0 = vunpack.i.l.bf16 %v2977_v1 }
  0xb4   : > { %5849 = vst [vmem:[#allocation32_spill] sm:$0xff] %v4234_v27  ;;  %v863_v26 = vrot.slane %v4083_v22, 1  ;;  %3056 = vrot.lane.b32.xlu0 %v3055_v9, %s3627_s8  ;;  %v4243_v28 = vsel %vm837_vm2, %v860_v10, %v861_v58  ;;  %v865_v12 = vrot.slane %v4114_v40, 1  ;;  %v866_v6 = vrot.slane %v4108_v39, 1 }
  0xb5   : > { %3051 = vrot.lane.b32.xlu1 %v3050_v61, %s3627_s8  ;;  %5850 = vst [vmem:[#allocation33_spill] sm:$0xff] %v4243_v28  ;;  %v637_v7 = vsel %vm613_vm0, %v3988_v2, %v2974_v43  ;;  %v3065_v51 = vpack.i.bf16 %v4243_v28, %v4218_v50  ;;  %v636_v36 = vsel %vm613_vm0, %v3984_v20, %v2973_v16  ;;  %v868_v20 = vrot.slane %v4086_v11, 1  ;;  %v2982_v16 = vpop.permute.xlu1 %2981  ;;  %v2987_v28 = vpop.permute.xlu0 %2986 }
  0xb6   : > { %v713_v1 = vrot.slane %v637_v7, 7  ;;  %v639_v61 = vsel %vm613_vm0, %v3996_v3, %v2979_v18  ;;  %v712_v9 = vrot.slane %v636_v36, 7  ;;  %v638_v8 = vsel %vm613_vm0, %v3992_v21, %v2978_v0 }
  0xb7   : > { %v716_v10 = vrot.slane %v639_v61, 7  ;;  %v4258_v2 = vsel %vm837_vm2, %v861_v58, %v863_v26  ;;  %v715_v38 = vrot.slane %v638_v8, 7  ;;  %v4264_v7 = vsel %vm837_vm2, %v865_v12, %v866_v6 }
  0xb8   : > { %5851 = vst [vmem:[#allocation34_spill] sm:$0xff] %v4258_v2  ;;  %v4261_v43 = vsel %vm678_vm1, %v713_v1, 0.0  ;;  %5852 = vst [vmem:[#allocation35_spill] sm:$0xff] %v4264_v7  ;;  %3066 = vrot.lane.b32.xlu0 %v3065_v51, %s3627_s8  ;;  %v4270_v21 = vsel %vm678_vm1, %v712_v9, %v713_v1  ;;  %v4273_v3 = vsel %vm678_vm1, 0.0, %v712_v9  ;;  %v3070_v8 = vpack.i.bf16 %v4264_v7, %v4258_v2 }
  0xb9   : > { %3061 = vrot.lane.b32.xlu1 %v3060_v42, %s3627_s8  ;;  %5853 = vst [vmem:[#allocation36_spill] sm:$0xff] %v4270_v21  ;;  %5854 = vst [vmem:[#allocation37_spill] sm:$0xff] %v4273_v3  ;;  %v4276_v36 = vsel %vm678_vm1, %v716_v10, 0.0  ;;  %v4281_v58 = vsel %vm678_vm1, %v715_v38, %v716_v10  ;;  %v4284_v18 = vsel %vm678_vm1, 0.0, %v715_v38  ;;  %v4287_v42 = vsel %vm837_vm2, %v866_v6, %v868_v20 }
  0xba   : > { %5855 = vst [vmem:[#allocation38_spill] sm:$0xff] %v4281_v58  ;;  %5856 = vst [vmem:[#allocation39_spill] sm:$0xff] %v4284_v18  ;;  %v870_v0 = vrot.slane %v4120_v48, 1  ;;  %v871_v26 = vrot.slane %v4117_v52, 1  ;;  %v2984_v12 = vunpack.i.h.bf16 %v2982_v16  ;;  %v2983_v51 = vunpack.i.l.bf16 %v2982_v16 }
  0xbb   : > { %5857 = vst [vmem:[#allocation40_spill] sm:$0xff] %v4287_v42  ;;  %v2989_v1 = vunpack.i.h.bf16 %v2987_v28  ;;  %v2988_v61 = vunpack.i.l.bf16 %v2987_v28  ;;  %v873_v9 = vrot.slane %v4111_v34, 1  ;;  %v875_v7 = vrot.slane %v4129_v56, 1 }
  0xbc   : > { %v876_v10 = vrot.slane %v4126_v49, 1  ;;  %v4296_v38 = vsel %vm837_vm2, %v870_v0, %v871_v26  ;;  %v641_v6 = vsel %vm613_vm0, %v4006_v23, %v2984_v12  ;;  %v640_v20 = vsel %vm613_vm0, %v4002_v35, %v2983_v51 }
  0xbd   : > { %3071 = vrot.lane.b32.xlu1 %v3070_v8, %s3627_s8  ;;  %5858 = vst [vmem:[#allocation41_spill] sm:$0xff] %v4296_v38  ;;  %v643_v28 = vsel %vm613_vm0, %v4016_v13, %v2989_v1  ;;  %v3075_v16 = vpack.i.bf16 %v4296_v38, %v4287_v42  ;;  %v719_v2 = vrot.slane %v641_v6, 7  ;;  %v718_v50 = vrot.slane %v640_v20, 7 }
  0xbe   : > { %v722_v25 = vrot.slane %v643_v28, 7  ;;  %v642_v8 = vsel %vm613_vm0, %v4012_v41, %v2988_v61  ;;  %v4309_v0 = vsel %vm837_vm2, %v871_v26, %v873_v9  ;;  %v4312_v23 = vsel %vm837_vm2, %v875_v7, %v876_v10 }
  0xbf   : > { %5859 = vst [vmem:[#allocation42_spill] sm:$0xff] %v4309_v0  ;;  %5860 = vst [vmem:[#allocation43_spill] sm:$0xff] %v4312_v23  ;;  %v878_v35 = vrot.slane %v4123_v44, 1  ;;  %3076 = vrot.lane.b32.xlu0 %v3075_v16, %s3627_s8  ;;  %v4317_v13 = vsel %vm678_vm1, %v719_v2, 0.0  ;;  %v4320_v12 = vsel %vm678_vm1, %v718_v50, %v719_v2  ;;  %v4323_v51 = vsel %vm678_vm1, 0.0, %v718_v50 }
  0xc0   : > { %5861 = vst [vmem:[#allocation44_spill] sm:$0xff] %v4317_v13  ;;  %5862 = vst [vmem:[#allocation45_spill] sm:$0xff] %v4320_v12  ;;  %v721_v41 = vrot.slane %v642_v8, 7  ;;  %v3080_v26 = vpack.i.bf16 %v4312_v23, %v4309_v0  ;;  %v880_v1 = vrot.slane %v4186_v63, 1  ;;  %v881_v61 = vrot.slane %v4183_v62, 1 }
  0xc1   : > { %5863 = vst [vmem:[#allocation46_spill] sm:$0xff] %v4323_v51  ;;  %v4328_v7 = vsel %vm837_vm2, %v876_v10, %v878_v35  ;;  %v883_v50 = vrot.slane %v4180_v19, 1  ;;  %v885_v6 = vrot.slane %v4225_v32, 1  ;;  %v886_v10 = vrot.slane %v4222_v54, 1 }
  0xc2   : > { %5864 = vst [vmem:[#allocation47_spill] sm:$0xff] %v4328_v7  ;;  %v4333_v9 = vsel %vm678_vm1, %v721_v41, %v722_v25  ;;  %v4336_v2 = vsel %vm678_vm1, 0.0, %v721_v41  ;;  %3081 = vrot.lane.b32.xlu1 %v3080_v26, %s3627_s8  ;;  %v4342_v20 = vsel %vm837_vm2, %v880_v1, %v881_v61  ;;  %v888_v28 = vrot.slane %v4206_v60, 1 }
  0xc3   : > { %5865 = vst [vmem:[#allocation48_spill] sm:$0xff] %v4333_v9  ;;  %5866 = vst [vmem:[#allocation49_spill] sm:$0xff] %v4336_v2  ;;  %v890_v16 = vrot.slane %v4234_v27, 1  ;;  %v3085_v8 = vpack.i.bf16 %v4342_v20, %v4328_v7  ;;  %v4350_v35 = vsel %vm837_vm2, %v881_v61, %v883_v50  ;;  %v891_v41 = vrot.slane %v4231_v30, 1 }
  0xc4   : > { %5867 = vst [vmem:[#allocation50_spill] sm:$0xff] %v4342_v20  ;;  %5868 = vst [vmem:[#allocation51_spill] sm:$0xff] %v4350_v35  ;;  %v893_v23 = vrot.slane %v4228_v15, 1  ;;  %v4355_v26 = vsel %vm837_vm2, %v885_v6, %v886_v10  ;;  %v4358_v1 = vsel %vm837_vm2, %v886_v10, %v888_v28  ;;  %v895_v0 = vrot.slane %v4273_v3, 1 }
  0xc5   : > { %5869 = vst [vmem:[#allocation52_spill] sm:$0xff] %v4355_v26  ;;  %5870 = vst [vmem:[#allocation53_spill] sm:$0xff] %v4358_v1  ;;  %v896_v38 = vrot.slane %v4270_v21, 1  ;;  %3086 = vrot.lane.b32.xlu0 %v3085_v8, %s3627_s8  ;;  %v3090_v61 = vpack.i.bf16 %v4355_v26, %v4350_v35  ;;  %v4366_v50 = vsel %vm837_vm2, %v890_v16, %v891_v41  ;;  %v898_v6 = vrot.slane %v4261_v43, 1 }
  0xc6   : > { %5871 = vst [vmem:[#allocation54_spill] sm:$0xff] %v4366_v50  ;;  %v4369_v20 = vsel %vm837_vm2, %v891_v41, %v893_v23  ;;  %v3095_v10 = vpack.i.bf16 %v4366_v50, %v4358_v1  ;;  %v900_v7 = vrot.slane %v4284_v18, 1  ;;  %v901_v8 = vrot.slane %v4281_v58, 1 }
  0xc7   : > { %v4375_v28 = vsel %vm837_vm2, %v895_v0, %v896_v38  ;;  %3091 = vrot.lane.b32.xlu1 %v3090_v61, %s3627_s8  ;;  %v4381_v16 = vsel %vm837_vm2, %v896_v38, %v898_v6  ;;  %v903_v23 = vrot.slane %v4276_v36, 1  ;;  %v905_v41 = vrot.slane %v4323_v51, 1 }
  0xc8   : > { %5872 = vst [vmem:[#allocation55_spill] sm:$0xff] %v4375_v28  ;;  %5873 = vst [vmem:[#allocation56_spill] sm:$0xff] %v4381_v16  ;;  %v4386_v26 = vsel %vm837_vm2, %v900_v7, %v901_v8  ;;  %v906_v50 = vrot.slane %v4320_v12, 1  ;;  %v908_v0 = vrot.slane %v4317_v13, 1  ;;  %v910_v1 = vrot.slane %v4336_v2, 1 }
  0xc9   : > { %5874 = vst [vmem:[#allocation57_spill] sm:$0xff] %v4386_v26  ;;  %3096 = vrot.lane.b32.xlu0 %v3095_v10, %s3627_s8  ;;  %v3100_v61 = vpack.i.bf16 %v4375_v28, %v4369_v20  ;;  %v3105_v38 = vpack.i.bf16 %v4386_v26, %v4381_v16  ;;  %v911_v6 = vrot.slane %v4333_v9, 1  ;;  %v4398_v35 = vsel %vm678_vm1, %v722_v25, 0.0 }
  0xca   : > { %v4401_v7 = vsel %vm837_vm2, %v901_v8, %v903_v23  ;;  %v4404_v42 = vsel %vm837_vm2, %v905_v41, %v906_v50  ;;  %v4407_v13 = vsel %vm837_vm2, %v906_v50, %v908_v0  ;;  %v913_v10 = vrot.slane %v4398_v35, 1 }
  0xcb   : > { %3101 = vrot.lane.b32.xlu1 %v3100_v61, %s3627_s8  ;;  %v912_v26 = vsel %vm837_vm2, %v910_v1, %v911_v6  ;;  %v918_v16 = vrot.slane %v4031_v29, 2  ;;  %v919_v25 = vrot.slane %v4028_v55, 2  ;;  %v923_v8 = vrot.slane %v4061_v53, 2  ;;  %v5879_v53 = vld [vmem:[#allocation24_spill] sm:$0xff] }
  0xcc   : > { %v914_v28 = vsel %vm837_vm2, %v911_v6, %v913_v10  ;;  %v924_v23 = vrot.slane %v4058_v31, 2  ;;  %v3110_v50 = vpack.i.bf16 %v4404_v42, %v4401_v7  ;;  %v3115_v41 = vpack.i.bf16 %v912_v26, %v4407_v13 }
  0xcd   : > { %3106 = vrot.lane.b32.xlu0 %v3105_v38, %s3627_s8  ;;  %v4421_v0 = vpack.i.bf16 %v914_v28, %v912_v26  ;;  %v5876_v1 = vmov 0.0   ;;  %v926_v55 = vrot.slane %v4055_v5, 2  ;;  %v928_v6 = vrot.slane %v4034_v14, 2 }
  0xce   : > { %v4424_v61 = vrot.slane %v5876_v1, 2  ;;  %v4430_v10 = vsel %vm915_vm3, %v918_v16, %v919_v25  ;;  %v921_v38 = vrot.slane %v4025_v47, 2  ;;  %v4434_v31 = vsel %vm915_vm3, %v923_v8, %v924_v23 }
  0xcf   : > { %5875 = vst [vmem:[#allocation58_spill] sm:$0xff] %v4421_v0  ;;  %3111 = vrot.lane.b32.xlu1 %v3110_v50, %s3627_s8  ;;  %v929_v26 = vrot.slane %v4022_v46, 2  ;;  %v4438_v0 = vsel %vm915_vm3, %v924_v23, %v926_v55  ;;  %v931_v1 = vrot.slane %v4019_v57, 2  ;;  %v933_v5 = vrot.slane %v4064_v33, 2 }
  0xd0   : > { %5877 = vst [vmem:[#allocation59_spill] sm:$0xff] %v4424_v61  ;;  %v934_v14 = vrot.slane %v4052_v24, 2  ;;  %v936_v47 = vrot.slane %v4048_v4, 2  ;;  %v938_v8 = vrot.slane %v4097_v17, 2  ;;  %v939_v50 = vrot.slane %v4094_v37, 2 }
  0xd1   : > { %3116 = vrot.lane.b32.xlu0 %v3115_v41, %s3627_s8  ;;  %v4445_v16 = vsel %vm915_vm3, %v928_v6, %v929_v26  ;;  %v3120_v57 = vpack.i.bf16 %v4430_v10, %v4424_v61  ;;  %v4454_v55 = vsel %vm915_vm3, %v919_v25, %v921_v38  ;;  %v4461_v4 = vsel %vm915_vm3, %v929_v26, %v931_v1 }
  0xd2   : > { %v3125_v23 = vpack.i.bf16 %v4434_v31, %v4454_v55  ;;  %v3130_v41 = vpack.i.bf16 %v4445_v16, %v4438_v0  ;;  %v941_v6 = vrot.slane %v4083_v22, 2  ;;  %v4469_v25 = vsel %vm915_vm3, %v934_v14, %v936_v47 }
  0xd3   : > { %1065 = vrot.lane.b32.xlu1 %v914_v28, %s3627_s8  ;;  %v4466_v28 = vsel %vm915_vm3, %v933_v5, %v934_v14  ;;  %v4472_v38 = vsel %vm915_vm3, %v938_v8, %v939_v50  ;;  %v943_v61 = vrot.slane %v4114_v40, 2  ;;  %v944_v37 = vrot.slane %v4108_v39, 2  ;;  %s3633_s8 = smov 120  }
  0xd4   : > { %v946_v1 = vrot.slane %v4086_v11, 2  ;;  %v948_v22 = vrot.slane %v4120_v48, 2  ;;  %v949_v26 = vrot.slane %v4117_v52, 2  ;;  %v951_v5 = vrot.slane %v4111_v34, 2 }
  0xd5   : > { %3121 = vrot.lane.b32.xlu0 %v3120_v57, %s3628_s9  ;;  %v953_v14 = vrot.slane %v4129_v56, 2  ;;  %v954_v47 = vrot.slane %v4126_v49, 2  ;;  %v956_v8 = vrot.slane %v4123_v44, 2  ;;  %v3135_v57 = vpack.i.bf16 %v4466_v28, %v4461_v4 }
  0xd6   : > { %v958_v39 = vrot.slane %v4186_v63, 2  ;;  %v959_v11 = vrot.slane %v4183_v62, 2  ;;  %v4490_v52 = vsel %vm915_vm3, %v939_v50, %v941_v6  ;;  %v961_v34 = vrot.slane %v4180_v19, 2 }
  0xd7   : > { %3126 = vrot.lane.b32.xlu1 %v3125_v23, %s3628_s9  ;;  %v963_v23 = vrot.slane %v4225_v32, 2  ;;  %v964_v48 = vrot.slane %v4222_v54, 2  ;;  %v3140_v44 = vpack.i.bf16 %v4472_v38, %v4469_v25  ;;  %v4498_v40 = vsel %vm915_vm3, %v943_v61, %v944_v37 }
  0xd8   : > { %v4501_v17 = vsel %vm915_vm3, %v944_v37, %v946_v1  ;;  %v4508_v19 = vsel %vm915_vm3, %v949_v26, %v951_v5  ;;  %v4511_v50 = vsel %vm915_vm3, %v953_v14, %v954_v47  ;;  %v4514_v6 = vsel %vm915_vm3, %v954_v47, %v956_v8 }
  0xd9   : > { %3131 = vrot.lane.b32.xlu0 %v3130_v41, %s3628_s9  ;;  %v4504_v41 = vsel %vm915_vm3, %v948_v22, %v949_v26  ;;  %v966_v61 = vrot.slane %v4206_v60, 2  ;;  %v4518_v24 = vsel %vm915_vm3, %v958_v39, %v959_v11  ;;  %v968_v37 = vrot.slane %v4234_v27, 2  ;;  %v5894_v27 = vld [vmem:[#allocation42_spill] sm:$0xff] }
  0xda   : > { %v969_v1 = vrot.slane %v4231_v30, 2  ;;  %v971_v22 = vrot.slane %v4228_v15, 2  ;;  %v3145_v26 = vpack.i.bf16 %v4498_v40, %v4490_v52  ;;  %v4527_v5 = vsel %vm915_vm3, %v959_v11, %v961_v34  ;;  %v5893_v30 = vld [vmem:[#allocation41_spill] sm:$0xff] }
  0xdb   : > { %3136 = vrot.lane.b32.xlu1 %v3135_v57, %s3628_s9  ;;  %v4530_v14 = vsel %vm915_vm3, %v963_v23, %v964_v48  ;;  %v973_v39 = vrot.slane %v4273_v3, 2  ;;  %v974_v60 = vrot.slane %v4270_v21, 2  ;;  %v3150_v15 = vpack.i.bf16 %v4504_v41, %v4501_v17 }
  0xdc   : > { %v3155_v47 = vpack.i.bf16 %v4511_v50, %v4508_v19  ;;  %v3160_v8 = vpack.i.bf16 %v4518_v24, %v4514_v6  ;;  %v4542_v57 = vsel %vm915_vm3, %v964_v48, %v966_v61  ;;  %v3165_v11 = vpack.i.bf16 %v4530_v14, %v4527_v5 }
  0xdd   : > { %3141 = vrot.lane.b32.xlu0 %v3140_v44, %s3628_s9  ;;  %v4547_v34 = vsel %vm915_vm3, %v968_v37, %v969_v1  ;;  %v4550_v23 = vsel %vm915_vm3, %v969_v1, %v971_v22  ;;  %v988_v44 = vrot.slane %v4336_v2, 2  ;;  %v978_v33 = vrot.slane %v4284_v18, 2  ;;  %v5878_v22 = vld [vmem:[#allocation23_spill] sm:$0xff]  ;;  %v5880_v2 = vld [vmem:[#allocation25_spill] sm:$0xff] }
  0xde   : > { %v989_v48 = vrot.slane %v4333_v9, 2  ;;  %v991_v61 = vrot.slane %v4398_v35, 2  ;;  %v4559_v46 = vsel %vm915_vm3, %v973_v39, %v974_v60  ;;  %v979_v37 = vrot.slane %v4281_v58, 2  ;;  %v5881_v35 = vld [vmem:[#allocation26_spill] sm:$0xff] }
  0xdf   : > { %3146 = vrot.lane.b32.xlu1 %v3145_v26, %s3628_s9  ;;  %v976_v26 = vrot.slane %v4261_v43, 2  ;;  %v4564_v1 = vpack.i.bf16 %v4174_v45, %v4169_v59  ;;  %v4573_v29 = vpack.i.bf16 %v5881_v35, %v5880_v2  ;;  %v981_v39 = vrot.slane %v4276_v36, 2  ;;  %v5885_v2 = vld [vmem:[#allocation44_spill] sm:$0xff]  ;;  %v5886_v35 = vld [vmem:[#allocation33_spill] sm:$0xff]  ;;  %v5887_v36 = vld [vmem:[#allocation34_spill] sm:$0xff] }
  0xe0   : > { %v990_v43 = vsel %vm915_vm3, %v988_v44, %v989_v48  ;;  %v992_v9 = vsel %vm915_vm3, %v989_v48, %v991_v61  ;;  %v983_v58 = vrot.slane %v4323_v51, 2  ;;  %v984_v59 = vrot.slane %v4320_v12, 2  ;;  %v5884_v44 = vld [vmem:[#allocation28_spill] sm:$0xff]  ;;  %v2992_v12 = vpop.permute.xlu1 %2991  ;;  %v5890_v51 = vld [vmem:[#allocation35_spill] sm:$0xff] }
  0xe1   : > { %3151 = vrot.lane.b32.xlu0 %v3150_v15, %s3628_s9  ;;  %v4577_v18 = vpack.i.bf16 %v992_v9, %v990_v43  ;;  %v977_v45 = vsel %vm915_vm3, %v974_v60, %v976_v26  ;;  %v980_v48 = vsel %vm915_vm3, %v978_v33, %v979_v37  ;;  %v986_v61 = vrot.slane %v5885_v2, 2  ;;  %v5888_v60 = vld [vmem:[#allocation4_spill] sm:$0xff]  ;;  %v5889_v26 = vld [vmem:[#allocation2_spill] sm:$0xff] }
  0xe2   : > { %v4590_v21 = vpack.i.bf16 %v5887_v36, %v5886_v35  ;;  %v3175_v33 = vpack.i.bf16 %v4559_v46, %v4550_v23  ;;  %v3180_v2 = vpack.i.bf16 %v980_v48, %v977_v45  ;;  %v982_v35 = vsel %vm915_vm3, %v979_v37, %v981_v39  ;;  %v5895_v39 = vld [vmem:[#allocation43_spill] sm:$0xff] }
  0xe3   : > { %3156 = vrot.lane.b32.xlu1 %v3155_v47, %s3628_s9  ;;  %5882 = vst [vmem:[#allocation23_spill] sm:$0xff] %v4577_v18  ;;  %v5883_v47 = vld [vmem:[#allocation27_spill] sm:$0xff]  ;;  %v379_v18 = vadd.f32 %v5889_v26, %v5888_v60  ;;  %v985_v3 = vsel %vm915_vm3, %v983_v58, %v984_v59  ;;  %v987_v60 = vsel %vm915_vm3, %v984_v59, %v986_v61 }
  0xe4   : > { %v4584_v15 = vpack.i.bf16 %v5884_v44, %v5883_v47  ;;  %v5891_v47 = vld [vmem:[#allocation40_spill] sm:$0xff]  ;;  %v4611_v54 = vpack.i.bf16 %v5894_v27, %v5893_v30  ;;  %v4619_v37 = vpack.i.bf16 %v4501_v17, %v4498_v40  ;;  %v4623_v58 = vpack.i.bf16 %v4508_v19, %v4504_v41  ;;  %v5896_v59 = vld [vmem:[#allocation47_spill] sm:$0xff]  ;;  %v5897_v40 = vld [vmem:[#allocation50_spill] sm:$0xff] }
  0xe5   : > { %3161 = vrot.lane.b32.xlu0 %v3160_v8, %s3628_s9  ;;  %v3170_v8 = vpack.i.bf16 %v4547_v34, %v4542_v57  ;;  %v4599_v44 = vpack.i.bf16 %v5891_v47, %v5890_v51  ;;  %v3610_v51 = vld [vmem:[%s5731_s2] sm:$0xff]   ;;  %v2993_v47 = vunpack.i.l.bf16 %v2992_v12  ;;  %v4627_v30 = vpack.i.bf16 %v5896_v59, %v5895_v39  ;;  %v5898_v61 = vld [vmem:[#allocation51_spill] sm:$0xff] }
  0xe6   : > { %2842 = vmatprep.subr.bf16.mxu0 %v3610_v51  ;;  %2884 = vmatprep.subr.bf16.mxu1 %v3610_v51  ;;  %v3185_v27 = vpack.i.bf16 %v985_v3, %v982_v35  ;;  %v3190_v17 = vpack.i.bf16 %v990_v43, %v987_v60  ;;  %v3611_v41 = vld [vmem:[%s5731_s2 + $0x8] sm:$0xff]   ;;  %v5900_v43 = vld [vmem:[#allocation53_spill] sm:$0xff]  ;;  %v4674_v39 = vpack.i.bf16 %v977_v45, %v4559_v46 }
  0xe7   : > { %3166 = vrot.lane.b32.xlu1 %v3165_v11, %s3628_s9  ;;  %v5892_v11 = vld [vmem:[#allocation3_spill] sm:$0xff]  ;;  %2843 = vmatpush3.bf16.msra.mxu0 %v3610_v51  ;;  %v3613_v46 = vld [vmem:[%s5731_s2 + $0x18] sm:$0xff]   ;;  %v5905_v45 = vpack.i.bf16 %v5879_v53, %v5878_v22  ;;  %v3210_v59 = vpack.i.bf16 %v4438_v0, %v4434_v31  ;;  %v3614_v31 = vld [vmem:[%s5731_s2 + $0x20] ss:$0 sps:$4 sm:$0xff]  }
  0xe8   : > { %v380_v36 = vadd.f32 %v5889_v26, %v5892_v11  ;;  %v4636_v26 = vpack.i.bf16 %v5898_v61, %v5897_v40  ;;  %2889 = vmatpush3.bf16.msra.mxu1 %v3610_v51  ;;  %2844 = vmatprep.subr.bf16.mxu0 %v3611_v41  ;;  %v4655_v11 = vpack.i.bf16 %v4542_v57, %v4530_v14  ;;  %v5903_v14 = vld [vmem:[#allocation56_spill] sm:$0xff] }
  0xe9   : > { %3171 = vrot.lane.b32.xlu0 %v3170_v8, %s3628_s9  ;;  %v2994_v8 = vunpack.i.h.bf16 %v2992_v12  ;;  %v4632_v12 = vpack.i.bf16 %v4514_v6, %v4511_v50  ;;  %v4646_v50 = vpack.i.bf16 %v4527_v5, %v4518_v24  ;;  %v5899_v6 = vld [vmem:[#allocation52_spill] sm:$0xff]  ;;  %2885 = vmatprep.subr.bf16.mxu1 %v3611_v41  ;;  %v4663_v24 = vpack.i.bf16 %v4550_v23, %v4547_v34 }
  0xea   : > { %v3612_v5 = vld [vmem:[%s5731_s2 + $0x10] sm:$0xff]   ;;  %v4683_v23 = vpack.i.bf16 %v982_v35, %v980_v48  ;;  %v4699_v48 = vpack.i.bf16 %v4407_v13, %v4404_v42  ;;  %v4701_v35 = vpack.i.bf16 %v987_v60, %v985_v3  ;;  %v2130_v60 = vsel %vm2128_vm4, %v3614_v31, 0 }
  0xeb   : > { %3176 = vrot.lane.b32.xlu1 %v3175_v33, %s3628_s9  ;;  %v645_v19 = vsel %vm613_vm0, %v380_v36, %v2994_v8  ;;  %v644_v33 = vsel %vm613_vm0, %v379_v18, %v2993_v47  ;;  %v5901_v36 = vld [vmem:[#allocation54_spill] sm:$0xff]  ;;  %2845 = vmatpush3.bf16.msra.mxu0 %v3611_v41  ;;  %v5902_v47 = vld [vmem:[#allocation55_spill] sm:$0xff] }
  0xec   : > { %v725_v51 = vrot.slane %v645_v19, 7  ;;  %v4659_v18 = vpack.i.bf16 %v4369_v20, %v5901_v36  ;;  %v724_v8 = vrot.slane %v644_v33, 7  ;;  %v4671_v57 = vpack.i.bf16 %v5903_v14, %v5902_v47  ;;  %2846 = vmatprep.subr.bf16.mxu0 %v3612_v5  ;;  %2890 = vmatpush3.bf16.msra.mxu1 %v3611_v41  ;;  %v5904_v20 = vld [vmem:[#allocation57_spill] sm:$0xff] }
  0xed   : > { %3181 = vrot.lane.b32.xlu0 %v3180_v2, %s3628_s9  ;;  %v4650_v2 = vpack.i.bf16 %v5900_v43, %v5899_v6  ;;  %v4680_v34 = vpack.i.bf16 %v4401_v7, %v5904_v20  ;;  %2886 = vmatprep.subr.bf16.mxu1 %v3612_v5  ;;  %v3230_v6 = vpack.i.bf16 %v4461_v4, %v4445_v16  ;;  %v5906_v4 = vld [vmem:[#allocation16_spill] sm:$0xff] }
  0xee   : > { %v789_v7 = vsel %vm678_vm1, 0.0, %v724_v8  ;;  %v726_v0 = vsel %vm678_vm1, %v724_v8, %v725_v51 }
  0xef   : > { %3186 = vrot.lane.b32.xlu1 %v3185_v27, %s3628_s9  ;;  %2847 = vmatpush3.bf16.msra.mxu0 %v3612_v5  ;;  %v3205_v27 = vpack.i.bf16 %v4454_v55, %v4430_v10  ;;  %v995_v10 = vrot.slane %v789_v7, 1  ;;  %v1000_v55 = vrot.slane %v789_v7, 2  ;;  %v4709_v3 = vpack.i.bf16 %v726_v0, %v789_v7 }
  0xf0   : > { %2848 = vmatprep.subr.bf16.mxu0 %v3613_v46  ;;  %2891 = vmatpush3.bf16.msra.mxu1 %v3612_v5  ;;  %v996_v42 = vrot.slane %v726_v0, 1  ;;  %v1001_v13 = vrot.slane %v726_v0, 2  ;;  %v5907_v5 = vld [vmem:[#allocation21_spill] sm:$0xff] }
  0xf1   : > { %3191 = vrot.lane.b32.xlu0 %v3190_v17, %s3628_s9  ;;  %2887 = vmatprep.subr.bf16.mxu1 %v3613_v46 }
  0xf2   : > { %v997_v17 = vsel %vm837_vm2, %v995_v10, %v996_v42  ;;  %v1002_v61 = vsel %vm915_vm3, %v1000_v55, %v1001_v13 }
  0xf3   : > { %1158 = vrot.lane.b32.xlu1 %v992_v9, %s3628_s9  ;;  %v805_v9 = vsel %vm678_vm1, %v725_v51, 0.0  ;;  %2849 = vmatpush3.bf16.msra.mxu0 %v3613_v46 }
  0xf4   : > { %v998_v53 = vrot.slane %v805_v9, 1  ;;  %v1003_v22 = vrot.slane %v805_v9, 2  ;;  %2894 = vmatprep.subr.msk.bf16.mxu0 %vm2128_vm4, %v3614_v31  ;;  %2892 = vmatpush3.bf16.msra.mxu1 %v3613_v46  ;;  %v3330_v9 = vpack.i.bf16 %v4126_v49, %v4129_v56 }
  0xf5   : > { %3201 = vrot.lane.b32.xlu0 %v4564_v1, %s3629_s16  ;;  %2895 = vmatprep.subr.msk.bf16.mxu1 %vm2128_vm4, %v3614_v31  ;;  %v5913_v31 = vld [vmem:[#allocation29_spill] sm:$0xff] }
  0xf6   : > { %v999_v40 = vsel %vm837_vm2, %v996_v42, %v998_v53  ;;  %v1004_v41 = vsel %vm915_vm3, %v1001_v13, %v1003_v22  ;;  %v3390_v0 = vpack.i.bf16 %v5913_v31, %v4225_v32 }
  0xf7   : > { %3196 = vrot.lane.b32.xlu1 %v5905_v45, %s3629_s16  ;;  %2851 = vmatpush3.bf16.msra.mxu0 %v2130_v60  ;;  %v4719_v19 = vpack.i.bf16 %v999_v40, %v997_v17  ;;  %v4721_v33 = vpack.i.bf16 %v1004_v41, %v1002_v61  ;;  %v5917_v17 = vld [vmem:[#allocation31_spill] sm:$0xff] }
  0xf8   : > { %2893 = vmatpush3.bf16.msra.mxu1 %v2130_v60  ;;  %v5916_v60 = vld [vmem:[#allocation32_spill] sm:$0xff] }
  0xf9   : > { %3211 = vrot.lane.b32.xlu0 %v3210_v59, %s3630_s19  ;;  %v3420_v40 = vpack.i.bf16 %v5917_v17, %v5916_v60  ;;  %v5930_v17 = vld [vmem:[#allocation8_spill] sm:$0xff]  ;;  %v5931_v60 = vld [vmem:[#allocation7_spill] sm:$0xff] }
  0xfb   : > { %3206 = vrot.lane.b32.xlu1 %v3205_v27, %s3630_s19 }
  0xfd   : > { %3221 = vrot.lane.b32.xlu0 %v4573_v29, %s3631_s24 }
  0xff   : > { %3216 = vrot.lane.b32.xlu1 %v4564_v1, %s3631_s24  ;;  %v3250_v1 = vpack.i.bf16 %v4469_v25, %v4466_v28  ;;  %v3275_v28 = vpack.i.bf16 %v4490_v52, %v4472_v38 }
 0x101   : > { %3231 = vrot.lane.b32.xlu0 %v3230_v6, %s3632_s26 }
 0x103   : > { %3226 = vrot.lane.b32.xlu1 %v3210_v59, %s3632_s26 }
 0x105   : > { %3241 = vrot.lane.b32.xlu0 %v4584_v15, %s3629_s16 }
 0x107   : > { %3236 = vrot.lane.b32.xlu1 %v4573_v29, %s3629_s16 }
 0x109   : > { %3251 = vrot.lane.b32.xlu0 %v3250_v1, %s3630_s19 }
 0x10b   : > { %3246 = vrot.lane.b32.xlu1 %v3230_v6, %s3630_s19 }
 0x10c   : > { %v4738_v16 = vpop.permute.xlu0 %2996 }
 0x10d   : > { %3256 = vrot.lane.b32.xlu0 %v5906_v4, %s3626_s7  ;;  %v5918_v4 = vld [vmem:[#allocation37_spill] sm:$0xff] }
 0x10f   : > { %3261 = vrot.lane.b32.xlu1 %v4584_v15, %s3631_s24 }
 0x110   : > { %v4744_v43 = vpop.permute.xlu0 %3006 }
 0x111   : > { %3266 = vrot.lane.b32.xlu0 %v4590_v21, %s3631_s24 }
 0x113   : > { %v4748_v29 = vpop.permute.xlu1 %3001  ;;  %3271 = vrot.lane.b32.xlu1 %v3250_v1, %s3632_s26 }
 0x115   : > { %3276 = vrot.lane.b32.xlu0 %v3275_v28, %s3632_s26 }
 0x116   : > { %v4756_v51 = vpop.permute.xlu0 %3016 }
 0x117   : > { %v4754_v25 = vpop.permute.xlu1 %3011  ;;  %3281 = vrot.lane.b32.xlu1 %v4590_v21, %s3629_s16  ;;  %v5908_v21 = vld [vmem:[#allocation22_spill] sm:$0xff] }
 0x119   : > { %3286 = vrot.lane.b32.xlu0 %v4599_v44, %s3629_s16 }
 0x11a   : > { %v4764_v36 = vpop.permute.xlu0 %3026 }
 0x11b   : > { %v4762_v15 = vpop.permute.xlu1 %3021  ;;  %3291 = vrot.lane.b32.xlu1 %v3275_v28, %s3630_s19  ;;  %v5919_v28 = vld [vmem:[#allocation36_spill] sm:$0xff] }
 0x11d   : > { %3296 = vrot.lane.b32.xlu0 %v4619_v37, %s3630_s19 }
 0x11e   : > { %v4771_v38 = vpop.permute.xlu0 %3036 }
 0x11f   : > { %v4769_v52 = vpop.permute.xlu1 %3031  ;;  %3301 = vrot.lane.b32.xlu1 %v5907_v5, %s3626_s7  ;;  %v3450_v5 = vpack.i.bf16 %v5919_v28, %v5918_v4 }
 0x121   : > { %3306 = vrot.lane.b32.xlu0 %v5908_v21, %s3626_s7 }
 0x122   : > { %v4779_v47 = vpop.permute.xlu0 %3046 }
 0x123   : > { %v4777_v8 = vpop.permute.xlu1 %3041  ;;  %3311 = vrot.lane.b32.xlu1 %v4599_v44, %s3631_s24  ;;  %v3048_v28 = vunpack.i.l.bf16 %v4779_v47  ;;  %v3049_v4 = vunpack.i.h.bf16 %v4779_v47  ;;  %v3004_v47 = vunpack.i.h.bf16 %v4748_v29 }
 0x125   : > { %3316 = vrot.lane.b32.xlu0 %v4611_v54, %s3631_s24  ;;  %v1760_v31 = vsel %vm1758_vm5, %v5930_v17, %v3049_v4  ;;  %v2999_v4 = vunpack.i.h.bf16 %v4738_v16 }
 0x126   : > { %v4787_v20 = vpop.permute.xlu0 %3056 }
 0x127   : > { %v4785_v14 = vpop.permute.xlu1 %3051  ;;  %3321 = vrot.lane.b32.xlu1 %v4619_v37, %s3632_s26 }
 0x129   : > { %3326 = vrot.lane.b32.xlu0 %v4623_v58, %s3632_s26 }
 0x12a   : > { %v4798_v44 = vpop.permute.xlu0 %3066 }
 0x12b   : > { %v4795_v46 = vpop.permute.xlu1 %3061  ;;  %3331 = vrot.lane.b32.xlu1 %v3330_v9, %s3625_s30 }
 0x12d   : > { %3336 = vrot.lane.b32.xlu0 %v4611_v54, %s3629_s16  ;;  %v3360_v54 = vpack.i.bf16 %v4183_v62, %v4186_v63 }
 0x12f   : > { %v4802_v45 = vpop.permute.xlu1 %3071  ;;  %3341 = vrot.lane.b32.xlu1 %v4627_v30, %s3629_s16 }
 0x131   : > { %3346 = vrot.lane.b32.xlu0 %v4623_v58, %s3630_s19  ;;  %v4808_v37 = vpop.permute.xlu0 %3076 }
 0x133   : > { %3351 = vrot.lane.b32.xlu1 %v4632_v12, %s3630_s19 }
 0x134   : > { %v4812_v59 = vpop.permute.xlu1 %3081 }
 0x135   : > { %3356 = vrot.lane.b32.xlu0 %v3330_v9, %s3626_s7 }
 0x137   : > { %v4817_v7 = vpop.permute.xlu0 %3086  ;;  %3361 = vrot.lane.b32.xlu1 %v3360_v54, %s3626_s7 }
 0x139   : > { %3366 = vrot.lane.b32.xlu0 %v4627_v30, %s3631_s24  ;;  %v4822_v58 = vpop.permute.xlu1 %3091 }
 0x13b   : > { %v4824_v27 = vpop.permute.xlu0 %3096  ;;  %3371 = vrot.lane.b32.xlu1 %v4636_v26, %s3631_s24 }
 0x13c   : > { %5909 = vst [vmem:[#allocation24_spill] sm:$0xff] %v4824_v27 }
 0x13d   : > { %3376 = vrot.lane.b32.xlu0 %v4632_v12, %s3632_s26  ;;  %v4830_v53 = vpop.permute.xlu1 %3101 }
 0x13e   : > { %5910 = vst [vmem:[#allocation25_spill] sm:$0xff] %v4830_v53 }
 0x13f   : > { %v4832_v22 = vpop.permute.xlu0 %3106  ;;  %3381 = vrot.lane.b32.xlu1 %v4646_v50, %s3632_s26 }
 0x140   : > { %5911 = vst [vmem:[#allocation26_spill] sm:$0xff] %v4832_v22 }
 0x141   : > { %3386 = vrot.lane.b32.xlu0 %v3360_v54, %s3625_s30  ;;  %v4837_v30 = vpop.permute.xlu1 %3111 }
 0x142   : > { %5912 = vst [vmem:[#allocation27_spill] sm:$0xff] %v4837_v30  ;;  %v5929_v30 = vld [vmem:[#allocation45_spill] sm:$0xff] }
 0x143   : > { %v4841_v10 = vpop.permute.xlu0 %3116  ;;  %3391 = vrot.lane.b32.xlu1 %v3390_v0, %s3625_s30 }
 0x144   : > { %5914 = vst [vmem:[#allocation28_spill] sm:$0xff] %v4841_v10 }
 0x145   : > { %3396 = vrot.lane.b32.xlu0 %v4636_v26, %s3629_s16  ;;  %v4846_v12 = vpop.permute.xlu1 %1065 }
 0x146   : > { %5915 = vst [vmem:[#allocation44_spill] sm:$0xff] %v4846_v12  ;;  %v5927_v12 = vld [vmem:[#allocation38_spill] sm:$0xff] }
 0x147   : > { %v4848_v55 = vpop.permute.xlu0 %3121  ;;  %3401 = vrot.lane.b32.xlu1 %v4650_v2, %s3629_s16 }
 0x149   : > { %3406 = vrot.lane.b32.xlu0 %v4646_v50, %s3630_s19  ;;  %v4854_v42 = vpop.permute.xlu1 %3126 }
 0x14b   : > { %v4856_v13 = vpop.permute.xlu0 %3131  ;;  %3411 = vrot.lane.b32.xlu1 %v4655_v11, %s3630_s19 }
 0x14d   : > { %3416 = vrot.lane.b32.xlu0 %v3390_v0, %s3626_s7  ;;  %v4861_v26 = vpop.permute.xlu1 %3136 }
 0x14f   : > { %v4865_v61 = vpop.permute.xlu0 %3141  ;;  %3421 = vrot.lane.b32.xlu1 %v3420_v40, %s3626_s7 }
 0x151   : > { %3426 = vrot.lane.b32.xlu0 %v4650_v2, %s3631_s24  ;;  %v4870_v50 = vpop.permute.xlu1 %3146 }
 0x153   : > { %v4872_v41 = vpop.permute.xlu0 %3151  ;;  %3431 = vrot.lane.b32.xlu1 %v4659_v18, %s3631_s24 }
 0x155   : > { %3436 = vrot.lane.b32.xlu0 %v4655_v11, %s3632_s26  ;;  %v4878_v6 = vpop.permute.xlu1 %3156 }
 0x157   : > { %v4880_v1 = vpop.permute.xlu0 %3161  ;;  %3441 = vrot.lane.b32.xlu1 %v4663_v24, %s3632_s26 }
 0x159   : > { %3446 = vrot.lane.b32.xlu0 %v3420_v40, %s3625_s30  ;;  %v4885_v2 = vpop.permute.xlu1 %3166  ;;  %v5926_v40 = vld [vmem:[#allocation39_spill] sm:$0xff] }
 0x15a   : > { %v3480_v10 = vpack.i.bf16 %v5927_v12, %v5926_v40  ;;  %v1759_v40 = vsel %vm1758_vm5, 0.0, %v3048_v28 }
 0x15b   : > { %v4889_v21 = vpop.permute.xlu0 %3171  ;;  %3451 = vrot.lane.b32.xlu1 %v3450_v5, %s3625_s30 }
 0x15c   : > { %5920 = vst [vmem:[#allocation33_spill] sm:$0xff] %v4889_v21 }
 0x15d   : > { %3456 = vrot.lane.b32.xlu0 %v4659_v18, %s3629_s16  ;;  %v4894_v11 = vpop.permute.xlu1 %3176 }
 0x15e   : > { %5921 = vst [vmem:[#allocation34_spill] sm:$0xff] %v4894_v11 }
 0x15f   : > { %v4896_v9 = vpop.permute.xlu0 %3181  ;;  %3461 = vrot.lane.b32.xlu1 %v4671_v57, %s3629_s16 }
 0x160   : > { %5922 = vst [vmem:[#allocation4_spill] sm:$0xff] %v4896_v9  ;;  %v5928_v9 = vld [vmem:[#allocation46_spill] sm:$0xff] }
 0x161   : > { %3466 = vrot.lane.b32.xlu0 %v4663_v24, %s3630_s19  ;;  %v4902_v54 = vpop.permute.xlu1 %3186  ;;  %v3053_v24 = vunpack.i.l.bf16 %v4785_v14  ;;  %v4926_v22 = vpack.i.bf16 %v5929_v30, %v5928_v9 }
 0x162   : > { %5923 = vst [vmem:[#allocation2_spill] sm:$0xff] %v4902_v54  ;;  %v3123_v54 = vunpack.i.l.bf16 %v4848_v55 }
 0x163   : > { %v4904_v0 = vpop.permute.xlu0 %3191  ;;  %3471 = vrot.lane.b32.xlu1 %v4674_v39, %s3630_s19  ;;  %v1761_v32 = vsel %vm1758_vm5, %v5931_v60, %v3053_v24 }
 0x164   : > { %5924 = vst [vmem:[#allocation35_spill] sm:$0xff] %v4904_v0 }
 0x165   : > { %3476 = vrot.lane.b32.xlu0 %v3450_v5, %s3626_s7  ;;  %v4909_v18 = vpop.permute.xlu1 %1158  ;;  %v3124_v5 = vunpack.i.h.bf16 %v4848_v55  ;;  %v3003_v55 = vunpack.i.l.bf16 %v4748_v29 }
 0x166   : > { %5925 = vst [vmem:[#allocation40_spill] sm:$0xff] %v4909_v18  ;;  %v3128_v18 = vunpack.i.l.bf16 %v4854_v42 }
 0x167   : > { %v3202_v0 = vpop.permute.xlu0 %3201  ;;  %3481 = vrot.lane.b32.xlu1 %v3480_v10, %s3626_s7  ;;  %v1792_v28 = vsel %vm1790_vm6, %v1760_v31, %v3124_v5  ;;  %v3034_v31 = vunpack.i.h.bf16 %v4769_v52 }
 0x168   : > { %v1793_v30 = vsel %vm1790_vm6, %v1761_v32, %v3128_v18  ;;  %v3204_v9 = vunpack.i.h.bf16 %v3202_v0  ;;  %v3203_v21 = vunpack.i.l.bf16 %v3202_v0  ;;  %v3033_v32 = vunpack.i.l.bf16 %v4769_v52 }
 0x169   : > { %3486 = vrot.lane.b32.xlu0 %v4671_v57, %s3631_s24  ;;  %v3197_v12 = vpop.permute.xlu1 %3196  ;;  %v1791_v57 = vsel %vm1790_vm6, %v1759_v40, %v3123_v54  ;;  %v2998_v54 = vunpack.i.l.bf16 %v4738_v16  ;;  %v1826_v0 = vsel %vm1822_vm7, %v1793_v30, %v3004_v47 }
 0x16a   : > { %v3199_v29 = vunpack.i.h.bf16 %v3197_v12  ;;  %v3198_v53 = vunpack.i.l.bf16 %v3197_v12  ;;  %v1825_v12 = vsel %vm1822_vm7, %v1792_v28, %v3003_v55  ;;  %v1824_v5 = vsel %vm1822_vm7, %v1791_v57, %v2999_v4 }
 0x16b   : > { %v3212_v11 = vpop.permute.xlu0 %3211  ;;  %3491 = vrot.lane.b32.xlu1 %v4680_v34, %s3631_s24  ;;  %v1823_v16 = vsel %vm1822_vm7, %v1791_v57, %v2998_v54  ;;  %v3039_v54 = vunpack.i.h.bf16 %v4771_v38  ;;  %v3038_v57 = vunpack.i.l.bf16 %v4771_v38 }
 0x16c   : > { %v3214_v27 = vunpack.i.h.bf16 %v3212_v11  ;;  %v3213_v17 = vunpack.i.l.bf16 %v3212_v11  ;;  %v1858_v11 = vsel %vm1855_vm8, %v1825_v12, %v3203_v21  ;;  %v1857_v52 = vsel %vm1855_vm8, %v1824_v5, %v3199_v29 }
 0x16d   : > { %3496 = vrot.lane.b32.xlu0 %v4674_v39, %s3632_s26  ;;  %v3207_v60 = vpop.permute.xlu1 %3206  ;;  %v1859_v39 = vsel %vm1855_vm8, %v1826_v0, %v3204_v9 }
 0x16e   : > { %v3209_v40 = vunpack.i.h.bf16 %v3207_v60  ;;  %v3208_v24 = vunpack.i.l.bf16 %v3207_v60  ;;  %v1856_v60 = vsel %vm1855_vm8, %v1823_v16, %v3198_v53  ;;  %v1891_v30 = vsel %vm1888_vm9, %v1858_v11, %v3213_v17 }
 0x16f   : > { %v3222_v18 = vpop.permute.xlu0 %3221  ;;  %3501 = vrot.lane.b32.xlu1 %v4683_v23, %s3632_s26  ;;  %v1892_v47 = vsel %vm1888_vm9, %v1859_v39, %v3214_v27  ;;  %v1924_v17 = vsel %vm1921_vm10, %v1891_v30, %v3038_v57  ;;  %v3058_v30 = vunpack.i.l.bf16 %v4787_v20  ;;  %v3063_v57 = vunpack.i.l.bf16 %v4795_v46 }
 0x170   : > { %v1889_v28 = vsel %vm1888_vm9, %v1856_v60, %v3208_v24  ;;  %v1890_v9 = vsel %vm1888_vm9, %v1857_v52, %v3209_v40  ;;  %v3224_v21 = vunpack.i.h.bf16 %v3222_v18  ;;  %v3223_v0 = vunpack.i.l.bf16 %v3222_v18 }
 0x171   : > { %3506 = vrot.lane.b32.xlu0 %v3480_v10, %s3625_s30  ;;  %v3217_v55 = vpop.permute.xlu1 %3216  ;;  %v1925_v40 = vsel %vm1921_vm10, %v1892_v47, %v3039_v54  ;;  %v1922_v38 = vsel %vm1921_vm10, %v1889_v28, %v3033_v32  ;;  %v1923_v12 = vsel %vm1921_vm10, %v1890_v9, %v3034_v31  ;;  %v3054_v31 = vunpack.i.h.bf16 %v4785_v14 }
 0x172   : > { %v3219_v53 = vunpack.i.h.bf16 %v3217_v55  ;;  %v3218_v4 = vunpack.i.l.bf16 %v3217_v55  ;;  %v1957_v18 = vsel %vm1954_vm11, %v1924_v17, %v3223_v0  ;;  %v1958_v39 = vsel %vm1954_vm11, %v1925_v40, %v3224_v21  ;;  %v5934_v17 = vld [vmem:[#allocation12_spill] sm:$0xff] }
 0x173   : > { %v3232_v29 = vpop.permute.xlu0 %3231  ;;  %3511 = vrot.lane.b32.xlu1 %v4926_v22, %s3625_s30  ;;  %v3129_v28 = vunpack.i.h.bf16 %v4854_v42  ;;  %v3133_v9 = vunpack.i.l.bf16 %v4856_v13  ;;  %v3059_v54 = vunpack.i.h.bf16 %v4787_v20  ;;  %v5932_v42 = vld [vmem:[#allocation49_spill] sm:$0xff]  ;;  %v3008_v20 = vunpack.i.l.bf16 %v4744_v43 }
 0x174   : > { %v3234_v27 = vunpack.i.h.bf16 %v3232_v29  ;;  %v3233_v10 = vunpack.i.l.bf16 %v3232_v29  ;;  %v1956_v32 = vsel %vm1954_vm11, %v1923_v12, %v3219_v53  ;;  %v3134_v53 = vunpack.i.h.bf16 %v4856_v13  ;;  %v5935_v13 = vld [vmem:[#allocation11_spill] sm:$0xff] }
 0x175   : > { %3516 = vrot.lane.b32.xlu0 %v4680_v34, %s3629_s16  ;;  %v3227_v24 = vpop.permute.xlu1 %3226  ;;  %v1955_v34 = vsel %vm1954_vm11, %v1922_v38, %v3218_v4  ;;  %v3138_v4 = vunpack.i.l.bf16 %v4861_v26  ;;  %v1762_v40 = vsel %vm1758_vm5, %v5934_v17, %v3054_v31  ;;  %v3014_v31 = vunpack.i.h.bf16 %v4754_v25 }
 0x176   : > { %v3229_v11 = vunpack.i.h.bf16 %v3227_v24  ;;  %v3228_v16 = vunpack.i.l.bf16 %v3227_v24  ;;  %v1990_v5 = vsel %vm1987_vm12, %v1957_v18, %v3233_v10  ;;  %v1991_v60 = vsel %vm1987_vm12, %v1958_v39, %v3234_v27  ;;  %v5933_v27 = vld [vmem:[#allocation48_spill] sm:$0xff] }
 0x177   : > { %v4973_v52 = vpop.permute.xlu0 %3241  ;;  %3521 = vrot.lane.b32.xlu1 %v4699_v48, %s3629_s16  ;;  %v2021_v14 = vpack.c.bf16 %v1991_v60, %v1990_v5  ;;  %v3009_v10 = vunpack.i.h.bf16 %v4744_v43  ;;  %v1763_v24 = vsel %vm1758_vm5, %v5935_v13, %v3058_v30  ;;  %v1794_v38 = vsel %vm1790_vm6, %v1762_v40, %v3129_v28  ;;  %v5937_v5 = vld [vmem:[#allocation6_spill] sm:$0xff] }
 0x178   : > { %v1988_v47 = vsel %vm1987_vm12, %v1955_v34, %v3228_v16  ;;  %v1989_v55 = vsel %vm1987_vm12, %v1956_v32, %v3229_v11  ;;  %v1795_v12 = vsel %vm1790_vm6, %v1763_v24, %v3133_v9  ;;  %v5936_v16 = vld [vmem:[#allocation9_spill] sm:$0xff]  ;;  %v1765_v60 = vsel %vm1758_vm5, %v5937_v5, %v3063_v57 }
 0x179   : > { %3526 = vrot.lane.b32.xlu0 %v4683_v23, %s3630_s19  ;;  %v3237_v21 = vpop.permute.xlu1 %3236  ;;  %v2020_v0 = vpack.c.bf16 %v1989_v55, %v1988_v47  ;;  %v4996_v23 = vpack.i.bf16 %v5933_v27, %v5932_v42  ;;  %v1764_v43 = vsel %vm1758_vm5, %v5936_v16, %v3059_v54  ;;  %v3013_v30 = vunpack.i.l.bf16 %v4754_v25 }
 0x17a   : > { %v3239_v18 = vunpack.i.h.bf16 %v3237_v21  ;;  %v3238_v39 = vunpack.i.l.bf16 %v3237_v21  ;;  %v1796_v47 = vsel %vm1790_vm6, %v1764_v43, %v3134_v53  ;;  %v1797_v55 = vsel %vm1790_vm6, %v1765_v60, %v3138_v4 }
 0x17b   : > { %v3252_v29 = vpop.permute.xlu0 %3251  ;;  %3531 = vrot.lane.b32.xlu1 %v4701_v35, %s3630_s19  ;;  %2852 = vmatprep.mubr.msk.bf16.mxu0 %vm2079_vm13, %v2020_v0  ;;  %v3243_v9 = vunpack.i.l.bf16 %v4973_v52  ;;  %v1827_v21 = vsel %vm1822_vm7, %v1794_v38, %v3008_v20  ;;  %v1828_v0 = vsel %vm1822_vm7, %v1795_v12, %v3009_v10  ;;  %v1830_v4 = vsel %vm1822_vm7, %v1797_v55, %v3014_v31  ;;  %v5938_v12 = vld [vmem:[#allocation58_spill] sm:$0xff] }
 0x17c   : > { %2853 = vmatmul.mubr.msk.bf16.vlgmr.msra.gmra.mrb[0].mxu0 %vm2079_vm13, %v2021_v14  ;;  %v1860_v54 = vsel %vm1855_vm8, %v1827_v21, %v3238_v39  ;;  %v1861_v25 = vsel %vm1855_vm8, %v1828_v0, %v3239_v18  ;;  %v3254_v57 = vunpack.i.h.bf16 %v3252_v29  ;;  %v3253_v14 = vunpack.i.l.bf16 %v3252_v29 }
 0x17d   : > { %3536 = vrot.lane.b32.xlu0 %v4926_v22, %s3626_s7  ;;  %v3247_v11 = vpop.permute.xlu1 %3246  ;;  %v3244_v22 = vunpack.i.h.bf16 %v4973_v52  ;;  %v1829_v17 = vsel %vm1822_vm7, %v1796_v47, %v3013_v30  ;;  %v3044_v29 = vunpack.i.h.bf16 %v4777_v8 }
 0x17e   : > { %v3249_v34 = vunpack.i.h.bf16 %v3247_v11  ;;  %v3248_v32 = vunpack.i.l.bf16 %v3247_v11  ;;  %v1862_v39 = vsel %vm1855_vm8, %v1829_v17, %v3243_v9  ;;  %v5939_v9 = vld [vmem:[#allocation23_spill] sm:$0xff] }
 0x17f   : > { %v3257_v28 = vpop.permute.xlu0 %3256  ;;  %3541 = vrot.lane.b32.xlu1 %v4996_v23, %s3626_s7  ;;  %v1863_v18 = vsel %vm1855_vm8, %v1830_v4, %v3244_v22  ;;  %v1895_v11 = vsel %vm1888_vm9, %v1862_v39, %v3253_v14 }
 0x180   : > { %v1893_v52 = vsel %vm1888_vm9, %v1860_v54, %v3248_v32  ;;  %v1894_v20 = vsel %vm1888_vm9, %v1861_v25, %v3249_v34  ;;  %v3259_v40 = vunpack.i.h.bf16 %v3257_v28  ;;  %v3258_v10 = vunpack.i.l.bf16 %v3257_v28 }
 0x181   : > { %3546 = vrot.lane.b32.xlu0 %v4699_v48, %s3631_s24  ;;  %v3262_v53 = vpop.permute.xlu1 %3261  ;;  %v3043_v48 = vunpack.i.l.bf16 %v4777_v8  ;;  %v1896_v16 = vsel %vm1888_vm9, %v1863_v18, %v3254_v57  ;;  %v1927_v32 = vsel %vm1921_vm10, %v1894_v20, %v3044_v29  ;;  %v3068_v20 = vunpack.i.l.bf16 %v4798_v44  ;;  %v5940_v18 = vld [vmem:[#allocation13_spill] sm:$0xff] }
 0x182   : > { %v3264_v13 = vunpack.i.h.bf16 %v3262_v53  ;;  %v3263_v24 = vunpack.i.l.bf16 %v3262_v53  ;;  %v1928_v30 = vsel %vm1921_vm10, %v1895_v11, %v3258_v10  ;;  %v1929_v47 = vsel %vm1921_vm10, %v1896_v16, %v3259_v40 }
 0x183   : > { %v3267_v38 = vpop.permute.xlu0 %3266  ;;  %3551 = vrot.lane.b32.xlu1 %v5938_v12, %s3631_s24  ;;  %v1926_v34 = vsel %vm1921_vm10, %v1893_v52, %v3043_v48  ;;  %v3064_v52 = vunpack.i.h.bf16 %v4795_v46  ;;  %v3144_v29 = vunpack.i.h.bf16 %v4865_v61  ;;  %v3148_v48 = vunpack.i.l.bf16 %v4870_v50 }
 0x184   : > { %v3269_v43 = vunpack.i.h.bf16 %v3267_v38  ;;  %v3268_v5 = vunpack.i.l.bf16 %v3267_v38  ;;  %v1959_v55 = vsel %vm1954_vm11, %v1926_v34, %v3263_v24  ;;  %v1960_v28 = vsel %vm1954_vm11, %v1927_v32, %v3264_v13  ;;  %v5943_v34 = vld [vmem:[#allocation14_spill] sm:$0xff] }
 0x185   : > { %3556 = vrot.lane.b32.xlu0 %v4701_v35, %s3632_s26  ;;  %v3272_v60 = vpop.permute.xlu1 %3271  ;;  %v3139_v13 = vunpack.i.h.bf16 %v4861_v26  ;;  %v3069_v24 = vunpack.i.h.bf16 %v4798_v44  ;;  %v3073_v38 = vunpack.i.l.bf16 %v4802_v45  ;;  %v1766_v39 = vsel %vm1758_vm5, %v5940_v18, %v3064_v52  ;;  %v5941_v26 = vld [vmem:[#allocation10_spill] sm:$0xff] }
 0x186   : > { %v3274_v31 = vunpack.i.h.bf16 %v3272_v60  ;;  %v3273_v8 = vunpack.i.l.bf16 %v3272_v60  ;;  %v1961_v25 = vsel %vm1954_vm11, %v1928_v30, %v3268_v5  ;;  %v1962_v57 = vsel %vm1954_vm11, %v1929_v47, %v3269_v43  ;;  %v5942_v5 = vld [vmem:[#allocation15_spill] sm:$0xff] }
 0x187   : > { %v3277_v22 = vpop.permute.xlu0 %3276  ;;  %3561 = vrot.lane.b32.xlu1 %v5939_v9, %s3632_s26  ;;  %v1767_v11 = vsel %vm1758_vm5, %v5941_v26, %v3068_v20  ;;  %v1798_v44 = vsel %vm1790_vm6, %v1766_v39, %v3139_v13  ;;  %v3019_v43 = vunpack.i.h.bf16 %v4756_v51  ;;  %v1768_v60 = vsel %vm1758_vm5, %v5942_v5, %v3069_v24 }
 0x188   : > { %v1992_v35 = vsel %vm1987_vm12, %v1959_v55, %v3273_v8  ;;  %v1993_v21 = vsel %vm1987_vm12, %v1960_v28, %v3274_v31  ;;  %v3279_v0 = vunpack.i.h.bf16 %v3277_v22  ;;  %v3278_v54 = vunpack.i.l.bf16 %v3277_v22 }
 0x189   : > { %3566 = vrot.lane.b32.xlu0 %v4996_v23, %s3625_s30  ;;  %v3282_v14 = vpop.permute.xlu1 %3281  ;;  %v2022_v53 = vpack.c.bf16 %v1993_v21, %v1992_v35  ;;  %v3143_v23 = vunpack.i.l.bf16 %v4865_v61  ;;  %v3018_v61 = vunpack.i.l.bf16 %v4756_v51  ;;  %v1769_v32 = vsel %vm1758_vm5, %v5943_v34, %v3073_v38 }
 0x18a   : > { %v1994_v4 = vsel %vm1987_vm12, %v1961_v25, %v3278_v54  ;;  %v1995_v17 = vsel %vm1987_vm12, %v1962_v57, %v3279_v0  ;;  %v1800_v8 = vsel %vm1790_vm6, %v1768_v60, %v3144_v29  ;;  %v1801_v30 = vsel %vm1790_vm6, %v1769_v32, %v3148_v48 }
 0x18b   : > { %v3287_v40 = vpop.permute.xlu0 %3286  ;;  %3571 = vrot.lane.b32.xlu1 %v4709_v3, %s3625_s30  ;;  %2856 = vmatprep.mubr.msk.bf16.mxu0 %vm2079_vm13, %v2022_v53  ;;  %v2023_v10 = vpack.c.bf16 %v1995_v17, %v1994_v4  ;;  %v3284_v47 = vunpack.i.h.bf16 %v3282_v14  ;;  %v3283_v55 = vunpack.i.l.bf16 %v3282_v14  ;;  %v3024_v28 = vunpack.i.h.bf16 %v4762_v15 }
 0x18c   : > { %v3023_v51 = vunpack.i.l.bf16 %v4762_v15  ;;  %v1831_v22 = vsel %vm1822_vm7, %v1798_v44, %v3018_v61  ;;  %v3288_v0 = vunpack.i.l.bf16 %v3287_v40 }
 0x18d   : > { %3576 = vrot.lane.b32.xlu0 %v5938_v12, %s3629_s16  ;;  %2857 = vmatmul.mubr.msk.bf16.gmra.mrb[4].mxu0 %vm2079_vm13, %v2023_v10  ;;  %v3292_v46 = vpop.permute.xlu1 %3291  ;;  %v1799_v12 = vsel %vm1790_vm6, %v1767_v11, %v3143_v23  ;;  %v1834_v57 = vsel %vm1822_vm7, %v1801_v30, %v3024_v28  ;;  %v1864_v17 = vsel %vm1855_vm8, %v1831_v22, %v3283_v55  ;;  %v5945_v30 = vld [vmem:[#allocation5_spill] sm:$0xff] }
 0x18e   : > { %v1832_v35 = vsel %vm1822_vm7, %v1799_v12, %v3019_v43  ;;  %v3294_v54 = vunpack.i.h.bf16 %v3292_v46  ;;  %v3293_v25 = vunpack.i.l.bf16 %v3292_v46  ;;  %v1833_v14 = vsel %vm1822_vm7, %v1800_v8, %v3023_v51 }
 0x18f   : > { %v3297_v16 = vpop.permute.xlu0 %3296  ;;  %3581 = vrot.lane.b32.xlu1 %v4719_v19, %s3629_s16  ;;  %v1865_v52 = vsel %vm1855_vm8, %v1832_v35, %v3284_v47  ;;  %v5944_v46 = vmov 0.0   ;;  %v1866_v48 = vsel %vm1855_vm8, %v1833_v14, %v3288_v0  ;;  %v3074_v14 = vunpack.i.h.bf16 %v4802_v45 }
 0x190   : > { %v3299_v53 = vunpack.i.h.bf16 %v3297_v16  ;;  %v3298_v4 = vunpack.i.l.bf16 %v3297_v16  ;;  %v1898_v18 = vsel %vm1888_vm9, %v1865_v52, %v3294_v54  ;;  %v3079_v52 = vunpack.i.h.bf16 %v4808_v37 }
 0x191   : > { %3586 = vrot.lane.b32.xlu0 %v5939_v9, %s3630_s19  ;;  %v3302_v31 = vpop.permute.xlu1 %3301  ;;  %v3289_v9 = vunpack.i.h.bf16 %v3287_v40 }
 0x192   : > { %v3304_v20 = vunpack.i.h.bf16 %v3302_v31  ;;  %v3303_v10 = vunpack.i.l.bf16 %v3302_v31  ;;  %v1899_v39 = vsel %vm1888_vm9, %v1866_v48, %v3298_v4 }
 0x193   : > { %v3307_v21 = vpop.permute.xlu0 %3306  ;;  %3591 = vrot.lane.b32.xlu1 %v4721_v33, %s3630_s19  ;;  %v1867_v29 = vsel %vm1855_vm8, %v1834_v57, %v3289_v9  ;;  %v5946_v57 = vld [vmem:[#allocation59_spill] sm:$0xff] }
 0x194   : > { %v3309_v13 = vunpack.i.h.bf16 %v3307_v21  ;;  %v3308_v40 = vunpack.i.l.bf16 %v3307_v21  ;;  %v1900_v26 = vsel %vm1888_vm9, %v1867_v29, %v3299_v53  ;;  %v1931_v43 = vsel %vm1921_vm10, %v1898_v18, %v3304_v20 }
 0x195   : > { %3596 = vrot.lane.b32.xlu0 %v4709_v3, %s3626_s7  ;;  %v3312_v15 = vpop.permute.xlu1 %3311  ;;  %v1897_v3 = vsel %vm1888_vm9, %v1864_v17, %v3293_v25  ;;  %v3078_v53 = vunpack.i.l.bf16 %v4808_v37  ;;  %v3083_v20 = vunpack.i.l.bf16 %v4812_v59  ;;  %v3029_v29 = vunpack.i.h.bf16 %v4764_v36 }
 0x196   : > { %v3314_v23 = vunpack.i.h.bf16 %v3312_v15  ;;  %v3313_v24 = vunpack.i.l.bf16 %v3312_v15  ;;  %v1930_v12 = vsel %vm1921_vm10, %v1897_v3, %v3303_v10  ;;  %v1932_v60 = vsel %vm1921_vm10, %v1899_v39, %v3308_v40  ;;  %v5947_v10 = vld [vmem:[#allocation18_spill] sm:$0xff]  ;;  %v5948_v40 = vld [vmem:[#allocation17_spill] sm:$0xff]  ;;  %v5949_v39 = vld [vmem:[#allocation20_spill] sm:$0xff] }
 0x197   : > { %v3317_v38 = vpop.permute.xlu0 %3316  ;;  %1539 = vrot.lane.b32.xlu1 %v5944_v46, %s3626_s7  ;;  %v1933_v34 = vsel %vm1921_vm10, %v1900_v26, %v3309_v13  ;;  %v3153_v15 = vunpack.i.l.bf16 %v4872_v41  ;;  %v1770_v13 = vsel %vm1758_vm5, %v5947_v10, %v3074_v14  ;;  %v1771_v45 = vsel %vm1758_vm5, %v5948_v40, %v3078_v53  ;;  %s5372_s7 = scalar_lea.vmem %s5733_s4, %s3683_s25  ;;  %s2793_s25 = sshll.u32 %s5974_s22, 1 }
 0x198   : > { %v3319_v11 = vunpack.i.h.bf16 %v3317_v38  ;;  %v3318_v16 = vunpack.i.l.bf16 %v3317_v38  ;;  %v1963_v32 = vsel %vm1954_vm11, %v1930_v12, %v3313_v24  ;;  %v1964_v31 = vsel %vm1954_vm11, %v1931_v43, %v3314_v23  ;;  %s274_s14 = scalar_lea.vmem %s5735_s6, %s2793_s25 }
 0x199   : > { %3601 = vrot.lane.b32.xlu0 %v4719_v19, %s3631_s24  ;;  %v3322_v44 = vpop.permute.xlu1 %3321  ;;  %v3154_v23 = vunpack.i.h.bf16 %v4872_v41  ;;  %v3158_v24 = vunpack.i.l.bf16 %v4878_v6  ;;  %v1803_v46 = vsel %vm1790_vm6, %v1771_v45, %v3153_v15  ;;  %v3028_v37 = vunpack.i.l.bf16 %v4764_v36 }
 0x19a   : > { %v3324_v61 = vunpack.i.h.bf16 %v3322_v44  ;;  %v3323_v5 = vunpack.i.l.bf16 %v3322_v44  ;;  %v1965_v51 = vsel %vm1954_vm11, %v1932_v60, %v3318_v16  ;;  %v1966_v22 = vsel %vm1954_vm11, %v1933_v34, %v3319_v11  ;;  %v5950_v11 = vld [vmem:[#allocation19_spill] sm:$0xff] }
 0x19b   : > { %v3327_v8 = vpop.permute.xlu0 %3326  ;;  %1632 = vrot.lane.b32.xlu1 %v5945_v30, %s3631_s24  ;;  %v1772_v26 = vsel %vm1758_vm5, %v5949_v39, %v3079_v52  ;;  %v1773_v41 = vsel %vm1758_vm5, %v5950_v11, %v3083_v20 }
 0x19c   : > { %v1996_v19 = vsel %vm1987_vm12, %v1963_v32, %v3323_v5  ;;  %v1997_v47 = vsel %vm1987_vm12, %v1964_v31, %v3324_v61  ;;  %v3329_v55 = vunpack.i.h.bf16 %v3327_v8  ;;  %v3328_v28 = vunpack.i.l.bf16 %v3327_v8 }
 0x19d   : > { %v2024_v35 = vpack.c.bf16 %v1997_v47, %v1996_v19  ;;  %3606 = vrot.lane.b32.xlu0 %v4721_v33, %s3632_s26  ;;  %v3332_v21 = vpop.permute.xlu1 %3331  ;;  %v3149_v33 = vunpack.i.h.bf16 %v4870_v50  ;;  %v1804_v12 = vsel %vm1790_vm6, %v1772_v26, %v3154_v23  ;;  %v1805_v43 = vsel %vm1790_vm6, %v1773_v41, %v3158_v24 }
 0x19e   : > { %v1998_v9 = vsel %vm1987_vm12, %v1965_v51, %v3328_v28  ;;  %v1999_v0 = vsel %vm1987_vm12, %v1966_v22, %v3329_v55  ;;  %v3334_v48 = vunpack.i.h.bf16 %v3332_v21  ;;  %v3333_v3 = vunpack.i.l.bf16 %v3332_v21 }
 0x19f   : > { %v2025_v54 = vpack.c.bf16 %v1999_v0, %v1998_v9  ;;  %v3337_v25 = vpop.permute.xlu0 %3336  ;;  %1725 = vrot.lane.b32.xlu1 %v5946_v57, %s3632_s26  ;;  %2860 = vmatprep.mubr.msk.bf16.mxu0 %vm2079_vm13, %v2024_v35  ;;  %v1802_v50 = vsel %vm1790_vm6, %v1770_v13, %v3149_v33  ;;  %v1836_v5 = vsel %vm1822_vm7, %v1803_v46, %v3029_v29 }
 0x1a0   : > { %v3339_v16 = vunpack.i.h.bf16 %v3337_v25  ;;  %v3338_v44 = vunpack.i.l.bf16 %v3337_v25  ;;  %v1835_v61 = vsel %vm1822_vm7, %v1802_v50, %v3028_v37  ;;  %v1838_v8 = vsel %vm1822_vm7, %v1805_v43, %v3334_v48 }
 0x1a1   : > { %2861 = vmatmul.mubr.msk.bf16.gmra.mrb[8].mxu0 %vm2079_vm13, %v2025_v54  ;;  %v3342_v4 = vpop.permute.xlu1 %3341  ;;  %v1837_v30 = vsel %vm1822_vm7, %v1804_v12, %v3333_v3 }
 0x1a2   : > { %v3344_v60 = vunpack.i.h.bf16 %v3342_v4  ;;  %v3343_v34 = vunpack.i.l.bf16 %v3342_v4  ;;  %v1868_v28 = vsel %vm1855_vm8, %v1835_v61, %v3338_v44  ;;  %v1869_v51 = vsel %vm1855_vm8, %v1836_v5, %v3339_v16 }
 0x1a3   : > { %v3347_v17 = vpop.permute.xlu0 %3346  ;;  %v3084_v5 = vunpack.i.h.bf16 %v4812_v59 }
 0x1a4   : > { %v3349_v32 = vunpack.i.h.bf16 %v3347_v17  ;;  %v3348_v31 = vunpack.i.l.bf16 %v3347_v17  ;;  %v1870_v57 = vsel %vm1855_vm8, %v1837_v30, %v3343_v34  ;;  %v1871_v14 = vsel %vm1855_vm8, %v1838_v8, %v3344_v60 }
 0x1a5   : > { %v3352_v38 = vpop.permute.xlu1 %3351  ;;  %v3088_v60 = vunpack.i.l.bf16 %v4817_v7  ;;  %v3093_v34 = vunpack.i.l.bf16 %v4822_v58  ;;  %v3163_v8 = vunpack.i.l.bf16 %v4880_v1  ;;  %v3164_v30 = vunpack.i.h.bf16 %v4880_v1 }
 0x1a6   : > { %v3354_v19 = vunpack.i.h.bf16 %v3352_v38  ;;  %v3353_v47 = vunpack.i.l.bf16 %v3352_v38  ;;  %v1901_v53 = vsel %vm1888_vm9, %v1868_v28, %v3348_v31  ;;  %v1902_v4 = vsel %vm1888_vm9, %v1869_v51, %v3349_v32 }
 0x1a7   : > { %v3357_v18 = vpop.permute.xlu0 %3356  ;;  %v3159_v31 = vunpack.i.h.bf16 %v4878_v6  ;;  %v1774_v59 = vsel %vm1758_vm5, %v4129_v56, %v3084_v5  ;;  %v1775_v51 = vsel %vm1758_vm5, %v4126_v49, %v3088_v60  ;;  %v1777_v6 = vsel %vm1758_vm5, %v4183_v62, %v3093_v34 }
 0x1a8   : > { %v3359_v22 = vunpack.i.h.bf16 %v3357_v18  ;;  %v3358_v35 = vunpack.i.l.bf16 %v3357_v18  ;;  %v1903_v33 = vsel %vm1888_vm9, %v1870_v57, %v3353_v47  ;;  %v1904_v15 = vsel %vm1888_vm9, %v1871_v14, %v3354_v19 }
 0x1a9   : > { %v3362_v36 = vpop.permute.xlu1 %3361  ;;  %v3168_v19 = vunpack.i.l.bf16 %v4885_v2 }
 0x1aa   : > { %v3364_v21 = vunpack.i.h.bf16 %v3362_v36  ;;  %v3363_v9 = vunpack.i.l.bf16 %v3362_v36  ;;  %v1934_v10 = vsel %vm1921_vm10, %v1901_v53, %v3358_v35  ;;  %v1935_v13 = vsel %vm1921_vm10, %v1902_v4, %v3359_v22 }
 0x1ab   : > { %v3367_v55 = vpop.permute.xlu0 %3366  ;;  %v3089_v36 = vunpack.i.h.bf16 %v4817_v7 }
 0x1ac   : > { %v3369_v0 = vunpack.i.h.bf16 %v3367_v55  ;;  %v3368_v54 = vunpack.i.l.bf16 %v3367_v55  ;;  %v1936_v23 = vsel %vm1921_vm10, %v1903_v33, %v3363_v9  ;;  %v1937_v24 = vsel %vm1921_vm10, %v1904_v15, %v3364_v21 }
 0x1ad   : > { %v3372_v25 = vpop.permute.xlu1 %3371  ;;  %v1776_v7 = vsel %vm1758_vm5, %v4186_v63, %v3089_v36  ;;  %v1806_v21 = vsel %vm1790_vm6, %v1774_v59, %v3159_v31  ;;  %v1807_v9 = vsel %vm1790_vm6, %v1775_v51, %v3163_v8 }
 0x1ae   : > { %v3374_v17 = vunpack.i.h.bf16 %v3372_v25  ;;  %v3373_v52 = vunpack.i.l.bf16 %v3372_v25  ;;  %v1967_v38 = vsel %vm1954_vm11, %v1934_v10, %v3368_v54  ;;  %v1968_v50 = vsel %vm1954_vm11, %v1935_v13, %v3369_v0 }
 0x1af   : > { %v3377_v20 = vpop.permute.xlu0 %3376  ;;  %v1808_v56 = vsel %vm1790_vm6, %v1776_v7, %v3164_v30  ;;  %v1809_v25 = vsel %vm1790_vm6, %v1777_v6, %v3168_v19 }
 0x1b0   : > { %v3379_v40 = vunpack.i.h.bf16 %v3377_v20  ;;  %v3378_v45 = vunpack.i.l.bf16 %v3377_v20  ;;  %v1969_v18 = vsel %vm1954_vm11, %v1936_v23, %v3373_v52  ;;  %v1970_v39 = vsel %vm1954_vm11, %v1937_v24, %v3374_v17 }
 0x1b1   : > { %v3382_v46 = vpop.permute.xlu1 %3381 }
 0x1b2   : > { %v2000_v29 = vsel %vm1987_vm12, %v1967_v38, %v3378_v45  ;;  %v2001_v37 = vsel %vm1987_vm12, %v1968_v50, %v3379_v40  ;;  %v3384_v48 = vunpack.i.h.bf16 %v3382_v46  ;;  %v3383_v3 = vunpack.i.l.bf16 %v3382_v46 }
 0x1b3   : > { %v2026_v26 = vpack.c.bf16 %v2001_v37, %v2000_v29  ;;  %v3387_v11 = vpop.permute.xlu0 %3386 }
 0x1b4   : > { %v2002_v41 = vsel %vm1987_vm12, %v1969_v18, %v3383_v3  ;;  %v2003_v16 = vsel %vm1987_vm12, %v1970_v39, %v3384_v48  ;;  %v3389_v47 = vunpack.i.h.bf16 %v3387_v11  ;;  %v3388_v55 = vunpack.i.l.bf16 %v3387_v11 }
 0x1b5   : > { %v2027_v44 = vpack.c.bf16 %v2003_v16, %v2002_v41  ;;  %2864 = vmatprep.mubr.msk.bf16.mxu0 %vm2079_vm13, %v2026_v26  ;;  %v3392_v12 = vpop.permute.xlu1 %3391 }
 0x1b6   : > { %v3394_v22 = vunpack.i.h.bf16 %v3392_v12  ;;  %v3393_v35 = vunpack.i.l.bf16 %v3392_v12  ;;  %v1839_v63 = vsel %vm1822_vm7, %v1806_v21, %v3388_v55  ;;  %v1840_v49 = vsel %vm1822_vm7, %v1807_v9, %v3389_v47  ;;  %v5951_v21 = vld [vmem:[#allocation24_spill] sm:$0xff] }
 0x1b7   : > { %v3397_v43 = vpop.permute.xlu0 %3396  ;;  %2865 = vmatmul.mubr.msk.bf16.gmra.mrb[12].mxu0 %vm2079_vm13, %v2027_v44  ;;  %v3099_v9 = vunpack.i.h.bf16 %v5951_v21 }
 0x1b8   : > { %v3399_v0 = vunpack.i.h.bf16 %v3397_v43  ;;  %v3398_v54 = vunpack.i.l.bf16 %v3397_v43  ;;  %v1842_v33 = vsel %vm1822_vm7, %v1809_v25, %v3394_v22  ;;  %v1841_v15 = vsel %vm1822_vm7, %v1808_v56, %v3393_v35 }
 0x1b9   : > { %v3402_v61 = vpop.permute.xlu1 %3401 }
 0x1ba   : > { %v3404_v14 = vunpack.i.h.bf16 %v3402_v61  ;;  %v3403_v62 = vunpack.i.l.bf16 %v3402_v61  ;;  %v1872_v10 = vsel %vm1855_vm8, %v1839_v63, %v3398_v54  ;;  %v1873_v13 = vsel %vm1855_vm8, %v1840_v49, %v3399_v0  ;;  %v5952_v54 = vld [vmem:[#allocation25_spill] sm:$0xff] }
 0x1bb   : > { %v3407_v32 = vpop.permute.xlu0 %3406  ;;  %v3098_v0 = vunpack.i.l.bf16 %v5951_v21  ;;  %v3103_v56 = vunpack.i.l.bf16 %v5952_v54  ;;  %v3169_v63 = vunpack.i.h.bf16 %v4885_v2  ;;  %v5953_v49 = vld [vmem:[#allocation33_spill] sm:$0xff] }
 0x1bc   : > { %v3409_v53 = vunpack.i.h.bf16 %v3407_v32  ;;  %v3408_v4 = vunpack.i.l.bf16 %v3407_v32  ;;  %v1874_v29 = vsel %vm1855_vm8, %v1841_v15, %v3403_v62  ;;  %v1875_v37 = vsel %vm1855_vm8, %v1842_v33, %v3404_v14  ;;  %v5954_v62 = vld [vmem:[#allocation34_spill] sm:$0xff] }
 0x1bd   : > { %v3412_v28 = vpop.permute.xlu1 %3411  ;;  %v3174_v14 = vunpack.i.h.bf16 %v5953_v49 }
 0x1be   : > { %v3414_v17 = vunpack.i.h.bf16 %v3412_v28  ;;  %v3413_v52 = vunpack.i.l.bf16 %v3412_v28  ;;  %v1905_v48 = vsel %vm1888_vm9, %v1872_v10, %v3408_v4  ;;  %v1906_v3 = vsel %vm1888_vm9, %v1873_v13, %v3409_v53  ;;  %v5957_v10 = vld [vmem:[#allocation29_spill] sm:$0xff] }
 0x1bf   : > { %v3417_v1 = vpop.permute.xlu0 %3416  ;;  %v3178_v53 = vunpack.i.l.bf16 %v5954_v62  ;;  %v1779_v13 = vsel %vm1758_vm5, %v5957_v10, %v3098_v0 }
 0x1c0   : > { %v3419_v40 = vunpack.i.h.bf16 %v3417_v1  ;;  %v3418_v45 = vunpack.i.l.bf16 %v3417_v1  ;;  %v1907_v18 = vsel %vm1888_vm9, %v1874_v29, %v3413_v52  ;;  %v1908_v39 = vsel %vm1888_vm9, %v1875_v37, %v3414_v17  ;;  %v5955_v17 = vld [vmem:[#allocation30_spill] sm:$0xff]  ;;  %v5956_v52 = vld [vmem:[#allocation32_spill] sm:$0xff] }
 0x1c1   : > { %v3422_v57 = vpop.permute.xlu1 %3421  ;;  %v3094_v1 = vunpack.i.h.bf16 %v4822_v58 }
 0x1c2   : > { %v3424_v23 = vunpack.i.h.bf16 %v3422_v57  ;;  %v3423_v24 = vunpack.i.l.bf16 %v3422_v57  ;;  %v1938_v16 = vsel %vm1921_vm10, %v1905_v48, %v3418_v45  ;;  %v1939_v44 = vsel %vm1921_vm10, %v1906_v3, %v3419_v40  ;;  %v5958_v40 = vld [vmem:[#allocation31_spill] sm:$0xff] }
 0x1c3   : > { %v3427_v20 = vpop.permute.xlu0 %3426  ;;  %v3173_v57 = vunpack.i.l.bf16 %v5953_v49  ;;  %v1778_v58 = vsel %vm1758_vm5, %v5955_v17, %v3094_v1  ;;  %v1781_v2 = vsel %vm1758_vm5, %v5958_v40, %v3103_v56 }
 0x1c4   : > { %v3429_v38 = vunpack.i.h.bf16 %v3427_v20  ;;  %v3428_v50 = vunpack.i.l.bf16 %v3427_v20  ;;  %v1940_v61 = vsel %vm1921_vm10, %v1907_v18, %v3423_v24  ;;  %v1941_v5 = vsel %vm1921_vm10, %v1908_v39, %v3424_v23 }
 0x1c5   : > { %v3432_v46 = vpop.permute.xlu1 %3431  ;;  %v1780_v20 = vsel %vm1758_vm5, %v5956_v52, %v3099_v9  ;;  %v1813_v48 = vsel %vm1790_vm6, %v1781_v2, %v3178_v53 }
 0x1c6   : > { %v3434_v26 = vunpack.i.h.bf16 %v3432_v46  ;;  %v3433_v11 = vunpack.i.l.bf16 %v3432_v46  ;;  %v1971_v60 = vsel %vm1954_vm11, %v1938_v16, %v3428_v50  ;;  %v1972_v34 = vsel %vm1954_vm11, %v1939_v44, %v3429_v38 }
 0x1c7   : > { %v3437_v41 = vpop.permute.xlu0 %3436  ;;  %v1810_v38 = vsel %vm1790_vm6, %v1778_v58, %v3169_v63  ;;  %v1811_v50 = vsel %vm1790_vm6, %v1779_v13, %v3173_v57  ;;  %v1812_v37 = vsel %vm1790_vm6, %v1780_v20, %v3174_v14 }
 0x1c8   : > { %v3439_v12 = vunpack.i.h.bf16 %v3437_v41  ;;  %v3438_v43 = vunpack.i.l.bf16 %v3437_v41  ;;  %v1973_v19 = vsel %vm1954_vm11, %v1940_v61, %v3433_v11  ;;  %v1974_v47 = vsel %vm1954_vm11, %v1941_v5, %v3434_v26 }
 0x1c9   : > { %v3442_v36 = vpop.permute.xlu1 %3441 }
 0x1ca   : > { %v3444_v32 = vunpack.i.h.bf16 %v3442_v36  ;;  %v3443_v31 = vunpack.i.l.bf16 %v3442_v36  ;;  %v2004_v8 = vsel %vm1987_vm12, %v1971_v60, %v3438_v43  ;;  %v2005_v30 = vsel %vm1987_vm12, %v1972_v34, %v3439_v12 }
 0x1cb   : > { %v3447_v55 = vpop.permute.xlu0 %3446  ;;  %v2028_v28 = vpack.c.bf16 %v2005_v30, %v2004_v8 }
 0x1cc   : > { %v2006_v59 = vsel %vm1987_vm12, %v1973_v19, %v3443_v31  ;;  %v2007_v7 = vsel %vm1987_vm12, %v1974_v47, %v3444_v32  ;;  %v3449_v4 = vunpack.i.h.bf16 %v3447_v55  ;;  %v3448_v33 = vunpack.i.l.bf16 %v3447_v55 }
 0x1cd   : > { %v2029_v51 = vpack.c.bf16 %v2007_v7, %v2006_v59  ;;  %2868 = vmatprep.mubr.msk.bf16.mxu1 %vm2079_vm13, %v2028_v28  ;;  %v3452_v6 = vpop.permute.xlu1 %3451 }
 0x1ce   : > { %v3454_v45 = vunpack.i.h.bf16 %v3452_v6  ;;  %v3453_v23 = vunpack.i.l.bf16 %v3452_v6  ;;  %v1843_v3 = vsel %vm1822_vm7, %v1810_v38, %v3448_v33  ;;  %v1844_v18 = vsel %vm1822_vm7, %v1811_v50, %v3449_v4  ;;  %v5959_v38 = vld [vmem:[#allocation26_spill] sm:$0xff] }
 0x1cf   : > { %v3457_v22 = vpop.permute.xlu0 %3456  ;;  %2869 = vmatmul.mubr.msk.bf16.vlgmr.msra.gmra.mrb[0].mxu1 %vm2079_vm13, %v2029_v51  ;;  %v3109_v50 = vunpack.i.h.bf16 %v5959_v38 }
 0x1d0   : > { %v3459_v46 = vunpack.i.h.bf16 %v3457_v22  ;;  %v3458_v29 = vunpack.i.l.bf16 %v3457_v22  ;;  %v1846_v44 = vsel %vm1822_vm7, %v1813_v48, %v3454_v45  ;;  %v1845_v12 = vsel %vm1822_vm7, %v1812_v37, %v3453_v23 }
 0x1d1   : > { %v3462_v35 = vpop.permute.xlu1 %3461 }
 0x1d2   : > { %v3464_v26 = vunpack.i.h.bf16 %v3462_v35  ;;  %v3463_v11 = vunpack.i.l.bf16 %v3462_v35  ;;  %v1876_v36 = vsel %vm1855_vm8, %v1843_v3, %v3458_v29  ;;  %v1877_v60 = vsel %vm1855_vm8, %v1844_v18, %v3459_v46  ;;  %v5960_v29 = vld [vmem:[#allocation27_spill] sm:$0xff]  ;;  %v5961_v18 = vld [vmem:[#allocation4_spill] sm:$0xff] }
 0x1d3   : > { %v3467_v25 = vpop.permute.xlu0 %3466  ;;  %v3108_v46 = vunpack.i.l.bf16 %v5959_v38  ;;  %v3113_v37 = vunpack.i.l.bf16 %v5960_v29  ;;  %v3179_v3 = vunpack.i.h.bf16 %v5954_v62 }
 0x1d4   : > { %v3469_v41 = vunpack.i.h.bf16 %v3467_v25  ;;  %v3468_v16 = vunpack.i.l.bf16 %v3467_v25  ;;  %v1878_v55 = vsel %vm1855_vm8, %v1845_v12, %v3463_v11  ;;  %v1879_v28 = vsel %vm1855_vm8, %v1846_v44, %v3464_v26  ;;  %v5962_v11 = vld [vmem:[#allocation2_spill] sm:$0xff] }
 0x1d5   : > { %v3472_v15 = vpop.permute.xlu1 %3471  ;;  %v3184_v26 = vunpack.i.h.bf16 %v5961_v18 }
 0x1d6   : > { %v3474_v43 = vunpack.i.h.bf16 %v3472_v15  ;;  %v3473_v61 = vunpack.i.l.bf16 %v3472_v15  ;;  %v1909_v59 = vsel %vm1888_vm9, %v1876_v36, %v3468_v16  ;;  %v1910_v7 = vsel %vm1888_vm9, %v1877_v60, %v3469_v41  ;;  %v5965_v36 = vld [vmem:[#allocation36_spill] sm:$0xff] }
 0x1d7   : > { %v3477_v24 = vpop.permute.xlu0 %3476  ;;  %v3188_v41 = vunpack.i.l.bf16 %v5962_v11  ;;  %v1783_v60 = vsel %vm1758_vm5, %v5965_v36, %v3108_v46 }
 0x1d8   : > { %v3479_v34 = vunpack.i.h.bf16 %v3477_v24  ;;  %v3478_v32 = vunpack.i.l.bf16 %v3477_v24  ;;  %v1911_v51 = vsel %vm1888_vm9, %v1878_v55, %v3473_v61  ;;  %v1912_v6 = vsel %vm1888_vm9, %v1879_v28, %v3474_v43  ;;  %v5963_v43 = vld [vmem:[#allocation37_spill] sm:$0xff]  ;;  %v5964_v61 = vld [vmem:[#allocation39_spill] sm:$0xff] }
 0x1d9   : > { %v3482_v39 = vpop.permute.xlu1 %3481  ;;  %v3104_v24 = vunpack.i.h.bf16 %v5952_v54 }
 0x1da   : > { %v3484_v31 = vunpack.i.h.bf16 %v3482_v39  ;;  %v3483_v8 = vunpack.i.l.bf16 %v3482_v39  ;;  %v1942_v21 = vsel %vm1921_vm10, %v1909_v59, %v3478_v32  ;;  %v1943_v9 = vsel %vm1921_vm10, %v1910_v7, %v3479_v34  ;;  %v5966_v34 = vld [vmem:[#allocation38_spill] sm:$0xff] }
 0x1db   : > { %v3487_v5 = vpop.permute.xlu0 %3486  ;;  %v3183_v39 = vunpack.i.l.bf16 %v5961_v18  ;;  %v1782_v54 = vsel %vm1758_vm5, %v5963_v43, %v3104_v24  ;;  %v1785_v62 = vsel %vm1758_vm5, %v5966_v34, %v3113_v37 }
 0x1dc   : > { %v3489_v30 = vunpack.i.h.bf16 %v3487_v5  ;;  %v3488_v19 = vunpack.i.l.bf16 %v3487_v5  ;;  %v1944_v25 = vsel %vm1921_vm10, %v1911_v51, %v3483_v8  ;;  %v1945_v63 = vsel %vm1921_vm10, %v1912_v6, %v3484_v31 }
 0x1dd   : > { %v3492_v47 = vpop.permute.xlu1 %3491  ;;  %v1784_v5 = vsel %vm1758_vm5, %v5964_v61, %v3109_v50  ;;  %v1817_v59 = vsel %vm1790_vm6, %v1785_v62, %v3188_v41 }
 0x1de   : > { %v3494_v22 = vunpack.i.h.bf16 %v3492_v47  ;;  %v3493_v35 = vunpack.i.l.bf16 %v3492_v47  ;;  %v1975_v49 = vsel %vm1954_vm11, %v1942_v21, %v3488_v19  ;;  %v1976_v57 = vsel %vm1954_vm11, %v1943_v9, %v3489_v30 }
 0x1df   : > { %v3497_v1 = vpop.permute.xlu0 %3496  ;;  %v1814_v30 = vsel %vm1790_vm6, %v1782_v54, %v3179_v3  ;;  %v1815_v19 = vsel %vm1790_vm6, %v1783_v60, %v3183_v39  ;;  %v1816_v28 = vsel %vm1790_vm6, %v1784_v5, %v3184_v26 }
 0x1e0   : > { %v3499_v0 = vunpack.i.h.bf16 %v3497_v1  ;;  %v3498_v56 = vunpack.i.l.bf16 %v3497_v1  ;;  %v1977_v17 = vsel %vm1954_vm11, %v1944_v25, %v3493_v35  ;;  %v1978_v58 = vsel %vm1954_vm11, %v1945_v63, %v3494_v22 }
 0x1e1   : > { %v3502_v14 = vpop.permute.xlu1 %3501 }
 0x1e2   : > { %v2008_v53 = vsel %vm1987_vm12, %v1975_v49, %v3498_v56  ;;  %v2009_v4 = vsel %vm1987_vm12, %v1976_v57, %v3499_v0  ;;  %v3504_v33 = vunpack.i.h.bf16 %v3502_v14  ;;  %v3503_v15 = vunpack.i.l.bf16 %v3502_v14 }
 0x1e3   : > { %v2030_v52 = vpack.c.bf16 %v2009_v4, %v2008_v53  ;;  %v3507_v20 = vpop.permute.xlu0 %3506 }
 0x1e4   : > { %v2010_v10 = vsel %vm1987_vm12, %v1977_v17, %v3503_v15  ;;  %v2011_v13 = vsel %vm1987_vm12, %v1978_v58, %v3504_v33  ;;  %v3509_v16 = vunpack.i.h.bf16 %v3507_v20  ;;  %v3508_v44 = vunpack.i.l.bf16 %v3507_v20 }
 0x1e5   : > { %v2031_v40 = vpack.c.bf16 %v2011_v13, %v2010_v10  ;;  %2872 = vmatprep.mubr.msk.bf16.mxu1 %vm2079_vm13, %v2030_v52  ;;  %v3512_v2 = vpop.permute.xlu1 %3511 }
 0x1e6   : > { %v3514_v32 = vunpack.i.h.bf16 %v3512_v2  ;;  %v3513_v31 = vunpack.i.l.bf16 %v3512_v2  ;;  %v1847_v7 = vsel %vm1822_vm7, %v1814_v30, %v3508_v44  ;;  %v1848_v51 = vsel %vm1822_vm7, %v1815_v19, %v3509_v16 }
 0x1e7   : > { %v3517_v45 = vpop.permute.xlu0 %3516  ;;  %2873 = vmatmul.mubr.msk.bf16.gmra.mrb[4].mxu1 %vm2079_vm13, %v2031_v40 }
 0x1e8   : > { %v3519_v47 = vunpack.i.h.bf16 %v3517_v45  ;;  %v3518_v55 = vunpack.i.l.bf16 %v3517_v45  ;;  %v1850_v9 = vsel %vm1822_vm7, %v1817_v59, %v3514_v32  ;;  %v1849_v0 = vsel %vm1822_vm7, %v1816_v28, %v3513_v31  ;;  %v5968_v28 = vld [vmem:[#allocation35_spill] sm:$0xff] }
 0x1e9   : > { %v3522_v23 = vpop.permute.xlu1 %3521  ;;  %v3114_v31 = vunpack.i.h.bf16 %v5960_v29  ;;  %v3193_v59 = vunpack.i.l.bf16 %v5968_v28  ;;  %v5970_v29 = vld [vmem:[#allocation45_spill] sm:$0xff] }
 0x1ea   : > { %v3524_v22 = vunpack.i.h.bf16 %v3522_v23  ;;  %v3523_v35 = vunpack.i.l.bf16 %v3522_v23  ;;  %v1880_v49 = vsel %vm1855_vm8, %v1847_v7, %v3518_v55  ;;  %v1881_v57 = vsel %vm1855_vm8, %v1848_v51, %v3519_v47  ;;  %v5969_v51 = vld [vmem:[#allocation46_spill] sm:$0xff] }
 0x1eb   : > { %v3527_v48 = vpop.permute.xlu0 %3526  ;;  %v3189_v55 = vunpack.i.h.bf16 %v5962_v11 }
 0x1ec   : > { %v3529_v1 = vunpack.i.h.bf16 %v3527_v48  ;;  %v3528_v21 = vunpack.i.l.bf16 %v3527_v48  ;;  %v1882_v52 = vsel %vm1855_vm8, %v1849_v0, %v3523_v35  ;;  %v1883_v20 = vsel %vm1855_vm8, %v1850_v9, %v3524_v22  ;;  %v5971_v9 = vld [vmem:[#allocation44_spill] sm:$0xff] }
 0x1ed   : > { %v3532_v12 = vpop.permute.xlu1 %3531  ;;  %v3194_v35 = vunpack.i.h.bf16 %v5968_v28  ;;  %v1789_v0 = vsel %vm1758_vm5, %v5933_v27, %v5971_v9 }
 0x1ee   : > { %v3534_v56 = vunpack.i.h.bf16 %v3532_v12  ;;  %v3533_v25 = vunpack.i.l.bf16 %v3532_v12  ;;  %v1913_v10 = vsel %vm1888_vm9, %v1880_v49, %v3528_v21  ;;  %v1914_v13 = vsel %vm1888_vm9, %v1881_v57, %v3529_v1 }
 0x1ef   : > { %v3537_v8 = vpop.permute.xlu0 %3536 }
 0x1f0   : > { %v3539_v14 = vunpack.i.h.bf16 %v3537_v8  ;;  %v3538_v53 = vunpack.i.l.bf16 %v3537_v8  ;;  %v1915_v40 = vsel %vm1888_vm9, %v1882_v52, %v3533_v25  ;;  %v1916_v2 = vsel %vm1888_vm9, %v1883_v20, %v3534_v56  ;;  %v5967_v8 = vld [vmem:[#allocation28_spill] sm:$0xff] }
 0x1f1   : > { %v3542_v6 = vpop.permute.xlu1 %3541  ;;  %v3119_v30 = vunpack.i.h.bf16 %v5967_v8  ;;  %v3118_v47 = vunpack.i.l.bf16 %v5967_v8 }
 0x1f2   : > { %v3544_v4 = vunpack.i.h.bf16 %v3542_v6  ;;  %v3543_v33 = vunpack.i.l.bf16 %v3542_v6  ;;  %v1946_v38 = vsel %vm1921_vm10, %v1913_v10, %v3538_v53  ;;  %v1947_v50 = vsel %vm1921_vm10, %v1914_v13, %v3539_v14 }
 0x1f3   : > { %v3547_v63 = vpop.permute.xlu0 %3546  ;;  %v1786_v6 = vsel %vm1758_vm5, %v5969_v51, %v3114_v31  ;;  %v1788_v22 = vsel %vm1758_vm5, %v5932_v42, %v3119_v30  ;;  %v1787_v21 = vsel %vm1758_vm5, %v5970_v29, %v3118_v47  ;;  %v5366_v51 = vld [vmem:[%s5732_s3] ss:$0 sm:$0xff] }
 0x1f4   : > { %v3549_v15 = vunpack.i.h.bf16 %v3547_v63  ;;  %v3548_v17 = vunpack.i.l.bf16 %v3547_v63  ;;  %v1948_v48 = vsel %vm1921_vm10, %v1915_v40, %v3543_v33  ;;  %v1949_v3 = vsel %vm1921_vm10, %v1916_v2, %v3544_v4 }
 0x1f5   : > { %v3552_v58 = vpop.permute.xlu1 %3551  ;;  %v1818_v25 = vsel %vm1790_vm6, %v1786_v6, %v3189_v55  ;;  %v1819_v63 = vsel %vm1790_vm6, %v1787_v21, %v3193_v59 }
 0x1f6   : > { %v3554_v45 = vunpack.i.h.bf16 %v3552_v58  ;;  %v3553_v23 = vunpack.i.l.bf16 %v3552_v58  ;;  %v1979_v18 = vsel %vm1954_vm11, %v1946_v38, %v3548_v17  ;;  %v1980_v39 = vsel %vm1954_vm11, %v1947_v50, %v3549_v15  ;;  %v5972_v17 = vld [vmem:[#allocation40_spill] sm:$0xff] }
 0x1f7   : > { %v3557_v24 = vpop.permute.xlu0 %3556  ;;  %v1820_v15 = vsel %vm1790_vm6, %v1788_v22, %v3194_v35  ;;  %v1821_v58 = vsel %vm1790_vm6, %v1789_v0, %v5972_v17 }
 0x1f8   : > { %v3559_v46 = vunpack.i.h.bf16 %v3557_v24  ;;  %v3558_v37 = vunpack.i.l.bf16 %v3557_v24  ;;  %v1981_v43 = vsel %vm1954_vm11, %v1948_v48, %v3553_v23  ;;  %v1982_v54 = vsel %vm1954_vm11, %v1949_v3, %v3554_v45 }
 0x1f9   : > { %v3562_v26 = vpop.permute.xlu1 %3561 }
 0x1fa   : > { %v2012_v41 = vsel %vm1987_vm12, %v1979_v18, %v3558_v37  ;;  %v2013_v16 = vsel %vm1987_vm12, %v1980_v39, %v3559_v46  ;;  %v3564_v44 = vunpack.i.h.bf16 %v3562_v26  ;;  %v3563_v12 = vunpack.i.l.bf16 %v3562_v26 }
 0x1fb   : > { %v2032_v61 = vpack.c.bf16 %v2013_v16, %v2012_v41  ;;  %v3567_v5 = vpop.permute.xlu0 %3566 }
 0x1fc   : > { %v2014_v36 = vsel %vm1987_vm12, %v1981_v43, %v3563_v12  ;;  %v2015_v60 = vsel %vm1987_vm12, %v1982_v54, %v3564_v44  ;;  %v3569_v11 = vunpack.i.h.bf16 %v3567_v5  ;;  %v3568_v56 = vunpack.i.l.bf16 %v3567_v5 }
 0x1fd   : > { %v2033_v34 = vpack.c.bf16 %v2015_v60, %v2014_v36  ;;  %2876 = vmatprep.mubr.msk.bf16.mxu1 %vm2079_vm13, %v2032_v61  ;;  %v3572_v62 = vpop.permute.xlu1 %3571 }
 0x1fe   : > { %v3574_v49 = vunpack.i.h.bf16 %v3572_v62  ;;  %v3573_v57 = vunpack.i.l.bf16 %v3572_v62  ;;  %v1851_v10 = vsel %vm1822_vm7, %v1818_v25, %v3568_v56  ;;  %v1852_v13 = vsel %vm1822_vm7, %v1819_v63, %v3569_v11 }
 0x1ff   : > { %v3577_v32 = vpop.permute.xlu0 %3576  ;;  %2877 = vmatmul.mubr.msk.bf16.gmra.mrb[8].mxu1 %vm2079_vm13, %v2033_v34 }
 0x200   : > { %v3579_v42 = vunpack.i.h.bf16 %v3577_v32  ;;  %v3578_v53 = vunpack.i.l.bf16 %v3577_v32  ;;  %v1854_v45 = vsel %vm1822_vm7, %v1821_v58, %v3574_v49  ;;  %v1853_v23 = vsel %vm1822_vm7, %v1820_v15, %v3573_v57 }
 0x201   : > { %v3582_v19 = vpop.permute.xlu1 %3581 }
 0x202   : > { %v3584_v4 = vunpack.i.h.bf16 %v3582_v19  ;;  %v3583_v33 = vunpack.i.l.bf16 %v3582_v19  ;;  %v1884_v46 = vsel %vm1855_vm8, %v1851_v10, %v3578_v53  ;;  %v1885_v37 = vsel %vm1855_vm8, %v1852_v13, %v3579_v42 }
 0x203   : > { %v3587_v7 = vpop.permute.xlu0 %3586 }
 0x204   : > { %v3589_v40 = vunpack.i.h.bf16 %v3587_v7  ;;  %v3588_v2 = vunpack.i.l.bf16 %v3587_v7  ;;  %v1886_v48 = vsel %vm1855_vm8, %v1853_v23, %v3583_v33  ;;  %v1887_v3 = vsel %vm1855_vm8, %v1854_v45, %v3584_v4 }
 0x205   : > { %v3592_v1 = vpop.permute.xlu1 %3591 }
 0x206   : > { %v3594_v52 = vunpack.i.h.bf16 %v3592_v1  ;;  %v3593_v27 = vunpack.i.l.bf16 %v3592_v1  ;;  %v1917_v44 = vsel %vm1888_vm9, %v1884_v46, %v3588_v2  ;;  %v1918_v12 = vsel %vm1888_vm9, %v1885_v37, %v3589_v40 }
 0x207   : > { %v3597_v14 = vpop.permute.xlu0 %3596 }
 0x208   : > { %v3599_v24 = vunpack.i.h.bf16 %v3597_v14  ;;  %v3598_v38 = vunpack.i.l.bf16 %v3597_v14  ;;  %v1919_v18 = vsel %vm1888_vm9, %v1886_v48, %v3593_v27  ;;  %v1920_v39 = vsel %vm1888_vm9, %v1887_v3, %v3594_v52 }
 0x209   : > { %v1540_v20 = vpop.permute.xlu1 %1539 }
 0x20a   : > { %v1950_v43 = vsel %vm1921_vm10, %v1917_v44, %v3598_v38  ;;  %v1951_v54 = vsel %vm1921_vm10, %v1918_v12, %v3599_v24  ;;  %v1952_v5 = vsel %vm1921_vm10, %v1919_v18, %v1540_v20  ;;  %v1953_v36 = vsel %vm1921_vm10, %v1920_v39, %v1540_v20 }
 0x20b   : > { %v3602_v50 = vpop.permute.xlu0 %3601 }
 0x20c   : > { %v3604_v26 = vunpack.i.h.bf16 %v3602_v50  ;;  %v3603_v41 = vunpack.i.l.bf16 %v3602_v50 }
 0x20d   : > { %v1633_v16 = vpop.permute.xlu1 %1632 }
 0x20e   : > { %v1983_v62 = vsel %vm1954_vm11, %v1950_v43, %v3603_v41  ;;  %v1984_v32 = vsel %vm1954_vm11, %v1951_v54, %v3604_v26  ;;  %v1985_v31 = vsel %vm1954_vm11, %v1952_v5, %v1633_v16  ;;  %v1986_v8 = vsel %vm1954_vm11, %v1953_v36, %v1633_v16 }
 0x20f   : > { %v3607_v61 = vpop.permute.xlu0 %3606 }
 0x210   : > { %v3609_v60 = vunpack.i.h.bf16 %v3607_v61  ;;  %v3608_v34 = vunpack.i.l.bf16 %v3607_v61 }
 0x211   : > { %v1726_v30 = vpop.permute.xlu1 %1725 }
 0x212   : > { %v2016_v19 = vsel %vm1987_vm12, %v1983_v62, %v3608_v34  ;;  %v2017_v47 = vsel %vm1987_vm12, %v1984_v32, %v3609_v60  ;;  %v2018_v55 = vsel %vm1987_vm12, %v1985_v31, %v1726_v30  ;;  %v2019_v28 = vsel %vm1987_vm12, %v1986_v8, %v1726_v30 }
 0x213   : > { %v2034_v59 = vpack.c.bf16 %v2017_v47, %v2016_v19  ;;  %v2035_v7 = vpack.c.bf16 %v2019_v28, %v2018_v55 }
 0x215   : > { %2880 = vmatprep.mubr.msk.bf16.mxu1 %vm2079_vm13, %v2034_v59 }
 0x216   : > { %2881 = vmatmul.mubr.msk.bf16.gmra.mrb[12].mxu1 %vm2079_vm13, %v2035_v7 }
 0x24f   : > { %v2854_v6 = vpop.f32.mrb[0].mxu0 }
 0x250   : > { %v2175_v22 = vadd.f32 %v2854_v6, %v5366_v51  ;;  %v2166_v35 = vpop.f32.mrb[1].mxu0 }
 0x251   : > { %v2167_v1 = vadd.f32 %v5366_v51, %v2166_v35  ;;  %v2855_v29 = vpop.f32.mrb[2].mxu0 }
 0x252   : > { %2295 = vst.msk [vmem:[%s5372_s7 + $0x10] sm:$0xff] %vm1758_vm5, %v2175_v22  ;;  %v2178_v21 = vadd.f32 %v2855_v29, %v5366_v51  ;;  %2361 = vrot.lane.b32.xlu0 %v2175_v22, %s3633_s8  ;;  %v2169_v9 = vpop.f32.mrb[3].mxu0  ;;  %v2557_v56 = vmul.f32 %v2175_v22, %v2175_v22  ;;  %v2489_v14 = vsel %vm2485_vm14, %v2175_v22, 0.0 }
 0x253   : > { %2293 = vst.msk [vmem:[%s5372_s7] sm:$0xff] %vm1758_vm5, %v2167_v1  ;;  %v2555_v0 = vmul.f32 %v2167_v1, %v2167_v1  ;;  %v2170_v11 = vadd.f32 %v5366_v51, %v2169_v9  ;;  %v2486_v25 = vsel %vm2485_vm14, %v2167_v1, 0.0 }
 0x254   : > { %2296 = vst.msk [vmem:[%s5372_s7 + $0x18] sm:$0xff] %vm1758_vm5, %v2178_v21  ;;  %2363 = vrot.lane.b32.xlu1 %v2178_v21, %s3633_s8  ;;  %v2558_v53 = vmul.f32 %v2178_v21, %v2178_v21  ;;  %v2590_v17 = vsel %vm2485_vm14, %v2557_v56, 0.0  ;;  %v2491_v58 = vsel %vm2485_vm14, %v2178_v21, 0.0 }
 0x255   : > { %2294 = vst.msk [vmem:[%s5372_s7 + $0x8] sm:$0xff] %vm1758_vm5, %v2170_v11  ;;  %v2487_v63 = vsel %vm2485_vm14, %v2170_v11, 0.0  ;;  %v2556_v49 = vmul.f32 %v2170_v11, %v2170_v11  ;;  %v2587_v42 = vsel %vm2485_vm14, %v2555_v0, 0.0 }
 0x256   : > { %v2488_v57 = vadd.f32 %v2487_v63, %v2486_v25  ;;  %2357 = vrot.lane.b32.xlu0 %v2167_v1, %s3633_s8  ;;  %v2592_v20 = vsel %vm2485_vm14, %v2558_v53, 0.0 }
 0x257   : > { %v2588_v4 = vsel %vm2485_vm14, %v2556_v49, 0.0 }
 0x258   : > { %v2490_v33 = vadd.f32 %v2489_v14, %v2488_v57  ;;  %v2589_v15 = vadd.f32 %v2588_v4, %v2587_v42  ;;  %2359 = vrot.lane.b32.xlu1 %v2170_v11, %s3633_s8 }
 0x25a   : > { %v2591_v52 = vadd.f32 %v2590_v17, %v2589_v15  ;;  %v2492_v27 = vadd.f32 %v2491_v58, %v2490_v33 }
 0x25c   : > { %v2593_v10 = vadd.f32 %v2592_v20, %v2591_v52 }
 0x260   : > { %v2858_v13 = vpop.f32.mrb[4].mxu0 }
 0x261   : > { %v5399_v40 = vadd.f32 %v2858_v13, %v5366_v51  ;;  %v2182_v2 = vpop.f32.mrb[5].mxu0 }
 0x262   : > { %v5402_v45 = vadd.f32 %v5366_v51, %v2182_v2  ;;  %v2859_v23 = vpop.f32.mrb[6].mxu0 }
 0x263   : > { %2299 = vst.msk [vmem:[%s5372_s7 + $0x30] sm:$0xff] %vm1758_vm5, %v5399_v40  ;;  %v5408_v24 = vadd.f32 %v2859_v23, %v5366_v51  ;;  %v2185_v38 = vpop.f32.mrb[7].mxu0  ;;  %v2561_v34 = vmul.f32 %v5399_v40, %v5399_v40  ;;  %v2497_v32 = vsel %vm2485_vm14, %v5399_v40, 0.0 }
 0x264   : > { %2297 = vst.msk [vmem:[%s5372_s7 + $0x20] sm:$0xff] %vm1758_vm5, %v5402_v45  ;;  %v5414_v50 = vadd.f32 %v5366_v51, %v2185_v38  ;;  %v2559_v41 = vmul.f32 %v5402_v45, %v5402_v45  ;;  %v2493_v44 = vsel %vm2485_vm14, %v5402_v45, 0.0 }
 0x265   : > { %2300 = vst.msk [vmem:[%s5372_s7 + $0x38] sm:$0xff] %vm1758_vm5, %v5408_v24  ;;  %v2494_v54 = vadd.f32 %v2493_v44, %v2492_v27  ;;  %v2598_v8 = vsel %vm2485_vm14, %v2561_v34, 0.0  ;;  %v2562_v30 = vmul.f32 %v5408_v24, %v5408_v24  ;;  %v2499_v55 = vsel %vm2485_vm14, %v5408_v24, 0.0 }
 0x266   : > { %2298 = vst.msk [vmem:[%s5372_s7 + $0x28] sm:$0xff] %vm1758_vm5, %v5414_v50  ;;  %v2594_v12 = vsel %vm2485_vm14, %v2559_v41, 0.0  ;;  %v2560_v43 = vmul.f32 %v5414_v50, %v5414_v50  ;;  %v2495_v61 = vsel %vm2485_vm14, %v5414_v50, 0.0 }
 0x267   : > { %v2595_v5 = vadd.f32 %v2594_v12, %v2593_v10  ;;  %v2496_v60 = vadd.f32 %v2495_v61, %v2494_v54  ;;  %v2600_v7 = vsel %vm2485_vm14, %v2562_v30, 0.0 }
 0x268   : > { %v2596_v36 = vsel %vm2485_vm14, %v2560_v43, 0.0 }
 0x269   : > { %v2597_v62 = vadd.f32 %v2596_v36, %v2595_v5  ;;  %v2498_v31 = vadd.f32 %v2497_v32, %v2496_v60 }
 0x26b   : > { %v2599_v47 = vadd.f32 %v2598_v8, %v2597_v62  ;;  %v2500_v59 = vadd.f32 %v2499_v55, %v2498_v31 }
 0x26d   : > { %v2601_v29 = vadd.f32 %v2600_v7, %v2599_v47 }
 0x274   : > { %v2862_v46 = vpop.f32.mrb[8].mxu0 }
 0x275   : > { %v5423_v37 = vadd.f32 %v2862_v46, %v5366_v51  ;;  %v2198_v48 = vpop.f32.mrb[9].mxu0 }
 0x276   : > { %v5426_v3 = vadd.f32 %v5366_v51, %v2198_v48  ;;  %v2863_v18 = vpop.f32.mrb[10].mxu0 }
 0x277   : > { %2303 = vst.msk [vmem:[%s5372_s7 + $0x50] sm:$0xff] %vm1758_vm5, %v5423_v37  ;;  %v5432_v39 = vadd.f32 %v2863_v18, %v5366_v51  ;;  %v2201_v26 = vpop.f32.mrb[11].mxu0  ;;  %v2565_v53 = vmul.f32 %v5423_v37, %v5423_v37  ;;  %v2505_v33 = vsel %vm2485_vm14, %v5423_v37, 0.0 }
 0x278   : > { %2301 = vst.msk [vmem:[%s5372_s7 + $0x40] sm:$0xff] %vm1758_vm5, %v5426_v3  ;;  %v5440_v16 = vadd.f32 %v5366_v51, %v2201_v26  ;;  %v2563_v19 = vmul.f32 %v5426_v3, %v5426_v3  ;;  %v2501_v28 = vsel %vm2485_vm14, %v5426_v3, 0.0 }
 0x279   : > { %2304 = vst.msk [vmem:[%s5372_s7 + $0x58] sm:$0xff] %vm1758_vm5, %v5432_v39  ;;  %v2502_v1 = vadd.f32 %v2501_v28, %v2500_v59  ;;  %v2606_v17 = vsel %vm2485_vm14, %v2565_v53, 0.0  ;;  %v2566_v58 = vmul.f32 %v5432_v39, %v5432_v39  ;;  %v2507_v20 = vsel %vm2485_vm14, %v5432_v39, 0.0 }
 0x27a   : > { %2302 = vst.msk [vmem:[%s5372_s7 + $0x48] sm:$0xff] %vm1758_vm5, %v5440_v16  ;;  %v2602_v6 = vsel %vm2485_vm14, %v2563_v19, 0.0  ;;  %v2564_v22 = vmul.f32 %v5440_v16, %v5440_v16  ;;  %v2503_v0 = vsel %vm2485_vm14, %v5440_v16, 0.0 }
 0x27b   : > { %v2603_v25 = vadd.f32 %v2602_v6, %v2601_v29  ;;  %v2504_v42 = vadd.f32 %v2503_v0, %v2502_v1  ;;  %v2608_v2 = vsel %vm2485_vm14, %v2566_v58, 0.0 }
 0x27c   : > { %v2604_v57 = vsel %vm2485_vm14, %v2564_v22, 0.0 }
 0x27d   : > { %v2605_v4 = vadd.f32 %v2604_v57, %v2603_v25  ;;  %v2506_v15 = vadd.f32 %v2505_v33, %v2504_v42 }
 0x27f   : > { %v2607_v27 = vadd.f32 %v2606_v17, %v2605_v4  ;;  %v2508_v13 = vadd.f32 %v2507_v20, %v2506_v15 }
 0x281   : > { %v2609_v48 = vadd.f32 %v2608_v2, %v2607_v27 }
 0x28a   : > { %v2866_v35 = vpop.f32.mrb[12].mxu0 }
 0x28b   : > { %v5474_v21 = vadd.f32 %v2866_v35, %v5366_v51  ;;  %v2214_v9 = vpop.f32.mrb[13].mxu0 }
 0x28c   : > { %v5479_v11 = vadd.f32 %v5366_v51, %v2214_v9  ;;  %v2867_v56 = vpop.f32.mrb[14].mxu0 }
 0x28d   : > { %2307 = vst.msk [vmem:[%s5372_s7 + $0x70] sm:$0xff] %vm1758_vm5, %v5474_v21  ;;  %v5485_v63 = vadd.f32 %v2867_v56, %v5366_v51  ;;  %v2217_v49 = vpop.f32.mrb[15].mxu0  ;;  %v2569_v12 = vmul.f32 %v5474_v21, %v5474_v21  ;;  %v2513_v54 = vsel %vm2485_vm14, %v5474_v21, 0.0 }
 0x28e   : > { %2305 = vst.msk [vmem:[%s5372_s7 + $0x60] sm:$0xff] %vm1758_vm5, %v5479_v11  ;;  %v5492_v14 = vadd.f32 %v5366_v51, %v2217_v49  ;;  %v2567_v52 = vmul.f32 %v5479_v11, %v5479_v11  ;;  %v2509_v10 = vsel %vm2485_vm14, %v5479_v11, 0.0 }
 0x28f   : > { %2308 = vst.msk [vmem:[%s5372_s7 + $0x78] sm:$0xff] %vm1758_vm5, %v5485_v63  ;;  %v2510_v46 = vadd.f32 %v2509_v10, %v2508_v13  ;;  %v2614_v5 = vsel %vm2485_vm14, %v2569_v12, 0.0  ;;  %v2570_v36 = vmul.f32 %v5485_v63, %v5485_v63  ;;  %v2515_v31 = vsel %vm2485_vm14, %v5485_v63, 0.0 }
 0x290   : > { %2306 = vst.msk [vmem:[%s5372_s7 + $0x68] sm:$0xff] %vm1758_vm5, %v5492_v14  ;;  %v2610_v23 = vsel %vm2485_vm14, %v2567_v52, 0.0  ;;  %v2568_v38 = vmul.f32 %v5492_v14, %v5492_v14  ;;  %v2511_v18 = vsel %vm2485_vm14, %v5492_v14, 0.0 }
 0x291   : > { %v2611_v26 = vadd.f32 %v2610_v23, %v2609_v48  ;;  %v2512_v44 = vadd.f32 %v2511_v18, %v2510_v46  ;;  %v2616_v28 = vsel %vm2485_vm14, %v2570_v36, 0.0 }
 0x292   : > { %v2612_v41 = vsel %vm2485_vm14, %v2568_v38, 0.0 }
 0x293   : > { %v2613_v43 = vadd.f32 %v2612_v41, %v2611_v26  ;;  %v2514_v61 = vadd.f32 %v2513_v54, %v2512_v44 }
 0x295   : > { %v2615_v34 = vadd.f32 %v2614_v5, %v2613_v43  ;;  %v2516_v19 = vadd.f32 %v2515_v31, %v2514_v61 }
 0x297   : > { %v2617_v35 = vadd.f32 %v2616_v28, %v2615_v34 }
 0x2a2   : > { %v2870_v60 = vpop.f32.mrb[0].mxu1 }
 0x2a3   : > { %v2239_v62 = vadd.f32 %v2870_v60, %v5366_v51  ;;  %v2230_v32 = vpop.f32.mrb[1].mxu1 }
 0x2a4   : > { %v2231_v8 = vadd.f32 %v5366_v51, %v2230_v32  ;;  %v2871_v30 = vpop.f32.mrb[2].mxu1 }
 0x2a5   : > { %2311 = vst.msk [vmem:[%s5372_s7 + $0x90] sm:$0xff] %vm1758_vm5, %v2239_v62  ;;  %v2242_v47 = vadd.f32 %v2871_v30, %v5366_v51  ;;  %v2233_v55 = vpop.f32.mrb[3].mxu1  ;;  %2393 = vrot.lane.b32.xlu0 %v2239_v62, %s3633_s8  ;;  %v2573_v1 = vmul.f32 %v2239_v62, %v2239_v62  ;;  %v2521_v49 = vsel %vm2485_vm14, %v2239_v62, 0.0 }
 0x2a6   : > { %2309 = vst.msk [vmem:[%s5372_s7 + $0x80] sm:$0xff] %vm1758_vm5, %v2231_v8  ;;  %v2517_v59 = vsel %vm2485_vm14, %v2231_v8, 0.0  ;;  %v2571_v7 = vmul.f32 %v2231_v8, %v2231_v8  ;;  %v2234_v6 = vadd.f32 %v5366_v51, %v2233_v55 }
 0x2a7   : > { %v2518_v22 = vadd.f32 %v2517_v59, %v2516_v19  ;;  %2312 = vst.msk [vmem:[%s5372_s7 + $0x98] sm:$0xff] %vm1758_vm5, %v2242_v47  ;;  %2395 = vrot.lane.b32.xlu1 %v2242_v47, %s3633_s8  ;;  %v2574_v57 = vmul.f32 %v2242_v47, %v2242_v47  ;;  %v2622_v33 = vsel %vm2485_vm14, %v2573_v1, 0.0  ;;  %v2523_v15 = vsel %vm2485_vm14, %v2242_v47, 0.0 }
 0x2a8   : > { %v2618_v29 = vsel %vm2485_vm14, %v2571_v7, 0.0  ;;  %2310 = vst.msk [vmem:[%s5372_s7 + $0x88] sm:$0xff] %vm1758_vm5, %v2234_v6  ;;  %v2519_v9 = vsel %vm2485_vm14, %v2234_v6, 0.0  ;;  %v2572_v0 = vmul.f32 %v2234_v6, %v2234_v6 }
 0x2a9   : > { %v2619_v56 = vadd.f32 %v2618_v29, %v2617_v35  ;;  %v2520_v25 = vadd.f32 %v2519_v9, %v2518_v22  ;;  %2389 = vrot.lane.b32.xlu0 %v2231_v8, %s3633_s8  ;;  %v2624_v52 = vsel %vm2485_vm14, %v2574_v57, 0.0 }
 0x2aa   : > { %v2620_v42 = vsel %vm2485_vm14, %v2572_v0, 0.0 }
 0x2ab   : > { %v2522_v53 = vadd.f32 %v2521_v49, %v2520_v25  ;;  %v2621_v4 = vadd.f32 %v2620_v42, %v2619_v56  ;;  %2391 = vrot.lane.b32.xlu1 %v2234_v6, %s3633_s8 }
 0x2ad   : > { %v2623_v17 = vadd.f32 %v2622_v33, %v2621_v4  ;;  %2369 = vrot.lane.b32.xlu0 %v5399_v40, %s3633_s8  ;;  %v2524_v58 = vadd.f32 %v2523_v15, %v2522_v53 }
 0x2af   : > { %2371 = vrot.lane.b32.xlu1 %v5408_v24, %s3633_s8  ;;  %v2625_v27 = vadd.f32 %v2624_v52, %v2623_v17 }
 0x2b1   : > { %2365 = vrot.lane.b32.xlu0 %v5402_v45, %s3633_s8 }
 0x2b3   : > { %2367 = vrot.lane.b32.xlu1 %v5414_v50, %s3633_s8 }
 0x2ba   : > { %v2874_v20 = vpop.f32.mrb[4].mxu1 }
 0x2bb   : > { %v2255_v10 = vadd.f32 %v2874_v20, %v5366_v51  ;;  %v2246_v13 = vpop.f32.mrb[5].mxu1 }
 0x2bc   : > { %v2247_v40 = vadd.f32 %v5366_v51, %v2246_v13  ;;  %v2875_v2 = vpop.f32.mrb[6].mxu1 }
 0x2bd   : > { %2315 = vst.msk [vmem:[%s5372_s7 + $0xb0] sm:$0xff] %vm1758_vm5, %v2255_v10  ;;  %v2258_v24 = vadd.f32 %v2875_v2, %v5366_v51  ;;  %v2249_v23 = vpop.f32.mrb[7].mxu1  ;;  %2401 = vrot.lane.b32.xlu0 %v2255_v10, %s3633_s8  ;;  %v2577_v48 = vmul.f32 %v2255_v10, %v2255_v10  ;;  %v2529_v43 = vsel %vm2485_vm14, %v2255_v10, 0.0 }
 0x2be   : > { %2313 = vst.msk [vmem:[%s5372_s7 + $0xa0] sm:$0xff] %vm1758_vm5, %v2247_v40  ;;  %v2525_v45 = vsel %vm2485_vm14, %v2247_v40, 0.0  ;;  %v2575_v50 = vmul.f32 %v2247_v40, %v2247_v40  ;;  %v2250_v38 = vadd.f32 %v5366_v51, %v2249_v23 }
 0x2bf   : > { %v2526_v46 = vadd.f32 %v2525_v45, %v2524_v58  ;;  %2316 = vst.msk [vmem:[%s5372_s7 + $0xb8] sm:$0xff] %vm1758_vm5, %v2258_v24  ;;  %2403 = vrot.lane.b32.xlu1 %v2258_v24, %s3633_s8  ;;  %v2578_v54 = vmul.f32 %v2258_v24, %v2258_v24  ;;  %v2630_v60 = vsel %vm2485_vm14, %v2577_v48, 0.0  ;;  %v2531_v34 = vsel %vm2485_vm14, %v2258_v24, 0.0 }
 0x2c0   : > { %v2626_v18 = vsel %vm2485_vm14, %v2575_v50, 0.0  ;;  %2314 = vst.msk [vmem:[%s5372_s7 + $0xa8] sm:$0xff] %vm1758_vm5, %v2250_v38  ;;  %v2527_v26 = vsel %vm2485_vm14, %v2250_v38, 0.0  ;;  %v2576_v41 = vmul.f32 %v2250_v38, %v2250_v38 }
 0x2c1   : > { %v2627_v44 = vadd.f32 %v2626_v18, %v2625_v27  ;;  %v2528_v12 = vadd.f32 %v2527_v26, %v2526_v46  ;;  %2397 = vrot.lane.b32.xlu0 %v2247_v40, %s3633_s8  ;;  %v2632_v8 = vsel %vm2485_vm14, %v2578_v54, 0.0 }
 0x2c2   : > { %v2628_v61 = vsel %vm2485_vm14, %v2576_v41, 0.0 }
 0x2c3   : > { %v2530_v5 = vadd.f32 %v2529_v43, %v2528_v12  ;;  %v2629_v36 = vadd.f32 %v2628_v61, %v2627_v44  ;;  %2399 = vrot.lane.b32.xlu1 %v2250_v38, %s3633_s8 }
 0x2c4   : > { %v2362_v62 = vpop.permute.xlu0 %2361 }
 0x2c5   : > { %v2631_v32 = vadd.f32 %v2630_v60, %v2629_v36  ;;  %2455 = vst.msk [vmem:[%s5586_s11 + $0x10] sm:$0xff] %vm1758_vm5, %v2362_v62  ;;  %2377 = vrot.lane.b32.xlu0 %v5423_v37, %s3633_s8  ;;  %v2532_v31 = vadd.f32 %v2531_v34, %v2530_v5 }
 0x2c6   : > { %v2364_v30 = vpop.permute.xlu1 %2363 }
 0x2c7   : > { %2456 = vst.msk [vmem:[%s5586_s11 + $0x18] sm:$0xff] %vm1758_vm5, %v2364_v30  ;;  %2379 = vrot.lane.b32.xlu1 %v5432_v39, %s3633_s8  ;;  %v2633_v19 = vadd.f32 %v2632_v8, %v2631_v32 }
 0x2c8   : > { %v2358_v47 = vpop.permute.xlu0 %2357 }
 0x2c9   : > { %2453 = vst.msk [vmem:[%s5586_s11] sm:$0xff] %vm1758_vm5, %v2358_v47  ;;  %2373 = vrot.lane.b32.xlu0 %v5426_v3, %s3633_s8 }
 0x2ca   : > { %v2360_v55 = vpop.permute.xlu1 %2359 }
 0x2cb   : > { %2454 = vst.msk [vmem:[%s5586_s11 + $0x8] sm:$0xff] %vm1758_vm5, %v2360_v55  ;;  %2375 = vrot.lane.b32.xlu1 %v5440_v16, %s3633_s8 }
 0x2d2   : > { %v2878_v37 = vpop.f32.mrb[8].mxu1 }
 0x2d3   : > { %v2271_v28 = vadd.f32 %v2878_v37, %v5366_v51  ;;  %v2262_v59 = vpop.f32.mrb[9].mxu1 }
 0x2d4   : > { %v2263_v39 = vadd.f32 %v5366_v51, %v2262_v59  ;;  %v2879_v7 = vpop.f32.mrb[10].mxu1 }
 0x2d5   : > { %2319 = vst.msk [vmem:[%s5372_s7 + $0xd0] sm:$0xff] %vm1758_vm5, %v2271_v28  ;;  %v2274_v6 = vadd.f32 %v2879_v7, %v5366_v51  ;;  %v2265_v3 = vpop.f32.mrb[11].mxu1  ;;  %2409 = vrot.lane.b32.xlu0 %v2271_v28, %s3633_s8  ;;  %v2581_v29 = vmul.f32 %v2271_v28, %v2271_v28  ;;  %v2537_v57 = vsel %vm2485_vm14, %v2271_v28, 0.0 }
 0x2d6   : > { %2317 = vst.msk [vmem:[%s5372_s7 + $0xc0] sm:$0xff] %vm1758_vm5, %v2263_v39  ;;  %v2533_v22 = vsel %vm2485_vm14, %v2263_v39, 0.0  ;;  %v2579_v16 = vmul.f32 %v2263_v39, %v2263_v39  ;;  %v2266_v35 = vadd.f32 %v5366_v51, %v2265_v3 }
 0x2d7   : > { %v2534_v1 = vadd.f32 %v2533_v22, %v2532_v31  ;;  %2320 = vst.msk [vmem:[%s5372_s7 + $0xd8] sm:$0xff] %vm1758_vm5, %v2274_v6  ;;  %2411 = vrot.lane.b32.xlu1 %v2274_v6, %s3633_s8  ;;  %v2582_v42 = vmul.f32 %v2274_v6, %v2274_v6  ;;  %v2638_v15 = vsel %vm2485_vm14, %v2581_v29, 0.0  ;;  %v2539_v17 = vsel %vm2485_vm14, %v2274_v6, 0.0 }
 0x2d8   : > { %v2634_v9 = vsel %vm2485_vm14, %v2579_v16, 0.0  ;;  %2318 = vst.msk [vmem:[%s5372_s7 + $0xc8] sm:$0xff] %vm1758_vm5, %v2266_v35  ;;  %v2535_v0 = vsel %vm2485_vm14, %v2266_v35, 0.0  ;;  %v2580_v56 = vmul.f32 %v2266_v35, %v2266_v35 }
 0x2d9   : > { %v2635_v25 = vadd.f32 %v2634_v9, %v2633_v19  ;;  %v2536_v49 = vadd.f32 %v2535_v0, %v2534_v1  ;;  %2405 = vrot.lane.b32.xlu0 %v2263_v39, %s3633_s8  ;;  %v2640_v27 = vsel %vm2485_vm14, %v2582_v42, 0.0 }
 0x2da   : > { %v2636_v53 = vsel %vm2485_vm14, %v2580_v56, 0.0 }
 0x2db   : > { %v2538_v4 = vadd.f32 %v2537_v57, %v2536_v49  ;;  %v2637_v33 = vadd.f32 %v2636_v53, %v2635_v25  ;;  %2407 = vrot.lane.b32.xlu1 %v2266_v35, %s3633_s8 }
 0x2dd   : > { %v2639_v58 = vadd.f32 %v2638_v15, %v2637_v33  ;;  %2385 = vrot.lane.b32.xlu0 %v5474_v21, %s3633_s8  ;;  %v2540_v52 = vadd.f32 %v2539_v17, %v2538_v4 }
 0x2df   : > { %2387 = vrot.lane.b32.xlu1 %v5485_v63, %s3633_s8  ;;  %v2641_v20 = vadd.f32 %v2640_v27, %v2639_v58 }
 0x2e1   : > { %2381 = vrot.lane.b32.xlu0 %v5479_v11, %s3633_s8 }
 0x2e3   : > { %2383 = vrot.lane.b32.xlu1 %v5492_v14, %s3633_s8 }
 0x2e9   : > { %v2882_v10 = vpop.f32.mrb[12].mxu1 }
 0x2ea   : > { %v2287_v13 = vadd.f32 %v2882_v10, %v5366_v51  ;;  %v2278_v21 = vpop.f32.mrb[13].mxu1 }
 0x2eb   : > { %v2279_v40 = vadd.f32 %v5366_v51, %v2278_v21  ;;  %v2883_v2 = vpop.f32.mrb[14].mxu1 }
 0x2ec   : > { %2323 = vst.msk [vmem:[%s5372_s7 + $0xf0] sm:$0xff] %vm1758_vm5, %v2287_v13  ;;  %v2290_v63 = vadd.f32 %v2883_v2, %v5366_v51  ;;  %v2281_v24 = vpop.f32.mrb[15].mxu1  ;;  %2417 = vrot.lane.b32.xlu0 %v2287_v13, %s3633_s8  ;;  %v2585_v50 = vmul.f32 %v2287_v13, %v2287_v13  ;;  %v2545_v41 = vsel %vm2485_vm14, %v2287_v13, 0.0 }
 0x2ed   : > { %2321 = vst.msk [vmem:[%s5372_s7 + $0xe0] sm:$0xff] %vm1758_vm5, %v2279_v40  ;;  %v2541_v11 = vsel %vm2485_vm14, %v2279_v40, 0.0  ;;  %v2583_v14 = vmul.f32 %v2279_v40, %v2279_v40  ;;  %v2282_v23 = vadd.f32 %v5366_v51, %v2281_v24 }
 0x2ee   : > { %v2542_v45 = vadd.f32 %v2541_v11, %v2540_v52  ;;  %2324 = vst.msk [vmem:[%s5372_s7 + $0xf8] sm:$0xff] %vm1758_vm5, %v2290_v63  ;;  %v2586_v51 = vmul.f32 %v2290_v63, %v2290_v63  ;;  %v2646_v54 = vsel %vm2485_vm14, %v2585_v50, 0.0  ;;  %v2547_v61 = vsel %vm2485_vm14, %v2290_v63, 0.0 }
 0x2ef   : > { %v2642_v38 = vsel %vm2485_vm14, %v2583_v14, 0.0  ;;  %2322 = vst.msk [vmem:[%s5372_s7 + $0xe8] sm:$0xff] %vm1758_vm5, %v2282_v23  ;;  %v2543_v46 = vsel %vm2485_vm14, %v2282_v23, 0.0  ;;  %v2584_v48 = vmul.f32 %v2282_v23, %v2282_v23  ;;  %2415 = vrot.lane.b32.xlu1 %v2282_v23, %s3633_s8 }
 0x2f0   : > { %v2643_v18 = vadd.f32 %v2642_v38, %v2641_v20  ;;  %v2544_v26 = vadd.f32 %v2543_v46, %v2542_v45  ;;  %2413 = vrot.lane.b32.xlu0 %v2279_v40, %s3633_s8  ;;  %v2648_v60 = vsel %vm2485_vm14, %v2586_v51, 0.0 }
 0x2f1   : > { %v2644_v44 = vsel %vm2485_vm14, %v2584_v48, 0.0 }
 0x2f2   : > { %v2546_v12 = vadd.f32 %v2545_v41, %v2544_v26  ;;  %v2645_v43 = vadd.f32 %v2644_v44, %v2643_v18 }
 0x2f3   : > { %2419 = vrot.lane.b32.xlu1 %v2290_v63, %s3633_s8 }
 0x2f4   : > { %v2548_v5 = vadd.f32 %v2547_v61, %v2546_v12  ;;  %v2647_v36 = vadd.f32 %v2646_v54, %v2645_v43 }
 0x2f6   : > { %v2549_v34 = vrot.slane %v2548_v5, 4  ;;  %v2649_v62 = vadd.f32 %v2648_v60, %v2647_v36 }
 0x2f8   : > { %v2550_v32 = vadd.f32 %v2549_v34, %v2548_v5  ;;  %v2650_v31 = vrot.slane %v2649_v62, 4 }
 0x2fa   : > { %v2551_v8 = vrot.slane %v2550_v32, 2  ;;  %v2651_v30 = vadd.f32 %v2650_v31, %v2649_v62 }
 0x2fc   : > { %v2552_v19 = vadd.f32 %v2551_v8, %v2550_v32  ;;  %v2652_v47 = vrot.slane %v2651_v30, 2 }
 0x2fe   : > { %v2553_v55 = vrot.slane %v2552_v19, 1  ;;  %v2653_v37 = vadd.f32 %v2652_v47, %v2651_v30 }
 0x300   : > { %v2654_v28 = vrot.slane %v2653_v37, 1  ;;  %v2554_v59 = vadd.f32 %v2553_v55, %v2552_v19 }
 0x302   : > { %v2655_v39 = vadd.f32 %v2654_v28, %v2653_v37 }
 0x304   : > { %v2656_v7 = vsel %vm678_vm1, %v2554_v59, %v2655_v39 }
 0x305   : > { %2658 = vrot.lane.b32.xlu0 %v2656_v7, %s3633_s8 }
 0x317   : > { %v2394_v6 = vpop.permute.xlu0 %2393 }
 0x318   : > { %2471 = vst.msk [vmem:[%s5586_s11 + $0x90] sm:$0xff] %vm1758_vm5, %v2394_v6 }
 0x319   : > { %v2396_v3 = vpop.permute.xlu1 %2395 }
 0x31a   : > { %2472 = vst.msk [vmem:[%s5586_s11 + $0x98] sm:$0xff] %vm1758_vm5, %v2396_v3 }
 0x31b   : > { %v2390_v22 = vpop.permute.xlu0 %2389 }
 0x31c   : > { %2469 = vst.msk [vmem:[%s5586_s11 + $0x80] sm:$0xff] %vm1758_vm5, %v2390_v22 }
 0x31d   : > { %v2392_v16 = vpop.permute.xlu1 %2391 }
 0x31e   : > { %2470 = vst.msk [vmem:[%s5586_s11 + $0x88] sm:$0xff] %vm1758_vm5, %v2392_v16 }
 0x31f   : > { %v2370_v35 = vpop.permute.xlu0 %2369 }
 0x320   : > { %2459 = vst.msk [vmem:[%s5586_s11 + $0x30] sm:$0xff] %vm1758_vm5, %v2370_v35 }
 0x321   : > { %v2372_v1 = vpop.permute.xlu1 %2371 }
 0x322   : > { %2460 = vst.msk [vmem:[%s5586_s11 + $0x38] sm:$0xff] %vm1758_vm5, %v2372_v1 }
 0x323   : > { %v2366_v29 = vpop.permute.xlu0 %2365 }
 0x324   : > { %2457 = vst.msk [vmem:[%s5586_s11 + $0x20] sm:$0xff] %vm1758_vm5, %v2366_v29 }
 0x325   : > { %v2368_v9 = vpop.permute.xlu1 %2367 }
 0x326   : > { %2458 = vst.msk [vmem:[%s5586_s11 + $0x28] sm:$0xff] %vm1758_vm5, %v2368_v9 }
 0x32f   : > { %v2402_v0 = vpop.permute.xlu0 %2401 }
 0x330   : > { %2475 = vst.msk [vmem:[%s5586_s11 + $0xb0] sm:$0xff] %vm1758_vm5, %v2402_v0 }
 0x331   : > { %v2404_v56 = vpop.permute.xlu1 %2403 }
 0x332   : > { %2476 = vst.msk [vmem:[%s5586_s11 + $0xb8] sm:$0xff] %vm1758_vm5, %v2404_v56 }
 0x333   : > { %v2398_v25 = vpop.permute.xlu0 %2397 }
 0x334   : > { %2473 = vst.msk [vmem:[%s5586_s11 + $0xa0] sm:$0xff] %vm1758_vm5, %v2398_v25 }
 0x335   : > { %v2400_v49 = vpop.permute.xlu1 %2399 }
 0x336   : > { %2474 = vst.msk [vmem:[%s5586_s11 + $0xa8] sm:$0xff] %vm1758_vm5, %v2400_v49 }
 0x337   : > { %v2378_v57 = vpop.permute.xlu0 %2377 }
 0x338   : > { %2463 = vst.msk [vmem:[%s5586_s11 + $0x50] sm:$0xff] %vm1758_vm5, %v2378_v57 }
 0x339   : > { %v2380_v42 = vpop.permute.xlu1 %2379 }
 0x33a   : > { %2464 = vst.msk [vmem:[%s5586_s11 + $0x58] sm:$0xff] %vm1758_vm5, %v2380_v42 }
 0x33b   : > { %v2374_v53 = vpop.permute.xlu0 %2373 }
 0x33c   : > { %2461 = vst.msk [vmem:[%s5586_s11 + $0x40] sm:$0xff] %vm1758_vm5, %v2374_v53 }
 0x33d   : > { %v2376_v4 = vpop.permute.xlu1 %2375 }
 0x33e   : > { %2462 = vst.msk [vmem:[%s5586_s11 + $0x48] sm:$0xff] %vm1758_vm5, %v2376_v4 }
 0x347   : > { %v2410_v33 = vpop.permute.xlu0 %2409 }
 0x348   : > { %2479 = vst.msk [vmem:[%s5586_s11 + $0xd0] sm:$0xff] %vm1758_vm5, %v2410_v33 }
 0x349   : > { %v2412_v15 = vpop.permute.xlu1 %2411 }
 0x34a   : > { %2480 = vst.msk [vmem:[%s5586_s11 + $0xd8] sm:$0xff] %vm1758_vm5, %v2412_v15 }
 0x34b   : > { %v2406_v17 = vpop.permute.xlu0 %2405 }
 0x34c   : > { %2477 = vst.msk [vmem:[%s5586_s11 + $0xc0] sm:$0xff] %vm1758_vm5, %v2406_v17 }
 0x34d   : > { %v2408_v58 = vpop.permute.xlu1 %2407 }
 0x34e   : > { %2478 = vst.msk [vmem:[%s5586_s11 + $0xc8] sm:$0xff] %vm1758_vm5, %v2408_v58 }
 0x34f   : > { %v2386_v52 = vpop.permute.xlu0 %2385 }
 0x350   : > { %2467 = vst.msk [vmem:[%s5586_s11 + $0x70] sm:$0xff] %vm1758_vm5, %v2386_v52 }
 0x351   : > { %v2388_v27 = vpop.permute.xlu1 %2387 }
 0x352   : > { %2468 = vst.msk [vmem:[%s5586_s11 + $0x78] sm:$0xff] %vm1758_vm5, %v2388_v27 }
 0x353   : > { %v2382_v20 = vpop.permute.xlu0 %2381 }
 0x354   : > { %2465 = vst.msk [vmem:[%s5586_s11 + $0x60] sm:$0xff] %vm1758_vm5, %v2382_v20 }
 0x355   : > { %v2384_v10 = vpop.permute.xlu1 %2383 }
 0x356   : > { %2466 = vst.msk [vmem:[%s5586_s11 + $0x68] sm:$0xff] %vm1758_vm5, %v2384_v10 }
 0x35e   : > { %v2418_v13 = vpop.permute.xlu0 %2417 }
 0x35f   : > { %2483 = vst.msk [vmem:[%s5586_s11 + $0xf0] sm:$0xff] %vm1758_vm5, %v2418_v13 }
 0x361   : > { %v2416_v21 = vpop.permute.xlu1 %2415 }
 0x362   : > { %2482 = vst.msk [vmem:[%s5586_s11 + $0xe8] sm:$0xff] %vm1758_vm5, %v2416_v21  ;;  %v2414_v40 = vpop.permute.xlu0 %2413 }
 0x363   : > { %2481 = vst.msk [vmem:[%s5586_s11 + $0xe0] sm:$0xff] %vm1758_vm5, %v2414_v40 }
 0x365   : > { %v2420_v2 = vpop.permute.xlu1 %2419 }
 0x366   : > { %2484 = vst.msk [vmem:[%s5586_s11 + $0xf8] sm:$0xff] %vm1758_vm5, %v2420_v2 }
 0x377   : > { %v2659_v63 = vpop.permute.xlu0 %2658 }
 0x378   : > { %2662 = vst.msk [vmem:[%s274_s14] sm:$0x3] %vm2661_vm15, %v2659_v63 }
 0x379 PF: > { %s17_s21 = sadd.s32 1, %s3621_s21  }
 0x37a   : > { %p14_p4 = scmp.ge.s32.totalorder %s17_s21, 4  }
 0x37c   :  { %16 = sbr.rel (!%p14_p4) target bundleno = 1 (0x1), region = 90 }

</bundles_post_ra>
